<compile_context>
chip_gen: v7x
topology: tpu7x:2x2x1
jax: 0.10.0
libtpu: 0.0.40
codegen_flags: <defaults>
</compile_context>

<pallas_src>
import jax
import jax.numpy as jnp
from jax.experimental import pallas as pl
from jax.experimental.pallas import tpu as pltpu


INPUT_SHAPE = (1, 80, 80)   # as in the PyTorch module (NCHW, C=1)
NUM_ACTIONS = 6             # Pong action space

# Geometry fixed by the PyTorch module:
# 80x80 -> conv(8x8,s4) 19x19x32 -> conv(4x4,s2) 8x8x64 -> conv(3x3,s1) 6x6x64 -> 512 -> 6
_H1 = 19
_H2 = 8
_H3 = 6
_C1, _C2, _C3 = 32, 64, 64
_K1, _S1 = 8, 4
_K2, _S2 = 4, 2
_K3, _S3 = 3, 1
_PK1 = _K1 * _K1 * 1        # 64  conv1 patch columns (C_in = 1), (kh, kw) order
_PK2 = _K2 * _K2 * _C1      # 512 conv2 patch columns, (kh, kw, c_in) order
_PK3 = _K3 * _K3 * _C2      # 576 conv3 patch columns, (kh, kw, c_in) order
_FC1 = 512
_FC2_PAD = 128              # lane-dense padded fc2 width (unmasked final store)
_NEG = -1e30                # pad-logit value; exp() underflows to exactly 0

# Parity-split conv1 output grid kept in VMEM:  ho = 2*h2 + pi, wo = 2*w2 + pj
_PH = 10                    # ceil(19 / 2)
_PW = 16                    # 10 padded to 16 so the (w2, b) sublane dim stays tile aligned


# ---------------------------------------------------------------------------
# The fused kernel: conv1 matmul + in-VMEM im2col conv2/conv3 + fc1 + fc2 + softmax
# ---------------------------------------------------------------------------
def _actor_kernel(p1_ref, w1_ref, b1_ref, w2_ref, b2_ref, w3_ref, b3_ref,
                  wf1_ref, bf1_ref, wf2_ref, bf2_ref, out_ref):
    B = out_ref.shape[0]
    f32, bf16 = jnp.float32, jnp.bfloat16

    # ---- conv1: one matmul over the pre-built, parity-ordered patch matrix ----------
    a1 = jnp.dot(p1_ref[...], w1_ref[...], preferred_element_type=f32)   # [640*B, 32]
    a1 = jnp.maximum(a1 + b1_ref[...], 0.0).astype(bf16)
    # view [parity class, h2, (w2, b), c]; lane dim unchanged, sublane factor 16*B is
    # a multiple of the bf16 (16, 128) tile -> layout-preserving reshape.
    a1q = a1.reshape(4, _PH, _PW * B, _C1)

    # ---- conv2 (stride 2): in-VMEM im2col via the parity split -> one K=512 matmul --
    pieces = []
    for di in range(_K2):
        for dj in range(_K2):
            pi, qi = di % 2, di // 2
            pj, qj = dj % 2, dj // 2
            cls = pi * 2 + pj
            # A1[b, :, 2*ho2+di, 2*wo2+dj] == a1q[cls, ho2+qi, (wo2+qj)*B + b, :]
            pieces.append(a1q[cls, qi:qi + _H2, qj * B:(qj + _H2) * B, :])  # [8, 8B, 32]
    p2 = jnp.concatenate(pieces, axis=-1)                # [8, 8B, 512], cols (kh, kw, ci)
    p2 = p2.reshape(_H2 * _H2 * B, _PK2)                 # [64B, 512]  (aligned merge)
    a2 = jnp.dot(p2, w2_ref[...], preferred_element_type=f32)
    a2 = jnp.maximum(a2 + b2_ref[...], 0.0).astype(bf16)
    a2q = a2.reshape(_H2, _H2 * B, _C2)                  # [8, 8B, 64] rows = (ho2,(wo2,b))

    # ---- conv3 (stride 1): in-VMEM im2col; its per-row matmuls are fused straight ---
    # ---- into the fc1 contraction (no flatten, no HBM round trip) --------------------
    pieces = []
    for di in range(_K3):
        for dj in range(_K3):
            pieces.append(a2q[di:di + _H3, dj * B:(dj + _H3) * B, :])       # [6, 6B, 64]
    p3 = jnp.concatenate(pieces, axis=-1)                # [6, 6B, 576], cols (kh, kw, ci)

    h1 = jnp.zeros((B, _FC1), f32)
    for ho in range(_H3):
        row = jnp.dot(p3[ho], w3_ref[...], preferred_element_type=f32)      # [6B, 64]
        row = jnp.maximum(row + b3_ref[...], 0.0).astype(bf16)              # conv3 out row
        for wo in range(_H3):
            r = ho * _H3 + wo
            v = row[wo * B:(wo + 1) * B, :]                                  # [B, 64]
            wblk = wf1_ref[r * _C3:(r + 1) * _C3, :]                         # [64, 512]
            h1 = h1 + jnp.dot(v, wblk, preferred_element_type=f32)

    # ---- fc1 epilogue + fc2 + softmax (lane-dense padded to 128 columns) ------------
    h1 = jnp.maximum(h1 + bf1_ref[...], 0.0).astype(bf16)                    # [B, 512]
    logits = jnp.dot(h1, wf2_ref[...], preferred_element_type=f32) + bf2_ref[...]
    m = jnp.max(logits, axis=-1, keepdims=True)
    e = jnp.exp(logits - m)                               # padded lanes: exp(-1e30-m) == 0
    out_ref[...] = e / jnp.sum(e, axis=-1, keepdims=True)


# ---------------------------------------------------------------------------
# XLA glue: conv1 im2col on the raw input, parameter re-layout (done once)
# ---------------------------------------------------------------------------
def _conv1_patches(x):
    """im2col of the raw NCHW input for conv1 (8x8, stride 4).  Rows are ordered
    (parity class, h2, w2, b) and w2 is padded 10 -> 16 so the fused kernel can read
    the stride-2 conv2 windows as plain unit-stride, tile-aligned slices."""
    B = x.shape[0]
    xs = x[:, 0]                                                        # [B, 80, 80]
    cols = []
    for di in range(_K1):
        for dj in range(_K1):
            cols.append(xs[:, di:di + _S1 * _H1:_S1, dj:dj + _S1 * _H1:_S1])   # [B,19,19]
    p = jnp.stack(cols, axis=-1)                                        # [B,19,19,64]
    p = jnp.pad(p, ((0, 0), (0, 1), (0, 1), (0, 0)))                    # [B,20,20,64]
    p = p.reshape(B, _PH, 2, _PH, 2, _PK1)                              # ho=2*h2+pi, wo=2*w2+pj
    p = p.transpose(2, 4, 1, 3, 0, 5)                                   # [pi,pj,h2,w2,B,64]
    p = jnp.pad(p, ((0, 0), (0, 0), (0, 0), (0, _PW - _PH), (0, 0), (0, 0)))
    return p.reshape(4 * _PH * _PW * B, _PK1).astype(jnp.bfloat16)      # [640*B, 64]


def prepare_params(params):
    """One-time re-layout of the PyTorch-style parameters into the kernel layout:
    patch-major channels-last bf16 weights, fc1 pre-permuted to (h, w, c) flatten order,
    fc weights pre-transposed, fc2 zero/-1e30 padded to a lane-dense 128 columns."""
    bf16, f32 = jnp.bfloat16, jnp.float32
    w1 = params["c1_w"].reshape(_C1, _PK1).T                            # [(kh,kw), 32]
    w2 = params["c2_w"].transpose(2, 3, 1, 0).reshape(_PK2, _C2)        # [(kh,kw,ci), 64]
    w3 = params["c3_w"].transpose(2, 3, 1, 0).reshape(_PK3, _C3)        # [(kh,kw,ci), 64]
    # torch flattens conv3 output as (c, h, w); the kernel produces (h, w, c) blocks,
    # so permute fc1's input axis once here instead of moving activations every call.
    wf1 = (params["fc1_w"].reshape(_FC1, _C3, _H3, _H3)
           .transpose(0, 2, 3, 1).reshape(_FC1, _H3 * _H3 * _C3).T)     # [2304, 512]
    num_actions = params["fc2_w"].shape[0]
    wf2 = jnp.zeros((_FC1, _FC2_PAD), f32).at[:, :num_actions].set(params["fc2_w"].T)
    bf2 = jnp.full((_FC2_PAD,), _NEG, f32).at[:num_actions].set(params["fc2_b"])
    return {
        "w1": w1.astype(bf16), "b1": params["c1_b"].reshape(1, _C1).astype(f32),
        "w2": w2.astype(bf16), "b2": params["c2_b"].reshape(1, _C2).astype(f32),
        "w3": w3.astype(bf16), "b3": params["c3_b"].reshape(1, _C3).astype(f32),
        "wf1": wf1.astype(bf16), "bf1": params["fc1_b"].reshape(1, _FC1).astype(f32),
        "wf2": wf2.astype(bf16), "bf2": bf2.reshape(1, _FC2_PAD),
    }


@jax.jit
def actor_net_forward(kparams, x):
    """x: [B, 1, 80, 80] float32 NCHW -> action probabilities [B, NUM_ACTIONS]."""
    B = x.shape[0]
    p1 = _conv1_patches(x)
    ins = (p1, kparams["w1"], kparams["b1"], kparams["w2"], kparams["b2"],
           kparams["w3"], kparams["b3"], kparams["wf1"], kparams["bf1"],
           kparams["wf2"], kparams["bf2"])
    probs = pl.pallas_call(
        _actor_kernel,
        out_shape=jax.ShapeDtypeStruct((B, _FC2_PAD), jnp.float32),
        grid=(1,),
        in_specs=[pl.BlockSpec(a.shape, lambda i: (0, 0)) for a in ins],
        out_specs=pl.BlockSpec((B, _FC2_PAD), lambda i: (0, 0)),
        compiler_params=pltpu.CompilerParams(vmem_limit_bytes=32 * 1024 * 1024),
    )(*ins)
    # TODO(synk): torch.distributions.Categorical has no Pallas equivalent; we return its `probs`.
    return probs[:, :NUM_ACTIONS]


# ---------------------------------------------------------------------------
# Deterministic synthetic parameters (PyTorch-layout, uniform(-1/sqrt(fan_in), ..))
# ---------------------------------------------------------------------------
def init_params(key, num_actions=NUM_ACTIONS):
    ks = jax.random.split(key, 10)

    def u(k, shape, fan_in):
        bound = 1.0 / jnp.sqrt(jnp.float32(fan_in))
        return jax.random.uniform(k, shape, jnp.float32, -bound, bound)

    conv_out = _C3 * _H3 * _H3   # 64 * 6 * 6 = 2304
    return {
        "c1_w": u(ks[0], (32, 1, 8, 8), 1 * 8 * 8),
        "c1_b": u(ks[1], (32,), 1 * 8 * 8),
        "c2_w": u(ks[2], (64, 32, 4, 4), 32 * 4 * 4),
        "c2_b": u(ks[3], (64,), 32 * 4 * 4),
        "c3_w": u(ks[4], (64, 64, 3, 3), 64 * 3 * 3),
        "c3_b": u(ks[5], (64,), 64 * 3 * 3),
        "fc1_w": u(ks[6], (512, conv_out), conv_out),
        "fc1_b": u(ks[7], (512,), conv_out),
        "fc2_w": u(ks[8], (num_actions, 512), 512),
        "fc2_b": u(ks[9], (num_actions,), 512),
    }


if __name__ == "__main__":
    key = jax.random.PRNGKey(0)
    pkey, xkey = jax.random.split(key)
    params = init_params(pkey, NUM_ACTIONS)
    kparams = prepare_params(params)     # weight re-layout / bf16 cast done once

    batch = 2
    x = jax.random.normal(xkey, (batch,) + INPUT_SHAPE, dtype=jnp.float32)

    probs = jax.block_until_ready(actor_net_forward(kparams, x))

    assert probs.shape == (batch, NUM_ACTIONS)
    assert bool(jnp.all(jnp.isfinite(probs)))
    assert bool(jnp.all(probs >= 0.0))
    assert bool(jnp.allclose(jnp.sum(probs, axis=1), 1.0, atol=1e-5))
    print("KERNEL_OK")
</pallas_src>

<mosaic_0001>
module attributes {stable_mosaic.version = 11 : i64} {
  func.func @_actor_kernel(%arg0: i32, %arg1: memref<1280x64xbf16, #tpu.memory_space<vmem>>, %arg2: memref<64x32xbf16, #tpu.memory_space<vmem>>, %arg3: memref<1x32xf32, #tpu.memory_space<vmem>>, %arg4: memref<512x64xbf16, #tpu.memory_space<vmem>>, %arg5: memref<1x64xf32, #tpu.memory_space<vmem>>, %arg6: memref<576x64xbf16, #tpu.memory_space<vmem>>, %arg7: memref<1x64xf32, #tpu.memory_space<vmem>>, %arg8: memref<2304x512xbf16, #tpu.memory_space<vmem>>, %arg9: memref<1x512xf32, #tpu.memory_space<vmem>>, %arg10: memref<512x128xbf16, #tpu.memory_space<vmem>>, %arg11: memref<1x128xf32, #tpu.memory_space<vmem>>, %arg12: memref<2x128xf32, #tpu.memory_space<vmem>>) attributes {dimension_semantics = [#tpu.dimension_semantics<arbitrary>], iteration_bounds = array<i64: 1>, scalar_prefetch = 0 : i64, scratch_operands = 0 : i64, tpu.core_type = #tpu.core_type<tc>, window_params = [{pipeline_mode = #tpu.pipeline_mode<synchronous>, transform_indices = @transform_0, window_bounds = array<i64: 1280, 64>}, {pipeline_mode = #tpu.pipeline_mode<synchronous>, transform_indices = @transform_1, window_bounds = array<i64: 64, 32>}, {pipeline_mode = #tpu.pipeline_mode<synchronous>, transform_indices = @transform_2, window_bounds = array<i64: 1, 32>}, {pipeline_mode = #tpu.pipeline_mode<synchronous>, transform_indices = @transform_3, window_bounds = array<i64: 512, 64>}, {pipeline_mode = #tpu.pipeline_mode<synchronous>, transform_indices = @transform_4, window_bounds = array<i64: 1, 64>}, {pipeline_mode = #tpu.pipeline_mode<synchronous>, transform_indices = @transform_5, window_bounds = array<i64: 576, 64>}, {pipeline_mode = #tpu.pipeline_mode<synchronous>, transform_indices = @transform_6, window_bounds = array<i64: 1, 64>}, {pipeline_mode = #tpu.pipeline_mode<synchronous>, transform_indices = @transform_7, window_bounds = array<i64: 2304, 512>}, {pipeline_mode = #tpu.pipeline_mode<synchronous>, transform_indices = @transform_8, window_bounds = array<i64: 1, 512>}, {pipeline_mode = #tpu.pipeline_mode<synchronous>, transform_indices = @transform_9, window_bounds = array<i64: 512, 128>}, {pipeline_mode = #tpu.pipeline_mode<synchronous>, transform_indices = @transform_10, window_bounds = array<i64: 1, 128>}, {pipeline_mode = #tpu.pipeline_mode<synchronous>, transform_indices = @transform_11, window_bounds = array<i64: 2, 128>}]} {
    %c0 = arith.constant 0 : index
    %c0_0 = arith.constant 0 : index
    %0 = vector.load %arg1[%c0, %c0_0] : memref<1280x64xbf16, #tpu.memory_space<vmem>>, vector<1280x64xbf16>
    %c0_1 = arith.constant 0 : index
    %c0_2 = arith.constant 0 : index
    %1 = vector.load %arg2[%c0_1, %c0_2] : memref<64x32xbf16, #tpu.memory_space<vmem>>, vector<64x32xbf16>
    %cst = arith.constant dense<0.000000e+00> : vector<1280x32xf32>
    %2 = tpu.matmul %0, %1, %cst {dimension_numbers = #tpu.dot_dimension_numbers<[1], [0], [0], [1], [0, 0, 1, 1], [], []>} : vector<1280x64xbf16>, vector<64x32xbf16>, vector<1280x32xf32> -> vector<1280x32xf32>
    %c0_3 = arith.constant 0 : index
    %c0_4 = arith.constant 0 : index
    %3 = vector.load %arg3[%c0_3, %c0_4] : memref<1x32xf32, #tpu.memory_space<vmem>>, vector<1x32xf32>
    %4 = vector.broadcast %3 : vector<1x32xf32> to vector<1280x32xf32>
    %5 = arith.addf %2, %4 : vector<1280x32xf32>
    %cst_5 = arith.constant 0.000000e+00 : f32
    %6 = vector.broadcast %cst_5 : f32 to vector<1280x32xf32>
    %7 = arith.maximumf %5, %6 : vector<1280x32xf32>
    %8 = arith.truncf %7 : vector<1280x32xf32> to vector<1280x32xbf16>
    %9 = vector.shape_cast %8 : vector<1280x32xbf16> to vector<4x10x32x32xbf16>
    %10 = vector.extract_strided_slice %9 {offsets = [0, 0, 0, 0], sizes = [1, 8, 16, 32], strides = [1, 1, 1, 1]} : vector<4x10x32x32xbf16> to vector<1x8x16x32xbf16>
    %11 = vector.shape_cast %10 : vector<1x8x16x32xbf16> to vector<8x16x32xbf16>
    %12 = vector.extract_strided_slice %9 {offsets = [1, 0, 0, 0], sizes = [1, 8, 16, 32], strides = [1, 1, 1, 1]} : vector<4x10x32x32xbf16> to vector<1x8x16x32xbf16>
    %13 = vector.shape_cast %12 : vector<1x8x16x32xbf16> to vector<8x16x32xbf16>
    %14 = vector.extract_strided_slice %9 {offsets = [0, 0, 2, 0], sizes = [1, 8, 16, 32], strides = [1, 1, 1, 1]} : vector<4x10x32x32xbf16> to vector<1x8x16x32xbf16>
    %15 = vector.shape_cast %14 : vector<1x8x16x32xbf16> to vector<8x16x32xbf16>
    %16 = vector.extract_strided_slice %9 {offsets = [1, 0, 2, 0], sizes = [1, 8, 16, 32], strides = [1, 1, 1, 1]} : vector<4x10x32x32xbf16> to vector<1x8x16x32xbf16>
    %17 = vector.shape_cast %16 : vector<1x8x16x32xbf16> to vector<8x16x32xbf16>
    %18 = vector.extract_strided_slice %9 {offsets = [2, 0, 0, 0], sizes = [1, 8, 16, 32], strides = [1, 1, 1, 1]} : vector<4x10x32x32xbf16> to vector<1x8x16x32xbf16>
    %19 = vector.shape_cast %18 : vector<1x8x16x32xbf16> to vector<8x16x32xbf16>
    %20 = vector.extract_strided_slice %9 {offsets = [3, 0, 0, 0], sizes = [1, 8, 16, 32], strides = [1, 1, 1, 1]} : vector<4x10x32x32xbf16> to vector<1x8x16x32xbf16>
    %21 = vector.shape_cast %20 : vector<1x8x16x32xbf16> to vector<8x16x32xbf16>
    %22 = vector.extract_strided_slice %9 {offsets = [2, 0, 2, 0], sizes = [1, 8, 16, 32], strides = [1, 1, 1, 1]} : vector<4x10x32x32xbf16> to vector<1x8x16x32xbf16>
    %23 = vector.shape_cast %22 : vector<1x8x16x32xbf16> to vector<8x16x32xbf16>
    %24 = vector.extract_strided_slice %9 {offsets = [3, 0, 2, 0], sizes = [1, 8, 16, 32], strides = [1, 1, 1, 1]} : vector<4x10x32x32xbf16> to vector<1x8x16x32xbf16>
    %25 = vector.shape_cast %24 : vector<1x8x16x32xbf16> to vector<8x16x32xbf16>
    %26 = vector.extract_strided_slice %9 {offsets = [0, 1, 0, 0], sizes = [1, 8, 16, 32], strides = [1, 1, 1, 1]} : vector<4x10x32x32xbf16> to vector<1x8x16x32xbf16>
    %27 = vector.shape_cast %26 : vector<1x8x16x32xbf16> to vector<8x16x32xbf16>
    %28 = vector.extract_strided_slice %9 {offsets = [1, 1, 0, 0], sizes = [1, 8, 16, 32], strides = [1, 1, 1, 1]} : vector<4x10x32x32xbf16> to vector<1x8x16x32xbf16>
    %29 = vector.shape_cast %28 : vector<1x8x16x32xbf16> to vector<8x16x32xbf16>
    %30 = vector.extract_strided_slice %9 {offsets = [0, 1, 2, 0], sizes = [1, 8, 16, 32], strides = [1, 1, 1, 1]} : vector<4x10x32x32xbf16> to vector<1x8x16x32xbf16>
    %31 = vector.shape_cast %30 : vector<1x8x16x32xbf16> to vector<8x16x32xbf16>
    %32 = vector.extract_strided_slice %9 {offsets = [1, 1, 2, 0], sizes = [1, 8, 16, 32], strides = [1, 1, 1, 1]} : vector<4x10x32x32xbf16> to vector<1x8x16x32xbf16>
    %33 = vector.shape_cast %32 : vector<1x8x16x32xbf16> to vector<8x16x32xbf16>
    %34 = vector.extract_strided_slice %9 {offsets = [2, 1, 0, 0], sizes = [1, 8, 16, 32], strides = [1, 1, 1, 1]} : vector<4x10x32x32xbf16> to vector<1x8x16x32xbf16>
    %35 = vector.shape_cast %34 : vector<1x8x16x32xbf16> to vector<8x16x32xbf16>
    %36 = vector.extract_strided_slice %9 {offsets = [3, 1, 0, 0], sizes = [1, 8, 16, 32], strides = [1, 1, 1, 1]} : vector<4x10x32x32xbf16> to vector<1x8x16x32xbf16>
    %37 = vector.shape_cast %36 : vector<1x8x16x32xbf16> to vector<8x16x32xbf16>
    %38 = vector.extract_strided_slice %9 {offsets = [2, 1, 2, 0], sizes = [1, 8, 16, 32], strides = [1, 1, 1, 1]} : vector<4x10x32x32xbf16> to vector<1x8x16x32xbf16>
    %39 = vector.shape_cast %38 : vector<1x8x16x32xbf16> to vector<8x16x32xbf16>
    %40 = vector.extract_strided_slice %9 {offsets = [3, 1, 2, 0], sizes = [1, 8, 16, 32], strides = [1, 1, 1, 1]} : vector<4x10x32x32xbf16> to vector<1x8x16x32xbf16>
    %41 = vector.shape_cast %40 : vector<1x8x16x32xbf16> to vector<8x16x32xbf16>
    %42 = tpu.concatenate %11, %13, %15, %17, %19, %21, %23, %25, %27, %29, %31, %33, %35, %37, %39, %41 in 2 : vector<8x16x32xbf16>, vector<8x16x32xbf16>, vector<8x16x32xbf16>, vector<8x16x32xbf16>, vector<8x16x32xbf16>, vector<8x16x32xbf16>, vector<8x16x32xbf16>, vector<8x16x32xbf16>, vector<8x16x32xbf16>, vector<8x16x32xbf16>, vector<8x16x32xbf16>, vector<8x16x32xbf16>, vector<8x16x32xbf16>, vector<8x16x32xbf16>, vector<8x16x32xbf16>, vector<8x16x32xbf16> -> vector<8x16x512xbf16>
    %43 = vector.shape_cast %42 : vector<8x16x512xbf16> to vector<128x512xbf16>
    %c0_6 = arith.constant 0 : index
    %c0_7 = arith.constant 0 : index
    %44 = vector.load %arg4[%c0_6, %c0_7] : memref<512x64xbf16, #tpu.memory_space<vmem>>, vector<512x64xbf16>
    %cst_8 = arith.constant dense<0.000000e+00> : vector<128x64xf32>
    %45 = tpu.matmul %43, %44, %cst_8 {dimension_numbers = #tpu.dot_dimension_numbers<[1], [0], [0], [1], [0, 0, 1, 1], [], []>} : vector<128x512xbf16>, vector<512x64xbf16>, vector<128x64xf32> -> vector<128x64xf32>
    %c0_9 = arith.constant 0 : index
    %c0_10 = arith.constant 0 : index
    %46 = vector.load %arg5[%c0_9, %c0_10] : memref<1x64xf32, #tpu.memory_space<vmem>>, vector<1x64xf32>
    %47 = vector.broadcast %46 : vector<1x64xf32> to vector<128x64xf32>
    %48 = arith.addf %45, %47 : vector<128x64xf32>
    %cst_11 = arith.constant 0.000000e+00 : f32
    %49 = vector.broadcast %cst_11 : f32 to vector<128x64xf32>
    %50 = arith.maximumf %48, %49 : vector<128x64xf32>
    %51 = arith.truncf %50 : vector<128x64xf32> to vector<128x64xbf16>
    %52 = vector.shape_cast %51 : vector<128x64xbf16> to vector<8x16x64xbf16>
    %53 = vector.extract_strided_slice %52 {offsets = [0, 0, 0], sizes = [6, 12, 64], strides = [1, 1, 1]} : vector<8x16x64xbf16> to vector<6x12x64xbf16>
    %54 = vector.extract_strided_slice %52 {offsets = [0, 2, 0], sizes = [6, 12, 64], strides = [1, 1, 1]} : vector<8x16x64xbf16> to vector<6x12x64xbf16>
    %55 = vector.extract_strided_slice %52 {offsets = [0, 4, 0], sizes = [6, 12, 64], strides = [1, 1, 1]} : vector<8x16x64xbf16> to vector<6x12x64xbf16>
    %56 = vector.extract_strided_slice %52 {offsets = [1, 0, 0], sizes = [6, 12, 64], strides = [1, 1, 1]} : vector<8x16x64xbf16> to vector<6x12x64xbf16>
    %57 = vector.extract_strided_slice %52 {offsets = [1, 2, 0], sizes = [6, 12, 64], strides = [1, 1, 1]} : vector<8x16x64xbf16> to vector<6x12x64xbf16>
    %58 = vector.extract_strided_slice %52 {offsets = [1, 4, 0], sizes = [6, 12, 64], strides = [1, 1, 1]} : vector<8x16x64xbf16> to vector<6x12x64xbf16>
    %59 = vector.extract_strided_slice %52 {offsets = [2, 0, 0], sizes = [6, 12, 64], strides = [1, 1, 1]} : vector<8x16x64xbf16> to vector<6x12x64xbf16>
    %60 = vector.extract_strided_slice %52 {offsets = [2, 2, 0], sizes = [6, 12, 64], strides = [1, 1, 1]} : vector<8x16x64xbf16> to vector<6x12x64xbf16>
    %61 = vector.extract_strided_slice %52 {offsets = [2, 4, 0], sizes = [6, 12, 64], strides = [1, 1, 1]} : vector<8x16x64xbf16> to vector<6x12x64xbf16>
    %62 = tpu.concatenate %53, %54, %55, %56, %57, %58, %59, %60, %61 in 2 : vector<6x12x64xbf16>, vector<6x12x64xbf16>, vector<6x12x64xbf16>, vector<6x12x64xbf16>, vector<6x12x64xbf16>, vector<6x12x64xbf16>, vector<6x12x64xbf16>, vector<6x12x64xbf16>, vector<6x12x64xbf16> -> vector<6x12x576xbf16>
    %cst_12 = arith.constant 0.000000e+00 : f32
    %63 = vector.broadcast %cst_12 : f32 to vector<2x512xf32>
    %64 = vector.extract_strided_slice %62 {offsets = [0, 0, 0], sizes = [1, 12, 576], strides = [1, 1, 1]} : vector<6x12x576xbf16> to vector<1x12x576xbf16>
    %65 = vector.shape_cast %64 : vector<1x12x576xbf16> to vector<12x576xbf16>
    %c0_13 = arith.constant 0 : index
    %c0_14 = arith.constant 0 : index
    %66 = vector.load %arg6[%c0_13, %c0_14] : memref<576x64xbf16, #tpu.memory_space<vmem>>, vector<576x64xbf16>
    %cst_15 = arith.constant dense<0.000000e+00> : vector<12x64xf32>
    %67 = tpu.matmul %65, %66, %cst_15 {dimension_numbers = #tpu.dot_dimension_numbers<[1], [0], [0], [1], [0, 0, 1, 1], [], []>} : vector<12x576xbf16>, vector<576x64xbf16>, vector<12x64xf32> -> vector<12x64xf32>
    %c0_16 = arith.constant 0 : index
    %c0_17 = arith.constant 0 : index
    %68 = vector.load %arg7[%c0_16, %c0_17] : memref<1x64xf32, #tpu.memory_space<vmem>>, vector<1x64xf32>
    %69 = vector.broadcast %68 : vector<1x64xf32> to vector<12x64xf32>
    %70 = arith.addf %67, %69 : vector<12x64xf32>
    %cst_18 = arith.constant 0.000000e+00 : f32
    %71 = vector.broadcast %cst_18 : f32 to vector<12x64xf32>
    %72 = arith.maximumf %70, %71 : vector<12x64xf32>
    %73 = arith.truncf %72 : vector<12x64xf32> to vector<12x64xbf16>
    %74 = vector.extract_strided_slice %73 {offsets = [0, 0], sizes = [2, 64], strides = [1, 1]} : vector<12x64xbf16> to vector<2x64xbf16>
    %c0_19 = arith.constant 0 : index
    %c0_20 = arith.constant 0 : index
    %75 = vector.load %arg8[%c0_19, %c0_20] : memref<2304x512xbf16, #tpu.memory_space<vmem>>, vector<64x512xbf16>
    %cst_21 = arith.constant dense<0.000000e+00> : vector<2x512xf32>
    %76 = tpu.matmul %74, %75, %cst_21 {dimension_numbers = #tpu.dot_dimension_numbers<[1], [0], [0], [1], [0, 0, 1, 1], [], []>} : vector<2x64xbf16>, vector<64x512xbf16>, vector<2x512xf32> -> vector<2x512xf32>
    %77 = arith.addf %63, %76 : vector<2x512xf32>
    %78 = vector.extract_strided_slice %73 {offsets = [2, 0], sizes = [2, 64], strides = [1, 1]} : vector<12x64xbf16> to vector<2x64xbf16>
    %c64 = arith.constant 64 : index
    %c0_22 = arith.constant 0 : index
    %79 = vector.load %arg8[%c64, %c0_22] : memref<2304x512xbf16, #tpu.memory_space<vmem>>, vector<64x512xbf16>
    %cst_23 = arith.constant dense<0.000000e+00> : vector<2x512xf32>
    %80 = tpu.matmul %78, %79, %cst_23 {dimension_numbers = #tpu.dot_dimension_numbers<[1], [0], [0], [1], [0, 0, 1, 1], [], []>} : vector<2x64xbf16>, vector<64x512xbf16>, vector<2x512xf32> -> vector<2x512xf32>
    %81 = arith.addf %77, %80 : vector<2x512xf32>
    %82 = vector.extract_strided_slice %73 {offsets = [4, 0], sizes = [2, 64], strides = [1, 1]} : vector<12x64xbf16> to vector<2x64xbf16>
    %c128 = arith.constant 128 : index
    %c0_24 = arith.constant 0 : index
    %83 = vector.load %arg8[%c128, %c0_24] : memref<2304x512xbf16, #tpu.memory_space<vmem>>, vector<64x512xbf16>
    %cst_25 = arith.constant dense<0.000000e+00> : vector<2x512xf32>
    %84 = tpu.matmul %82, %83, %cst_25 {dimension_numbers = #tpu.dot_dimension_numbers<[1], [0], [0], [1], [0, 0, 1, 1], [], []>} : vector<2x64xbf16>, vector<64x512xbf16>, vector<2x512xf32> -> vector<2x512xf32>
    %85 = arith.addf %81, %84 : vector<2x512xf32>
    %86 = vector.extract_strided_slice %73 {offsets = [6, 0], sizes = [2, 64], strides = [1, 1]} : vector<12x64xbf16> to vector<2x64xbf16>
    %c192 = arith.constant 192 : index
    %c0_26 = arith.constant 0 : index
    %87 = vector.load %arg8[%c192, %c0_26] : memref<2304x512xbf16, #tpu.memory_space<vmem>>, vector<64x512xbf16>
    %cst_27 = arith.constant dense<0.000000e+00> : vector<2x512xf32>
    %88 = tpu.matmul %86, %87, %cst_27 {dimension_numbers = #tpu.dot_dimension_numbers<[1], [0], [0], [1], [0, 0, 1, 1], [], []>} : vector<2x64xbf16>, vector<64x512xbf16>, vector<2x512xf32> -> vector<2x512xf32>
    %89 = arith.addf %85, %88 : vector<2x512xf32>
    %90 = vector.extract_strided_slice %73 {offsets = [8, 0], sizes = [2, 64], strides = [1, 1]} : vector<12x64xbf16> to vector<2x64xbf16>
    %c256 = arith.constant 256 : index
    %c0_28 = arith.constant 0 : index
    %91 = vector.load %arg8[%c256, %c0_28] : memref<2304x512xbf16, #tpu.memory_space<vmem>>, vector<64x512xbf16>
    %cst_29 = arith.constant dense<0.000000e+00> : vector<2x512xf32>
    %92 = tpu.matmul %90, %91, %cst_29 {dimension_numbers = #tpu.dot_dimension_numbers<[1], [0], [0], [1], [0, 0, 1, 1], [], []>} : vector<2x64xbf16>, vector<64x512xbf16>, vector<2x512xf32> -> vector<2x512xf32>
    %93 = arith.addf %89, %92 : vector<2x512xf32>
    %94 = vector.extract_strided_slice %73 {offsets = [10, 0], sizes = [2, 64], strides = [1, 1]} : vector<12x64xbf16> to vector<2x64xbf16>
    %c320 = arith.constant 320 : index
    %c0_30 = arith.constant 0 : index
    %95 = vector.load %arg8[%c320, %c0_30] : memref<2304x512xbf16, #tpu.memory_space<vmem>>, vector<64x512xbf16>
    %cst_31 = arith.constant dense<0.000000e+00> : vector<2x512xf32>
    %96 = tpu.matmul %94, %95, %cst_31 {dimension_numbers = #tpu.dot_dimension_numbers<[1], [0], [0], [1], [0, 0, 1, 1], [], []>} : vector<2x64xbf16>, vector<64x512xbf16>, vector<2x512xf32> -> vector<2x512xf32>
    %97 = arith.addf %93, %96 : vector<2x512xf32>
    %98 = vector.extract_strided_slice %62 {offsets = [1, 0, 0], sizes = [1, 12, 576], strides = [1, 1, 1]} : vector<6x12x576xbf16> to vector<1x12x576xbf16>
    %99 = vector.shape_cast %98 : vector<1x12x576xbf16> to vector<12x576xbf16>
    %c0_32 = arith.constant 0 : index
    %c0_33 = arith.constant 0 : index
    %100 = vector.load %arg6[%c0_32, %c0_33] : memref<576x64xbf16, #tpu.memory_space<vmem>>, vector<576x64xbf16>
    %cst_34 = arith.constant dense<0.000000e+00> : vector<12x64xf32>
    %101 = tpu.matmul %99, %100, %cst_34 {dimension_numbers = #tpu.dot_dimension_numbers<[1], [0], [0], [1], [0, 0, 1, 1], [], []>} : vector<12x576xbf16>, vector<576x64xbf16>, vector<12x64xf32> -> vector<12x64xf32>
    %c0_35 = arith.constant 0 : index
    %c0_36 = arith.constant 0 : index
    %102 = vector.load %arg7[%c0_35, %c0_36] : memref<1x64xf32, #tpu.memory_space<vmem>>, vector<1x64xf32>
    %103 = vector.broadcast %102 : vector<1x64xf32> to vector<12x64xf32>
    %104 = arith.addf %101, %103 : vector<12x64xf32>
    %cst_37 = arith.constant 0.000000e+00 : f32
    %105 = vector.broadcast %cst_37 : f32 to vector<12x64xf32>
    %106 = arith.maximumf %104, %105 : vector<12x64xf32>
    %107 = arith.truncf %106 : vector<12x64xf32> to vector<12x64xbf16>
    %108 = vector.extract_strided_slice %107 {offsets = [0, 0], sizes = [2, 64], strides = [1, 1]} : vector<12x64xbf16> to vector<2x64xbf16>
    %c384 = arith.constant 384 : index
    %c0_38 = arith.constant 0 : index
    %109 = vector.load %arg8[%c384, %c0_38] : memref<2304x512xbf16, #tpu.memory_space<vmem>>, vector<64x512xbf16>
    %cst_39 = arith.constant dense<0.000000e+00> : vector<2x512xf32>
    %110 = tpu.matmul %108, %109, %cst_39 {dimension_numbers = #tpu.dot_dimension_numbers<[1], [0], [0], [1], [0, 0, 1, 1], [], []>} : vector<2x64xbf16>, vector<64x512xbf16>, vector<2x512xf32> -> vector<2x512xf32>
    %111 = arith.addf %97, %110 : vector<2x512xf32>
    %112 = vector.extract_strided_slice %107 {offsets = [2, 0], sizes = [2, 64], strides = [1, 1]} : vector<12x64xbf16> to vector<2x64xbf16>
    %c448 = arith.constant 448 : index
    %c0_40 = arith.constant 0 : index
    %113 = vector.load %arg8[%c448, %c0_40] : memref<2304x512xbf16, #tpu.memory_space<vmem>>, vector<64x512xbf16>
    %cst_41 = arith.constant dense<0.000000e+00> : vector<2x512xf32>
    %114 = tpu.matmul %112, %113, %cst_41 {dimension_numbers = #tpu.dot_dimension_numbers<[1], [0], [0], [1], [0, 0, 1, 1], [], []>} : vector<2x64xbf16>, vector<64x512xbf16>, vector<2x512xf32> -> vector<2x512xf32>
    %115 = arith.addf %111, %114 : vector<2x512xf32>
    %116 = vector.extract_strided_slice %107 {offsets = [4, 0], sizes = [2, 64], strides = [1, 1]} : vector<12x64xbf16> to vector<2x64xbf16>
    %c512 = arith.constant 512 : index
    %c0_42 = arith.constant 0 : index
    %117 = vector.load %arg8[%c512, %c0_42] : memref<2304x512xbf16, #tpu.memory_space<vmem>>, vector<64x512xbf16>
    %cst_43 = arith.constant dense<0.000000e+00> : vector<2x512xf32>
    %118 = tpu.matmul %116, %117, %cst_43 {dimension_numbers = #tpu.dot_dimension_numbers<[1], [0], [0], [1], [0, 0, 1, 1], [], []>} : vector<2x64xbf16>, vector<64x512xbf16>, vector<2x512xf32> -> vector<2x512xf32>
    %119 = arith.addf %115, %118 : vector<2x512xf32>
    %120 = vector.extract_strided_slice %107 {offsets = [6, 0], sizes = [2, 64], strides = [1, 1]} : vector<12x64xbf16> to vector<2x64xbf16>
    %c576 = arith.constant 576 : index
    %c0_44 = arith.constant 0 : index
    %121 = vector.load %arg8[%c576, %c0_44] : memref<2304x512xbf16, #tpu.memory_space<vmem>>, vector<64x512xbf16>
    %cst_45 = arith.constant dense<0.000000e+00> : vector<2x512xf32>
    %122 = tpu.matmul %120, %121, %cst_45 {dimension_numbers = #tpu.dot_dimension_numbers<[1], [0], [0], [1], [0, 0, 1, 1], [], []>} : vector<2x64xbf16>, vector<64x512xbf16>, vector<2x512xf32> -> vector<2x512xf32>
    %123 = arith.addf %119, %122 : vector<2x512xf32>
    %124 = vector.extract_strided_slice %107 {offsets = [8, 0], sizes = [2, 64], strides = [1, 1]} : vector<12x64xbf16> to vector<2x64xbf16>
    %c640 = arith.constant 640 : index
    %c0_46 = arith.constant 0 : index
    %125 = vector.load %arg8[%c640, %c0_46] : memref<2304x512xbf16, #tpu.memory_space<vmem>>, vector<64x512xbf16>
    %cst_47 = arith.constant dense<0.000000e+00> : vector<2x512xf32>
    %126 = tpu.matmul %124, %125, %cst_47 {dimension_numbers = #tpu.dot_dimension_numbers<[1], [0], [0], [1], [0, 0, 1, 1], [], []>} : vector<2x64xbf16>, vector<64x512xbf16>, vector<2x512xf32> -> vector<2x512xf32>
    %127 = arith.addf %123, %126 : vector<2x512xf32>
    %128 = vector.extract_strided_slice %107 {offsets = [10, 0], sizes = [2, 64], strides = [1, 1]} : vector<12x64xbf16> to vector<2x64xbf16>
    %c704 = arith.constant 704 : index
    %c0_48 = arith.constant 0 : index
    %129 = vector.load %arg8[%c704, %c0_48] : memref<2304x512xbf16, #tpu.memory_space<vmem>>, vector<64x512xbf16>
    %cst_49 = arith.constant dense<0.000000e+00> : vector<2x512xf32>
    %130 = tpu.matmul %128, %129, %cst_49 {dimension_numbers = #tpu.dot_dimension_numbers<[1], [0], [0], [1], [0, 0, 1, 1], [], []>} : vector<2x64xbf16>, vector<64x512xbf16>, vector<2x512xf32> -> vector<2x512xf32>
    %131 = arith.addf %127, %130 : vector<2x512xf32>
    %132 = vector.extract_strided_slice %62 {offsets = [2, 0, 0], sizes = [1, 12, 576], strides = [1, 1, 1]} : vector<6x12x576xbf16> to vector<1x12x576xbf16>
    %133 = vector.shape_cast %132 : vector<1x12x576xbf16> to vector<12x576xbf16>
    %c0_50 = arith.constant 0 : index
    %c0_51 = arith.constant 0 : index
    %134 = vector.load %arg6[%c0_50, %c0_51] : memref<576x64xbf16, #tpu.memory_space<vmem>>, vector<576x64xbf16>
    %cst_52 = arith.constant dense<0.000000e+00> : vector<12x64xf32>
    %135 = tpu.matmul %133, %134, %cst_52 {dimension_numbers = #tpu.dot_dimension_numbers<[1], [0], [0], [1], [0, 0, 1, 1], [], []>} : vector<12x576xbf16>, vector<576x64xbf16>, vector<12x64xf32> -> vector<12x64xf32>
    %c0_53 = arith.constant 0 : index
    %c0_54 = arith.constant 0 : index
    %136 = vector.load %arg7[%c0_53, %c0_54] : memref<1x64xf32, #tpu.memory_space<vmem>>, vector<1x64xf32>
    %137 = vector.broadcast %136 : vector<1x64xf32> to vector<12x64xf32>
    %138 = arith.addf %135, %137 : vector<12x64xf32>
    %cst_55 = arith.constant 0.000000e+00 : f32
    %139 = vector.broadcast %cst_55 : f32 to vector<12x64xf32>
    %140 = arith.maximumf %138, %139 : vector<12x64xf32>
    %141 = arith.truncf %140 : vector<12x64xf32> to vector<12x64xbf16>
    %142 = vector.extract_strided_slice %141 {offsets = [0, 0], sizes = [2, 64], strides = [1, 1]} : vector<12x64xbf16> to vector<2x64xbf16>
    %c768 = arith.constant 768 : index
    %c0_56 = arith.constant 0 : index
    %143 = vector.load %arg8[%c768, %c0_56] : memref<2304x512xbf16, #tpu.memory_space<vmem>>, vector<64x512xbf16>
    %cst_57 = arith.constant dense<0.000000e+00> : vector<2x512xf32>
    %144 = tpu.matmul %142, %143, %cst_57 {dimension_numbers = #tpu.dot_dimension_numbers<[1], [0], [0], [1], [0, 0, 1, 1], [], []>} : vector<2x64xbf16>, vector<64x512xbf16>, vector<2x512xf32> -> vector<2x512xf32>
    %145 = arith.addf %131, %144 : vector<2x512xf32>
    %146 = vector.extract_strided_slice %141 {offsets = [2, 0], sizes = [2, 64], strides = [1, 1]} : vector<12x64xbf16> to vector<2x64xbf16>
    %c832 = arith.constant 832 : index
    %c0_58 = arith.constant 0 : index
    %147 = vector.load %arg8[%c832, %c0_58] : memref<2304x512xbf16, #tpu.memory_space<vmem>>, vector<64x512xbf16>
    %cst_59 = arith.constant dense<0.000000e+00> : vector<2x512xf32>
    %148 = tpu.matmul %146, %147, %cst_59 {dimension_numbers = #tpu.dot_dimension_numbers<[1], [0], [0], [1], [0, 0, 1, 1], [], []>} : vector<2x64xbf16>, vector<64x512xbf16>, vector<2x512xf32> -> vector<2x512xf32>
    %149 = arith.addf %145, %148 : vector<2x512xf32>
    %150 = vector.extract_strided_slice %141 {offsets = [4, 0], sizes = [2, 64], strides = [1, 1]} : vector<12x64xbf16> to vector<2x64xbf16>
    %c896 = arith.constant 896 : index
    %c0_60 = arith.constant 0 : index
    %151 = vector.load %arg8[%c896, %c0_60] : memref<2304x512xbf16, #tpu.memory_space<vmem>>, vector<64x512xbf16>
    %cst_61 = arith.constant dense<0.000000e+00> : vector<2x512xf32>
    %152 = tpu.matmul %150, %151, %cst_61 {dimension_numbers = #tpu.dot_dimension_numbers<[1], [0], [0], [1], [0, 0, 1, 1], [], []>} : vector<2x64xbf16>, vector<64x512xbf16>, vector<2x512xf32> -> vector<2x512xf32>
    %153 = arith.addf %149, %152 : vector<2x512xf32>
    %154 = vector.extract_strided_slice %141 {offsets = [6, 0], sizes = [2, 64], strides = [1, 1]} : vector<12x64xbf16> to vector<2x64xbf16>
    %c960 = arith.constant 960 : index
    %c0_62 = arith.constant 0 : index
    %155 = vector.load %arg8[%c960, %c0_62] : memref<2304x512xbf16, #tpu.memory_space<vmem>>, vector<64x512xbf16>
    %cst_63 = arith.constant dense<0.000000e+00> : vector<2x512xf32>
    %156 = tpu.matmul %154, %155, %cst_63 {dimension_numbers = #tpu.dot_dimension_numbers<[1], [0], [0], [1], [0, 0, 1, 1], [], []>} : vector<2x64xbf16>, vector<64x512xbf16>, vector<2x512xf32> -> vector<2x512xf32>
    %157 = arith.addf %153, %156 : vector<2x512xf32>
    %158 = vector.extract_strided_slice %141 {offsets = [8, 0], sizes = [2, 64], strides = [1, 1]} : vector<12x64xbf16> to vector<2x64xbf16>
    %c1024 = arith.constant 1024 : index
    %c0_64 = arith.constant 0 : index
    %159 = vector.load %arg8[%c1024, %c0_64] : memref<2304x512xbf16, #tpu.memory_space<vmem>>, vector<64x512xbf16>
    %cst_65 = arith.constant dense<0.000000e+00> : vector<2x512xf32>
    %160 = tpu.matmul %158, %159, %cst_65 {dimension_numbers = #tpu.dot_dimension_numbers<[1], [0], [0], [1], [0, 0, 1, 1], [], []>} : vector<2x64xbf16>, vector<64x512xbf16>, vector<2x512xf32> -> vector<2x512xf32>
    %161 = arith.addf %157, %160 : vector<2x512xf32>
    %162 = vector.extract_strided_slice %141 {offsets = [10, 0], sizes = [2, 64], strides = [1, 1]} : vector<12x64xbf16> to vector<2x64xbf16>
    %c1088 = arith.constant 1088 : index
    %c0_66 = arith.constant 0 : index
    %163 = vector.load %arg8[%c1088, %c0_66] : memref<2304x512xbf16, #tpu.memory_space<vmem>>, vector<64x512xbf16>
    %cst_67 = arith.constant dense<0.000000e+00> : vector<2x512xf32>
    %164 = tpu.matmul %162, %163, %cst_67 {dimension_numbers = #tpu.dot_dimension_numbers<[1], [0], [0], [1], [0, 0, 1, 1], [], []>} : vector<2x64xbf16>, vector<64x512xbf16>, vector<2x512xf32> -> vector<2x512xf32>
    %165 = arith.addf %161, %164 : vector<2x512xf32>
    %166 = vector.extract_strided_slice %62 {offsets = [3, 0, 0], sizes = [1, 12, 576], strides = [1, 1, 1]} : vector<6x12x576xbf16> to vector<1x12x576xbf16>
    %167 = vector.shape_cast %166 : vector<1x12x576xbf16> to vector<12x576xbf16>
    %c0_68 = arith.constant 0 : index
    %c0_69 = arith.constant 0 : index
    %168 = vector.load %arg6[%c0_68, %c0_69] : memref<576x64xbf16, #tpu.memory_space<vmem>>, vector<576x64xbf16>
    %cst_70 = arith.constant dense<0.000000e+00> : vector<12x64xf32>
    %169 = tpu.matmul %167, %168, %cst_70 {dimension_numbers = #tpu.dot_dimension_numbers<[1], [0], [0], [1], [0, 0, 1, 1], [], []>} : vector<12x576xbf16>, vector<576x64xbf16>, vector<12x64xf32> -> vector<12x64xf32>
    %c0_71 = arith.constant 0 : index
    %c0_72 = arith.constant 0 : index
    %170 = vector.load %arg7[%c0_71, %c0_72] : memref<1x64xf32, #tpu.memory_space<vmem>>, vector<1x64xf32>
    %171 = vector.broadcast %170 : vector<1x64xf32> to vector<12x64xf32>
    %172 = arith.addf %169, %171 : vector<12x64xf32>
    %cst_73 = arith.constant 0.000000e+00 : f32
    %173 = vector.broadcast %cst_73 : f32 to vector<12x64xf32>
    %174 = arith.maximumf %172, %173 : vector<12x64xf32>
    %175 = arith.truncf %174 : vector<12x64xf32> to vector<12x64xbf16>
    %176 = vector.extract_strided_slice %175 {offsets = [0, 0], sizes = [2, 64], strides = [1, 1]} : vector<12x64xbf16> to vector<2x64xbf16>
    %c1152 = arith.constant 1152 : index
    %c0_74 = arith.constant 0 : index
    %177 = vector.load %arg8[%c1152, %c0_74] : memref<2304x512xbf16, #tpu.memory_space<vmem>>, vector<64x512xbf16>
    %cst_75 = arith.constant dense<0.000000e+00> : vector<2x512xf32>
    %178 = tpu.matmul %176, %177, %cst_75 {dimension_numbers = #tpu.dot_dimension_numbers<[1], [0], [0], [1], [0, 0, 1, 1], [], []>} : vector<2x64xbf16>, vector<64x512xbf16>, vector<2x512xf32> -> vector<2x512xf32>
    %179 = arith.addf %165, %178 : vector<2x512xf32>
    %180 = vector.extract_strided_slice %175 {offsets = [2, 0], sizes = [2, 64], strides = [1, 1]} : vector<12x64xbf16> to vector<2x64xbf16>
    %c1216 = arith.constant 1216 : index
    %c0_76 = arith.constant 0 : index
    %181 = vector.load %arg8[%c1216, %c0_76] : memref<2304x512xbf16, #tpu.memory_space<vmem>>, vector<64x512xbf16>
    %cst_77 = arith.constant dense<0.000000e+00> : vector<2x512xf32>
    %182 = tpu.matmul %180, %181, %cst_77 {dimension_numbers = #tpu.dot_dimension_numbers<[1], [0], [0], [1], [0, 0, 1, 1], [], []>} : vector<2x64xbf16>, vector<64x512xbf16>, vector<2x512xf32> -> vector<2x512xf32>
    %183 = arith.addf %179, %182 : vector<2x512xf32>
    %184 = vector.extract_strided_slice %175 {offsets = [4, 0], sizes = [2, 64], strides = [1, 1]} : vector<12x64xbf16> to vector<2x64xbf16>
    %c1280 = arith.constant 1280 : index
    %c0_78 = arith.constant 0 : index
    %185 = vector.load %arg8[%c1280, %c0_78] : memref<2304x512xbf16, #tpu.memory_space<vmem>>, vector<64x512xbf16>
    %cst_79 = arith.constant dense<0.000000e+00> : vector<2x512xf32>
    %186 = tpu.matmul %184, %185, %cst_79 {dimension_numbers = #tpu.dot_dimension_numbers<[1], [0], [0], [1], [0, 0, 1, 1], [], []>} : vector<2x64xbf16>, vector<64x512xbf16>, vector<2x512xf32> -> vector<2x512xf32>
    %187 = arith.addf %183, %186 : vector<2x512xf32>
    %188 = vector.extract_strided_slice %175 {offsets = [6, 0], sizes = [2, 64], strides = [1, 1]} : vector<12x64xbf16> to vector<2x64xbf16>
    %c1344 = arith.constant 1344 : index
    %c0_80 = arith.constant 0 : index
    %189 = vector.load %arg8[%c1344, %c0_80] : memref<2304x512xbf16, #tpu.memory_space<vmem>>, vector<64x512xbf16>
    %cst_81 = arith.constant dense<0.000000e+00> : vector<2x512xf32>
    %190 = tpu.matmul %188, %189, %cst_81 {dimension_numbers = #tpu.dot_dimension_numbers<[1], [0], [0], [1], [0, 0, 1, 1], [], []>} : vector<2x64xbf16>, vector<64x512xbf16>, vector<2x512xf32> -> vector<2x512xf32>
    %191 = arith.addf %187, %190 : vector<2x512xf32>
    %192 = vector.extract_strided_slice %175 {offsets = [8, 0], sizes = [2, 64], strides = [1, 1]} : vector<12x64xbf16> to vector<2x64xbf16>
    %c1408 = arith.constant 1408 : index
    %c0_82 = arith.constant 0 : index
    %193 = vector.load %arg8[%c1408, %c0_82] : memref<2304x512xbf16, #tpu.memory_space<vmem>>, vector<64x512xbf16>
    %cst_83 = arith.constant dense<0.000000e+00> : vector<2x512xf32>
    %194 = tpu.matmul %192, %193, %cst_83 {dimension_numbers = #tpu.dot_dimension_numbers<[1], [0], [0], [1], [0, 0, 1, 1], [], []>} : vector<2x64xbf16>, vector<64x512xbf16>, vector<2x512xf32> -> vector<2x512xf32>
    %195 = arith.addf %191, %194 : vector<2x512xf32>
    %196 = vector.extract_strided_slice %175 {offsets = [10, 0], sizes = [2, 64], strides = [1, 1]} : vector<12x64xbf16> to vector<2x64xbf16>
    %c1472 = arith.constant 1472 : index
    %c0_84 = arith.constant 0 : index
    %197 = vector.load %arg8[%c1472, %c0_84] : memref<2304x512xbf16, #tpu.memory_space<vmem>>, vector<64x512xbf16>
    %cst_85 = arith.constant dense<0.000000e+00> : vector<2x512xf32>
    %198 = tpu.matmul %196, %197, %cst_85 {dimension_numbers = #tpu.dot_dimension_numbers<[1], [0], [0], [1], [0, 0, 1, 1], [], []>} : vector<2x64xbf16>, vector<64x512xbf16>, vector<2x512xf32> -> vector<2x512xf32>
    %199 = arith.addf %195, %198 : vector<2x512xf32>
    %200 = vector.extract_strided_slice %62 {offsets = [4, 0, 0], sizes = [1, 12, 576], strides = [1, 1, 1]} : vector<6x12x576xbf16> to vector<1x12x576xbf16>
    %201 = vector.shape_cast %200 : vector<1x12x576xbf16> to vector<12x576xbf16>
    %c0_86 = arith.constant 0 : index
    %c0_87 = arith.constant 0 : index
    %202 = vector.load %arg6[%c0_86, %c0_87] : memref<576x64xbf16, #tpu.memory_space<vmem>>, vector<576x64xbf16>
    %cst_88 = arith.constant dense<0.000000e+00> : vector<12x64xf32>
    %203 = tpu.matmul %201, %202, %cst_88 {dimension_numbers = #tpu.dot_dimension_numbers<[1], [0], [0], [1], [0, 0, 1, 1], [], []>} : vector<12x576xbf16>, vector<576x64xbf16>, vector<12x64xf32> -> vector<12x64xf32>
    %c0_89 = arith.constant 0 : index
    %c0_90 = arith.constant 0 : index
    %204 = vector.load %arg7[%c0_89, %c0_90] : memref<1x64xf32, #tpu.memory_space<vmem>>, vector<1x64xf32>
    %205 = vector.broadcast %204 : vector<1x64xf32> to vector<12x64xf32>
    %206 = arith.addf %203, %205 : vector<12x64xf32>
    %cst_91 = arith.constant 0.000000e+00 : f32
    %207 = vector.broadcast %cst_91 : f32 to vector<12x64xf32>
    %208 = arith.maximumf %206, %207 : vector<12x64xf32>
    %209 = arith.truncf %208 : vector<12x64xf32> to vector<12x64xbf16>
    %210 = vector.extract_strided_slice %209 {offsets = [0, 0], sizes = [2, 64], strides = [1, 1]} : vector<12x64xbf16> to vector<2x64xbf16>
    %c1536 = arith.constant 1536 : index
    %c0_92 = arith.constant 0 : index
    %211 = vector.load %arg8[%c1536, %c0_92] : memref<2304x512xbf16, #tpu.memory_space<vmem>>, vector<64x512xbf16>
    %cst_93 = arith.constant dense<0.000000e+00> : vector<2x512xf32>
    %212 = tpu.matmul %210, %211, %cst_93 {dimension_numbers = #tpu.dot_dimension_numbers<[1], [0], [0], [1], [0, 0, 1, 1], [], []>} : vector<2x64xbf16>, vector<64x512xbf16>, vector<2x512xf32> -> vector<2x512xf32>
    %213 = arith.addf %199, %212 : vector<2x512xf32>
    %214 = vector.extract_strided_slice %209 {offsets = [2, 0], sizes = [2, 64], strides = [1, 1]} : vector<12x64xbf16> to vector<2x64xbf16>
    %c1600 = arith.constant 1600 : index
    %c0_94 = arith.constant 0 : index
    %215 = vector.load %arg8[%c1600, %c0_94] : memref<2304x512xbf16, #tpu.memory_space<vmem>>, vector<64x512xbf16>
    %cst_95 = arith.constant dense<0.000000e+00> : vector<2x512xf32>
    %216 = tpu.matmul %214, %215, %cst_95 {dimension_numbers = #tpu.dot_dimension_numbers<[1], [0], [0], [1], [0, 0, 1, 1], [], []>} : vector<2x64xbf16>, vector<64x512xbf16>, vector<2x512xf32> -> vector<2x512xf32>
    %217 = arith.addf %213, %216 : vector<2x512xf32>
    %218 = vector.extract_strided_slice %209 {offsets = [4, 0], sizes = [2, 64], strides = [1, 1]} : vector<12x64xbf16> to vector<2x64xbf16>
    %c1664 = arith.constant 1664 : index
    %c0_96 = arith.constant 0 : index
    %219 = vector.load %arg8[%c1664, %c0_96] : memref<2304x512xbf16, #tpu.memory_space<vmem>>, vector<64x512xbf16>
    %cst_97 = arith.constant dense<0.000000e+00> : vector<2x512xf32>
    %220 = tpu.matmul %218, %219, %cst_97 {dimension_numbers = #tpu.dot_dimension_numbers<[1], [0], [0], [1], [0, 0, 1, 1], [], []>} : vector<2x64xbf16>, vector<64x512xbf16>, vector<2x512xf32> -> vector<2x512xf32>
    %221 = arith.addf %217, %220 : vector<2x512xf32>
    %222 = vector.extract_strided_slice %209 {offsets = [6, 0], sizes = [2, 64], strides = [1, 1]} : vector<12x64xbf16> to vector<2x64xbf16>
    %c1728 = arith.constant 1728 : index
    %c0_98 = arith.constant 0 : index
    %223 = vector.load %arg8[%c1728, %c0_98] : memref<2304x512xbf16, #tpu.memory_space<vmem>>, vector<64x512xbf16>
    %cst_99 = arith.constant dense<0.000000e+00> : vector<2x512xf32>
    %224 = tpu.matmul %222, %223, %cst_99 {dimension_numbers = #tpu.dot_dimension_numbers<[1], [0], [0], [1], [0, 0, 1, 1], [], []>} : vector<2x64xbf16>, vector<64x512xbf16>, vector<2x512xf32> -> vector<2x512xf32>
    %225 = arith.addf %221, %224 : vector<2x512xf32>
    %226 = vector.extract_strided_slice %209 {offsets = [8, 0], sizes = [2, 64], strides = [1, 1]} : vector<12x64xbf16> to vector<2x64xbf16>
    %c1792 = arith.constant 1792 : index
    %c0_100 = arith.constant 0 : index
    %227 = vector.load %arg8[%c1792, %c0_100] : memref<2304x512xbf16, #tpu.memory_space<vmem>>, vector<64x512xbf16>
    %cst_101 = arith.constant dense<0.000000e+00> : vector<2x512xf32>
    %228 = tpu.matmul %226, %227, %cst_101 {dimension_numbers = #tpu.dot_dimension_numbers<[1], [0], [0], [1], [0, 0, 1, 1], [], []>} : vector<2x64xbf16>, vector<64x512xbf16>, vector<2x512xf32> -> vector<2x512xf32>
    %229 = arith.addf %225, %228 : vector<2x512xf32>
    %230 = vector.extract_strided_slice %209 {offsets = [10, 0], sizes = [2, 64], strides = [1, 1]} : vector<12x64xbf16> to vector<2x64xbf16>
    %c1856 = arith.constant 1856 : index
    %c0_102 = arith.constant 0 : index
    %231 = vector.load %arg8[%c1856, %c0_102] : memref<2304x512xbf16, #tpu.memory_space<vmem>>, vector<64x512xbf16>
    %cst_103 = arith.constant dense<0.000000e+00> : vector<2x512xf32>
    %232 = tpu.matmul %230, %231, %cst_103 {dimension_numbers = #tpu.dot_dimension_numbers<[1], [0], [0], [1], [0, 0, 1, 1], [], []>} : vector<2x64xbf16>, vector<64x512xbf16>, vector<2x512xf32> -> vector<2x512xf32>
    %233 = arith.addf %229, %232 : vector<2x512xf32>
    %234 = vector.extract_strided_slice %62 {offsets = [5, 0, 0], sizes = [1, 12, 576], strides = [1, 1, 1]} : vector<6x12x576xbf16> to vector<1x12x576xbf16>
    %235 = vector.shape_cast %234 : vector<1x12x576xbf16> to vector<12x576xbf16>
    %c0_104 = arith.constant 0 : index
    %c0_105 = arith.constant 0 : index
    %236 = vector.load %arg6[%c0_104, %c0_105] : memref<576x64xbf16, #tpu.memory_space<vmem>>, vector<576x64xbf16>
    %cst_106 = arith.constant dense<0.000000e+00> : vector<12x64xf32>
    %237 = tpu.matmul %235, %236, %cst_106 {dimension_numbers = #tpu.dot_dimension_numbers<[1], [0], [0], [1], [0, 0, 1, 1], [], []>} : vector<12x576xbf16>, vector<576x64xbf16>, vector<12x64xf32> -> vector<12x64xf32>
    %c0_107 = arith.constant 0 : index
    %c0_108 = arith.constant 0 : index
    %238 = vector.load %arg7[%c0_107, %c0_108] : memref<1x64xf32, #tpu.memory_space<vmem>>, vector<1x64xf32>
    %239 = vector.broadcast %238 : vector<1x64xf32> to vector<12x64xf32>
    %240 = arith.addf %237, %239 : vector<12x64xf32>
    %cst_109 = arith.constant 0.000000e+00 : f32
    %241 = vector.broadcast %cst_109 : f32 to vector<12x64xf32>
    %242 = arith.maximumf %240, %241 : vector<12x64xf32>
    %243 = arith.truncf %242 : vector<12x64xf32> to vector<12x64xbf16>
    %244 = vector.extract_strided_slice %243 {offsets = [0, 0], sizes = [2, 64], strides = [1, 1]} : vector<12x64xbf16> to vector<2x64xbf16>
    %c1920 = arith.constant 1920 : index
    %c0_110 = arith.constant 0 : index
    %245 = vector.load %arg8[%c1920, %c0_110] : memref<2304x512xbf16, #tpu.memory_space<vmem>>, vector<64x512xbf16>
    %cst_111 = arith.constant dense<0.000000e+00> : vector<2x512xf32>
    %246 = tpu.matmul %244, %245, %cst_111 {dimension_numbers = #tpu.dot_dimension_numbers<[1], [0], [0], [1], [0, 0, 1, 1], [], []>} : vector<2x64xbf16>, vector<64x512xbf16>, vector<2x512xf32> -> vector<2x512xf32>
    %247 = arith.addf %233, %246 : vector<2x512xf32>
    %248 = vector.extract_strided_slice %243 {offsets = [2, 0], sizes = [2, 64], strides = [1, 1]} : vector<12x64xbf16> to vector<2x64xbf16>
    %c1984 = arith.constant 1984 : index
    %c0_112 = arith.constant 0 : index
    %249 = vector.load %arg8[%c1984, %c0_112] : memref<2304x512xbf16, #tpu.memory_space<vmem>>, vector<64x512xbf16>
    %cst_113 = arith.constant dense<0.000000e+00> : vector<2x512xf32>
    %250 = tpu.matmul %248, %249, %cst_113 {dimension_numbers = #tpu.dot_dimension_numbers<[1], [0], [0], [1], [0, 0, 1, 1], [], []>} : vector<2x64xbf16>, vector<64x512xbf16>, vector<2x512xf32> -> vector<2x512xf32>
    %251 = arith.addf %247, %250 : vector<2x512xf32>
    %252 = vector.extract_strided_slice %243 {offsets = [4, 0], sizes = [2, 64], strides = [1, 1]} : vector<12x64xbf16> to vector<2x64xbf16>
    %c2048 = arith.constant 2048 : index
    %c0_114 = arith.constant 0 : index
    %253 = vector.load %arg8[%c2048, %c0_114] : memref<2304x512xbf16, #tpu.memory_space<vmem>>, vector<64x512xbf16>
    %cst_115 = arith.constant dense<0.000000e+00> : vector<2x512xf32>
    %254 = tpu.matmul %252, %253, %cst_115 {dimension_numbers = #tpu.dot_dimension_numbers<[1], [0], [0], [1], [0, 0, 1, 1], [], []>} : vector<2x64xbf16>, vector<64x512xbf16>, vector<2x512xf32> -> vector<2x512xf32>
    %255 = arith.addf %251, %254 : vector<2x512xf32>
    %256 = vector.extract_strided_slice %243 {offsets = [6, 0], sizes = [2, 64], strides = [1, 1]} : vector<12x64xbf16> to vector<2x64xbf16>
    %c2112 = arith.constant 2112 : index
    %c0_116 = arith.constant 0 : index
    %257 = vector.load %arg8[%c2112, %c0_116] : memref<2304x512xbf16, #tpu.memory_space<vmem>>, vector<64x512xbf16>
    %cst_117 = arith.constant dense<0.000000e+00> : vector<2x512xf32>
    %258 = tpu.matmul %256, %257, %cst_117 {dimension_numbers = #tpu.dot_dimension_numbers<[1], [0], [0], [1], [0, 0, 1, 1], [], []>} : vector<2x64xbf16>, vector<64x512xbf16>, vector<2x512xf32> -> vector<2x512xf32>
    %259 = arith.addf %255, %258 : vector<2x512xf32>
    %260 = vector.extract_strided_slice %243 {offsets = [8, 0], sizes = [2, 64], strides = [1, 1]} : vector<12x64xbf16> to vector<2x64xbf16>
    %c2176 = arith.constant 2176 : index
    %c0_118 = arith.constant 0 : index
    %261 = vector.load %arg8[%c2176, %c0_118] : memref<2304x512xbf16, #tpu.memory_space<vmem>>, vector<64x512xbf16>
    %cst_119 = arith.constant dense<0.000000e+00> : vector<2x512xf32>
    %262 = tpu.matmul %260, %261, %cst_119 {dimension_numbers = #tpu.dot_dimension_numbers<[1], [0], [0], [1], [0, 0, 1, 1], [], []>} : vector<2x64xbf16>, vector<64x512xbf16>, vector<2x512xf32> -> vector<2x512xf32>
    %263 = arith.addf %259, %262 : vector<2x512xf32>
    %264 = vector.extract_strided_slice %243 {offsets = [10, 0], sizes = [2, 64], strides = [1, 1]} : vector<12x64xbf16> to vector<2x64xbf16>
    %c2240 = arith.constant 2240 : index
    %c0_120 = arith.constant 0 : index
    %265 = vector.load %arg8[%c2240, %c0_120] : memref<2304x512xbf16, #tpu.memory_space<vmem>>, vector<64x512xbf16>
    %cst_121 = arith.constant dense<0.000000e+00> : vector<2x512xf32>
    %266 = tpu.matmul %264, %265, %cst_121 {dimension_numbers = #tpu.dot_dimension_numbers<[1], [0], [0], [1], [0, 0, 1, 1], [], []>} : vector<2x64xbf16>, vector<64x512xbf16>, vector<2x512xf32> -> vector<2x512xf32>
    %267 = arith.addf %263, %266 : vector<2x512xf32>
    %c0_122 = arith.constant 0 : index
    %c0_123 = arith.constant 0 : index
    %268 = vector.load %arg9[%c0_122, %c0_123] : memref<1x512xf32, #tpu.memory_space<vmem>>, vector<1x512xf32>
    %269 = vector.broadcast %268 : vector<1x512xf32> to vector<2x512xf32>
    %270 = arith.addf %267, %269 : vector<2x512xf32>
    %cst_124 = arith.constant 0.000000e+00 : f32
    %271 = vector.broadcast %cst_124 : f32 to vector<2x512xf32>
    %272 = arith.maximumf %270, %271 : vector<2x512xf32>
    %273 = arith.truncf %272 : vector<2x512xf32> to vector<2x512xbf16>
    %c0_125 = arith.constant 0 : index
    %c0_126 = arith.constant 0 : index
    %274 = vector.load %arg10[%c0_125, %c0_126] : memref<512x128xbf16, #tpu.memory_space<vmem>>, vector<512x128xbf16>
    %cst_127 = arith.constant dense<0.000000e+00> : vector<2x128xf32>
    %275 = tpu.matmul %273, %274, %cst_127 {dimension_numbers = #tpu.dot_dimension_numbers<[1], [0], [0], [1], [0, 0, 1, 1], [], []>} : vector<2x512xbf16>, vector<512x128xbf16>, vector<2x128xf32> -> vector<2x128xf32>
    %c0_128 = arith.constant 0 : index
    %c0_129 = arith.constant 0 : index
    %276 = vector.load %arg11[%c0_128, %c0_129] : memref<1x128xf32, #tpu.memory_space<vmem>>, vector<1x128xf32>
    %277 = vector.broadcast %276 : vector<1x128xf32> to vector<2x128xf32>
    %278 = arith.addf %275, %277 : vector<2x128xf32>
    %cst_130 = arith.constant dense<0xFF800000> : vector<2xf32>
    %279 = vector.multi_reduction <maximumf>, %278, %cst_130 [1] : vector<2x128xf32> to vector<2xf32>
    %280 = vector.shape_cast %279 : vector<2xf32> to vector<2x1xf32>
    %281 = vector.broadcast %280 : vector<2x1xf32> to vector<2x128xf32>
    %282 = arith.subf %278, %281 : vector<2x128xf32>
    %283 = math.exp %282 : vector<2x128xf32>
    %cst_131 = arith.constant dense<0.000000e+00> : vector<2xf32>
    %284 = vector.multi_reduction <add>, %283, %cst_131 [1] : vector<2x128xf32> to vector<2xf32>
    %285 = vector.shape_cast %284 : vector<2xf32> to vector<2x1xf32>
    %286 = vector.broadcast %285 : vector<2x1xf32> to vector<2x128xf32>
    %287 = arith.divf %283, %286 : vector<2x128xf32>
    %c0_132 = arith.constant 0 : index
    %c0_133 = arith.constant 0 : index
    %288 = vector.load %arg12[%c0_132, %c0_133] : memref<2x128xf32, #tpu.memory_space<vmem>>, vector<2x128xf32>
    tpu.vector_store %arg12[%c0_132, %c0_133], %287 {strides = array<i32>} : memref<2x128xf32, #tpu.memory_space<vmem>>, vector<2x128xf32>,
    return
  }
  func.func @transform_0(%arg0: i32) -> (i32, i32) {
    %c0_i32 = arith.constant 0 : i32
    %c0_i32_0 = arith.constant 0 : i32
    %c0_i32_1 = arith.constant 0 : i32
    return %c0_i32, %c0_i32_0 : i32, i32
  }
  func.func @transform_1(%arg0: i32) -> (i32, i32) {
    %c0_i32 = arith.constant 0 : i32
    %c0_i32_0 = arith.constant 0 : i32
    %c0_i32_1 = arith.constant 0 : i32
    return %c0_i32, %c0_i32_0 : i32, i32
  }
  func.func @transform_2(%arg0: i32) -> (i32, i32) {
    %c0_i32 = arith.constant 0 : i32
    %c0_i32_0 = arith.constant 0 : i32
    %c0_i32_1 = arith.constant 0 : i32
    return %c0_i32, %c0_i32_0 : i32, i32
  }
  func.func @transform_3(%arg0: i32) -> (i32, i32) {
    %c0_i32 = arith.constant 0 : i32
    %c0_i32_0 = arith.constant 0 : i32
    %c0_i32_1 = arith.constant 0 : i32
    return %c0_i32, %c0_i32_0 : i32, i32
  }
  func.func @transform_4(%arg0: i32) -> (i32, i32) {
    %c0_i32 = arith.constant 0 : i32
    %c0_i32_0 = arith.constant 0 : i32
    %c0_i32_1 = arith.constant 0 : i32
    return %c0_i32, %c0_i32_0 : i32, i32
  }
  func.func @transform_5(%arg0: i32) -> (i32, i32) {
    %c0_i32 = arith.constant 0 : i32
    %c0_i32_0 = arith.constant 0 : i32
    %c0_i32_1 = arith.constant 0 : i32
    return %c0_i32, %c0_i32_0 : i32, i32
  }
  func.func @transform_6(%arg0: i32) -> (i32, i32) {
    %c0_i32 = arith.constant 0 : i32
    %c0_i32_0 = arith.constant 0 : i32
    %c0_i32_1 = arith.constant 0 : i32
    return %c0_i32, %c0_i32_0 : i32, i32
  }
  func.func @transform_7(%arg0: i32) -> (i32, i32) {
    %c0_i32 = arith.constant 0 : i32
    %c0_i32_0 = arith.constant 0 : i32
    %c0_i32_1 = arith.constant 0 : i32
    return %c0_i32, %c0_i32_0 : i32, i32
  }
  func.func @transform_8(%arg0: i32) -> (i32, i32) {
    %c0_i32 = arith.constant 0 : i32
    %c0_i32_0 = arith.constant 0 : i32
    %c0_i32_1 = arith.constant 0 : i32
    return %c0_i32, %c0_i32_0 : i32, i32
  }
  func.func @transform_9(%arg0: i32) -> (i32, i32) {
    %c0_i32 = arith.constant 0 : i32
    %c0_i32_0 = arith.constant 0 : i32
    %c0_i32_1 = arith.constant 0 : i32
    return %c0_i32, %c0_i32_0 : i32, i32
  }
  func.func @transform_10(%arg0: i32) -> (i32, i32) {
    %c0_i32 = arith.constant 0 : i32
    %c0_i32_0 = arith.constant 0 : i32
    %c0_i32_1 = arith.constant 0 : i32
    return %c0_i32, %c0_i32_0 : i32, i32
  }
  func.func @transform_11(%arg0: i32) -> (i32, i32) {
    %c0_i32 = arith.constant 0 : i32
    %c0_i32_0 = arith.constant 0 : i32
    %c0_i32_1 = arith.constant 0 : i32
    return %c0_i32, %c0_i32_0 : i32, i32
  }
}

</mosaic_0001>

<bundles_post_ra>
// kernel: actor_net_forward.1
= control target key start
LH: loop header
LB: loop body
LE: loop exit
PB: predicated region body
PF: predicated region fallthrough
CT: control target
= control target key end

     0   :  { %vm639_vm0 = vcmask 523264   ;;  %vm1793_vm1 = vcmask 1046528   ;;  %s13856_s25 = smov 64   ;;  %s13857_s26 = smov 32   ;;  %s18022_s0 = inlined_call_operand.vmem [shape: bf16[1280,64], index: 0, kind: input, shape index: {}]   ;;  %s18023_s1 = inlined_call_operand.vmem [shape: bf16[64,32], index: 1, kind: input, shape index: {}]   ;;  %s18024_s2 = inlined_call_operand.vmem [shape: f32[1,32], index: 2, kind: input, shape index: {}]   ;;  %s18025_s3 = inlined_call_operand.vmem [shape: bf16[512,64], index: 3, kind: input, shape index: {}]   ;;  %s18026_s4 = inlined_call_operand.vmem [shape: f32[1,64], index: 4, kind: input, shape index: {}]   ;;  %s18027_s5 = inlined_call_operand.vmem [shape: bf16[576,64], index: 5, kind: input, shape index: {}]   ;;  %s18028_s6 = inlined_call_operand.vmem [shape: f32[1,64], index: 6, kind: input, shape index: {}]   ;;  %s18029_s7 = inlined_call_operand.vmem [shape: bf16[2304,512], index: 7, kind: input, shape index: {}]   ;;  %s18030_s8 = inlined_call_operand.vmem [shape: f32[1,512], index: 8, kind: input, shape index: {}]   ;;  %s18031_s9 = inlined_call_operand.vmem [shape: bf16[512,128], index: 9, kind: input, shape index: {}]   ;;  %s18032_s10 = inlined_call_operand.vmem [shape: f32[1,128], index: 10, kind: input, shape index: {}]   ;;  %s18033_s11 = inlined_call_operand.hbm [shape: f32[2,128], index: 11, kind: output, shape index: {}]  }
   0x1   :  { %v12689_v0 = vld [vmem:[%s18023_s1] sm:$0xff]   ;;  %v12690_v1 = vld [vmem:[%s18023_s1 + $0x8] sm:$0xff]   ;;  %v12691_v2 = vld [vmem:[%s18023_s1 + $0x10] sm:$0xff]   ;;  %s13858_s27 = smov 96  }
   0x2   :  { %12442 = vmatprep.subr.bf16.mxu0 %v12689_v0  ;;  %v12693_v3 = vld [vmem:[%s18022_s0] sm:$0xff]   ;;  %v12692_v4 = vld [vmem:[%s18023_s1 + $0x18] sm:$0xff]   ;;  %v12694_v5 = vld [vmem:[%s18022_s0 + $0x8] sm:$0xff]  }
   0x3   :  { %12443 = vmatpush3.bf16.msra.mxu0 %v12689_v0  ;;  %12450 = vmatprep.mubr.msk.bf16.mxu0 %vm639_vm0, %v12693_v3  ;;  %v12695_v6 = vld [vmem:[%s18022_s0 + $0x10] sm:$0xff]   ;;  %v12696_v7 = vld [vmem:[%s18022_s0 + $0x18] sm:$0xff]   ;;  %v12697_v8 = vld [vmem:[%s18022_s0 + $0x20] sm:$0xff]  }
   0x4   :  { %12444 = vmatprep.subr.bf16.mxu0 %v12690_v1  ;;  %v12698_v9 = vld [vmem:[%s18022_s0 + $0x28] sm:$0xff]   ;;  %v12699_v10 = vld [vmem:[%s18022_s0 + $0x30] sm:$0xff]   ;;  %v12700_v11 = vld [vmem:[%s18022_s0 + $0x38] sm:$0xff]  }
   0x5   :  { %v12701_v12 = vld [vmem:[%s18022_s0 + $0x40] sm:$0xff]   ;;  %v12702_v13 = vld [vmem:[%s18022_s0 + $0x48] sm:$0xff]   ;;  %v12703_v14 = vld [vmem:[%s18022_s0 + $0x50] sm:$0xff]  }
   0x6   :  { %v12704_v15 = vld [vmem:[%s18022_s0 + $0x58] sm:$0xff]   ;;  %v12705_v16 = vld [vmem:[%s18022_s0 + $0x60] sm:$0xff]   ;;  %v12706_v17 = vld [vmem:[%s18022_s0 + $0x68] sm:$0xff]  }
   0x7   :  { %12445 = vmatpush3.bf16.msra.mxu0 %v12690_v1  ;;  %v12707_v18 = vld [vmem:[%s18022_s0 + $0x70] sm:$0xff]   ;;  %v12708_v19 = vld [vmem:[%s18022_s0 + $0x78] sm:$0xff]   ;;  %v12709_v20 = vld [vmem:[%s18022_s0 + $0x80] sm:$0xff]  }
   0x8   :  { %12446 = vmatprep.subr.bf16.mxu0 %v12691_v2  ;;  %v12710_v21 = vld [vmem:[%s18022_s0 + $0x88] sm:$0xff]   ;;  %v12711_v22 = vld [vmem:[%s18022_s0 + $0x90] sm:$0xff]   ;;  %v12712_v23 = vld [vmem:[%s18022_s0 + $0x98] sm:$0xff]  }
   0x9   :  { %v12713_v24 = vld [vmem:[%s18022_s0 + $0xa0] sm:$0xff]   ;;  %v12714_v25 = vld [vmem:[%s18022_s0 + $0xa8] sm:$0xff]   ;;  %v12715_v26 = vld [vmem:[%s18022_s0 + $0xb0] sm:$0xff]  }
   0xa   :  { %v12716_v27 = vld [vmem:[%s18022_s0 + $0xb8] sm:$0xff]   ;;  %v12717_v28 = vld [vmem:[%s18022_s0 + $0xc0] sm:$0xff]   ;;  %v12718_v29 = vld [vmem:[%s18022_s0 + $0xc8] sm:$0xff]  }
   0xb   :  { %12447 = vmatpush3.bf16.msra.mxu0 %v12691_v2  ;;  %v12719_v30 = vld [vmem:[%s18022_s0 + $0xd0] sm:$0xff]   ;;  %v12720_v31 = vld [vmem:[%s18022_s0 + $0xd8] sm:$0xff]   ;;  %v12721_v32 = vld [vmem:[%s18022_s0 + $0xe0] sm:$0xff]  }
   0xc   :  { %12448 = vmatprep.subr.bf16.mxu0 %v12692_v4  ;;  %v12722_v33 = vld [vmem:[%s18022_s0 + $0xe8] sm:$0xff]   ;;  %v12723_v34 = vld [vmem:[%s18022_s0 + $0xf0] sm:$0xff]   ;;  %v12724_v35 = vld [vmem:[%s18022_s0 + $0xf8] sm:$0xff]  }
   0xd   :  { %v12725_v36 = vld [vmem:[%s18022_s0 + $0x100] sm:$0xff]   ;;  %v12726_v37 = vld [vmem:[%s18022_s0 + $0x108] sm:$0xff]   ;;  %v12727_v38 = vld [vmem:[%s18022_s0 + $0x110] sm:$0xff]  }
   0xe   :  { %v12728_v39 = vld [vmem:[%s18022_s0 + $0x118] sm:$0xff]   ;;  %v12729_v40 = vld [vmem:[%s18022_s0 + $0x120] sm:$0xff]   ;;  %v12730_v41 = vld [vmem:[%s18022_s0 + $0x128] sm:$0xff]  }
   0xf   :  { %12449 = vmatpush3.bf16.msra.mxu0 %v12692_v4  ;;  %v12731_v42 = vld [vmem:[%s18022_s0 + $0x130] sm:$0xff]   ;;  %v12732_v43 = vld [vmem:[%s18022_s0 + $0x138] sm:$0xff]   ;;  %v12733_v44 = vld [vmem:[%s18022_s0 + $0x140] sm:$0xff]  }
  0x10   :  { %v12734_v45 = vld [vmem:[%s18022_s0 + $0x148] sm:$0xff]   ;;  %v12735_v46 = vld [vmem:[%s18022_s0 + $0x150] sm:$0xff]   ;;  %v12736_v47 = vld [vmem:[%s18022_s0 + $0x158] sm:$0xff]  }
  0x11   :  { %v12737_v48 = vld [vmem:[%s18022_s0 + $0x160] sm:$0xff]   ;;  %v12738_v49 = vld [vmem:[%s18022_s0 + $0x168] sm:$0xff]   ;;  %v12739_v50 = vld [vmem:[%s18022_s0 + $0x170] sm:$0xff]  }
  0x12   :  { %12451 = vmatmul.mubr.msk.bf16.vlgmr.msra.gmra.mrb[0].mxu0 %vm639_vm0, %v12694_v5  ;;  %v12740_v51 = vld [vmem:[%s18022_s0 + $0x178] sm:$0xff]   ;;  %v12741_v52 = vld [vmem:[%s18022_s0 + $0x180] sm:$0xff]   ;;  %v12742_v53 = vld [vmem:[%s18022_s0 + $0x188] sm:$0xff]  }
  0x13   :  { %12454 = vmatprep.mubr.msk.bf16.mxu0 %vm639_vm0, %v12695_v6  ;;  %v12743_v54 = vld [vmem:[%s18022_s0 + $0x190] sm:$0xff]   ;;  %v12744_v55 = vld [vmem:[%s18022_s0 + $0x198] sm:$0xff]   ;;  %v12745_v56 = vld [vmem:[%s18022_s0 + $0x1a0] sm:$0xff]  }
  0x14   :  { %v12746_v57 = vld [vmem:[%s18022_s0 + $0x1a8] sm:$0xff]   ;;  %v12747_v58 = vld [vmem:[%s18022_s0 + $0x1b0] sm:$0xff]   ;;  %v14156_v59 = vld [vmem:[%s18024_s2] ss:$0 sm:$0xff] }
  0x15   :  { %v12748_v60 = vld [vmem:[%s18022_s0 + $0x1b8] sm:$0xff]   ;;  %v12749_v62 = vld [vmem:[%s18022_s0 + $0x1c0] sm:$0xff]  }
  0x1a   :  { %12455 = vmatmul.mubr.msk.bf16.gmra.mrb[4].mxu0 %vm639_vm0, %v12696_v7 }
  0x1b   :  { %12458 = vmatprep.mubr.msk.bf16.mxu0 %vm639_vm0, %v12697_v8 }
  0x22   :  { %12459 = vmatmul.mubr.msk.bf16.gmra.mrb[8].mxu0 %vm639_vm0, %v12698_v9 }
  0x23   :  { %12462 = vmatprep.mubr.msk.bf16.mxu0 %vm639_vm0, %v12699_v10  ;;  %v12750_v10 = vld [vmem:[%s18022_s0 + $0x1c8] sm:$0xff]  }
  0x2a   :  { %12463 = vmatmul.mubr.msk.bf16.gmra.mrb[12].mxu0 %vm639_vm0, %v12700_v11 }
  0x2b   :  { %12466 = vmatprep.mubr.msk.bf16.mxu0 %vm639_vm0, %v12701_v12 }
  0x32   :  { %12467 = vmatmul.mubr.msk.bf16.gmra.mrb[16].mxu0 %vm639_vm0, %v12702_v13 }
  0x33   :  { %12470 = vmatprep.mubr.msk.bf16.mxu0 %vm639_vm0, %v12703_v14  ;;  %v12751_v14 = vld [vmem:[%s18022_s0 + $0x1d0] sm:$0xff]  }
  0x3a   :  { %12471 = vmatmul.mubr.msk.bf16.gmra.mrb[20].mxu0 %vm639_vm0, %v12704_v15 }
  0x3b   :  { %12474 = vmatprep.mubr.msk.bf16.mxu0 %vm639_vm0, %v12705_v16 }
  0x42   :  { %12475 = vmatmul.mubr.msk.bf16.gmra.mrb[24].mxu0 %vm639_vm0, %v12706_v17 }
  0x43   :  { %12478 = vmatprep.mubr.msk.bf16.mxu0 %vm639_vm0, %v12707_v18 }
  0x4a   :  { %12479 = vmatmul.mubr.msk.bf16.gmra.mrb[28].mxu0 %vm639_vm0, %v12708_v19 }
  0x4b   :  { %12482 = vmatprep.mubr.msk.bf16.mxu0 %vm639_vm0, %v12709_v20 }
  0x52   :  { %12483 = vmatmul.mubr.msk.bf16.gmra.mrb[32].mxu0 %vm639_vm0, %v12710_v21 }
  0x53   :  { %12486 = vmatprep.mubr.msk.bf16.mxu0 %vm639_vm0, %v12711_v22 }
  0x5a   :  { %12487 = vmatmul.mubr.msk.bf16.gmra.mrb[36].mxu0 %vm639_vm0, %v12712_v23 }
  0x5b   :  { %12490 = vmatprep.mubr.msk.bf16.mxu0 %vm639_vm0, %v12713_v24 }
  0x62   :  { %12491 = vmatmul.mubr.msk.bf16.gmra.mrb[40].mxu0 %vm639_vm0, %v12714_v25 }
  0x63   :  { %12494 = vmatprep.mubr.msk.bf16.mxu0 %vm639_vm0, %v12715_v26 }
  0x6a   :  { %12495 = vmatmul.mubr.msk.bf16.gmra.mrb[44].mxu0 %vm639_vm0, %v12716_v27 }
  0x6b   :  { %12498 = vmatprep.mubr.msk.bf16.mxu0 %vm639_vm0, %v12717_v28 }
  0x72   :  { %12499 = vmatmul.mubr.msk.bf16.gmra.mrb[48].mxu0 %vm639_vm0, %v12718_v29 }
  0x73   :  { %12502 = vmatprep.mubr.msk.bf16.mxu0 %vm639_vm0, %v12719_v30  ;;  %v12752_v30 = vld [vmem:[%s18022_s0 + $0x1d8] sm:$0xff]  }
  0x7a   :  { %12503 = vmatmul.mubr.msk.bf16.gmra.mrb[52].mxu0 %vm639_vm0, %v12720_v31 }
  0x7b   :  { %12506 = vmatprep.mubr.msk.bf16.mxu0 %vm639_vm0, %v12721_v32 }
  0x82   :  { %12507 = vmatmul.mubr.msk.bf16.gmra.mrb[56].mxu0 %vm639_vm0, %v12722_v33  ;;  %v12753_v33 = vld [vmem:[%s18022_s0 + $0x1e0] sm:$0xff]  }
  0x83   :  { %12510 = vmatprep.mubr.msk.bf16.mxu0 %vm639_vm0, %v12723_v34 }
  0x8a   :  { %12511 = vmatmul.mubr.msk.bf16.gmra.mrb[60].mxu0 %vm639_vm0, %v12724_v35 }
  0x8b   :  { %12514 = vmatprep.mubr.msk.bf16.mxu0 %vm639_vm0, %v12725_v36 }
  0x92   :  { %12515 = vmatmul.mubr.msk.bf16.gmra.mrb[64].mxu0 %vm639_vm0, %v12726_v37 }
  0x93   :  { %12518 = vmatprep.mubr.msk.bf16.mxu0 %vm639_vm0, %v12727_v38 }
  0x9a   :  { %12519 = vmatmul.mubr.msk.bf16.gmra.mrb[68].mxu0 %vm639_vm0, %v12728_v39 }
  0x9b   :  { %12522 = vmatprep.mubr.msk.bf16.mxu0 %vm639_vm0, %v12729_v40 }
  0xa2   :  { %12523 = vmatmul.mubr.msk.bf16.gmra.mrb[72].mxu0 %vm639_vm0, %v12730_v41 }
  0xa3   :  { %12526 = vmatprep.mubr.msk.bf16.mxu0 %vm639_vm0, %v12731_v42 }
  0xaa   :  { %12527 = vmatmul.mubr.msk.bf16.gmra.mrb[76].mxu0 %vm639_vm0, %v12732_v43 }
  0xab   :  { %12530 = vmatprep.mubr.msk.bf16.mxu0 %vm639_vm0, %v12733_v44 }
  0xb2   :  { %12531 = vmatmul.mubr.msk.bf16.gmra.mrb[80].mxu0 %vm639_vm0, %v12734_v45 }
  0xb3   :  { %12534 = vmatprep.mubr.msk.bf16.mxu0 %vm639_vm0, %v12735_v46 }
  0xba   :  { %12535 = vmatmul.mubr.msk.bf16.gmra.mrb[84].mxu0 %vm639_vm0, %v12736_v47 }
  0xbb   :  { %12538 = vmatprep.mubr.msk.bf16.mxu0 %vm639_vm0, %v12737_v48 }
  0xc2   :  { %12539 = vmatmul.mubr.msk.bf16.gmra.mrb[88].mxu0 %vm639_vm0, %v12738_v49  ;;  %v12754_v49 = vld [vmem:[%s18022_s0 + $0x1e8] sm:$0xff]  }
  0xc3   :  { %12542 = vmatprep.mubr.msk.bf16.mxu0 %vm639_vm0, %v12739_v50 }
  0xca   :  { %12543 = vmatmul.mubr.msk.bf16.gmra.mrb[92].mxu0 %vm639_vm0, %v12740_v51 }
  0xcb   :  { %12546 = vmatprep.mubr.msk.bf16.mxu0 %vm639_vm0, %v12741_v52  ;;  %v12755_v52 = vld [vmem:[%s18022_s0 + $0x1f0] sm:$0xff]  }
  0xd2   :  { %12547 = vmatmul.mubr.msk.bf16.gmra.mrb[96].mxu0 %vm639_vm0, %v12742_v53 }
  0xd3   :  { %12550 = vmatprep.mubr.msk.bf16.mxu0 %vm639_vm0, %v12743_v54 }
  0xda   :  { %12551 = vmatmul.mubr.msk.bf16.gmra.mrb[100].mxu0 %vm639_vm0, %v12744_v55 }
  0xdb   :  { %12554 = vmatprep.mubr.msk.bf16.mxu0 %vm639_vm0, %v12745_v56 }
  0xe2   :  { %12555 = vmatmul.mubr.msk.bf16.gmra.mrb[104].mxu0 %vm639_vm0, %v12746_v57 }
  0xe3   :  { %12558 = vmatprep.mubr.msk.bf16.mxu0 %vm639_vm0, %v12747_v58 }
  0xe5   :  { %v12452_v61 = vpop.f32.mrb[0].mxu0 }
  0xe6   :  { %v923_v63 = vadd.f32 %v12452_v61, %v14156_v59  ;;  %v914_v0 = vpop.f32.mrb[1].mxu0 }
  0xe7   :  { %v915_v1 = vadd.f32 %v14156_v59, %v914_v0  ;;  %v12453_v2 = vpop.f32.mrb[2].mxu0 }
  0xe8   :  { %v926_v3 = vadd.f32 %v12453_v2, %v14156_v59  ;;  %v917_v4 = vpop.f32.mrb[3].mxu0  ;;  %v1539_v6 = vmax.f32 %v923_v63, 0.0 }
  0xe9   :  { %v918_v5 = vadd.f32 %v14156_v59, %v917_v4  ;;  %v1537_v8 = vmax.f32 %v915_v1, 0.0 }
  0xea   :  { %v1540_v7 = vmax.f32 %v926_v3, 0.0  ;;  %12559 = vmatmul.mubr.msk.bf16.gmra.mrb[108].mxu0 %vm639_vm0, %v12748_v60 }
  0xeb   :  { %v1538_v9 = vmax.f32 %v918_v5, 0.0  ;;  %12562 = vmatprep.mubr.msk.bf16.mxu0 %vm639_vm0, %v12749_v62  ;;  %v12756_v5 = vld [vmem:[%s18022_s0 + $0x1f8] sm:$0xff]  }
  0xec   :  { %v1682_v11 = vpack.c.bf16 %v1540_v7, %v1539_v6 }
  0xed   :  { %v14175_v12 = vpack.c.bf16 %v1538_v9, %v1537_v8  ;;  %v12456_v13 = vpop.f32.mrb[4].mxu0  ;;  %v12757_v8 = vld [vmem:[%s18022_s0 + $0x200] sm:$0xff]  }
  0xee   :  { %v939_v15 = vadd.f32 %v12456_v13, %v14156_v59  ;;  %v930_v16 = vpop.f32.mrb[5].mxu0  ;;  %v1795_v17 = vrot.slane %v1682_v11, 1 }
  0xef   :  { %v931_v18 = vadd.f32 %v14156_v59, %v930_v16  ;;  %v12457_v19 = vpop.f32.mrb[6].mxu0  ;;  %v1794_v20 = vrot.slane %v14175_v12, 1 }
  0xf0   :  { %v942_v21 = vadd.f32 %v12457_v19, %v14156_v59  ;;  %v933_v22 = vpop.f32.mrb[7].mxu0  ;;  %v1543_v25 = vmax.f32 %v939_v15, 0.0 }
  0xf1   :  { %v934_v23 = vadd.f32 %v14156_v59, %v933_v22  ;;  %v1796_v24 = vsel %vm1793_vm1, %v1794_v20, %v1795_v17  ;;  %v1541_v27 = vmax.f32 %v931_v18, 0.0  ;;  %v12758_v22 = vld [vmem:[%s18022_s0 + $0x208] sm:$0xff]  }
  0xf2   :  { %v1544_v26 = vmax.f32 %v942_v21, 0.0  ;;  %12563 = vmatmul.mubr.msk.bf16.gmra.mrb[112].mxu0 %vm639_vm0, %v12750_v10  ;;  %1818 = vrot.lane.b32.xlu1 %v1796_v24, %s13856_s25 }
  0xf3   :  { %v1542_v28 = vmax.f32 %v934_v23, 0.0  ;;  %12566 = vmatprep.mubr.msk.bf16.mxu0 %vm639_vm0, %v12751_v14 }
  0xf4   :  { %v1684_v29 = vpack.c.bf16 %v1544_v26, %v1543_v25  ;;  %v12759_v25 = vld [vmem:[%s18022_s0 + $0x210] sm:$0xff]  }
  0xf5   :  { %v14192_v31 = vpack.c.bf16 %v1542_v28, %v1541_v27  ;;  %v12460_v32 = vpop.f32.mrb[8].mxu0 }
  0xf6   :  { %v955_v34 = vadd.f32 %v12460_v32, %v14156_v59  ;;  %v946_v35 = vpop.f32.mrb[9].mxu0  ;;  %v1798_v36 = vrot.slane %v1684_v29, 1 }
  0xf7   :  { %v947_v37 = vadd.f32 %v14156_v59, %v946_v35  ;;  %v12461_v38 = vpop.f32.mrb[10].mxu0  ;;  %v1797_v39 = vrot.slane %v14192_v31, 1 }
  0xf8   :  { %v958_v40 = vadd.f32 %v12461_v38, %v14156_v59  ;;  %v949_v41 = vpop.f32.mrb[11].mxu0  ;;  %v1547_v44 = vmax.f32 %v955_v34, 0.0 }
  0xf9   :  { %v950_v42 = vadd.f32 %v14156_v59, %v949_v41  ;;  %v1799_v43 = vsel %vm1793_vm1, %v1797_v39, %v1798_v36  ;;  %v1545_v46 = vmax.f32 %v947_v37, 0.0  ;;  %v12760_v39 = vld [vmem:[%s18022_s0 + $0x218] sm:$0xff]  }
  0xfa   :  { %v1548_v45 = vmax.f32 %v958_v40, 0.0  ;;  %12567 = vmatmul.mubr.msk.bf16.gmra.mrb[116].mxu0 %vm639_vm0, %v12752_v30  ;;  %1820 = vrot.lane.b32.xlu1 %v1799_v43, %s13856_s25 }
  0xfb   :  { %v1546_v47 = vmax.f32 %v950_v42, 0.0  ;;  %12570 = vmatprep.mubr.msk.bf16.mxu0 %vm639_vm0, %v12753_v33  ;;  %v12761_v42 = vld [vmem:[%s18022_s0 + $0x220] sm:$0xff]  }
  0xfc   :  { %v1686_v48 = vpack.c.bf16 %v1548_v45, %v1547_v44 }
  0xfd   :  { %v14209_v50 = vpack.c.bf16 %v1546_v47, %v1545_v46  ;;  %v12464_v51 = vpop.f32.mrb[12].mxu0 }
  0xfe   :  { %v971_v53 = vadd.f32 %v12464_v51, %v14156_v59  ;;  %v962_v54 = vpop.f32.mrb[13].mxu0  ;;  %v1801_v55 = vrot.slane %v1686_v48, 1 }
  0xff   :  { %v963_v56 = vadd.f32 %v14156_v59, %v962_v54  ;;  %v12465_v57 = vpop.f32.mrb[14].mxu0  ;;  %v1800_v58 = vrot.slane %v14209_v50, 1 }
 0x100   :  { %v974_v60 = vadd.f32 %v12465_v57, %v14156_v59  ;;  %v965_v61 = vpop.f32.mrb[15].mxu0  ;;  %v1551_v0 = vmax.f32 %v971_v53, 0.0 }
 0x101   :  { %v966_v62 = vadd.f32 %v14156_v59, %v965_v61  ;;  %v1802_v63 = vsel %vm1793_vm1, %v1800_v58, %v1801_v55  ;;  %v1549_v2 = vmax.f32 %v963_v56, 0.0  ;;  %v12762_v56 = vld [vmem:[%s18022_s0 + $0x228] sm:$0xff]  }
 0x102   :  { %v1552_v1 = vmax.f32 %v974_v60, 0.0  ;;  %12571 = vmatmul.mubr.msk.bf16.gmra.mrb[120].mxu0 %vm639_vm0, %v12754_v49  ;;  %1822 = vrot.lane.b32.xlu1 %v1802_v63, %s13856_s25  ;;  %v12763_v60 = vld [vmem:[%s18022_s0 + $0x230] sm:$0xff]  }
 0x103   :  { %v1550_v3 = vmax.f32 %v966_v62, 0.0  ;;  %12574 = vmatprep.mubr.msk.bf16.mxu0 %vm639_vm0, %v12755_v52 }
 0x104   :  { %v14223_v4 = vpack.c.bf16 %v1552_v1, %v1551_v0 }
 0x105   :  { %v14228_v6 = vpack.c.bf16 %v1550_v3, %v1549_v2  ;;  %v12468_v7 = vpop.f32.mrb[16].mxu0 }
 0x106   :  { %v987_v9 = vadd.f32 %v12468_v7, %v14156_v59  ;;  %v978_v10 = vpop.f32.mrb[17].mxu0 }
 0x107   :  { %v979_v11 = vadd.f32 %v14156_v59, %v978_v10  ;;  %v12469_v13 = vpop.f32.mrb[18].mxu0 }
 0x108   :  { %v990_v14 = vadd.f32 %v12469_v13, %v14156_v59  ;;  %v981_v15 = vpop.f32.mrb[19].mxu0  ;;  %v1555_v17 = vmax.f32 %v987_v9, 0.0 }
 0x109   :  { %v982_v16 = vadd.f32 %v14156_v59, %v981_v15  ;;  %v1553_v19 = vmax.f32 %v979_v11, 0.0  ;;  %v12764_v11 = vld [vmem:[%s18022_s0 + $0x238] sm:$0xff]   ;;  %v12765_v15 = vld [vmem:[%s18022_s0 + $0x240] sm:$0xff]  }
 0x10a   :  { %v1556_v18 = vmax.f32 %v990_v14, 0.0  ;;  %12575 = vmatmul.mubr.msk.bf16.gmra.mrb[124].mxu0 %vm639_vm0, %v12756_v5 }
 0x10b   :  { %v1554_v20 = vmax.f32 %v982_v16, 0.0  ;;  %12578 = vmatprep.mubr.msk.bf16.mxu0 %vm639_vm0, %v12757_v8 }
 0x10c   :  { %v14239_v21 = vpack.c.bf16 %v1556_v18, %v1555_v17 }
 0x10d   :  { %v14244_v23 = vpack.c.bf16 %v1554_v20, %v1553_v19  ;;  %v12472_v24 = vpop.f32.mrb[20].mxu0 }
 0x10e   :  { %v1003_v26 = vadd.f32 %v12472_v24, %v14156_v59  ;;  %v994_v27 = vpop.f32.mrb[21].mxu0 }
 0x10f   :  { %v995_v28 = vadd.f32 %v14156_v59, %v994_v27  ;;  %v12473_v29 = vpop.f32.mrb[22].mxu0 }
 0x110   :  { %v1006_v30 = vadd.f32 %v12473_v29, %v14156_v59  ;;  %v997_v32 = vpop.f32.mrb[23].mxu0  ;;  %v1559_v34 = vmax.f32 %v1003_v26, 0.0 }
 0x111   :  { %v998_v33 = vadd.f32 %v14156_v59, %v997_v32  ;;  %v1557_v36 = vmax.f32 %v995_v28, 0.0 }
 0x112   :  { %v1560_v35 = vmax.f32 %v1006_v30, 0.0  ;;  %12579 = vmatmul.mubr.msk.bf16.gmra.mrb[128].mxu0 %vm639_vm0, %v12758_v22  ;;  %v12766_v30 = vld [vmem:[%s18022_s0 + $0x248] sm:$0xff]  }
 0x113   :  { %v1558_v37 = vmax.f32 %v998_v33, 0.0  ;;  %12582 = vmatprep.mubr.msk.bf16.mxu0 %vm639_vm0, %v12759_v25 }
 0x114   :  { %v14255_v38 = vpack.c.bf16 %v1560_v35, %v1559_v34  ;;  %v12767_v34 = vld [vmem:[%s18022_s0 + $0x250] sm:$0xff]  }
 0x115   :  { %v14260_v40 = vpack.c.bf16 %v1558_v37, %v1557_v36  ;;  %v12476_v41 = vpop.f32.mrb[24].mxu0 }
 0x116   :  { %v1019_v43 = vadd.f32 %v12476_v41, %v14156_v59  ;;  %v1010_v44 = vpop.f32.mrb[25].mxu0 }
 0x117   :  { %v1011_v45 = vadd.f32 %v14156_v59, %v1010_v44  ;;  %v12477_v46 = vpop.f32.mrb[26].mxu0 }
 0x118   :  { %v1022_v47 = vadd.f32 %v12477_v46, %v14156_v59  ;;  %v1013_v48 = vpop.f32.mrb[27].mxu0  ;;  %v1563_v51 = vmax.f32 %v1019_v43, 0.0 }
 0x119   :  { %v1014_v49 = vadd.f32 %v14156_v59, %v1013_v48  ;;  %v1561_v53 = vmax.f32 %v1011_v45, 0.0 }
 0x11a   :  { %v1564_v52 = vmax.f32 %v1022_v47, 0.0  ;;  %12583 = vmatmul.mubr.msk.bf16.gmra.mrb[132].mxu0 %vm639_vm0, %v12760_v39  ;;  %v12768_v39 = vld [vmem:[%s18022_s0 + $0x258] sm:$0xff]  }
 0x11b   :  { %v1562_v54 = vmax.f32 %v1014_v49, 0.0  ;;  %12586 = vmatprep.mubr.msk.bf16.mxu0 %vm639_vm0, %v12761_v42  ;;  %v12769_v42 = vld [vmem:[%s18022_s0 + $0x260] sm:$0xff]  }
 0x11c   :  { %v14271_v55 = vpack.c.bf16 %v1564_v52, %v1563_v51 }
 0x11d   :  { %v14276_v57 = vpack.c.bf16 %v1562_v54, %v1561_v53  ;;  %v12480_v58 = vpop.f32.mrb[28].mxu0 }
 0x11e   :  { %v1035_v61 = vadd.f32 %v12480_v58, %v14156_v59  ;;  %v1026_v62 = vpop.f32.mrb[29].mxu0  ;;  %v12770_v58 = vld [vmem:[%s18022_s0 + $0x268] sm:$0xff]  }
 0x11f   :  { %v1027_v63 = vadd.f32 %v14156_v59, %v1026_v62  ;;  %v12481_v0 = vpop.f32.mrb[30].mxu0 }
 0x120   :  { %v1038_v1 = vadd.f32 %v12481_v0, %v14156_v59  ;;  %v1029_v2 = vpop.f32.mrb[31].mxu0  ;;  %v1567_v5 = vmax.f32 %v1035_v61, 0.0 }
 0x121   :  { %v1030_v3 = vadd.f32 %v14156_v59, %v1029_v2  ;;  %v1565_v8 = vmax.f32 %v1027_v63, 0.0 }
 0x122   :  { %v1568_v7 = vmax.f32 %v1038_v1, 0.0  ;;  %12587 = vmatmul.mubr.msk.bf16.gmra.mrb[136].mxu0 %vm639_vm0, %v12762_v56 }
 0x123   :  { %v1566_v9 = vmax.f32 %v1030_v3, 0.0  ;;  %12590 = vmatprep.mubr.msk.bf16.mxu0 %vm639_vm0, %v12763_v60 }
 0x124   :  { %v14287_v10 = vpack.c.bf16 %v1568_v7, %v1567_v5 }
 0x125   :  { %v14292_v13 = vpack.c.bf16 %v1566_v9, %v1565_v8  ;;  %v12484_v14 = vpop.f32.mrb[32].mxu0 }
 0x126   :  { %v1051_v16 = vadd.f32 %v12484_v14, %v14156_v59  ;;  %v1042_v17 = vpop.f32.mrb[33].mxu0 }
 0x127   :  { %v1043_v18 = vadd.f32 %v14156_v59, %v1042_v17  ;;  %v12485_v19 = vpop.f32.mrb[34].mxu0 }
 0x128   :  { %v1054_v20 = vadd.f32 %v12485_v19, %v14156_v59  ;;  %v1045_v22 = vpop.f32.mrb[35].mxu0  ;;  %v1571_v25 = vmax.f32 %v1051_v16, 0.0 }
 0x129   :  { %v1046_v24 = vadd.f32 %v14156_v59, %v1045_v22  ;;  %v1569_v27 = vmax.f32 %v1043_v18, 0.0 }
 0x12a   :  { %v1572_v26 = vmax.f32 %v1054_v20, 0.0  ;;  %12591 = vmatmul.mubr.msk.bf16.gmra.mrb[140].mxu0 %vm639_vm0, %v12764_v11  ;;  %v14341_v20 = vld [vmem:[%s18024_s2] ss:$0 sm:$0xff] }
 0x12b   :  { %v1570_v28 = vmax.f32 %v1046_v24, 0.0  ;;  %12594 = vmatprep.mubr.msk.bf16.mxu0 %vm639_vm0, %v12765_v15 }
 0x12c   :  { %v14303_v29 = vpack.c.bf16 %v1572_v26, %v1571_v25 }
 0x12d   :  { %v14308_v32 = vpack.c.bf16 %v1570_v28, %v1569_v27  ;;  %v12488_v33 = vpop.f32.mrb[36].mxu0 }
 0x12e   :  { %v1058_v35 = vpop.f32.mrb[37].mxu0 }
 0x12f   :  { %v12489_v36 = vpop.f32.mrb[38].mxu0 }
 0x130   :  { %v1060_v37 = vpop.f32.mrb[39].mxu0 }
 0x132   :  { %12595 = vmatmul.mubr.msk.bf16.gmra.mrb[144].mxu0 %vm639_vm0, %v12766_v30 }
 0x133   :  { %12598 = vmatprep.mubr.msk.bf16.mxu0 %vm639_vm0, %v12767_v34 }
 0x135   :  { %v12492_v41 = vpop.f32.mrb[40].mxu0 }
 0x136   :  { %v1079_v43 = vadd.f32 %v12492_v41, %v14156_v59  ;;  %v1070_v44 = vpop.f32.mrb[41].mxu0 }
 0x137   :  { %v1071_v45 = vadd.f32 %v14156_v59, %v1070_v44  ;;  %v12493_v46 = vpop.f32.mrb[42].mxu0 }
 0x138   :  { %v1082_v47 = vadd.f32 %v12493_v46, %v14156_v59  ;;  %v1073_v48 = vpop.f32.mrb[43].mxu0  ;;  %v1575_v51 = vmax.f32 %v1079_v43, 0.0 }
 0x139   :  { %v1074_v49 = vadd.f32 %v14156_v59, %v1073_v48  ;;  %v1573_v53 = vmax.f32 %v1071_v45, 0.0 }
 0x13a   :  { %v1576_v52 = vmax.f32 %v1082_v47, 0.0  ;;  %12599 = vmatmul.mubr.msk.bf16.gmra.mrb[148].mxu0 %vm639_vm0, %v12768_v39 }
 0x13b   :  { %v1574_v54 = vmax.f32 %v1074_v49, 0.0  ;;  %12602 = vmatprep.mubr.msk.bf16.mxu0 %vm639_vm0, %v12769_v42 }
 0x13c   :  { %v1700_v56 = vpack.c.bf16 %v1576_v52, %v1575_v51 }
 0x13d   :  { %v12496_v60 = vpop.f32.mrb[44].mxu0  ;;  %v1699_v61 = vpack.c.bf16 %v1574_v54, %v1573_v53 }
 0x13e   :  { %v1095_v62 = vadd.f32 %v12496_v60, %v14156_v59  ;;  %v1086_v63 = vpop.f32.mrb[45].mxu0  ;;  %v1843_v0 = vrot.slane %v1700_v56, 1 }
 0x13f   :  { %v1087_v1 = vadd.f32 %v14156_v59, %v1086_v63  ;;  %v12497_v2 = vpop.f32.mrb[46].mxu0  ;;  %1761 = vrot.lane.b32.xlu0 %v1699_v61, %s13857_s26  ;;  %v1842_v3 = vrot.slane %v1699_v61, 1 }
 0x140   :  { %v1098_v5 = vadd.f32 %v12497_v2, %v14156_v59  ;;  %v1089_v7 = vpop.f32.mrb[47].mxu0  ;;  %v1579_v11 = vmax.f32 %v1095_v62, 0.0 }
 0x141   :  { %v1090_v8 = vadd.f32 %v14156_v59, %v1089_v7  ;;  %v1844_v9 = vsel %vm1793_vm1, %v1842_v3, %v1843_v0  ;;  %v1577_v15 = vmax.f32 %v1087_v1, 0.0 }
 0x142   :  { %v1580_v14 = vmax.f32 %v1098_v5, 0.0  ;;  %1866 = vrot.lane.b32.xlu1 %v1844_v9, %s13858_s27  ;;  %12603 = vmatmul.mubr.msk.bf16.gmra.mrb[152].mxu0 %vm639_vm0, %v12770_v58 }
 0x143   :  { %v1578_v16 = vmax.f32 %v1090_v8, 0.0 }
 0x144   :  { %v1702_v17 = vpack.c.bf16 %v1580_v14, %v1579_v11 }
 0x145   :  { %v12500_v18 = vpop.f32.mrb[48].mxu0  ;;  %v1701_v19 = vpack.c.bf16 %v1578_v16, %v1577_v15 }
 0x146   :  { %v1111_v59 = vadd.f32 %v14341_v20, %v12500_v18  ;;  %v1102_v22 = vpop.f32.mrb[49].mxu0  ;;  %v1846_v24 = vrot.slane %v1702_v17, 1 }
 0x147   :  { %v1103_v25 = vadd.f32 %v14341_v20, %v1102_v22  ;;  %v12501_v26 = vpop.f32.mrb[50].mxu0  ;;  %v1845_v27 = vrot.slane %v1701_v19, 1  ;;  %1763 = vrot.lane.b32.xlu1 %v1701_v19, %s13857_s26 }
 0x148   :  { %v1114_v28 = vadd.f32 %v14341_v20, %v12501_v26  ;;  %v1105_v30 = vpop.f32.mrb[51].mxu0  ;;  %v1583_v35 = vmax.f32 %v1111_v59, 0.0 }
 0x149   :  { %v1106_v33 = vadd.f32 %v14341_v20, %v1105_v30  ;;  %v1847_v34 = vsel %vm1793_vm1, %v1845_v27, %v1846_v24  ;;  %v1581_v37 = vmax.f32 %v1103_v25, 0.0 }
 0x14a   :  { %v1584_v36 = vmax.f32 %v1114_v28, 0.0 }
 0x14b   :  { %v1582_v39 = vmax.f32 %v1106_v33, 0.0  ;;  %1868 = vrot.lane.b32.xlu1 %v1847_v34, %s13858_s27 }
 0x14c   :  { %v1704_v41 = vpack.c.bf16 %v1584_v36, %v1583_v35 }
 0x14d   :  { %v12504_v42 = vpop.f32.mrb[52].mxu0  ;;  %v1703_v43 = vpack.c.bf16 %v1582_v39, %v1581_v37 }
 0x14e   :  { %v1127_v44 = vadd.f32 %v14341_v20, %v12504_v42  ;;  %v1118_v45 = vpop.f32.mrb[53].mxu0  ;;  %v1849_v46 = vrot.slane %v1704_v41, 1 }
 0x14f   :  { %v1119_v47 = vadd.f32 %v14341_v20, %v1118_v45  ;;  %v12505_v48 = vpop.f32.mrb[54].mxu0  ;;  %v1848_v49 = vrot.slane %v1703_v43, 1  ;;  %1765 = vrot.lane.b32.xlu1 %v1703_v43, %s13857_s26 }
 0x150   :  { %v1130_v51 = vadd.f32 %v14341_v20, %v12505_v48  ;;  %v1121_v52 = vpop.f32.mrb[55].mxu0  ;;  %v1587_v56 = vmax.f32 %v1127_v44, 0.0 }
 0x151   :  { %v1122_v53 = vadd.f32 %v14341_v20, %v1121_v52  ;;  %v1850_v54 = vsel %vm1793_vm1, %v1848_v49, %v1849_v46  ;;  %v1585_v60 = vmax.f32 %v1119_v47, 0.0 }
 0x152   :  { %v1588_v58 = vmax.f32 %v1130_v51, 0.0 }
 0x153   :  { %v1586_v61 = vmax.f32 %v1122_v53, 0.0  ;;  %1870 = vrot.lane.b32.xlu1 %v1850_v54, %s13858_s27 }
 0x154   :  { %v1706_v62 = vpack.c.bf16 %v1588_v58, %v1587_v56 }
 0x155   :  { %v12508_v63 = vpop.f32.mrb[56].mxu0  ;;  %v14357_v0 = vpack.c.bf16 %v1586_v61, %v1585_v60 }
 0x156   :  { %v1143_v1 = vadd.f32 %v14341_v20, %v12508_v63  ;;  %v1134_v2 = vpop.f32.mrb[57].mxu0  ;;  %v1852_v3 = vrot.slane %v1706_v62, 1 }
 0x157   :  { %v1135_v5 = vadd.f32 %v14341_v20, %v1134_v2  ;;  %v12509_v7 = vpop.f32.mrb[58].mxu0  ;;  %v1851_v8 = vrot.slane %v14357_v0, 1 }
 0x158   :  { %v1146_v9 = vadd.f32 %v14341_v20, %v12509_v7  ;;  %v1137_v11 = vpop.f32.mrb[59].mxu0  ;;  %v1591_v16 = vmax.f32 %v1143_v1, 0.0 }
 0x159   :  { %v1138_v14 = vadd.f32 %v14341_v20, %v1137_v11  ;;  %v14365_v15 = vsel %vm1793_vm1, %v1851_v8, %v1852_v3  ;;  %v1589_v18 = vmax.f32 %v1135_v5, 0.0 }
 0x15a   :  { %v1592_v17 = vmax.f32 %v1146_v9, 0.0 }
 0x15b   :  { %v1590_v19 = vmax.f32 %v1138_v14, 0.0 }
 0x15c   :  { %v1708_v59 = vpack.c.bf16 %v1592_v17, %v1591_v16 }
 0x15d   :  { %v12512_v22 = vpop.f32.mrb[60].mxu0  ;;  %v14367_v24 = vpack.c.bf16 %v1590_v19, %v1589_v18 }
 0x15e   :  { %v1159_v25 = vadd.f32 %v14341_v20, %v12512_v22  ;;  %v1150_v26 = vpop.f32.mrb[61].mxu0  ;;  %v1855_v27 = vrot.slane %v1708_v59, 1 }
 0x15f   :  { %v1151_v28 = vadd.f32 %v14341_v20, %v1150_v26  ;;  %v12513_v30 = vpop.f32.mrb[62].mxu0  ;;  %v1854_v33 = vrot.slane %v14367_v24, 1 }
 0x160   :  { %16 = vsyncpa [#allocation3], 0  ;;  %v1162_v34 = vadd.f32 %v14341_v20, %v12513_v30  ;;  %v1153_v35 = vpop.f32.mrb[63].mxu0  ;;  %v1595_v39 = vmax.f32 %v1159_v25, 0.0  ;;  %vm2042_vm2 = vcmask 261120   ;;  %vm2083_vm3 = vcmask 785408  }
 0x161   :  { %v1154_v36 = vadd.f32 %v14341_v20, %v1153_v35  ;;  %v14375_v37 = vsel %vm1793_vm1, %v1854_v33, %v1855_v27  ;;  %v1593_v42 = vmax.f32 %v1151_v28, 0.0  ;;  %vm13860_vm4 = vmmov 0  }
 0x162   :  { %v1596_v41 = vmax.f32 %v1162_v34, 0.0  ;;  %vm10943_vm5 = vcmask 1041408  }
 0x163   :  { %v1594_v43 = vmax.f32 %v1154_v36, 0.0 }
 0x164   :  { %v1710_v44 = vpack.c.bf16 %v1596_v41, %v1595_v39 }
 0x165   :  { %v12516_v45 = vpop.f32.mrb[64].mxu0  ;;  %v14377_v46 = vpack.c.bf16 %v1594_v43, %v1593_v42 }
 0x166   :  { %v1175_v47 = vadd.f32 %v14341_v20, %v12516_v45  ;;  %v1166_v48 = vpop.f32.mrb[65].mxu0  ;;  %v1858_v49 = vrot.slane %v1710_v44, 1 }
 0x167   :  { %v1167_v51 = vadd.f32 %v14341_v20, %v1166_v48  ;;  %v12517_v52 = vpop.f32.mrb[66].mxu0  ;;  %v1857_v53 = vrot.slane %v14377_v46, 1 }
 0x168   :  { %v1178_v54 = vadd.f32 %v14341_v20, %v12517_v52  ;;  %v1169_v56 = vpop.f32.mrb[67].mxu0  ;;  %v1599_v61 = vmax.f32 %v1175_v47, 0.0 }
 0x169   :  { %v1170_v58 = vadd.f32 %v14341_v20, %v1169_v56  ;;  %v14385_v60 = vsel %vm1793_vm1, %v1857_v53, %v1858_v49  ;;  %v1597_v63 = vmax.f32 %v1167_v51, 0.0 }
 0x16a   :  { %v1600_v62 = vmax.f32 %v1178_v54, 0.0 }
 0x16b   :  { %v1598_v1 = vmax.f32 %v1170_v58, 0.0 }
 0x16c   :  { %v1712_v2 = vpack.c.bf16 %v1600_v62, %v1599_v61 }
 0x16d   :  { %v12520_v3 = vpop.f32.mrb[68].mxu0  ;;  %v14387_v5 = vpack.c.bf16 %v1598_v1, %v1597_v63 }
 0x16e   :  { %v1191_v7 = vadd.f32 %v14341_v20, %v12520_v3  ;;  %v1182_v8 = vpop.f32.mrb[69].mxu0  ;;  %v1861_v9 = vrot.slane %v1712_v2, 1 }
 0x16f   :  { %v1183_v11 = vadd.f32 %v14341_v20, %v1182_v8  ;;  %v12521_v14 = vpop.f32.mrb[70].mxu0  ;;  %v1860_v16 = vrot.slane %v14387_v5, 1 }
 0x170   :  { %v1194_v17 = vadd.f32 %v14341_v20, %v12521_v14  ;;  %v1185_v18 = vpop.f32.mrb[71].mxu0  ;;  %v1603_v22 = vmax.f32 %v1191_v7, 0.0 }
 0x171   :  { %v1186_v19 = vadd.f32 %v14341_v20, %v1185_v18  ;;  %v14395_v59 = vsel %vm1793_vm1, %v1860_v16, %v1861_v9  ;;  %v1601_v26 = vmax.f32 %v1183_v11, 0.0 }
 0x172   :  { %v1604_v25 = vmax.f32 %v1194_v17, 0.0 }
 0x173   :  { %v1602_v27 = vmax.f32 %v1186_v19, 0.0 }
 0x174   :  { %v1714_v28 = vpack.c.bf16 %v1604_v25, %v1603_v22 }
 0x175   :  { %v14397_v30 = vpack.c.bf16 %v1602_v27, %v1601_v26  ;;  %v12524_v33 = vpop.f32.mrb[72].mxu0 }
 0x176   :  { %v1864_v34 = vrot.slane %v1714_v28, 1  ;;  %v1207_v35 = vadd.f32 %v14341_v20, %v12524_v33  ;;  %v1198_v36 = vpop.f32.mrb[73].mxu0 }
 0x177   :  { %v1863_v39 = vrot.slane %v14397_v30, 1  ;;  %v1199_v41 = vadd.f32 %v14341_v20, %v1198_v36  ;;  %v12525_v42 = vpop.f32.mrb[74].mxu0 }
 0x178   :  { %v1210_v43 = vadd.f32 %v14341_v20, %v12525_v42  ;;  %v1201_v44 = vpop.f32.mrb[75].mxu0  ;;  %v1607_v48 = vmax.f32 %v1207_v35, 0.0 }
 0x179   :  { %v1202_v45 = vadd.f32 %v14341_v20, %v1201_v44  ;;  %v14405_v47 = vsel %vm1793_vm1, %v1863_v39, %v1864_v34  ;;  %v1605_v51 = vmax.f32 %v1199_v41, 0.0 }
 0x17a   :  { %v1608_v49 = vmax.f32 %v1210_v43, 0.0 }
 0x17b   :  { %v1606_v52 = vmax.f32 %v1202_v45, 0.0 }
 0x17c   :  { %v1716_v53 = vpack.c.bf16 %v1608_v49, %v1607_v48 }
 0x17d   :  { %v14407_v54 = vpack.c.bf16 %v1606_v52, %v1605_v51  ;;  %v12528_v56 = vpop.f32.mrb[76].mxu0 }
 0x17e   :  { %v2022_v58 = vrot.slane %v1716_v53, 1  ;;  %v1214_v61 = vpop.f32.mrb[77].mxu0 }
 0x17f   :  { %v2021_v62 = vrot.slane %v14407_v54, 1  ;;  %v12529_v63 = vpop.f32.mrb[78].mxu0  ;;  %v1803_v61 = vrot.slane %v14228_v6, 1 }
 0x180   :  { %v1216_v1 = vpop.f32.mrb[79].mxu0 }
 0x181   :  { %v14411_v2 = vsel %vm1793_vm1, %v2021_v62, %v2022_v58  ;;  %v1804_v62 = vrot.slane %v14223_v4, 1 }
 0x183   :  { %v1805_v4 = vsel %vm1793_vm1, %v1803_v61, %v1804_v62 }
 0x185   :  { %v12532_v3 = vpop.f32.mrb[80].mxu0 }
 0x186   :  { %v1235_v7 = vadd.f32 %v14341_v20, %v12532_v3  ;;  %v1226_v8 = vpop.f32.mrb[81].mxu0 }
 0x187   :  { %v1227_v9 = vadd.f32 %v14341_v20, %v1226_v8  ;;  %v12533_v11 = vpop.f32.mrb[82].mxu0 }
 0x188   :  { %v1238_v14 = vadd.f32 %v14341_v20, %v12533_v11  ;;  %v1229_v16 = vpop.f32.mrb[83].mxu0  ;;  %v1611_v18 = vmax.f32 %v1235_v7, 0.0 }
 0x189   :  { %v1230_v17 = vadd.f32 %v14341_v20, %v1229_v16  ;;  %v1609_v22 = vmax.f32 %v1227_v9, 0.0 }
 0x18a   :  { %v1612_v19 = vmax.f32 %v1238_v14, 0.0 }
 0x18b   :  { %v1610_v25 = vmax.f32 %v1230_v17, 0.0 }
 0x18c   :  { %v1718_v26 = vpack.c.bf16 %v1612_v19, %v1611_v18 }
 0x18d   :  { %v14417_v27 = vpack.c.bf16 %v1610_v25, %v1609_v22  ;;  %v12536_v28 = vpop.f32.mrb[84].mxu0 }
 0x18e   :  { %v1923_v33 = vrot.slane %v1718_v26, 1  ;;  %v1251_v34 = vadd.f32 %v14341_v20, %v12536_v28  ;;  %v1242_v35 = vpop.f32.mrb[85].mxu0 }
 0x18f   :  { %v1922_v36 = vrot.slane %v14417_v27, 1  ;;  %v1243_v39 = vadd.f32 %v14341_v20, %v1242_v35  ;;  %v12537_v41 = vpop.f32.mrb[86].mxu0 }
 0x190   :  { %v1254_v42 = vadd.f32 %v14341_v20, %v12537_v41  ;;  %v1245_v43 = vpop.f32.mrb[87].mxu0  ;;  %v1615_v48 = vmax.f32 %v1251_v34, 0.0 }
 0x191   :  { %v1246_v44 = vadd.f32 %v14341_v20, %v1245_v43  ;;  %v1924_v45 = vsel %vm1793_vm1, %v1922_v36, %v1923_v33  ;;  %v1613_v51 = vmax.f32 %v1243_v39, 0.0 }
 0x192   :  { %v1616_v49 = vmax.f32 %v1254_v42, 0.0  ;;  %1946 = vrot.lane.b32.xlu1 %v1924_v45, %s13856_s25 }
 0x193   :  { %v1614_v52 = vmax.f32 %v1246_v44, 0.0 }
 0x194   :  { %v1720_v53 = vpack.c.bf16 %v1616_v49, %v1615_v48  ;;  %v1806_v48 = vrot.slane %v14244_v23, 1  ;;  %v1807_v49 = vrot.slane %v14239_v21, 1 }
 0x195   :  { %v14426_v56 = vpack.c.bf16 %v1614_v52, %v1613_v51  ;;  %v12540_v58 = vpop.f32.mrb[88].mxu0 }
 0x196   :  { %v1926_v63 = vrot.slane %v1720_v53, 1  ;;  %v1267_v1 = vadd.f32 %v14341_v20, %v12540_v58  ;;  %v1258_v3 = vpop.f32.mrb[89].mxu0  ;;  %1767 = vrot.lane.b32.xlu1 %v14357_v0, %s13857_s26 }
 0x197   :  { %v1925_v7 = vrot.slane %v14426_v56, 1  ;;  %v1259_v8 = vadd.f32 %v14341_v20, %v1258_v3  ;;  %v12541_v9 = vpop.f32.mrb[90].mxu0 }
 0x198   :  { %v1270_v11 = vadd.f32 %v14341_v20, %v12541_v9  ;;  %v1261_v14 = vpop.f32.mrb[91].mxu0  ;;  %v1619_v18 = vmax.f32 %v1267_v1, 0.0 }
 0x199   :  { %v1262_v16 = vadd.f32 %v14341_v20, %v1261_v14  ;;  %v1927_v17 = vsel %vm1793_vm1, %v1925_v7, %v1926_v63  ;;  %v1617_v0 = vmax.f32 %v1259_v8, 0.0  ;;  %v1808_v63 = vsel %vm1793_vm1, %v1806_v48, %v1807_v49 }
 0x19a   :  { %v1620_v19 = vmax.f32 %v1270_v11, 0.0  ;;  %1948 = vrot.lane.b32.xlu0 %v1927_v17, %s13856_s25  ;;  %1824 = vrot.lane.b32.xlu1 %v1805_v4, %s13856_s25 }
 0x19b   :  { %v1618_v22 = vmax.f32 %v1262_v16, 0.0 }
 0x19c   :  { %v1722_v25 = vpack.c.bf16 %v1620_v19, %v1619_v18 }
 0x19d   :  { %v14441_v26 = vpack.c.bf16 %v1618_v22, %v1617_v0  ;;  %v12544_v28 = vpop.f32.mrb[92].mxu0 }
 0x19e   :  { %v1929_v33 = vrot.slane %v1722_v25, 1  ;;  %v1283_v34 = vadd.f32 %v14341_v20, %v12544_v28  ;;  %v1274_v35 = vpop.f32.mrb[93].mxu0  ;;  %1872 = vrot.lane.b32.xlu1 %v14365_v15, %s13858_s27  ;;  %v1809_v28 = vrot.slane %v14260_v40, 1 }
 0x19f   :  { %v1928_v36 = vrot.slane %v14441_v26, 1  ;;  %v1275_v39 = vadd.f32 %v14341_v20, %v1274_v35  ;;  %v12545_v41 = vpop.f32.mrb[94].mxu0 }
 0x1a0   :  { %v1286_v42 = vadd.f32 %v14341_v20, %v12545_v41  ;;  %v1277_v43 = vpop.f32.mrb[95].mxu0  ;;  %v1623_v51 = vmax.f32 %v1283_v34, 0.0 }
 0x1a1   :  { %v1278_v44 = vadd.f32 %v14341_v20, %v1277_v43  ;;  %v1930_v45 = vsel %vm1793_vm1, %v1928_v36, %v1929_v33  ;;  %v1621_v15 = vmax.f32 %v1275_v39, 0.0  ;;  %v1810_v33 = vrot.slane %v14255_v38, 1 }
 0x1a2   :  { %v1624_v52 = vmax.f32 %v1286_v42, 0.0  ;;  %1950 = vrot.lane.b32.xlu0 %v1930_v45, %s13856_s25  ;;  %1769 = vrot.lane.b32.xlu1 %v14367_v24, %s13857_s26 }
 0x1a3   :  { %v1622_v53 = vmax.f32 %v1278_v44, 0.0  ;;  %v1811_v38 = vsel %vm1793_vm1, %v1809_v28, %v1810_v33 }
 0x1a4   :  { %v1724_v58 = vpack.c.bf16 %v1624_v52, %v1623_v51 }
 0x1a5   :  { %v14456_v61 = vpack.c.bf16 %v1622_v53, %v1621_v15  ;;  %v12548_v62 = vpop.f32.mrb[96].mxu0  ;;  %v12771_v15 = vld [vmem:[%s18025_s3 + $0x40] sm:$0xff]  }
 0x1a6   :  { %v1932_v1 = vrot.slane %v1724_v58, 1  ;;  %v1299_v3 = vadd.f32 %v14341_v20, %v12548_v62  ;;  %v1290_v7 = vpop.f32.mrb[97].mxu0  ;;  %1826 = vrot.lane.b32.xlu1 %v1808_v63, %s13856_s25  ;;  %v12772_v53 = vld [vmem:[%s18025_s3] sm:$0xff]   ;;  %11976 = vmatprep.subr.bf16.mxu1 %v12771_v15 }
 0x1a7   :  { %v1931_v21 = vrot.slane %v14456_v61, 1  ;;  %v1291_v8 = vadd.f32 %v14341_v20, %v1290_v7  ;;  %v12549_v9 = vpop.f32.mrb[98].mxu0  ;;  %11977 = vmatpush3.bf16.msra.mxu1 %v12772_v53 }
 0x1a8   :  { %v1302_v24 = vadd.f32 %v14341_v20, %v12549_v9  ;;  %v1293_v11 = vpop.f32.mrb[99].mxu0  ;;  %v1627_v17 = vmax.f32 %v1299_v3, 0.0 }
 0x1a9   :  { %v1294_v14 = vadd.f32 %v14341_v20, %v1293_v11  ;;  %v1933_v16 = vsel %vm1793_vm1, %v1931_v21, %v1932_v1  ;;  %v1625_v18 = vmax.f32 %v1291_v8, 0.0 }
 0x1aa   :  { %v1628_v4 = vmax.f32 %v1302_v24, 0.0  ;;  %1952 = vrot.lane.b32.xlu0 %v1933_v16, %s13856_s25  ;;  %1874 = vrot.lane.b32.xlu1 %v14375_v37, %s13858_s27  ;;  %v1812_v16 = vrot.slane %v14276_v57, 1 }
 0x1ab   :  { %v1626_v19 = vmax.f32 %v1294_v14, 0.0 }
 0x1ac   :  { %v1726_v0 = vpack.c.bf16 %v1628_v4, %v1627_v17  ;;  %v1813_v17 = vrot.slane %v14271_v55, 1  ;;  %v12774_v4 = vld [vmem:[%s18025_s3 + $0x8] sm:$0xff]  }
 0x1ad   :  { %v14469_v22 = vpack.c.bf16 %v1626_v19, %v1625_v18  ;;  %v12552_v25 = vpop.f32.mrb[100].mxu0 }
 0x1ae   :  { %v1935_v34 = vrot.slane %v1726_v0, 1  ;;  %v1315_v35 = vadd.f32 %v14341_v20, %v12552_v25  ;;  %v1306_v36 = vpop.f32.mrb[101].mxu0  ;;  %1771 = vrot.lane.b32.xlu1 %v14377_v46, %s13857_s26 }
 0x1af   :  { %v1934_v39 = vrot.slane %v14469_v22, 1  ;;  %v1307_v37 = vadd.f32 %v14341_v20, %v1306_v36  ;;  %v12553_v41 = vpop.f32.mrb[102].mxu0  ;;  %v12776_v36 = vld [vmem:[%s18025_s3 + $0x10] sm:$0xff]  }
 0x1b0   :  { %v1318_v42 = vadd.f32 %v14341_v20, %v12553_v41  ;;  %v1309_v43 = vpop.f32.mrb[103].mxu0  ;;  %v1631_v48 = vmax.f32 %v1315_v35, 0.0  ;;  %v12775_v35 = vld [vmem:[%s18025_s3 + $0x50] sm:$0xff]  }
 0x1b1   :  { %v1310_v44 = vadd.f32 %v14341_v20, %v1309_v43  ;;  %v1936_v45 = vsel %vm1793_vm1, %v1934_v39, %v1935_v34  ;;  %v1629_v46 = vmax.f32 %v1307_v37, 0.0  ;;  %v1814_v34 = vsel %vm1793_vm1, %v1812_v16, %v1813_v17 }
 0x1b2   :  { %v1632_v49 = vmax.f32 %v1318_v42, 0.0  ;;  %1954 = vrot.lane.b32.xlu0 %v1936_v45, %s13856_s25  ;;  %1828 = vrot.lane.b32.xlu1 %v1811_v38, %s13856_s25  ;;  %v12777_v38 = vld [vmem:[%s18025_s3 + $0x58] sm:$0xff]  }
 0x1b3   :  { %v1630_v51 = vmax.f32 %v1310_v44, 0.0 }
 0x1b4   :  { %v1728_v52 = vpack.c.bf16 %v1632_v49, %v1631_v48  ;;  %v12778_v48 = vld [vmem:[%s18025_s3 + $0x18] sm:$0xff]  }
 0x1b5   :  { %v14490_v58 = vpack.c.bf16 %v1630_v51, %v1629_v46  ;;  %v12556_v62 = vpop.f32.mrb[104].mxu0 }
 0x1b6   :  { %v1938_v63 = vrot.slane %v1728_v52, 1  ;;  %v1331_v1 = vadd.f32 %v14341_v20, %v12556_v62  ;;  %v1322_v3 = vpop.f32.mrb[105].mxu0  ;;  %1876 = vrot.lane.b32.xlu1 %v14385_v60, %s13858_s27  ;;  %v12773_v60 = vld [vmem:[%s18025_s3 + $0x48] sm:$0xff]  }
 0x1b7   :  { %v1937_v7 = vrot.slane %v14490_v58, 1  ;;  %v1323_v21 = vadd.f32 %v14341_v20, %v1322_v3  ;;  %v12557_v8 = vpop.f32.mrb[106].mxu0  ;;  %11978 = vmatprep.subr.bf16.mxu1 %v12773_v60  ;;  %v1815_v3 = vrot.slane %v14292_v13, 1 }
 0x1b8   :  { %v1334_v9 = vadd.f32 %v14341_v20, %v12557_v8  ;;  %v1325_v24 = vpop.f32.mrb[107].mxu0  ;;  %v1635_v18 = vmax.f32 %v1331_v1, 0.0  ;;  %11979 = vmatpush3.bf16.msra.mxu1 %v12774_v4 }
 0x1b9   :  { %v1326_v11 = vadd.f32 %v14341_v20, %v1325_v24  ;;  %v1939_v14 = vsel %vm1793_vm1, %v1937_v7, %v1938_v63  ;;  %v1633_v0 = vmax.f32 %v1323_v21, 0.0  ;;  %11980 = vmatprep.subr.bf16.mxu1 %v12775_v35  ;;  %v1816_v7 = vrot.slane %v14287_v10, 1  ;;  %v12779_v21 = vld [vmem:[%s18025_s3 + $0x60] sm:$0xff]   ;;  %v12783_v35 = vld [vmem:[%s18025_s3 + $0x70] sm:$0xff]  }
 0x1ba   :  { %v1636_v19 = vmax.f32 %v1334_v9, 0.0  ;;  %1956 = vrot.lane.b32.xlu0 %v1939_v14, %s13856_s25  ;;  %1773 = vrot.lane.b32.xlu1 %v14387_v5, %s13857_s26 }
 0x1bb   :  { %v1634_v25 = vmax.f32 %v1326_v11, 0.0 }
 0x1bc   :  { %v1730_v28 = vpack.c.bf16 %v1636_v19, %v1635_v18  ;;  %11981 = vmatpush3.bf16.msra.mxu1 %v12776_v36  ;;  %v1817_v18 = vsel %vm1793_vm1, %v1815_v3, %v1816_v7  ;;  %v12782_v19 = vld [vmem:[%s18025_s3 + $0x28] sm:$0xff]   ;;  %v12784_v36 = vld [vmem:[%s18025_s3 + $0x30] sm:$0xff]  }
 0x1bd   :  { %v14511_v55 = vpack.c.bf16 %v1634_v25, %v1633_v0  ;;  %v12560_v33 = vpop.f32.mrb[108].mxu0  ;;  %11982 = vmatprep.subr.bf16.mxu1 %v12777_v38  ;;  %v12786_v38 = vld [vmem:[%s18025_s3 + $0x38] sm:$0xff]  }
 0x1be   :  { %v1941_v39 = vrot.slane %v1730_v28, 1  ;;  %v1347_v5 = vadd.f32 %v14341_v20, %v12560_v33  ;;  %v1338_v37 = vpop.f32.mrb[109].mxu0  ;;  %1830 = vrot.lane.b32.xlu1 %v1814_v34, %s13856_s25 }
 0x1bf   :  { %v1940_v41 = vrot.slane %v14511_v55, 1  ;;  %v1339_v42 = vadd.f32 %v14341_v20, %v1338_v37  ;;  %v12561_v43 = vpop.f32.mrb[110].mxu0 }
 0x1c0   :  { %v1350_v44 = vadd.f32 %v14341_v20, %v12561_v43  ;;  %v1341_v45 = vpop.f32.mrb[111].mxu0  ;;  %v1639_v51 = vmax.f32 %v1347_v5, 0.0  ;;  %11983 = vmatpush3.bf16.msra.mxu1 %v12778_v48  ;;  %v2015_v43 = vrot.slane %v14308_v32, 1 }
 0x1c1   :  { %v1342_v49 = vadd.f32 %v14341_v20, %v1341_v45  ;;  %v1942_v46 = vsel %vm1793_vm1, %v1940_v41, %v1941_v39  ;;  %v1637_v15 = vmax.f32 %v1339_v42, 0.0  ;;  %11984 = vmatprep.subr.bf16.mxu1 %v12779_v21  ;;  %v12785_v45 = vld [vmem:[%s18025_s3 + $0x78] sm:$0xff]  }
 0x1c2   :  { %v1640_v52 = vmax.f32 %v1350_v44, 0.0  ;;  %1958 = vrot.lane.b32.xlu0 %v1942_v46, %s13856_s25  ;;  %1878 = vrot.lane.b32.xlu1 %v14395_v59, %s13858_s27  ;;  %v12780_v59 = vld [vmem:[%s18025_s3 + $0x20] sm:$0xff]   ;;  %v2016_v44 = vrot.slane %v14303_v29, 1 }
 0x1c3   :  { %v1638_v53 = vmax.f32 %v1342_v49, 0.0 }
 0x1c4   :  { %v1732_v62 = vpack.c.bf16 %v1640_v52, %v1639_v51  ;;  %11985 = vmatpush3.bf16.msra.mxu1 %v12780_v59  ;;  %v2017_v48 = vsel %vm1793_vm1, %v2015_v43, %v2016_v44  ;;  %v12787_v51 = vld [vmem:[%s18025_s3 + $0xc0] sm:$0xff]  }
 0x1c5   :  { %v14536_v63 = vpack.c.bf16 %v1638_v53, %v1637_v15  ;;  %v12564_v1 = vpop.f32.mrb[112].mxu0 }
 0x1c6   :  { %v1944_v8 = vrot.slane %v1732_v62, 1  ;;  %v1363_v9 = vadd.f32 %v14341_v20, %v12564_v1  ;;  %v1354_v24 = vpop.f32.mrb[113].mxu0  ;;  %1775 = vrot.lane.b32.xlu1 %v14397_v30, %s13857_s26  ;;  %v12781_v30 = vld [vmem:[%s18025_s3 + $0x68] sm:$0xff]  }
 0x1c7   :  { %v1943_v11 = vrot.slane %v14536_v63, 1  ;;  %v1355_v14 = vadd.f32 %v14341_v20, %v1354_v24  ;;  %v12565_v10 = vpop.f32.mrb[114].mxu0  ;;  %11986 = vmatprep.subr.bf16.mxu1 %v12781_v30 }
 0x1c8   :  { %v1366_v16 = vadd.f32 %v14341_v20, %v12565_v10  ;;  %v1357_v17 = vpop.f32.mrb[115].mxu0  ;;  %v1643_v0 = vmax.f32 %v1363_v9, 0.0  ;;  %11987 = vmatpush3.bf16.msra.mxu1 %v12782_v19 }
 0x1c9   :  { %v1358_v60 = vadd.f32 %v14341_v20, %v1357_v17  ;;  %v1945_v4 = vsel %vm1793_vm1, %v1943_v11, %v1944_v8  ;;  %v1641_v28 = vmax.f32 %v1355_v14, 0.0  ;;  %11988 = vmatprep.subr.bf16.mxu1 %v12783_v35 }
 0x1ca   :  { %v1644_v25 = vmax.f32 %v1366_v16, 0.0  ;;  %1960 = vrot.lane.b32.xlu0 %v1945_v4, %s13856_s25  ;;  %1832 = vrot.lane.b32.xlu1 %v1817_v18, %s13856_s25 }
 0x1cb   :  { %v1642_v33 = vmax.f32 %v1358_v60, 0.0 }
 0x1cc   :  { %v14563_v34 = vpack.c.bf16 %v1644_v25, %v1643_v0  ;;  %11989 = vmatpush3.bf16.msra.mxu1 %v12784_v36 }
 0x1cd   :  { %v14571_v39 = vpack.c.bf16 %v1642_v33, %v1641_v28  ;;  %v12568_v5 = vpop.f32.mrb[116].mxu0  ;;  %11990 = vmatprep.subr.bf16.mxu1 %v12785_v45 }
 0x1ce   :  { %v1370_v37 = vpop.f32.mrb[117].mxu0  ;;  %1880 = vrot.lane.b32.xlu1 %v14405_v47, %s13858_s27 }
 0x1cf   :  { %v12569_v41 = vpop.f32.mrb[118].mxu0 }
 0x1d0   :  { %v1372_v42 = vpop.f32.mrb[119].mxu0  ;;  %11991 = vmatpush3.bf16.msra.mxu1 %v12786_v38 }
 0x1d1   :  { %12040 = vmatprep.subr.bf16.mxu1 %v12787_v51 }
 0x1d2   :  { %2011 = vrot.lane.b32.xlu1 %v14407_v54, %s13857_s26 }
 0x1d5   :  { %v12572_v47 = vpop.f32.mrb[120].mxu0 }
 0x1d6   :  { %v1391_v49 = vadd.f32 %v14341_v20, %v12572_v47  ;;  %v1382_v46 = vpop.f32.mrb[121].mxu0  ;;  %2018 = vrot.lane.b32.xlu1 %v2017_v48, %s13856_s25 }
 0x1d7   :  { %v1383_v29 = vadd.f32 %v14341_v20, %v1382_v46  ;;  %v12573_v54 = vpop.f32.mrb[122].mxu0 }
 0x1d8   :  { %v1394_v52 = vadd.f32 %v14341_v20, %v12573_v54  ;;  %v1385_v15 = vpop.f32.mrb[123].mxu0  ;;  %v1647_v62 = vmax.f32 %v1391_v49, 0.0 }
 0x1d9   :  { %v1386_v53 = vadd.f32 %v14341_v20, %v1385_v15  ;;  %v1645_v3 = vmax.f32 %v1383_v29, 0.0 }
 0x1da   :  { %v1648_v1 = vmax.f32 %v1394_v52, 0.0  ;;  %2024 = vrot.lane.b32.xlu1 %v14411_v2, %s13858_s27 }
 0x1db   :  { %v1646_v7 = vmax.f32 %v1386_v53, 0.0 }
 0x1dc   :  { %v1736_v21 = vpack.c.bf16 %v1648_v1, %v1647_v62 }
 0x1dd   :  { %v1735_v59 = vpack.c.bf16 %v1646_v7, %v1645_v3  ;;  %v12576_v8 = vpop.f32.mrb[124].mxu0 }
 0x1de   :  { %v1971_v9 = vrot.slane %v1736_v21, 1  ;;  %v1407_v24 = vadd.f32 %v14341_v20, %v12576_v8  ;;  %v1398_v11 = vpop.f32.mrb[125].mxu0 }
 0x1df   :  { %v1970_v14 = vrot.slane %v1735_v59, 1  ;;  %v1399_v10 = vadd.f32 %v14341_v20, %v1398_v11  ;;  %v12577_v16 = vpop.f32.mrb[126].mxu0  ;;  %1890 = vrot.lane.b32.xlu0 %v1735_v59, %s13857_s26 }
 0x1e0   :  { %v1410_v17 = vadd.f32 %v14341_v20, %v12577_v16  ;;  %v1401_v60 = vpop.f32.mrb[127].mxu0  ;;  %v1651_v18 = vmax.f32 %v1407_v24, 0.0 }
 0x1e1   :  { %v1402_v2 = vadd.f32 %v14341_v20, %v1401_v60  ;;  %v1972_v4 = vsel %vm1793_vm1, %v1970_v14, %v1971_v9  ;;  %v1649_v19 = vmax.f32 %v1399_v10, 0.0 }
 0x1e2   :  { %v1652_v30 = vmax.f32 %v1410_v17, 0.0 }
 0x1e3   :  { %v1650_v0 = vmax.f32 %v1402_v2, 0.0  ;;  %1994 = vrot.lane.b32.xlu0 %v1972_v4, %s13858_s27 }
 0x1e4   :  { %v1738_v25 = vpack.c.bf16 %v1652_v30, %v1651_v18 }
 0x1e5   :  { %v1737_v28 = vpack.c.bf16 %v1650_v0, %v1649_v19  ;;  %v12580_v33 = vpop.f32.mrb[128].mxu0 }
 0x1e6   :  { %v1974_v35 = vrot.slane %v1738_v25, 1  ;;  %v1423_v36 = vadd.f32 %v14341_v20, %v12580_v33  ;;  %v1414_v5 = vpop.f32.mrb[129].mxu0 }
 0x1e7   :  { %v1973_v37 = vrot.slane %v1737_v28, 1  ;;  %v1415_v41 = vadd.f32 %v14341_v20, %v1414_v5  ;;  %v12581_v42 = vpop.f32.mrb[130].mxu0  ;;  %1892 = vrot.lane.b32.xlu0 %v1737_v28, %s13857_s26 }
 0x1e8   :  { %v1426_v43 = vadd.f32 %v14341_v20, %v12581_v42  ;;  %v1417_v44 = vpop.f32.mrb[131].mxu0  ;;  %v1655_v47 = vmax.f32 %v1423_v36, 0.0 }
 0x1e9   :  { %v1418_v45 = vadd.f32 %v14341_v20, %v1417_v44  ;;  %v1975_v38 = vsel %vm1793_vm1, %v1973_v37, %v1974_v35  ;;  %v1653_v49 = vmax.f32 %v1415_v41, 0.0 }
 0x1ea   :  { %v1656_v48 = vmax.f32 %v1426_v43, 0.0 }
 0x1eb   :  { %v1654_v46 = vmax.f32 %v1418_v45, 0.0  ;;  %1996 = vrot.lane.b32.xlu0 %v1975_v38, %s13858_s27 }
 0x1ec   :  { %v1740_v29 = vpack.c.bf16 %v1656_v48, %v1655_v47 }
 0x1ed   :  { %v1739_v54 = vpack.c.bf16 %v1654_v46, %v1653_v49  ;;  %v12584_v51 = vpop.f32.mrb[132].mxu0  ;;  %v14630_v46 = vld [vmem:[%s18024_s2] ss:$0 sm:$0xff] }
 0x1ee   :  { %v1977_v52 = vrot.slane %v1740_v29, 1  ;;  %v1439_v15 = vadd.f32 %v14341_v20, %v12584_v51  ;;  %v1430_v53 = vpop.f32.mrb[133].mxu0 }
 0x1ef   :  { %v1976_v62 = vrot.slane %v1739_v54, 1  ;;  %v1431_v1 = vadd.f32 %v14341_v20, %v1430_v53  ;;  %v12585_v3 = vpop.f32.mrb[134].mxu0  ;;  %1894 = vrot.lane.b32.xlu0 %v1739_v54, %s13857_s26 }
 0x1f0   :  { %v1442_v7 = vadd.f32 %v14341_v20, %v12585_v3  ;;  %v1433_v21 = vpop.f32.mrb[135].mxu0  ;;  %v1659_v9 = vmax.f32 %v1439_v15, 0.0 }
 0x1f1   :  { %v1434_v59 = vadd.f32 %v14341_v20, %v1433_v21  ;;  %v1978_v8 = vsel %vm1793_vm1, %v1976_v62, %v1977_v52  ;;  %v1657_v11 = vmax.f32 %v1431_v1, 0.0 }
 0x1f2   :  { %v1660_v24 = vmax.f32 %v1442_v7, 0.0 }
 0x1f3   :  { %v1658_v14 = vmax.f32 %v1434_v59, 0.0  ;;  %1998 = vrot.lane.b32.xlu0 %v1978_v8, %s13858_s27 }
 0x1f4   :  { %v1742_v10 = vpack.c.bf16 %v1660_v24, %v1659_v9 }
 0x1f5   :  { %v1741_v16 = vpack.c.bf16 %v1658_v14, %v1657_v11  ;;  %v12588_v17 = vpop.f32.mrb[136].mxu0 }
 0x1f6   :  { %v1980_v60 = vrot.slane %v1742_v10, 1  ;;  %v1455_v2 = vadd.f32 %v14341_v20, %v12588_v17  ;;  %v1446_v4 = vpop.f32.mrb[137].mxu0 }
 0x1f7   :  { %v1979_v18 = vrot.slane %v1741_v16, 1  ;;  %v1447_v30 = vadd.f32 %v14341_v20, %v1446_v4  ;;  %v12589_v19 = vpop.f32.mrb[138].mxu0  ;;  %1896 = vrot.lane.b32.xlu0 %v1741_v16, %s13857_s26 }
 0x1f8   :  { %v1458_v0 = vadd.f32 %v14341_v20, %v12589_v19  ;;  %v1449_v25 = vpop.f32.mrb[139].mxu0  ;;  %v1663_v35 = vmax.f32 %v1455_v2, 0.0 }
 0x1f9   :  { %v1450_v28 = vadd.f32 %v14341_v20, %v1449_v25  ;;  %v1981_v33 = vsel %vm1793_vm1, %v1979_v18, %v1980_v60  ;;  %v1661_v5 = vmax.f32 %v1447_v30, 0.0  ;;  %v14642_v60 = vpop.permute.xlu1 %1818 }
 0x1fa   :  { %v1664_v36 = vmax.f32 %v1458_v0, 0.0 }
 0x1fb   :  { %v1662_v37 = vmax.f32 %v1450_v28, 0.0  ;;  %2000 = vrot.lane.b32.xlu0 %v1981_v33, %s13858_s27 }
 0x1fc   :  { %v1744_v41 = vpack.c.bf16 %v1664_v36, %v1663_v35 }
 0x1fd   :  { %v1743_v42 = vpack.c.bf16 %v1662_v37, %v1661_v5  ;;  %v12592_v43 = vpop.f32.mrb[140].mxu0  ;;  %v14645_v28 = vpop.permute.xlu1 %1820 }
 0x1fe   :  { %v1983_v44 = vrot.slane %v1744_v41, 1  ;;  %v1471_v45 = vadd.f32 %v14341_v20, %v12592_v43  ;;  %v1462_v38 = vpop.f32.mrb[141].mxu0 }
 0x1ff   :  { %v1982_v47 = vrot.slane %v1743_v42, 1  ;;  %v1463_v48 = vadd.f32 %v14341_v20, %v1462_v38  ;;  %v12593_v49 = vpop.f32.mrb[142].mxu0  ;;  %1898 = vrot.lane.b32.xlu0 %v1743_v42, %s13857_s26 }
 0x200   :  { %v1474_v29 = vadd.f32 %v14630_v46, %v12593_v49  ;;  %v1465_v54 = vpop.f32.mrb[143].mxu0  ;;  %v1667_v15 = vmax.f32 %v1471_v45, 0.0 }
 0x201   :  { %v1466_v51 = vadd.f32 %v14630_v46, %v1465_v54  ;;  %v1984_v52 = vsel %vm1793_vm1, %v1982_v47, %v1983_v44  ;;  %v1665_v62 = vmax.f32 %v1463_v48, 0.0  ;;  %v14653_v38 = vpop.permute.xlu1 %1822 }
 0x202   :  { %v1668_v53 = vmax.f32 %v1474_v29, 0.0 }
 0x203   :  { %v1666_v1 = vmax.f32 %v1466_v51, 0.0  ;;  %2002 = vrot.lane.b32.xlu0 %v1984_v52, %s13858_s27 }
 0x204   :  { %v1746_v20 = vpack.c.bf16 %v1668_v53, %v1667_v15 }
 0x205   :  { %v1745_v3 = vpack.c.bf16 %v1666_v1, %v1665_v62  ;;  %v12596_v7 = vpop.f32.mrb[144].mxu0  ;;  %v1867_v15 = vpop.permute.xlu1 %1866 }
 0x206   :  { %v1986_v21 = vrot.slane %v1746_v20, 1  ;;  %v1487_v59 = vadd.f32 %v14630_v46, %v12596_v7  ;;  %v1478_v8 = vpop.f32.mrb[145].mxu0 }
 0x207   :  { %v1985_v9 = vrot.slane %v1745_v3, 1  ;;  %v1479_v24 = vadd.f32 %v14630_v46, %v1478_v8  ;;  %v12597_v11 = vpop.f32.mrb[146].mxu0  ;;  %1900 = vrot.lane.b32.xlu0 %v1745_v3, %s13857_s26 }
 0x208   :  { %v1490_v14 = vadd.f32 %v14630_v46, %v12597_v11  ;;  %v1481_v10 = vpop.f32.mrb[147].mxu0  ;;  %v1671_v2 = vmax.f32 %v1487_v59, 0.0 }
 0x209   :  { %v1482_v16 = vadd.f32 %v14630_v46, %v1481_v10  ;;  %v1987_v17 = vsel %vm1793_vm1, %v1985_v9, %v1986_v21  ;;  %v1669_v18 = vmax.f32 %v1479_v24, 0.0  ;;  %v2031_v10 = vrot.slane %v14571_v39, 1 }
 0x20a   :  { %v1672_v4 = vmax.f32 %v1490_v14, 0.0  ;;  %v2032_v14 = vrot.slane %v14563_v34, 1 }
 0x20b   :  { %v1670_v30 = vmax.f32 %v1482_v16, 0.0  ;;  %2004 = vrot.lane.b32.xlu0 %v1987_v17, %s13858_s27 }
 0x20c   :  { %v1748_v19 = vpack.c.bf16 %v1672_v4, %v1671_v2  ;;  %v1764_v2 = vpop.permute.xlu1 %1763 }
 0x20d   :  { %v1747_v0 = vpack.c.bf16 %v1670_v30, %v1669_v18  ;;  %v12600_v25 = vpop.f32.mrb[148].mxu0 }
 0x20e   :  { %v1989_v33 = vrot.slane %v1748_v19, 1  ;;  %v1503_v35 = vadd.f32 %v14630_v46, %v12600_v25  ;;  %v1494_v36 = vpop.f32.mrb[149].mxu0  ;;  %v2033_v19 = vsel %vm1793_vm1, %v2031_v10, %v2032_v14  ;;  %v12792_v10 = vld [vmem:[%s18025_s3 + $0x90] sm:$0xff]  }
 0x20f   :  { %v1988_v5 = vrot.slane %v1747_v0, 1  ;;  %v1495_v37 = vadd.f32 %v14630_v46, %v1494_v36  ;;  %v12601_v41 = vpop.f32.mrb[150].mxu0  ;;  %1902 = vrot.lane.b32.xlu0 %v1747_v0, %s13857_s26 }
 0x210   :  { %v1506_v42 = vadd.f32 %v14630_v46, %v12601_v41  ;;  %v1497_v43 = vpop.f32.mrb[151].mxu0  ;;  %v1675_v47 = vmax.f32 %v1503_v35, 0.0  ;;  %v1762_v35 = vpop.permute.xlu0 %1761 }
 0x211   :  { %v1498_v44 = vadd.f32 %v14630_v46, %v1497_v43  ;;  %v1990_v45 = vsel %vm1793_vm1, %v1988_v5, %v1989_v33  ;;  %v1673_v49 = vmax.f32 %v1495_v37, 0.0 }
 0x212   :  { %v1676_v48 = vmax.f32 %v1506_v42, 0.0 }
 0x213   :  { %v1674_v29 = vmax.f32 %v1498_v44, 0.0  ;;  %2006 = vrot.lane.b32.xlu0 %v1990_v45, %s13858_s27 }
 0x214   :  { %v1750_v54 = vpack.c.bf16 %v1676_v48, %v1675_v47  ;;  %v1949_v5 = vpop.permute.xlu0 %1948 }
 0x215   :  { %v1749_v51 = vpack.c.bf16 %v1674_v29, %v1673_v49  ;;  %v12604_v52 = vpop.f32.mrb[152].mxu0 }
 0x216   :  { %v1992_v53 = vrot.slane %v1750_v54, 1  ;;  %v1519_v62 = vadd.f32 %v14630_v46, %v12604_v52  ;;  %v1510_v1 = vpop.f32.mrb[153].mxu0 }
 0x217   :  { %v1991_v20 = vrot.slane %v1749_v51, 1  ;;  %1904 = vrot.lane.b32.xlu0 %v1749_v51, %s13857_s26  ;;  %v1511_v3 = vadd.f32 %v14630_v46, %v1510_v1  ;;  %v12605_v7 = vpop.f32.mrb[154].mxu0  ;;  %v2045_v51 = vsel %vm2042_vm2, %v14175_v12, %v1762_v35  ;;  %v12789_v12 = vld [vmem:[%s18025_s3 + $0xc8] sm:$0xff]  }
 0x218   :  { %v1679_v21 = vmax.f32 %v1519_v62, 0.0  ;;  %v1522_v59 = vadd.f32 %v14630_v46, %v12605_v7  ;;  %v1513_v8 = vpop.f32.mrb[155].mxu0  ;;  %v1951_v41 = vpop.permute.xlu0 %1950  ;;  %v2068_v62 = vsel %vm639_vm0, %v2045_v51, %v14642_v60  ;;  %v12799_v51 = vld [vmem:[%s18025_s3 + $0xf0] sm:$0xff]  }
 0x219   :  { %v1677_v9 = vmax.f32 %v1511_v3, 0.0  ;;  %v1993_v24 = vsel %vm1793_vm1, %v1991_v20, %v1992_v53  ;;  %v1514_v11 = vadd.f32 %v14630_v46, %v1513_v8  ;;  %v1869_v46 = vpop.permute.xlu1 %1868  ;;  %v12788_v3 = vld [vmem:[%s18025_s3 + $0x80] sm:$0xff]  }
 0x21a   :  { %v1680_v16 = vmax.f32 %v1522_v59, 0.0  ;;  %v12790_v59 = vld [vmem:[%s18025_s3 + $0x88] sm:$0xff]  }
 0x21b   :  { %2008 = vrot.lane.b32.xlu0 %v1993_v24, %s13858_s27  ;;  %v1678_v17 = vmax.f32 %v1514_v11, 0.0  ;;  %v2048_v24 = vsel %vm2042_vm2, %v14192_v31, %v1764_v2  ;;  %v12793_v31 = vld [vmem:[%s18025_s3 + $0xd8] sm:$0xff]  }
 0x21c   :  { %v1752_v4 = vpack.c.bf16 %v1680_v16, %v1679_v21  ;;  %v14674_v42 = vpop.permute.xlu0 %1952  ;;  %v2070_v16 = vsel %vm639_vm0, %v2048_v24, %v14645_v28 }
 0x21d   :  { %v1751_v18 = vpack.c.bf16 %v1678_v17, %v1677_v9  ;;  %v1766_v34 = vpop.permute.xlu1 %1765  ;;  %v12791_v9 = vld [vmem:[%s18025_s3 + $0xd0] sm:$0xff]   ;;  %v14735_v17 = vsel %vm2083_vm3, %v2070_v16, %v1869_v46  ;;  %v12796_v46 = vld [vmem:[%s18025_s3 + $0xa0] sm:$0xff]  }
 0x21e   :  { %v2038_v30 = vrot.slane %v1752_v4, 1  ;;  %v12794_v4 = vld [vmem:[%s18025_s3 + $0x98] sm:$0xff]  }
 0x21f   :  { %v2037_v0 = vrot.slane %v1751_v18, 1  ;;  %2034 = vrot.lane.b32.xlu0 %v2033_v19, %s13856_s25  ;;  %v2051_v19 = vsel %vm2042_vm2, %v14209_v50, %v1766_v34 }
 0x221   :  { %v2039_v25 = vsel %vm1793_vm1, %v2037_v0, %v2038_v30  ;;  %v14670_v33 = vpop.permute.xlu1 %1870  ;;  %v12795_v30 = vld [vmem:[%s18025_s3 + $0xe0] sm:$0xff]  }
 0x223   :  { %2027 = vrot.lane.b32.xlu0 %v1751_v18, %s13857_s26 }
 0x224   :  { %v14678_v44 = vpop.permute.xlu0 %1954 }
 0x225   :  { %v1947_v36 = vpop.permute.xlu1 %1946 }
 0x227   :  { %2040 = vrot.lane.b32.xlu0 %v2039_v25, %s13858_s27 }
 0x229   :  { %v14672_v37 = vpop.permute.xlu1 %1767 }
 0x22c   :  { %v14682_v47 = vpop.permute.xlu0 %1956 }
 0x22d   :  { %v14676_v43 = vpop.permute.xlu1 %1824 }
 0x231   :  { %v14680_v45 = vpop.permute.xlu1 %1872 }
 0x234   :  { %v14684_v48 = vpop.permute.xlu0 %1958 }
 0x235   :  { %v14686_v49 = vpop.permute.xlu1 %1769 }
 0x239   :  { %v14690_v54 = vpop.permute.xlu1 %1826 }
 0x23c   :  { %v14688_v29 = vpop.permute.xlu0 %1960 }
 0x23d   :  { %v14702_v7 = vpop.permute.xlu1 %1874 }
 0x241   :  { %v14719_v11 = vpop.permute.xlu1 %1771 }
 0x245   :  { %v1829_v18 = vpop.permute.xlu1 %1828 }
 0x249   :  { %v1877_v34 = vpop.permute.xlu1 %1876 }
 0x251   :  { %v1891_v52 = vpop.permute.xlu0 %1890 }
 0x252   :  { %v2110_v53 = vsel %vm2042_vm2, %v14417_v27, %v1891_v52  ;;  %v2085_v27 = vsel %vm2083_vm3, %v2068_v62, %v1867_v15  ;;  %v12800_v62 = vld [vmem:[%s18025_s3 + $0xb0] sm:$0xff]  }
 0x253   :  { %v2133_v20 = vsel %vm639_vm0, %v2110_v53, %v1947_v36  ;;  %v12797_v36 = vld [vmem:[%s18025_s3 + $0xe8] sm:$0xff]  }
 0x255   :  { %v1995_v1 = vpop.permute.xlu0 %1994 }
 0x256   :  { %v2149_v21 = vsel %vm2083_vm3, %v2133_v20, %v1995_v1  ;;  %v1774_v1 = vpop.permute.xlu1 %1773 }
 0x257   :  { %2483 = vmatprep.mubr.bf16.mxu1 %v2149_v21 }
 0x258   :  { %2484 = vmatmul.mubr.bf16.vlgmr.msra.gmra.mrb[0].mxu1 %v2085_v27 }
 0x259   :  { %12041 = vmatpush3.bf16.msra.mxu1 %v12788_v3  ;;  %v1893_v60 = vpop.permute.xlu0 %1892  ;;  %v12802_v3 = vld [vmem:[%s18025_s3 + $0xb8] sm:$0xff]  }
 0x25a   :  { %v2113_v8 = vsel %vm2042_vm2, %v14426_v56, %v1893_v60  ;;  %12042 = vmatprep.subr.bf16.mxu1 %v12789_v12  ;;  %v1831_v21 = vpop.permute.xlu1 %1830  ;;  %v2057_v12 = vsel %vm2042_vm2, %v14244_v23, %v14686_v49 }
 0x25b   :  { %v2135_v14 = vsel %vm639_vm0, %v2113_v8, %v1949_v5  ;;  %v2076_v60 = vsel %vm639_vm0, %v2057_v12, %v14690_v54  ;;  %v12809_v12 = vld [vmem:[%s18027_s5 + $0x58] sm:$0xff]  }
 0x25d   :  { %v1997_v15 = vpop.permute.xlu0 %1996  ;;  %12043 = vmatpush3.bf16.msra.mxu1 %v12790_v59 }
 0x25e   :  { %v14726_v56 = vsel %vm2083_vm3, %v2135_v14, %v1997_v15  ;;  %12044 = vmatprep.subr.bf16.mxu1 %v12791_v9  ;;  %v1879_v9 = vpop.permute.xlu1 %1878 }
 0x25f   :  { %2491 = vmatprep.mubr.bf16.mxu1 %v14726_v56 }
 0x260   :  { %2492 = vmatmul.mubr.bf16.gmra.mrb[4].mxu1 %v14735_v17 }
 0x261   :  { %v1895_v2 = vpop.permute.xlu0 %1894  ;;  %12045 = vmatpush3.bf16.msra.mxu1 %v12792_v10 }
 0x262   :  { %v2116_v28 = vsel %vm2042_vm2, %v14441_v26, %v1895_v2  ;;  %12046 = vmatprep.subr.bf16.mxu1 %v12793_v31  ;;  %v2072_v26 = vsel %vm639_vm0, %v2051_v19, %v14653_v38  ;;  %v12798_v38 = vld [vmem:[%s18025_s3 + $0xa8] sm:$0xff]   ;;  %v1776_v14 = vpop.permute.xlu1 %1775 }
 0x263   :  { %v2137_v25 = vsel %vm639_vm0, %v2116_v28, %v1951_v41  ;;  %v14763_v50 = vsel %vm2083_vm3, %v2072_v26, %v14670_v33  ;;  %v2054_v33 = vsel %vm2042_vm2, %v14228_v6, %v14672_v37  ;;  %v12801_v6 = vld [vmem:[%s18025_s3 + $0xf8] sm:$0xff]  }
 0x265   :  { %v1999_v0 = vpop.permute.xlu0 %1998  ;;  %12047 = vmatpush3.bf16.msra.mxu1 %v12794_v4 }
 0x266   :  { %v14753_v35 = vsel %vm2083_vm3, %v2137_v25, %v1999_v0  ;;  %12048 = vmatprep.subr.bf16.mxu1 %v12795_v30  ;;  %v1833_v31 = vpop.permute.xlu1 %1832 }
 0x267   :  { %2499 = vmatprep.mubr.bf16.mxu1 %v14753_v35 }
 0x268   :  { %2500 = vmatmul.mubr.bf16.gmra.mrb[8].mxu1 %v14763_v50 }
 0x269   :  { %v1897_v5 = vpop.permute.xlu0 %1896  ;;  %12049 = vmatpush3.bf16.msra.mxu1 %v12796_v46 }
 0x26a   :  { %v2119_v41 = vsel %vm2042_vm2, %v14456_v61, %v1897_v5  ;;  %12050 = vmatprep.subr.bf16.mxu1 %v12797_v36  ;;  %v2074_v61 = vsel %vm639_vm0, %v2054_v33, %v14676_v43  ;;  %v1881_v28 = vpop.permute.xlu1 %1880 }
 0x26b   :  { %v2139_v53 = vsel %vm639_vm0, %v2119_v41, %v14674_v42  ;;  %v2094_v37 = vsel %vm2083_vm3, %v2074_v61, %v14680_v45 }
 0x26d   :  { %v2001_v52 = vpop.permute.xlu0 %2000  ;;  %12051 = vmatpush3.bf16.msra.mxu1 %v12798_v38 }
 0x26e   :  { %v2158_v20 = vsel %vm2083_vm3, %v2139_v53, %v2001_v52  ;;  %12052 = vmatprep.subr.bf16.mxu1 %v12799_v51  ;;  %v12803_v53 = vld [vmem:[%s18027_s5 + $0x40] sm:$0xff]  }
 0x26f   :  { %2507 = vmatprep.mubr.bf16.mxu1 %v2158_v20 }
 0x270   :  { %2508 = vmatmul.mubr.bf16.gmra.mrb[12].mxu1 %v2094_v37 }
 0x271   :  { %v1899_v42 = vpop.permute.xlu0 %1898  ;;  %12053 = vmatpush3.bf16.msra.mxu1 %v12800_v62  ;;  %v12805_v62 = vld [vmem:[%s18027_s5 + $0x48] sm:$0xff]  }
 0x272   :  { %v2122_v43 = vsel %vm2042_vm2, %v14469_v22, %v1899_v42  ;;  %12054 = vmatprep.subr.bf16.mxu1 %v12801_v6  ;;  %v2097_v22 = vsel %vm2083_vm3, %v2076_v60, %v14702_v7  ;;  %v12807_v42 = vld [vmem:[%s18027_s5 + $0x50] sm:$0xff]   ;;  %v12810_v60 = vld [vmem:[%s18027_s5 + $0x18] sm:$0xff]  }
 0x273   :  { %v2141_v45 = vsel %vm639_vm0, %v2122_v43, %v14678_v44  ;;  %v2060_v44 = vsel %vm2042_vm2, %v14260_v40, %v14719_v11  ;;  %v2063_v40 = vsel %vm2042_vm2, %v14276_v57, %v1774_v1  ;;  %v2066_v57 = vsel %vm2042_vm2, %v14292_v13, %v1776_v14 }
 0x274   :  { %v2078_v24 = vsel %vm639_vm0, %v2060_v44, %v1829_v18  ;;  %v2080_v16 = vsel %vm639_vm0, %v2063_v40, %v1831_v21  ;;  %v2082_v19 = vsel %vm639_vm0, %v2066_v57, %v1833_v31  ;;  %v12808_v21 = vld [vmem:[%s18027_s5 + $0x10] sm:$0xff]   ;;  %v12812_v44 = vld [vmem:[%s18027_s5 + $0x20] sm:$0xff]  }
 0x275   :  { %v2003_v27 = vpop.permute.xlu0 %2002  ;;  %12055 = vmatpush3.bf16.msra.mxu1 %v12802_v3  ;;  %v2100_v7 = vsel %vm2083_vm3, %v2078_v24, %v1877_v34  ;;  %v2103_v4 = vsel %vm2083_vm3, %v2080_v16, %v1879_v9  ;;  %v2106_v25 = vsel %vm2083_vm3, %v2082_v19, %v1881_v28 }
 0x276   :  { %v2161_v59 = vsel %vm2083_vm3, %v2141_v45, %v2003_v27  ;;  %12104 = vmatprep.subr.bf16.mxu1 %v12803_v53 }
 0x277   :  { %2515 = vmatprep.mubr.bf16.mxu1 %v2161_v59 }
 0x278   :  { %2516 = vmatmul.mubr.bf16.gmra.mrb[16].mxu1 %v2097_v22 }
 0x279   :  { %v1901_v8 = vpop.permute.xlu0 %1900 }
 0x27a   :  { %v2125_v23 = vsel %vm2042_vm2, %v14490_v58, %v1901_v8  ;;  %v12811_v8 = vld [vmem:[%s18027_s5 + $0x60] sm:$0xff]  }
 0x27b   :  { %v2143_v54 = vsel %vm639_vm0, %v2125_v23, %v14682_v47 }
 0x27d   :  { %v2005_v49 = vpop.permute.xlu0 %2004 }
 0x27e   :  { %v2164_v15 = vsel %vm2083_vm3, %v2143_v54, %v2005_v49  ;;  %v12813_v49 = vld [vmem:[%s18027_s5 + $0x68] sm:$0xff]  }
 0x27f   :  { %2523 = vmatprep.mubr.bf16.mxu1 %v2164_v15 }
 0x280   :  { %2524 = vmatmul.mubr.bf16.gmra.mrb[20].mxu1 %v2100_v7 }
 0x281   :  { %v1903_v10 = vpop.permute.xlu0 %1902 }
 0x282   :  { %v2128_v58 = vsel %vm2042_vm2, %v14511_v55, %v1903_v10  ;;  %v12815_v10 = vld [vmem:[%s18027_s5 + $0x70] sm:$0xff]  }
 0x283   :  { %v2145_v47 = vsel %vm639_vm0, %v2128_v58, %v14684_v48 }
 0x285   :  { %v2007_v11 = vpop.permute.xlu0 %2006 }
 0x286   :  { %v2167_v2 = vsel %vm2083_vm3, %v2145_v47, %v2007_v11  ;;  %v12816_v11 = vld [vmem:[%s18027_s5 + $0x30] sm:$0xff]   ;;  %v12817_v47 = vld [vmem:[%s18027_s5 + $0x78] sm:$0xff]  }
 0x287   :  { %2531 = vmatprep.mubr.bf16.mxu1 %v2167_v2 }
 0x288   :  { %2532 = vmatmul.mubr.bf16.gmra.mrb[24].mxu1 %v2103_v4 }
 0x289   :  { %v1905_v18 = vpop.permute.xlu0 %1904 }
 0x28a   :  { %v2131_v55 = vsel %vm2042_vm2, %v14536_v63, %v1905_v18 }
 0x28b   :  { %v2147_v48 = vsel %vm639_vm0, %v2131_v55, %v14688_v29  ;;  %v2012_v29 = vpop.permute.xlu1 %2011 }
 0x28d   :  { %v2009_v30 = vpop.permute.xlu0 %2008 }
 0x28e   :  { %v2170_v0 = vsel %vm2083_vm3, %v2147_v48, %v2009_v30 }
 0x28f   :  { %2539 = vmatprep.mubr.bf16.mxu1 %v2170_v0  ;;  %v2019_v46 = vpop.permute.xlu1 %2018 }
 0x290   :  { %2540 = vmatmul.mubr.bf16.gmra.mrb[28].mxu1 %v2106_v25 }
 0x291   :  { %2580 = vmatprep.mubr.bf16.mxu1 %v14726_v56  ;;  %v2035_v13 = vpop.permute.xlu0 %2034 }
 0x293   :  { %v2025_v36 = vpop.permute.xlu1 %2024 }
 0x295   :  { %v2028_v63 = vpop.permute.xlu0 %2027 }
 0x296   :  { %v2182_v56 = vsel %vm2042_vm2, %v14571_v39, %v2028_v63 }
 0x298   :  { %2581 = vmatmul.mubr.bf16.vlgmr.msra.gmra.mrb[32].mxu1 %v14735_v17 }
 0x299   :  { %2588 = vmatprep.mubr.bf16.mxu1 %v14753_v35  ;;  %v2041_v17 = vpop.permute.xlu0 %2040  ;;  %v2184_v35 = vsel %vm639_vm0, %v2182_v56, %v2035_v13 }
 0x29a   :  { %v2186_v26 = vsel %vm2083_vm3, %v2184_v35, %v2041_v17 }
 0x2a0   :  { %2589 = vmatmul.mubr.bf16.gmra.mrb[36].mxu1 %v14763_v50  ;;  %v2174_v50 = vsel %vm2042_vm2, %v14308_v32, %v2012_v29  ;;  %v12804_v32 = vld [vmem:[%s18027_s5] sm:$0xff]  }
 0x2a1   :  { %2596 = vmatprep.mubr.bf16.mxu1 %v2158_v20  ;;  %v2176_v34 = vsel %vm639_vm0, %v2174_v50, %v2019_v46  ;;  %12105 = vmatpush3.bf16.msra.mxu1 %v12804_v32  ;;  %v12806_v20 = vld [vmem:[%s18027_s5 + $0x8] sm:$0xff]  }
 0x2a2   :  { %v2178_v5 = vsel %vm2083_vm3, %v2176_v34, %v2025_v36  ;;  %12106 = vmatprep.subr.bf16.mxu1 %v12805_v62 }
 0x2a5   :  { %12107 = vmatpush3.bf16.msra.mxu1 %v12806_v20 }
 0x2a6   :  { %12108 = vmatprep.subr.bf16.mxu1 %v12807_v42  ;;  %v14940_v42 = vld [vmem:[%s18027_s5 + $0xc0] sm:$0xff]  }
 0x2a8   :  { %2597 = vmatmul.mubr.bf16.gmra.mrb[40].mxu1 %v2094_v37 }
 0x2a9   :  { %2604 = vmatprep.mubr.bf16.mxu1 %v2161_v59  ;;  %12109 = vmatpush3.bf16.msra.mxu1 %v12808_v21 }
 0x2aa   :  { %12110 = vmatprep.subr.bf16.mxu1 %v12809_v12 }
 0x2ad   :  { %12111 = vmatpush3.bf16.msra.mxu1 %v12810_v60 }
 0x2ae   :  { %12112 = vmatprep.subr.bf16.mxu1 %v12811_v8 }
 0x2b0   :  { %2605 = vmatmul.mubr.bf16.gmra.mrb[44].mxu1 %v2097_v22 }
 0x2b1   :  { %2612 = vmatprep.mubr.bf16.mxu1 %v2164_v15  ;;  %12113 = vmatpush3.bf16.msra.mxu1 %v12812_v44  ;;  %v12814_v15 = vld [vmem:[%s18027_s5 + $0x28] sm:$0xff]  }
 0x2b2   :  { %12114 = vmatprep.subr.bf16.mxu1 %v12813_v49 }
 0x2b5   :  { %12115 = vmatpush3.bf16.msra.mxu1 %v12814_v15 }
 0x2b6   :  { %12116 = vmatprep.subr.bf16.mxu1 %v12815_v10 }
 0x2b8   :  { %2613 = vmatmul.mubr.bf16.gmra.mrb[48].mxu1 %v2100_v7 }
 0x2b9   :  { %2620 = vmatprep.mubr.bf16.mxu1 %v2167_v2  ;;  %12117 = vmatpush3.bf16.msra.mxu1 %v12816_v11 }
 0x2ba   :  { %12118 = vmatprep.subr.bf16.mxu1 %v12817_v47 }
 0x2c0   :  { %2621 = vmatmul.mubr.bf16.gmra.mrb[52].mxu1 %v2103_v4 }
 0x2c1   :  { %2628 = vmatprep.mubr.bf16.mxu1 %v2170_v0 }
 0x2c8   :  { %2629 = vmatmul.mubr.bf16.gmra.mrb[56].mxu1 %v2106_v25 }
 0x2c9   :  { %2636 = vmatprep.mubr.bf16.mxu1 %v2186_v26 }
 0x2d0   :  { %2637 = vmatmul.mubr.bf16.gmra.mrb[60].mxu1 %v2178_v5  ;;  %v14925_v5 = vld [vmem:[%s18026_s4] ss:$0 sm:$0xff] }
 0x32b   :  { %v11992_v38 = vpop.f32.mrb[0].mxu1 }
 0x32c   :  { %v11993_v41 = vpop.f32.mrb[1].mxu1 }
 0x32d   :  { %v14845_v39 = vadd.f32 %v11993_v41, %v11992_v38  ;;  %v11995_v51 = vpop.f32.mrb[2].mxu1 }
 0x32e   :  { %v11996_v33 = vpop.f32.mrb[3].mxu1 }
 0x32f   :  { %v14847_v52 = vadd.f32 %v11996_v33, %v11995_v51  ;;  %v14930_v51 = vld [vmem:[%s18027_s5 + $0x38] sm:$0xff]   ;;  %v2486_v33 = vadd.f32 %v14845_v39, %v14925_v5 }
 0x330   :  { %12119 = vmatpush3.bf16.msra.mxu1 %v14930_v51 }
 0x331   :  { %12126 = vmatprep.subr.bf16.mxu1 %v14940_v42 }
 0x333   :  { %v11998_v61 = vpop.f32.mrb[4].mxu1 }
 0x334   :  { %v11999_v1 = vpop.f32.mrb[5].mxu1 }
 0x335   :  { %v14861_v6 = vadd.f32 %v11999_v1, %v11998_v61  ;;  %v12001_v37 = vpop.f32.mrb[6].mxu1  ;;  %v2489_v1 = vadd.f32 %v14847_v52, %v14925_v5 }
 0x336   :  { %v12002_v3 = vpop.f32.mrb[7].mxu1 }
 0x337   :  { %v14866_v43 = vadd.f32 %v12002_v3, %v12001_v37 }
 0x33b   :  { %v12004_v27 = vpop.f32.mrb[8].mxu1 }
 0x33c   :  { %v12005_v45 = vpop.f32.mrb[9].mxu1 }
 0x33d   :  { %v14877_v59 = vadd.f32 %v12005_v45, %v12004_v27  ;;  %v12007_v22 = vpop.f32.mrb[10].mxu1  ;;  %v2494_v45 = vadd.f32 %v14861_v6, %v14925_v5 }
 0x33e   :  { %v12008_v9 = vpop.f32.mrb[11].mxu1 }
 0x33f   :  { %v14882_v23 = vadd.f32 %v12008_v9, %v12007_v22  ;;  %v2497_v9 = vadd.f32 %v14866_v43, %v14925_v5  ;;  %v2502_v6 = vadd.f32 %v14877_v59, %v14925_v5 }
 0x341   :  { %v2505_v43 = vadd.f32 %v14882_v23, %v14925_v5 }
 0x343   :  { %v12010_v54 = vpop.f32.mrb[12].mxu1 }
 0x344   :  { %v12011_v24 = vpop.f32.mrb[13].mxu1 }
 0x345   :  { %v14893_v7 = vadd.f32 %v12011_v24, %v12010_v54  ;;  %v12013_v14 = vpop.f32.mrb[14].mxu1 }
 0x346   :  { %v12014_v58 = vpop.f32.mrb[15].mxu1 }
 0x347   :  { %v14898_v40 = vadd.f32 %v12014_v58, %v12013_v14  ;;  %v2510_v23 = vadd.f32 %v14893_v7, %v14925_v5 }
 0x34b   :  { %v12016_v16 = vpop.f32.mrb[16].mxu1 }
 0x34c   :  { %v12017_v31 = vpop.f32.mrb[17].mxu1 }
 0x34d   :  { %v14906_v2 = vadd.f32 %v12017_v31, %v12016_v16  ;;  %v12019_v4 = vpop.f32.mrb[18].mxu1 }
 0x34e   :  { %v12020_v18 = vpop.f32.mrb[19].mxu1 }
 0x34f   :  { %v14908_v55 = vadd.f32 %v12020_v18, %v12019_v4 }
 0x353   :  { %v12022_v28 = vpop.f32.mrb[20].mxu1 }
 0x354   :  { %v12023_v57 = vpop.f32.mrb[21].mxu1 }
 0x355   :  { %v14910_v30 = vadd.f32 %v12023_v57, %v12022_v28  ;;  %v12025_v48 = vpop.f32.mrb[22].mxu1 }
 0x356   :  { %v12026_v19 = vpop.f32.mrb[23].mxu1 }
 0x357   :  { %v14912_v0 = vadd.f32 %v12026_v19, %v12025_v48 }
 0x35b   :  { %v12028_v25 = vpop.f32.mrb[24].mxu1 }
 0x35c   :  { %v12029_v13 = vpop.f32.mrb[25].mxu1 }
 0x35d   :  { %v14914_v63 = vadd.f32 %v12029_v13, %v12028_v25  ;;  %v12031_v29 = vpop.f32.mrb[26].mxu1 }
 0x35e   :  { %v12032_v56 = vpop.f32.mrb[27].mxu1 }
 0x35f   :  { %v14916_v17 = vadd.f32 %v12032_v56, %v12031_v29 }
 0x363   :  { %v12034_v46 = vpop.f32.mrb[28].mxu1 }
 0x364   :  { %v12035_v35 = vpop.f32.mrb[29].mxu1 }
 0x365   :  { %v14918_v26 = vadd.f32 %v12035_v35, %v12034_v46  ;;  %v12037_v36 = vpop.f32.mrb[30].mxu1  ;;  %v2513_v46 = vadd.f32 %v14898_v40, %v14925_v5 }
 0x366   :  { %v12038_v50 = vpop.f32.mrb[31].mxu1 }
 0x367   :  { %v14920_v34 = vadd.f32 %v12038_v50, %v12037_v36 }
 0x36b   :  { %v12056_v38 = vpop.f32.mrb[32].mxu1 }
 0x36c   :  { %v12057_v41 = vpop.f32.mrb[33].mxu1 }
 0x36d   :  { %v12058_v53 = vadd.f32 %v12057_v41, %v12056_v38  ;;  %v12059_v32 = vpop.f32.mrb[34].mxu1 }
 0x36e   :  { %v12060_v62 = vpop.f32.mrb[35].mxu1 }
 0x36f   :  { %v2583_v61 = vadd.f32 %v12058_v53, %v2486_v33  ;;  %v12061_v20 = vadd.f32 %v12060_v62, %v12059_v32  ;;  %v2518_v62 = vadd.f32 %v14906_v2, %v14925_v5 }
 0x371   :  { %v2586_v37 = vadd.f32 %v12061_v20, %v2489_v1  ;;  %v2645_v3 = vmax.f32 %v2583_v61, 0.0 }
 0x373   :  { %v2646_v21 = vmax.f32 %v2586_v37, 0.0  ;;  %v12062_v12 = vpop.f32.mrb[36].mxu1 }
 0x374   :  { %v12063_v39 = vpop.f32.mrb[37].mxu1 }
 0x375   :  { %v14943_v27 = vpack.c.bf16 %v2646_v21, %v2645_v3  ;;  %v12064_v60 = vadd.f32 %v12063_v39, %v12062_v12  ;;  %v12065_v52 = vpop.f32.mrb[38].mxu1  ;;  %v2521_v3 = vadd.f32 %v14908_v55, %v14925_v5 }
 0x376   :  { %v12066_v22 = vpop.f32.mrb[39].mxu1 }
 0x377   :  { %v2591_v8 = vadd.f32 %v12064_v60, %v2494_v45  ;;  %v12067_v44 = vadd.f32 %v12066_v22, %v12065_v52  ;;  %v2675_v49 = vrot.slane %v14943_v27, 1 }
 0x379   :  { %v2594_v54 = vadd.f32 %v12067_v44, %v2497_v9  ;;  %2681 = vrot.lane.b32.xlu1 %v2675_v49, %s13856_s25  ;;  %v2647_v24 = vmax.f32 %v2591_v8, 0.0  ;;  %v2526_v8 = vadd.f32 %v14910_v30, %v14925_v5  ;;  %v2529_v49 = vadd.f32 %v14912_v0, %v14925_v5 }
 0x37b   :  { %v2648_v15 = vmax.f32 %v2594_v54, 0.0  ;;  %v12068_v14 = vpop.f32.mrb[40].mxu1 }
 0x37c   :  { %v12069_v10 = vpop.f32.mrb[41].mxu1 }
 0x37d   :  { %v14951_v58 = vpack.c.bf16 %v2648_v15, %v2647_v24  ;;  %v12070_v11 = vadd.f32 %v12069_v10, %v12068_v14  ;;  %v12071_v47 = vpop.f32.mrb[42].mxu1 }
 0x37e   :  { %v12072_v16 = vpop.f32.mrb[43].mxu1 }
 0x37f   :  { %v2599_v31 = vadd.f32 %v12070_v11, %v2502_v6  ;;  %v12073_v4 = vadd.f32 %v12072_v16, %v12071_v47  ;;  %2700 = vrot.lane.b32.xlu0 %v14951_v58, %s13856_s25  ;;  %v2694_v18 = vrot.slane %v14951_v58, 2  ;;  %v2676_v19 = vrot.slane %v14951_v58, 1 }
 0x380   :  { %v2534_v16 = vadd.f32 %v14914_v63, %v14925_v5 }
 0x381   :  { %v2602_v28 = vadd.f32 %v12073_v4, %v2505_v43  ;;  %2714 = vrot.lane.b32.xlu1 %v2694_v18, %s13856_s25  ;;  %v2649_v57 = vmax.f32 %v2599_v31, 0.0 }
 0x383   :  { %v2650_v59 = vmax.f32 %v2602_v28, 0.0  ;;  %v12074_v48 = vpop.f32.mrb[44].mxu1  ;;  %v2537_v28 = vadd.f32 %v14916_v17, %v14925_v5 }
 0x384   :  { %v12075_v25 = vpop.f32.mrb[45].mxu1 }
 0x385   :  { %v14966_v13 = vpack.c.bf16 %v2650_v59, %v2649_v57  ;;  %v12076_v29 = vadd.f32 %v12075_v25, %v12074_v48  ;;  %v12077_v56 = vpop.f32.mrb[46].mxu1  ;;  %2683 = vrot.lane.b32.xlu1 %v2676_v19, %s13856_s25 }
 0x386   :  { %v12078_v35 = vpop.f32.mrb[47].mxu1 }
 0x387   :  { %v2607_v36 = vadd.f32 %v12076_v29, %v2510_v23  ;;  %v12079_v50 = vadd.f32 %v12078_v35, %v12077_v56  ;;  %v2677_v38 = vrot.slane %v14966_v13, 1  ;;  %v14975_v41 = vrot.slane %v14966_v13, 2  ;;  %v12839_v35 = vld [vmem:[%s18029_s7 + $0x188] ss:$16 sps:$4 sm:$0xff]  }
 0x389   :  { %v2610_v7 = vadd.f32 %v12079_v50, %v2513_v46  ;;  %2685 = vrot.lane.b32.xlu0 %v2677_v38, %s13856_s25  ;;  %2716 = vrot.lane.b32.xlu1 %v14975_v41, %s13856_s25  ;;  %v2651_v33 = vmax.f32 %v2607_v36, 0.0  ;;  %v12841_v36 = vld [vmem:[%s18029_s7 + $0x18c] ss:$16 sps:$4 sm:$0xff]   ;;  %v2542_v50 = vadd.f32 %v14918_v26, %v14925_v5 }
 0x38a   :  { %3927 = vmatprep.subr.bf16.mxu0 %v12841_v36  ;;  %v12847_v36 = vld [vmem:[%s18029_s7 + $0x1cc] ss:$16 sps:$4 sm:$0xff]  }
 0x38b   :  { %v2652_v53 = vmax.f32 %v2610_v7, 0.0  ;;  %v12080_v32 = vpop.f32.mrb[48].mxu1  ;;  %3928 = vmatpush1.bf16.msra.mxu0 %v12839_v35  ;;  %v12845_v35 = vld [vmem:[%s18029_s7 + $0x1c8] ss:$16 sps:$4 sm:$0xff]  }
 0x38c   :  { %v12081_v40 = vpop.f32.mrb[49].mxu1 }
 0x38d   :  { %v14984_v61 = vpack.c.bf16 %v2652_v53, %v2651_v33  ;;  %v12082_v1 = vadd.f32 %v12081_v40, %v12080_v32  ;;  %v12083_v20 = vpop.f32.mrb[50].mxu1  ;;  %2702 = vrot.lane.b32.xlu0 %v14966_v13, %s13856_s25  ;;  %v12844_v32 = vld [vmem:[%s18029_s7 + $0x1ac] ss:$16 sps:$4 sm:$0xff]   ;;  %v2545_v40 = vadd.f32 %v14920_v34, %v14925_v5 }
 0x38e   :  { %v12084_v37 = vpop.f32.mrb[51].mxu1  ;;  %3929 = vmatprep.subr.bf16.mxu0 %v12844_v32  ;;  %v12851_v32 = vld [vmem:[%s18029_s7 + $0xa0] ss:$16 sps:$4 sm:$0xff]  }
 0x38f   :  { %v2615_v21 = vadd.f32 %v12082_v1, %v2518_v62  ;;  %v12085_v12 = vadd.f32 %v12084_v37, %v12083_v20  ;;  %v2678_v39 = vrot.slane %v14984_v61, 1  ;;  %v15003_v14 = vrot.slane %v14984_v61, 2 }
 0x391   :  { %v2618_v45 = vadd.f32 %v12085_v12, %v2521_v3  ;;  %2687 = vrot.lane.b32.xlu0 %v2678_v39, %s13856_s25  ;;  %v2653_v2 = vmax.f32 %v2615_v21, 0.0  ;;  %v12842_v3 = vld [vmem:[%s18029_s7 + $0x1a8] ss:$16 sps:$4 sm:$0xff]  }
 0x392   :  { %3930 = vmatpush1.bf16.msra.mxu0 %v12842_v3  ;;  %v12861_v3 = vld [vmem:[%s18029_s7 + $0xe4] ss:$16 sps:$4 sm:$0xff]  }
 0x393   :  { %v2654_v60 = vmax.f32 %v2618_v45, 0.0  ;;  %v12086_v52 = vpop.f32.mrb[52].mxu1  ;;  %3931 = vmatprep.subr.bf16.mxu0 %v12847_v36 }
 0x394   :  { %v12087_v22 = vpop.f32.mrb[53].mxu1 }
 0x395   :  { %v14996_v9 = vpack.c.bf16 %v2654_v60, %v2653_v2  ;;  %v12088_v44 = vadd.f32 %v12087_v22, %v12086_v52  ;;  %v12089_v55 = vpop.f32.mrb[54].mxu1  ;;  %2704 = vrot.lane.b32.xlu0 %v14984_v61, %s13856_s25  ;;  %v2693_v52 = vrot.slane %v14943_v27, 2 }
 0x396   :  { %v12090_v54 = vpop.f32.mrb[55].mxu1  ;;  %3932 = vmatpush1.bf16.msra.mxu0 %v12845_v35  ;;  %v15256_v35 = vld [vmem:[%s18028_s6] ss:$0 sm:$0xff] }
 0x397   :  { %v2623_v24 = vadd.f32 %v12088_v44, %v2526_v8  ;;  %v12091_v15 = vadd.f32 %v12090_v54, %v12089_v55  ;;  %v2679_v10 = vrot.slane %v14996_v9, 1  ;;  %v15021_v23 = vrot.slane %v14996_v9, 2  ;;  %v15071_v8 = vld [vmem:[%s18027_s5 + $0x80] sm:$0xff]   ;;  %v15077_v55 = vld [vmem:[%s18027_s5 + $0xc8] sm:$0xff]  }
 0x398   :  { %v15085_v54 = vld [vmem:[%s18027_s5 + $0x88] sm:$0xff]  }
 0x399   :  { %v2626_v6 = vadd.f32 %v12091_v15, %v2529_v49  ;;  %2718 = vrot.lane.b32.xlu0 %v15003_v14, %s13856_s25  ;;  %2689 = vrot.lane.b32.xlu1 %v2679_v10, %s13856_s25  ;;  %v2655_v30 = vmax.f32 %v2623_v24, 0.0  ;;  %v15091_v24 = vld [vmem:[%s18027_s5 + $0xd0] sm:$0xff]   ;;  %v15103_v15 = vld [vmem:[%s18027_s5 + $0xd8] sm:$0xff]  }
 0x39b   :  { %v2656_v11 = vmax.f32 %v2626_v6, 0.0  ;;  %v12092_v47 = vpop.f32.mrb[56].mxu1 }
 0x39c   :  { %v12093_v0 = vpop.f32.mrb[57].mxu1 }
 0x39d   :  { %v15013_v31 = vpack.c.bf16 %v2656_v11, %v2655_v30  ;;  %v12094_v43 = vadd.f32 %v12093_v0, %v12092_v47  ;;  %v12095_v4 = vpop.f32.mrb[58].mxu1  ;;  %2706 = vrot.lane.b32.xlu1 %v14996_v9, %s13856_s25  ;;  %v15114_v11 = vld [vmem:[%s18027_s5 + $0x98] sm:$0xff]   ;;  %v15120_v47 = vld [vmem:[%s18027_s5 + $0xe0] sm:$0xff]  }
 0x39e   :  { %v12096_v57 = vpop.f32.mrb[59].mxu1  ;;  %v15126_v0 = vld [vmem:[%s18027_s5 + $0xa0] sm:$0xff]  }
 0x39f   :  { %v2631_v59 = vadd.f32 %v12094_v43, %v2534_v16  ;;  %v12097_v48 = vadd.f32 %v12096_v57, %v12095_v4  ;;  %v2680_v25 = vrot.slane %v15013_v31, 1  ;;  %v15046_v26 = vrot.slane %v15013_v31, 2  ;;  %v15132_v16 = vld [vmem:[%s18027_s5 + $0xe8] sm:$0xff]   ;;  %v15144_v4 = vld [vmem:[%s18027_s5 + $0xf0] sm:$0xff]   ;;  %v15156_v57 = vld [vmem:[%s18027_s5 + $0xf8] sm:$0xff]  }
 0x3a0   :  { %v15138_v43 = vld [vmem:[%s18027_s5 + $0xa8] sm:$0xff]  }
 0x3a1   :  { %v2634_v29 = vadd.f32 %v12097_v48, %v2537_v28  ;;  %2691 = vrot.lane.b32.xlu0 %v2680_v25, %s13856_s25  ;;  %2720 = vrot.lane.b32.xlu1 %v15021_v23, %s13856_s25  ;;  %v2657_v63 = vmax.f32 %v2631_v59, 0.0  ;;  %v15150_v28 = vld [vmem:[%s18027_s5 + $0xb0] sm:$0xff]   ;;  %v15162_v59 = vld [vmem:[%s18027_s5 + $0xb8] sm:$0xff]  }
 0x3a3   :  { %v2658_v56 = vmax.f32 %v2634_v29, 0.0  ;;  %v12098_v46 = vpop.f32.mrb[60].mxu1  ;;  %v15169_v29 = vld [vmem:[%s18027_s5 + $0x100] sm:$0xff]  }
 0x3a4   :  { %v12099_v17 = vpop.f32.mrb[61].mxu1 }
 0x3a5   :  { %v15036_v7 = vpack.c.bf16 %v2658_v56, %v2657_v63  ;;  %v12100_v33 = vadd.f32 %v12099_v17, %v12098_v46  ;;  %2708 = vrot.lane.b32.xlu0 %v15013_v31, %s13856_s25  ;;  %v12101_v53 = vpop.f32.mrb[62].mxu1  ;;  %v13859_v63 = vmov 0.0   ;;  %v15179_v46 = vld [vmem:[%s18027_s5 + $0x108] sm:$0xff]   ;;  %v15195_v17 = vld [vmem:[%s18027_s5 + $0x118] sm:$0xff]  }
 0x3a6   :  { %v12102_v62 = vpop.f32.mrb[63].mxu1 }
 0x3a7   :  { %v2639_v1 = vadd.f32 %v12100_v33, %v2542_v50  ;;  %v12103_v20 = vadd.f32 %v12102_v62, %v12101_v53  ;;  %v2712_v37 = vrot.slane %v15036_v7, 1  ;;  %v2713_v45 = vrot.slane %v15036_v7, 2  ;;  %v12848_v50 = vld [vmem:[%s18029_s7 + $0x80] ss:$16 sps:$4 sm:$0xff]   ;;  %v12850_v33 = vld [vmem:[%s18029_s7 + $0x84] ss:$16 sps:$4 sm:$0xff]  }
 0x3a8   :  { %v12853_v53 = vld [vmem:[%s18029_s7 + $0xa4] ss:$16 sps:$4 sm:$0xff]  }
 0x3a9   :  { %v2642_v21 = vadd.f32 %v12103_v20, %v2545_v40  ;;  %2722 = vrot.lane.b32.xlu0 %v15046_v26, %s13856_s25  ;;  %2728 = vrot.lane.b32.xlu1 %v2712_v37, %s13856_s25  ;;  %v2659_v34 = vmax.f32 %v2639_v1, 0.0  ;;  %v12854_v40 = vld [vmem:[%s18022_s0 + $0x270] sm:$0xff]   ;;  %v12858_v20 = vld [vmem:[%s18022_s0 + $0x278] sm:$0xff]  }
 0x3aa   :  { %v12857_v62 = vld [vmem:[%s18029_s7 + $0xc4] ss:$16 sps:$4 sm:$0xff]   ;;  %v12855_v1 = vld [vmem:[%s18029_s7 + $0xc0] ss:$16 sps:$4 sm:$0xff]   ;;  %12606 = vmatprep.mubr.msk.bf16.mxu0 %vm639_vm0, %v12854_v40 }
 0x3ab   :  { %v2660_v5 = vmax.f32 %v2642_v21, 0.0  ;;  %12607 = vmatmul.mubr.msk.bf16.gmra.mrb[156].mxu0 %vm639_vm0, %v12858_v20  ;;  %v12864_v21 = vld [vmem:[%s18029_s7 + $0x1ec] ss:$16 sps:$4 sm:$0xff]  }
 0x3ac   :  { %3933 = vmatprep.subr.bf16.mxu0 %v12864_v21 }
 0x3ad   :  { %v15057_v12 = vpack.c.bf16 %v2660_v5, %v2659_v34  ;;  %2710 = vrot.lane.b32.xlu1 %v15036_v7, %s13856_s25  ;;  %v12859_v34 = vld [vmem:[%s18029_s7 + $0xe0] ss:$16 sps:$4 sm:$0xff]   ;;  %v12862_v5 = vld [vmem:[%s18029_s7 + $0x1e8] ss:$16 sps:$4 sm:$0xff]  }
 0x3ae   :  { %3934 = vmatpush1.bf16.msra.mxu0 %v12862_v5 }
 0x3af   :  { %v2727_v2 = vrot.slane %v15057_v12, 1 }
 0x3b1   :  { %2724 = vrot.lane.b32.xlu1 %v2713_v45, %s13856_s25  ;;  %2730 = vrot.lane.b32.xlu0 %v2727_v2, %s13856_s25  ;;  %v12867_v2 = vld [vmem:[%s18029_s7 + $0x8c] ss:$16 sps:$4 sm:$0xff]  }
 0x3eb   :  { %v2682_v60 = vpop.permute.xlu1 %2681 }
 0x3ec   :  { %v2735_v49 = vsel %vm639_vm0, %v14943_v27, %v2682_v60  ;;  %v15097_v27 = vld [vmem:[%s18027_s5 + $0x90] sm:$0xff]   ;;  %v13861_v60 = vmov 0  }
 0x3ed   :  { %3959 = vmatprep.mubr.bf16.mxu0 %v13861_v60 }
 0x3f1   :  { %v2701_v22 = vpop.permute.xlu0 %2700 }
 0x3f2   :  { %v2759_v44 = vsel %vm639_vm0, %v2693_v52, %v2701_v22  ;;  %v12870_v52 = vld [vmem:[%s18029_s7 + $0x20c] ss:$16 sps:$4 sm:$0xff]  }
 0x3f3   :  { %3142 = vmatprep.mubr.bf16.mxu1 %v2759_v44  ;;  %v2715_v48 = vpop.permute.xlu1 %2714  ;;  %4113 = vmatprep.subr.bf16.mxu0 %v12870_v52 }
 0x3f4   :  { %3143 = vmatmul.mubr.bf16.vlgmr.msra.gmra.mrb[64].mxu1 %v2735_v49  ;;  %v2783_v56 = vsel %vm639_vm0, %v2676_v19, %v2715_v48  ;;  %v15188_v19 = vld [vmem:[%s18027_s5 + $0x110] sm:$0xff]  }
 0x3f5   :  { %12127 = vmatpush3.bf16.msra.mxu1 %v15071_v8 }
 0x3f6   :  { %12128 = vmatprep.subr.bf16.mxu1 %v15077_v55 }
 0x3f9   :  { %12129 = vmatpush3.bf16.msra.mxu1 %v15085_v54 }
 0x3fa   :  { %12130 = vmatprep.subr.bf16.mxu1 %v15091_v24 }
 0x3fb   :  { %v2686_v6 = vpop.permute.xlu0 %2685 }
 0x3fc   :  { %v15107_v30 = vsel %vm639_vm0, %v14966_v13, %v2686_v6  ;;  %v12943_v13 = vld [vmem:[%s18029_s7 + $0x148] ss:$16 sps:$4 sm:$0xff]  }
 0x3fd   :  { %12131 = vmatpush3.bf16.msra.mxu1 %v15097_v27  ;;  %3183 = vmatprep.mubr.bf16.mxu1 %v15107_v30 }
 0x3fe   :  { %12132 = vmatprep.subr.bf16.mxu1 %v15103_v15 }
 0x401   :  { %12133 = vmatpush3.bf16.msra.mxu1 %v15114_v11 }
 0x402   :  { %12134 = vmatprep.subr.bf16.mxu1 %v15120_v47 }
 0x405   :  { %12135 = vmatpush3.bf16.msra.mxu1 %v15126_v0 }
 0x406   :  { %12136 = vmatprep.subr.bf16.mxu1 %v15132_v16 }
 0x409   :  { %12137 = vmatpush3.bf16.msra.mxu1 %v15138_v43 }
 0x40a   :  { %12138 = vmatprep.subr.bf16.mxu1 %v15144_v4 }
 0x40d   :  { %12139 = vmatpush3.bf16.msra.mxu1 %v15150_v28 }
 0x40e   :  { %12140 = vmatprep.subr.bf16.mxu1 %v15156_v57 }
 0x411   :  { %12141 = vmatpush3.bf16.msra.mxu1 %v15162_v59 }
 0x412   :  { %12610 = vmatprep.subr.bf16.mxu1 %v13859_v63 }
 0x414   :  { %3184 = vmatmul.mubr.bf16.vlgmr.msra.gmra.mrb[68].mxu1 %v2783_v56 }
 0x415   :  { %12611 = vmatpush3.bf16.msra.mxu1 %v15169_v29  ;;  %12618 = vmatprep.mubr.msk.bf16.mxu1 %vm13860_vm4, %v13859_v63 }
 0x416   :  { %12612 = vmatprep.subr.bf16.mxu1 %v13859_v63 }
 0x419   :  { %12613 = vmatpush3.bf16.msra.mxu1 %v15179_v46 }
 0x41a   :  { %12614 = vmatprep.subr.bf16.mxu1 %v13859_v63 }
 0x41d   :  { %12615 = vmatpush3.bf16.msra.mxu1 %v15188_v19 }
 0x41e   :  { %12616 = vmatprep.subr.bf16.mxu1 %v13859_v63 }
 0x421   :  { %12617 = vmatpush3.bf16.msra.mxu1 %v15195_v17 }
 0x422   :  { %3353 = vmatprep.subr.bf16.mxu1 %v12850_v33 }
 0x424   :  { %12619 = vmatmul.mubr.msk.bf16.vlgmr.msra.gmra.mrb[72].mxu1 %vm639_vm0, %v14975_v41 }
 0x425   :  { %3354 = vmatpush1.bf16.msra.mxu1 %v12848_v50  ;;  %3385 = vmatprep.mubr.bf16.mxu1 %v13861_v60 }
 0x426   :  { %3355 = vmatprep.subr.bf16.mxu1 %v12853_v53 }
 0x429   :  { %3356 = vmatpush1.bf16.msra.mxu1 %v12851_v32 }
 0x42a   :  { %3357 = vmatprep.subr.bf16.mxu1 %v12857_v62 }
 0x42d   :  { %3358 = vmatpush1.bf16.msra.mxu1 %v12855_v1 }
 0x42e   :  { %3359 = vmatprep.subr.bf16.mxu1 %v12861_v3 }
 0x431   :  { %3360 = vmatpush1.bf16.msra.mxu1 %v12859_v34 }
 0x432   :  { %3394 = vmatprep.subr.bf16.mxu1 %v12867_v2 }
 0x4c7   :  { %v12120_v22 = vpop.f32.mrb[64].mxu1 }
 0x4c8   :  { %v12121_v44 = vpop.f32.mrb[65].mxu1 }
 0x4c9   :  { %v12122_v49 = vadd.f32 %v12121_v44, %v12120_v22  ;;  %v12123_v6 = vpop.f32.mrb[66].mxu1 }
 0x4ca   :  { %v12124_v48 = vpop.f32.mrb[67].mxu1 }
 0x4cb   :  { %v12125_v56 = vadd.f32 %v12124_v48, %v12123_v6  ;;  %v3145_v33 = vadd.f32 %v12122_v49, %v15256_v35  ;;  %v12865_v49 = vld [vmem:[%s18029_s7 + $0x88] ss:$16 sps:$4 sm:$0xff]  }
 0x4cd   :  { %v3148_v62 = vadd.f32 %v12125_v56, %v15256_v35  ;;  %v12868_v56 = vld [vmem:[%s18029_s7 + $0x208] ss:$16 sps:$4 sm:$0xff]  }
 0x4e7   :  { %v12142_v36 = vpop.f32.mrb[68].mxu1 }
 0x4e8   :  { %v12143_v50 = vpop.f32.mrb[69].mxu1 }
 0x4e9   :  { %v12144_v53 = vadd.f32 %v12143_v50, %v12142_v36  ;;  %v12145_v32 = vpop.f32.mrb[70].mxu1 }
 0x4ea   :  { %v12146_v40 = vpop.f32.mrb[71].mxu1 }
 0x4eb   :  { %v12147_v1 = vadd.f32 %v12146_v40, %v12145_v32  ;;  %v3186_v20 = vadd.f32 %v12144_v53, %v3145_v33  ;;  %v12873_v33 = vld [vmem:[%s18029_s7 + $0xac] ss:$16 sps:$4 sm:$0xff]   ;;  %v12871_v32 = vld [vmem:[%s18029_s7 + $0xa8] ss:$16 sps:$4 sm:$0xff]  }
 0x4ec   :  { %v12876_v53 = vld [vmem:[%s18029_s7 + $0x22c] ss:$16 sps:$4 sm:$0xff]   ;;  %v12874_v40 = vld [vmem:[%s18029_s7 + $0x228] ss:$16 sps:$4 sm:$0xff]  }
 0x4ed   :  { %v3189_v3 = vadd.f32 %v12147_v1, %v3148_v62  ;;  %v12879_v62 = vld [vmem:[%s18029_s7 + $0xcc] ss:$16 sps:$4 sm:$0xff]  }
 0x4ee   :  { %v12882_v1 = vld [vmem:[%s18029_s7 + $0x24c] ss:$16 sps:$4 sm:$0xff]  }
 0x4f7   :  { %v3226_v21 = vpop.f32.mrb[72].mxu1 }
 0x4f8   :  { %v3227_v34 = vadd.f32 %v3226_v21, %v3186_v20  ;;  %v12620_v5 = vpop.f32.mrb[73].mxu1  ;;  %v12877_v20 = vld [vmem:[%s18029_s7 + $0xc8] ss:$16 sps:$4 sm:$0xff]   ;;  %v12885_v21 = vld [vmem:[%s18029_s7 + $0xec] ss:$16 sps:$4 sm:$0xff]  }
 0x4f9   :  { %v3229_v2 = vpop.f32.mrb[74].mxu1  ;;  %v12883_v5 = vld [vmem:[%s18029_s7 + $0xe8] ss:$16 sps:$4 sm:$0xff]  }
 0x4fa   :  { %v3230_v52 = vadd.f32 %v3229_v2, %v3189_v3  ;;  %v12621_v22 = vpop.f32.mrb[75].mxu1  ;;  %v3233_v44 = vmax.f32 %v3227_v34, 0.0  ;;  %v12880_v3 = vld [vmem:[%s18029_s7 + $0x248] ss:$16 sps:$4 sm:$0xff]   ;;  %v12888_v34 = vld [vmem:[%s18029_s7 + $0x26c] ss:$16 sps:$4 sm:$0xff]  }
 0x4fb   :  { %v12886_v2 = vld [vmem:[%s18029_s7 + $0x268] ss:$16 sps:$4 sm:$0xff]   ;;  %v12894_v22 = vld [vmem:[%s18029_s7 + $0x28c] ss:$16 sps:$4 sm:$0xff]  }
 0x4fc   :  { %v3234_v6 = vmax.f32 %v3230_v52, 0.0  ;;  %v12891_v52 = vld [vmem:[%s18029_s7 + $0x4] ss:$16 sps:$4 sm:$0xff]  }
 0x4fe   :  { %v15260_v48 = vpack.c.bf16 %v3234_v6, %v3233_v44  ;;  %v12889_v44 = vld [vmem:[%s18029_s7] ss:$16 sps:$4 sm:$0xff]   ;;  %v12892_v6 = vld [vmem:[%s18029_s7 + $0x288] ss:$16 sps:$4 sm:$0xff]  }
 0x500   :  { %v3269_v36 = vrot.slane %v15260_v48, 1  ;;  %v3802_v50 = vrot.slane %v15260_v48, 3 }
 0x502   :  { %11222 = vmatmul.mubr.msk.bf16.vlgmr.msra.gmra.mrb[76].mxu1 %vm639_vm0, %v3269_v36  ;;  %11277 = vmatmul.mubr.msk.bf16.vlgmr.msra.gmra.mrb[160].mxu0 %vm639_vm0, %v3802_v50 }
 0x503   :  { %3395 = vmatpush1.bf16.msra.mxu1 %v12865_v49  ;;  %4114 = vmatpush1.bf16.msra.mxu0 %v12868_v56  ;;  %v3988_v49 = vrot.slane %v15260_v48, 4  ;;  %v12897_v56 = vld [vmem:[%s18029_s7 + $0x24] ss:$16 sps:$4 sm:$0xff]  }
 0x504   :  { %3396 = vmatprep.subr.bf16.mxu1 %v12873_v33  ;;  %4115 = vmatprep.subr.bf16.mxu0 %v12876_v53  ;;  %v12900_v33 = vld [vmem:[%s18029_s7 + $0x2ac] ss:$16 sps:$4 sm:$0xff]   ;;  %v12895_v53 = vld [vmem:[%s18029_s7 + $0x20] ss:$16 sps:$4 sm:$0xff]  }
 0x505   :  { %3426 = vmatprep.mubr.bf16.mxu1 %v13861_v60  ;;  %4145 = vmatprep.mubr.bf16.mxu0 %v13861_v60 }
 0x507   :  { %3397 = vmatpush1.bf16.msra.mxu1 %v12871_v32  ;;  %4116 = vmatpush1.bf16.msra.mxu0 %v12874_v40  ;;  %v12898_v32 = vld [vmem:[%s18029_s7 + $0x2a8] ss:$16 sps:$4 sm:$0xff]   ;;  %v12906_v40 = vld [vmem:[%s18029_s7 + $0x2cc] ss:$16 sps:$4 sm:$0xff]  }
 0x508   :  { %3398 = vmatprep.subr.bf16.mxu1 %v12879_v62  ;;  %4117 = vmatprep.subr.bf16.mxu0 %v12882_v1  ;;  %v12901_v62 = vld [vmem:[%s18029_s7 + $0x40] ss:$16 sps:$4 sm:$0xff]   ;;  %v12904_v1 = vld [vmem:[%s18029_s7 + $0x2c8] ss:$16 sps:$4 sm:$0xff]  }
 0x50b   :  { %3399 = vmatpush1.bf16.msra.mxu1 %v12877_v20  ;;  %4118 = vmatpush1.bf16.msra.mxu0 %v12880_v3  ;;  %v12909_v20 = vld [vmem:[%s18029_s7 + $0x64] ss:$16 sps:$4 sm:$0xff]   ;;  %v12912_v3 = vld [vmem:[%s18029_s7 + $0x2ec] ss:$16 sps:$4 sm:$0xff]  }
 0x50c   :  { %3400 = vmatprep.subr.bf16.mxu1 %v12885_v21  ;;  %4119 = vmatprep.subr.bf16.mxu0 %v12888_v34  ;;  %v15361_v21 = vpop.permute.xlu0 %2702  ;;  %v12907_v34 = vld [vmem:[%s18029_s7 + $0x60] ss:$16 sps:$4 sm:$0xff]  }
 0x50f   :  { %3401 = vmatpush1.bf16.msra.mxu1 %v12883_v5  ;;  %4120 = vmatpush1.bf16.msra.mxu0 %v12886_v2  ;;  %v12910_v5 = vld [vmem:[%s18029_s7 + $0x2e8] ss:$16 sps:$4 sm:$0xff]   ;;  %v12915_v2 = vld [vmem:[%s18029_s7 + $0xc] ss:$16 sps:$4 sm:$0xff]  }
 0x510   :  { %3518 = vmatprep.subr.bf16.mxu1 %v12891_v52  ;;  %4299 = vmatprep.subr.bf16.mxu0 %v12894_v22  ;;  %v12913_v52 = vld [vmem:[%s18029_s7 + $0x8] ss:$16 sps:$4 sm:$0xff]   ;;  %v2688_v22 = vpop.permute.xlu0 %2687 }
 0x512   :  { %11223 = vmatmul.mubr.msk.bf16.vlgmr.msra.gmra.mrb[80].mxu1 %vm639_vm0, %v3269_v36  ;;  %11295 = vmatmul.mubr.msk.bf16.vlgmr.msra.gmra.mrb[164].mxu0 %vm639_vm0, %v3988_v49  ;;  %v12903_v36 = vld [vmem:[%s18029_s7 + $0x44] ss:$16 sps:$4 sm:$0xff]  }
 0x513   :  { %3519 = vmatpush1.bf16.msra.mxu1 %v12889_v44  ;;  %4300 = vmatpush1.bf16.msra.mxu0 %v12892_v6  ;;  %v4174_v44 = vrot.slane %v15260_v48, 5  ;;  %v12918_v6 = vld [vmem:[%s18029_s7 + $0x2c] ss:$16 sps:$4 sm:$0xff]  }
 0x514   :  { %3520 = vmatprep.subr.bf16.mxu1 %v12897_v56  ;;  %4301 = vmatprep.subr.bf16.mxu0 %v12900_v33  ;;  %v15388_v56 = vsel %vm639_vm0, %v14984_v61, %v2688_v22  ;;  %v12921_v33 = vld [vmem:[%s18029_s7 + $0x4c] ss:$16 sps:$4 sm:$0xff]  }
 0x515   :  { %3550 = vmatprep.mubr.bf16.mxu1 %v13861_v60  ;;  %4331 = vmatprep.mubr.bf16.mxu0 %v13861_v60  ;;  %v16166_v61 = vld [vmem:[%s18027_s5 + $0x108] sm:$0xff]  }
 0x517   :  { %3521 = vmatpush1.bf16.msra.mxu1 %v12895_v53  ;;  %4302 = vmatpush1.bf16.msra.mxu0 %v12898_v32  ;;  %v12924_v53 = vld [vmem:[%s18029_s7 + $0x6c] ss:$16 sps:$4 sm:$0xff]  }
 0x518   :  { %3522 = vmatprep.subr.bf16.mxu1 %v12903_v36  ;;  %4303 = vmatprep.subr.bf16.mxu0 %v12906_v40  ;;  %v12939_v32 = vld [vmem:[%s18029_s7 + $0x10c] ss:$16 sps:$4 sm:$0xff]  }
 0x519   :  { %v12942_v40 = vld [vmem:[%s18029_s7 + $0x12c] ss:$16 sps:$4 sm:$0xff]  }
 0x51b   :  { %3523 = vmatpush1.bf16.msra.mxu1 %v12901_v62  ;;  %4304 = vmatpush1.bf16.msra.mxu0 %v12904_v1  ;;  %v12945_v62 = vld [vmem:[%s18029_s7 + $0x14c] ss:$16 sps:$4 sm:$0xff]   ;;  %v12946_v1 = vld [vmem:[%s18029_s7 + $0x168] ss:$16 sps:$4 sm:$0xff]  }
 0x51c   :  { %3524 = vmatprep.subr.bf16.mxu1 %v12909_v20  ;;  %4305 = vmatprep.subr.bf16.mxu0 %v12912_v3  ;;  %v12951_v20 = vld [vmem:[%s18029_s7 + $0x184] ss:$16 sps:$4 sm:$0xff]   ;;  %v12608_v3 = vpop.f32.mrb[156].mxu0 }
 0x51d   :  { %v15633_v3 = vld [vmem:[%s18027_s5 + $0x68] sm:$0xff]  }
 0x51f   :  { %3525 = vmatpush1.bf16.msra.mxu1 %v12907_v34  ;;  %4306 = vmatpush1.bf16.msra.mxu0 %v12910_v5  ;;  %v1526_v34 = vpop.f32.mrb[157].mxu0  ;;  %v12949_v5 = vld [vmem:[%s18029_s7 + $0x180] ss:$16 sps:$4 sm:$0xff]  }
 0x520   :  { %3559 = vmatprep.subr.bf16.mxu1 %v12915_v2  ;;  %12175 = vmatprep.subr.bf16.mxu0 %v14940_v42  ;;  %v12916_v42 = vld [vmem:[%s18029_s7 + $0x28] ss:$16 sps:$4 sm:$0xff]   ;;  %v12609_v2 = vpop.f32.mrb[158].mxu0 }
 0x521   :  { %v1528_v22 = vpop.f32.mrb[159].mxu0  ;;  %v15639_v34 = vld [vmem:[%s18027_s5 + $0x28] sm:$0xff]   ;;  %v15651_v2 = vld [vmem:[%s18027_s5 + $0x30] sm:$0xff]  }
 0x522   :  { %11240 = vmatmul.mubr.msk.bf16.vlgmr.msra.gmra.mrb[84].mxu1 %vm639_vm0, %v15260_v48  ;;  %11313 = vmatmul.mubr.msk.bf16.vlgmr.msra.gmra.mrb[168].mxu0 %vm639_vm0, %v4174_v44 }
 0x523   :  { %3560 = vmatpush1.bf16.msra.mxu1 %v12913_v52  ;;  %12176 = vmatpush3.bf16.msra.mxu0 %v15071_v8  ;;  %v12919_v8 = vld [vmem:[%s18029_s7 + $0x48] ss:$16 sps:$4 sm:$0xff]   ;;  %v12954_v52 = vld [vmem:[%s18029_s7 + $0x1a4] ss:$16 sps:$4 sm:$0xff]  }
 0x524   :  { %4419 = vmatprep.mubr.bf16.mxu0 %v15388_v56  ;;  %3561 = vmatprep.subr.bf16.mxu1 %v12918_v6  ;;  %v12952_v6 = vld [vmem:[%s18029_s7 + $0x1a0] ss:$16 sps:$4 sm:$0xff]  }
 0x525   :  { %12177 = vmatprep.subr.bf16.mxu0 %v15077_v55  ;;  %3591 = vmatprep.mubr.bf16.mxu1 %v13861_v60  ;;  %v12922_v55 = vld [vmem:[%s18029_s7 + $0x68] ss:$16 sps:$4 sm:$0xff]  }
 0x527   :  { %3562 = vmatpush1.bf16.msra.mxu1 %v12916_v42  ;;  %12178 = vmatpush3.bf16.msra.mxu0 %v15085_v54  ;;  %v12927_v54 = vld [vmem:[%s18029_s7 + $0x104] ss:$16 sps:$4 sm:$0xff]  }
 0x528   :  { %3563 = vmatprep.subr.bf16.mxu1 %v12921_v33  ;;  %12179 = vmatprep.subr.bf16.mxu0 %v15091_v24  ;;  %v12925_v24 = vld [vmem:[%s18029_s7 + $0x100] ss:$16 sps:$4 sm:$0xff]   ;;  %v12957_v42 = vld [vmem:[%s18029_s7 + $0x1c4] ss:$16 sps:$4 sm:$0xff]  }
 0x529   :  { %v12955_v33 = vld [vmem:[%s18029_s7 + $0x1c0] ss:$16 sps:$4 sm:$0xff]  }
 0x52b   :  { %3564 = vmatpush1.bf16.msra.mxu1 %v12919_v8  ;;  %12180 = vmatpush3.bf16.msra.mxu0 %v15097_v27  ;;  %v12930_v27 = vld [vmem:[%s18029_s7 + $0x124] ss:$16 sps:$4 sm:$0xff]  }
 0x52c   :  { %3565 = vmatprep.subr.bf16.mxu1 %v12924_v53  ;;  %12181 = vmatprep.subr.bf16.mxu0 %v15103_v15  ;;  %v12928_v15 = vld [vmem:[%s18029_s7 + $0x120] ss:$16 sps:$4 sm:$0xff]   ;;  %v12960_v8 = vld [vmem:[%s18029_s7 + $0x1e4] ss:$16 sps:$4 sm:$0xff]  }
 0x52d   :  { %v12958_v53 = vld [vmem:[%s18029_s7 + $0x1e0] ss:$16 sps:$4 sm:$0xff]  }
 0x52f   :  { %3566 = vmatpush1.bf16.msra.mxu1 %v12922_v55  ;;  %12182 = vmatpush3.bf16.msra.mxu0 %v15114_v11  ;;  %v12933_v11 = vld [vmem:[%s18029_s7 + $0x144] ss:$16 sps:$4 sm:$0xff]  }
 0x530   :  { %3700 = vmatprep.subr.bf16.mxu1 %v12927_v54  ;;  %12183 = vmatprep.subr.bf16.mxu0 %v15120_v47  ;;  %v12931_v47 = vld [vmem:[%s18029_s7 + $0x140] ss:$16 sps:$4 sm:$0xff]   ;;  %v12963_v55 = vld [vmem:[%s18029_s7 + $0x204] ss:$16 sps:$4 sm:$0xff]  }
 0x531   :  { %v12961_v54 = vld [vmem:[%s18029_s7 + $0x200] ss:$16 sps:$4 sm:$0xff]  }
 0x532   :  { %11241 = vmatmul.mubr.msk.bf16.vlgmr.msra.gmra.mrb[88].mxu1 %vm639_vm0, %v15260_v48 }
 0x533   :  { %3701 = vmatpush1.bf16.msra.mxu1 %v12925_v24  ;;  %12184 = vmatpush3.bf16.msra.mxu0 %v15126_v0  ;;  %v15438_v0 = vpop.permute.xlu1 %2683  ;;  %v12966_v24 = vld [vmem:[%s18029_s7 + $0x224] ss:$16 sps:$4 sm:$0xff]  }
 0x534   :  { %3702 = vmatprep.subr.bf16.mxu1 %v12930_v27  ;;  %12185 = vmatprep.subr.bf16.mxu0 %v15132_v16  ;;  %v12936_v16 = vld [vmem:[%s18029_s7 + $0x164] ss:$16 sps:$4 sm:$0xff]   ;;  %v12964_v27 = vld [vmem:[%s18029_s7 + $0x220] ss:$16 sps:$4 sm:$0xff]   ;;  %v2739_v22 = vsel %vm639_vm0, %v14951_v58, %v15438_v0 }
 0x535   :  { %3732 = vmatprep.mubr.bf16.mxu1 %v13861_v60 }
 0x537   :  { %3703 = vmatpush1.bf16.msra.mxu1 %v12928_v15  ;;  %12186 = vmatpush3.bf16.msra.mxu0 %v15138_v43  ;;  %v12934_v43 = vld [vmem:[%s18029_s7 + $0x160] ss:$16 sps:$4 sm:$0xff]   ;;  %v2717_v36 = vpop.permute.xlu1 %2716  ;;  %v12969_v15 = vld [vmem:[%s18029_s7 + $0x244] ss:$16 sps:$4 sm:$0xff]  }
 0x538   :  { %3704 = vmatprep.subr.bf16.mxu1 %v12933_v11  ;;  %12187 = vmatprep.subr.bf16.mxu0 %v15144_v4  ;;  %v12937_v4 = vld [vmem:[%s18029_s7 + $0x108] ss:$16 sps:$4 sm:$0xff]   ;;  %v12967_v11 = vld [vmem:[%s18029_s7 + $0x240] ss:$16 sps:$4 sm:$0xff]  }
 0x53b   :  { %3705 = vmatpush1.bf16.msra.mxu1 %v12931_v47  ;;  %12188 = vmatpush3.bf16.msra.mxu0 %v15150_v28  ;;  %v3616_v28 = vrot.slane %v15260_v48, 2  ;;  %v12970_v47 = vld [vmem:[%s18029_s7 + $0x260] ss:$16 sps:$4 sm:$0xff]   ;;  %v15591_v48 = vld [vmem:[%s18027_s5 + $0x8] sm:$0xff]  }
 0x53c   :  { %3706 = vmatprep.subr.bf16.mxu1 %v12936_v16  ;;  %12189 = vmatprep.subr.bf16.mxu0 %v15156_v57  ;;  %v2787_v57 = vsel %vm639_vm0, %v2677_v38, %v2717_v36  ;;  %v12948_v38 = vld [vmem:[%s18029_s7 + $0x16c] ss:$16 sps:$4 sm:$0xff]   ;;  %v12975_v16 = vld [vmem:[%s18029_s7 + $0x284] ss:$16 sps:$4 sm:$0xff]   ;;  %v12976_v36 = vld [vmem:[%s18029_s7 + $0x2a0] ss:$16 sps:$4 sm:$0xff]  }
 0x53f   :  { %3707 = vmatpush1.bf16.msra.mxu1 %v12934_v43  ;;  %12190 = vmatpush3.bf16.msra.mxu0 %v15162_v59  ;;  %v12940_v59 = vld [vmem:[%s18029_s7 + $0x128] ss:$16 sps:$4 sm:$0xff]   ;;  %v12973_v43 = vld [vmem:[%s18029_s7 + $0x280] ss:$16 sps:$4 sm:$0xff]  }
 0x540   :  { %3741 = vmatprep.subr.bf16.mxu1 %v12939_v32  ;;  %v12978_v32 = vld [vmem:[%s18029_s7 + $0x2a4] ss:$16 sps:$4 sm:$0xff]  }
 0x542   :  { %11258 = vmatmul.mubr.msk.bf16.vlgmr.msra.gmra.mrb[92].mxu1 %vm639_vm0, %v3616_v28  ;;  %4420 = vmatmul.mubr.bf16.vlgmr.msra.gmra.mrb[172].mxu0 %v2787_v57  ;;  %v15566_v57 = vld [vmem:[%s18027_s5 + $0x40] sm:$0xff]  }
 0x543   :  { %3742 = vmatpush1.bf16.msra.mxu1 %v12937_v4  ;;  %3773 = vmatprep.mubr.bf16.mxu1 %v13861_v60  ;;  %v12981_v4 = vld [vmem:[%s18029_s7 + $0x2c4] ss:$16 sps:$4 sm:$0xff]  }
 0x544   :  { %3743 = vmatprep.subr.bf16.mxu1 %v12942_v40  ;;  %4603 = vmatprep.mubr.bf16.mxu0 %v13861_v60  ;;  %v12982_v40 = vld [vmem:[%s18029_s7 + $0x2e0] ss:$16 sps:$4 sm:$0xff]  }
 0x547   :  { %3744 = vmatpush1.bf16.msra.mxu1 %v12940_v59  ;;  %v2763_v59 = vsel %vm639_vm0, %v2694_v18, %v15361_v21  ;;  %v15597_v18 = vld [vmem:[%s18027_s5 + $0x50] sm:$0xff]  }
 0x548   :  { %3745 = vmatprep.subr.bf16.mxu1 %v12945_v62  ;;  %v15579_v62 = vld [vmem:[%s18027_s5] sm:$0xff]   ;;  %v15603_v21 = vld [vmem:[%s18027_s5 + $0x10] sm:$0xff]  }
 0x54b   :  { %3746 = vmatpush1.bf16.msra.mxu1 %v12943_v13  ;;  %v15585_v13 = vld [vmem:[%s18027_s5 + $0x48] sm:$0xff]  }
 0x54c   :  { %3747 = vmatprep.subr.bf16.mxu1 %v12948_v38  ;;  %v15615_v38 = vld [vmem:[%s18027_s5 + $0x18] sm:$0xff]  }
 0x54f   :  { %3748 = vmatpush1.bf16.msra.mxu1 %v12946_v1  ;;  %v15621_v1 = vld [vmem:[%s18027_s5 + $0x60] sm:$0xff]  }
 0x550   :  { %3886 = vmatprep.subr.bf16.mxu1 %v12951_v20  ;;  %v15627_v20 = vld [vmem:[%s18027_s5 + $0x20] sm:$0xff]  }
 0x552   :  { %11259 = vmatmul.mubr.msk.bf16.vlgmr.msra.gmra.mrb[96].mxu1 %vm639_vm0, %v3616_v28  ;;  %v12979_v28 = vld [vmem:[%s18029_s7 + $0x2c0] ss:$16 sps:$4 sm:$0xff]  }
 0x553   :  { %3887 = vmatpush1.bf16.msra.mxu1 %v12949_v5  ;;  %3918 = vmatprep.mubr.bf16.mxu1 %v13861_v60  ;;  %v15645_v5 = vld [vmem:[%s18027_s5 + $0x70] sm:$0xff]  }
 0x554   :  { %3888 = vmatprep.subr.bf16.mxu1 %v12954_v52  ;;  %v15657_v52 = vld [vmem:[%s18027_s5 + $0x78] sm:$0xff]  }
 0x557   :  { %3889 = vmatpush1.bf16.msra.mxu1 %v12952_v6 }
 0x558   :  { %3890 = vmatprep.subr.bf16.mxu1 %v12957_v42 }
 0x55b   :  { %3891 = vmatpush1.bf16.msra.mxu1 %v12955_v33 }
 0x55c   :  { %3892 = vmatprep.subr.bf16.mxu1 %v12960_v8 }
 0x55f   :  { %3893 = vmatpush1.bf16.msra.mxu1 %v12958_v53 }
 0x560   :  { %4072 = vmatprep.subr.bf16.mxu1 %v12963_v55 }
 0x562   :  { %11276 = vmatmul.mubr.msk.bf16.vlgmr.msra.gmra.mrb[100].mxu1 %vm639_vm0, %v3802_v50  ;;  %v12972_v50 = vld [vmem:[%s18029_s7 + $0x264] ss:$16 sps:$4 sm:$0xff]  }
 0x563   :  { %4073 = vmatpush1.bf16.msra.mxu1 %v12961_v54  ;;  %4104 = vmatprep.mubr.bf16.mxu1 %v13861_v60 }
 0x564   :  { %4074 = vmatprep.subr.bf16.mxu1 %v12966_v24 }
 0x567   :  { %4075 = vmatpush1.bf16.msra.mxu1 %v12964_v27 }
 0x568   :  { %4076 = vmatprep.subr.bf16.mxu1 %v12969_v15 }
 0x56b   :  { %4077 = vmatpush1.bf16.msra.mxu1 %v12967_v11 }
 0x56c   :  { %4078 = vmatprep.subr.bf16.mxu1 %v12972_v50 }
 0x56f   :  { %4079 = vmatpush1.bf16.msra.mxu1 %v12970_v47 }
 0x570   :  { %4258 = vmatprep.subr.bf16.mxu1 %v12975_v16 }
 0x572   :  { %11294 = vmatmul.mubr.msk.bf16.vlgmr.msra.gmra.mrb[104].mxu1 %vm639_vm0, %v3988_v49  ;;  %v12984_v49 = vld [vmem:[%s18029_s7 + $0x2e4] ss:$16 sps:$4 sm:$0xff]  }
 0x573   :  { %4259 = vmatpush1.bf16.msra.mxu1 %v12973_v43  ;;  %4290 = vmatprep.mubr.bf16.mxu1 %v13861_v60 }
 0x574   :  { %4260 = vmatprep.subr.bf16.mxu1 %v12978_v32 }
 0x577   :  { %4261 = vmatpush1.bf16.msra.mxu1 %v12976_v36 }
 0x578   :  { %4262 = vmatprep.subr.bf16.mxu1 %v12981_v4 }
 0x57b   :  { %4263 = vmatpush1.bf16.msra.mxu1 %v12979_v28 }
 0x57c   :  { %4264 = vmatprep.subr.bf16.mxu1 %v12984_v49  ;;  %v12985_v49 = vld [vmem:[%s18029_s7 + $0x300] ss:$16 sps:$4 sm:$0xff]  }
 0x57f   :  { %4265 = vmatpush1.bf16.msra.mxu1 %v12982_v40  ;;  %v12987_v40 = vld [vmem:[%s18029_s7 + $0x304] ss:$16 sps:$4 sm:$0xff]  }
 0x580   :  { %12153 = vmatprep.subr.bf16.mxu1 %v15566_v57  ;;  %4571 = vmatprep.subr.bf16.mxu0 %v12987_v40  ;;  %v13014_v40 = vld [vmem:[%s18029_s7 + $0x38c] ss:$16 sps:$4 sm:$0xff]  }
 0x581   :  { %4572 = vmatpush1.bf16.msra.mxu0 %v12985_v49  ;;  %v13011_v49 = vld [vmem:[%s18029_s7 + $0x384] ss:$16 sps:$4 sm:$0xff]  }
 0x582   :  { %11312 = vmatmul.mubr.msk.bf16.vlgmr.msra.gmra.mrb[108].mxu1 %vm639_vm0, %v4174_v44  ;;  %v15609_v44 = vld [vmem:[%s18027_s5 + $0x58] sm:$0xff]  }
 0x583   :  { %12154 = vmatpush3.bf16.msra.mxu1 %v15579_v62  ;;  %4378 = vmatprep.mubr.bf16.mxu1 %v2763_v59  ;;  %v12988_v59 = vld [vmem:[%s18029_s7 + $0x308] ss:$16 sps:$4 sm:$0xff]  }
 0x584   :  { %12155 = vmatprep.subr.bf16.mxu1 %v15585_v13 }
 0x587   :  { %12156 = vmatpush3.bf16.msra.mxu1 %v15591_v48 }
 0x588   :  { %12157 = vmatprep.subr.bf16.mxu1 %v15597_v18 }
 0x58b   :  { %12158 = vmatpush3.bf16.msra.mxu1 %v15603_v21 }
 0x58c   :  { %12159 = vmatprep.subr.bf16.mxu1 %v15609_v44 }
 0x58f   :  { %12160 = vmatpush3.bf16.msra.mxu1 %v15615_v38 }
 0x590   :  { %12161 = vmatprep.subr.bf16.mxu1 %v15621_v1 }
 0x593   :  { %12162 = vmatpush3.bf16.msra.mxu1 %v15627_v20 }
 0x594   :  { %12163 = vmatprep.subr.bf16.mxu1 %v15633_v3 }
 0x597   :  { %12164 = vmatpush3.bf16.msra.mxu1 %v15639_v34 }
 0x598   :  { %12165 = vmatprep.subr.bf16.mxu1 %v15645_v5 }
 0x59b   :  { %12166 = vmatpush3.bf16.msra.mxu1 %v15651_v2 }
 0x59c   :  { %12167 = vmatprep.subr.bf16.mxu1 %v15657_v52 }
 0x59f   :  { %12168 = vmatpush3.bf16.msra.mxu1 %v14930_v51 }
 0x5a0   :  { %12622 = vmatprep.subr.bf16.mxu1 %v13859_v63 }
 0x5a2   :  { %4379 = vmatmul.mubr.bf16.vlgmr.msra.gmra.mrb[112].mxu1 %v2739_v22  ;;  %v12990_v22 = vld [vmem:[%s18029_s7 + $0x30c] ss:$16 sps:$4 sm:$0xff]  }
 0x5a3   :  { %12623 = vmatpush3.bf16.msra.mxu1 %v15169_v29  ;;  %12630 = vmatprep.mubr.msk.bf16.mxu1 %vm13860_vm4, %v13859_v63 }
 0x5a4   :  { %12624 = vmatprep.subr.bf16.mxu1 %v13859_v63 }
 0x5a7   :  { %12625 = vmatpush3.bf16.msra.mxu1 %v15179_v46 }
 0x5a8   :  { %12626 = vmatprep.subr.bf16.mxu1 %v13859_v63 }
 0x5ab   :  { %12627 = vmatpush3.bf16.msra.mxu1 %v15188_v19 }
 0x5ac   :  { %12628 = vmatprep.subr.bf16.mxu1 %v13859_v63 }
 0x5af   :  { %12629 = vmatpush3.bf16.msra.mxu1 %v15195_v17 }
 0x5b0   :  { %4612 = vmatprep.subr.bf16.mxu1 %v12990_v22 }
 0x5b2   :  { %12631 = vmatmul.mubr.msk.bf16.vlgmr.msra.gmra.mrb[116].mxu1 %vm639_vm0, %v15003_v14 }
 0x5b3   :  { %4644 = vmatprep.mubr.bf16.mxu1 %v13861_v60  ;;  %4613 = vmatpush1.bf16.msra.mxu1 %v12988_v59 }
 0x5d5   :  { %v3387_v51 = vpop.f32.mrb[76].mxu1  ;;  %v15677_v58 = vpop.f32.mrb[160].mxu0 }
 0x5d6   :  { %v3389_v29 = vpop.f32.mrb[77].mxu1  ;;  %v15679_v0 = vpop.f32.mrb[161].mxu0 }
 0x5d7   :  { %v3391_v46 = vpop.f32.mrb[78].mxu1  ;;  %v3965_v6 = vpop.f32.mrb[162].mxu0 }
 0x5d8   :  { %v3392_v42 = vpop.f32.mrb[79].mxu1  ;;  %v3966_v33 = vpop.f32.mrb[163].mxu0  ;;  %v12991_v46 = vld [vmem:[%s18029_s7 + $0x320] ss:$16 sps:$4 sm:$0xff]   ;;  %v12994_v6 = vld [vmem:[%s18029_s7 + $0x328] ss:$16 sps:$4 sm:$0xff]  }
 0x5d9   :  { %v12999_v42 = vld [vmem:[%s18029_s7 + $0x344] ss:$16 sps:$4 sm:$0xff]   ;;  %v13002_v33 = vld [vmem:[%s18029_s7 + $0x34c] ss:$16 sps:$4 sm:$0xff]  }
 0x5e5   :  { %v3428_v19 = vpop.f32.mrb[80].mxu1  ;;  %v15681_v8 = vpop.f32.mrb[164].mxu0 }
 0x5e6   :  { %v3430_v53 = vpop.f32.mrb[81].mxu1  ;;  %v15683_v17 = vpop.f32.mrb[165].mxu0 }
 0x5e7   :  { %v3432_v55 = vpop.f32.mrb[82].mxu1  ;;  %v4151_v54 = vpop.f32.mrb[166].mxu0 }
 0x5e8   :  { %v3433_v24 = vpop.f32.mrb[83].mxu1  ;;  %v4152_v27 = vpop.f32.mrb[167].mxu0  ;;  %v12997_v54 = vld [vmem:[%s18029_s7 + $0x340] ss:$16 sps:$4 sm:$0xff]  }
 0x5e9   :  { %v13000_v24 = vld [vmem:[%s18029_s7 + $0x348] ss:$16 sps:$4 sm:$0xff]  }
 0x5f5   :  { %v3552_v15 = vpop.f32.mrb[84].mxu1  ;;  %v15685_v11 = vpop.f32.mrb[168].mxu0 }
 0x5f6   :  { %v3553_v50 = vadd.f32 %v3552_v15, %v3387_v51  ;;  %v3554_v47 = vpop.f32.mrb[85].mxu1  ;;  %v15687_v16 = vpop.f32.mrb[169].mxu0  ;;  %v12993_v51 = vld [vmem:[%s18029_s7 + $0x324] ss:$16 sps:$4 sm:$0xff]  }
 0x5f7   :  { %v3555_v43 = vadd.f32 %v3554_v47, %v3389_v29  ;;  %v3556_v32 = vpop.f32.mrb[86].mxu1  ;;  %v4337_v36 = vpop.f32.mrb[170].mxu0  ;;  %v12996_v29 = vld [vmem:[%s18029_s7 + $0x32c] ss:$16 sps:$4 sm:$0xff]   ;;  %4573 = vmatprep.subr.bf16.mxu0 %v12993_v51 }
 0x5f8   :  { %v3557_v4 = vpop.f32.mrb[87].mxu1  ;;  %v4338_v28 = vpop.f32.mrb[171].mxu0  ;;  %4614 = vmatprep.subr.bf16.mxu1 %v12996_v29  ;;  %4574 = vmatpush1.bf16.msra.mxu0 %v12991_v46 }
 0x5f9   :  { %4615 = vmatpush1.bf16.msra.mxu1 %v12994_v6  ;;  %4575 = vmatprep.subr.bf16.mxu0 %v12999_v42  ;;  %v13005_v4 = vld [vmem:[%s18029_s7 + $0x364] ss:$16 sps:$4 sm:$0xff]   ;;  %v13008_v28 = vld [vmem:[%s18029_s7 + $0x36c] ss:$16 sps:$4 sm:$0xff]  }
 0x5fa   :  { %4616 = vmatprep.subr.bf16.mxu1 %v13002_v33 }
 0x5fc   :  { %4576 = vmatpush1.bf16.msra.mxu0 %v12997_v54 }
 0x5fd   :  { %4617 = vmatpush1.bf16.msra.mxu1 %v13000_v24  ;;  %4577 = vmatprep.subr.bf16.mxu0 %v13005_v4 }
 0x5fe   :  { %4618 = vmatprep.subr.bf16.mxu1 %v13008_v28 }
 0x605   :  { %v3593_v55 = vpop.f32.mrb[88].mxu1 }
 0x606   :  { %v3594_v27 = vadd.f32 %v3593_v55, %v3428_v19  ;;  %v3595_v15 = vpop.f32.mrb[89].mxu1  ;;  %v13003_v19 = vld [vmem:[%s18029_s7 + $0x360] ss:$16 sps:$4 sm:$0xff]  }
 0x607   :  { %v3596_v47 = vadd.f32 %v3595_v15, %v3430_v53  ;;  %v3597_v32 = vpop.f32.mrb[90].mxu1  ;;  %v13006_v53 = vld [vmem:[%s18029_s7 + $0x368] ss:$16 sps:$4 sm:$0xff]   ;;  %4578 = vmatpush1.bf16.msra.mxu0 %v13003_v19 }
 0x608   :  { %v3598_v36 = vpop.f32.mrb[91].mxu1  ;;  %4619 = vmatpush1.bf16.msra.mxu1 %v13006_v53  ;;  %4758 = vmatprep.subr.bf16.mxu0 %v13011_v49 }
 0x609   :  { %4799 = vmatprep.subr.bf16.mxu1 %v13014_v40 }
 0x615   :  { %v3734_v59 = vpop.f32.mrb[92].mxu1  ;;  %v12191_v22 = vpop.f32.mrb[172].mxu0 }
 0x616   :  { %v3782_v51 = vadd.f32 %v3734_v59, %v3553_v50  ;;  %v3736_v29 = vpop.f32.mrb[93].mxu1  ;;  %v12192_v46 = vpop.f32.mrb[173].mxu0 }
 0x617   :  { %v3783_v6 = vadd.f32 %v3736_v29, %v3555_v43  ;;  %v12193_v42 = vadd.f32 %v12192_v46, %v12191_v22  ;;  %v3738_v33 = vpop.f32.mrb[94].mxu1  ;;  %v12194_v55 = vpop.f32.mrb[174].mxu0 }
 0x618   :  { %v3739_v54 = vpop.f32.mrb[95].mxu1  ;;  %v12195_v24 = vpop.f32.mrb[175].mxu0 }
 0x619   :  { %v12196_v15 = vadd.f32 %v12195_v24, %v12194_v55 }
 0x625   :  { %v3775_v32 = vpop.f32.mrb[96].mxu1 }
 0x626   :  { %v3784_v36 = vadd.f32 %v3775_v32, %v3594_v27  ;;  %v3777_v4 = vpop.f32.mrb[97].mxu1 }
 0x627   :  { %v3785_v28 = vadd.f32 %v3777_v4, %v3596_v47  ;;  %v3779_v19 = vpop.f32.mrb[98].mxu1 }
 0x628   :  { %v3970_v53 = vadd.f32 %v15677_v58, %v3784_v36  ;;  %v3780_v49 = vpop.f32.mrb[99].mxu1 }
 0x629   :  { %v3971_v40 = vadd.f32 %v15679_v0, %v3785_v28 }
 0x62a   :  { %v4156_v50 = vadd.f32 %v15681_v8, %v3970_v53 }
 0x62b   :  { %v4157_v43 = vadd.f32 %v15683_v17, %v3971_v40 }
 0x62c   :  { %v15748_v59 = vadd.f32 %v15685_v11, %v4156_v50 }
 0x62d   :  { %v15751_v22 = vadd.f32 %v15687_v16, %v4157_v43 }
 0x635   :  { %v3920_v29 = vpop.f32.mrb[100].mxu1 }
 0x636   :  { %v3968_v27 = vadd.f32 %v3920_v29, %v3782_v51  ;;  %v3922_v46 = vpop.f32.mrb[101].mxu1 }
 0x637   :  { %v3969_v47 = vadd.f32 %v3922_v46, %v3783_v6  ;;  %v3924_v33 = vpop.f32.mrb[102].mxu1 }
 0x638   :  { %v3925_v55 = vpop.f32.mrb[103].mxu1 }
 0x645   :  { %v4106_v58 = vpop.f32.mrb[104].mxu1 }
 0x646   :  { %v4154_v54 = vadd.f32 %v4106_v58, %v3968_v27  ;;  %v4108_v24 = vpop.f32.mrb[105].mxu1 }
 0x647   :  { %v4155_v0 = vadd.f32 %v4108_v24, %v3969_v47  ;;  %v4110_v32 = vpop.f32.mrb[106].mxu1 }
 0x648   :  { %v4111_v8 = vpop.f32.mrb[107].mxu1  ;;  %v13009_v32 = vld [vmem:[%s18029_s7 + $0x380] ss:$16 sps:$4 sm:$0xff]  }
 0x649   :  { %v13012_v8 = vld [vmem:[%s18029_s7 + $0x388] ss:$16 sps:$4 sm:$0xff]  }
 0x655   :  { %v4292_v36 = vpop.f32.mrb[108].mxu1 }
 0x656   :  { %v15753_v17 = vadd.f32 %v4292_v36, %v4154_v54  ;;  %v4294_v11 = vpop.f32.mrb[109].mxu1 }
 0x657   :  { %v15755_v4 = vadd.f32 %v4294_v11, %v4155_v0  ;;  %v4296_v16 = vpop.f32.mrb[110].mxu1  ;;  %v13018_v11 = vld [vmem:[%s18029_s7 + $0x3a8] ss:$16 sps:$4 sm:$0xff]  }
 0x658   :  { %v4297_v28 = vpop.f32.mrb[111].mxu1  ;;  %v13023_v16 = vld [vmem:[%s18029_s7 + $0x3c4] ss:$16 sps:$4 sm:$0xff]  }
 0x659   :  { %v13026_v28 = vld [vmem:[%s18029_s7 + $0x3cc] ss:$16 sps:$4 sm:$0xff]  }
 0x675   :  { %v12169_v19 = vpop.f32.mrb[112].mxu1 }
 0x676   :  { %v12170_v51 = vpop.f32.mrb[113].mxu1 }
 0x677   :  { %v12171_v53 = vadd.f32 %v12170_v51, %v12169_v19  ;;  %v12172_v6 = vpop.f32.mrb[114].mxu1  ;;  %v13021_v19 = vld [vmem:[%s18029_s7 + $0x3c0] ss:$16 sps:$4 sm:$0xff]   ;;  %v13024_v51 = vld [vmem:[%s18029_s7 + $0x3c8] ss:$16 sps:$4 sm:$0xff]  }
 0x678   :  { %v12173_v49 = vpop.f32.mrb[115].mxu1 }
 0x679   :  { %v4381_v40 = vadd.f32 %v12171_v53, %v15256_v35  ;;  %v12174_v50 = vadd.f32 %v12173_v49, %v12172_v6  ;;  %v13029_v53 = vld [vmem:[%s18029_s7 + $0x3e4] ss:$16 sps:$4 sm:$0xff]   ;;  %v13032_v6 = vld [vmem:[%s18029_s7 + $0x3ec] ss:$16 sps:$4 sm:$0xff]   ;;  %v13027_v49 = vld [vmem:[%s18029_s7 + $0x3e0] ss:$16 sps:$4 sm:$0xff]  }
 0x67b   :  { %v4384_v43 = vadd.f32 %v12174_v50, %v15256_v35  ;;  %v4422_v29 = vadd.f32 %v12193_v42, %v4381_v40  ;;  %v13017_v35 = vld [vmem:[%s18029_s7 + $0x3a4] ss:$16 sps:$4 sm:$0xff]   ;;  %v13020_v42 = vld [vmem:[%s18029_s7 + $0x3ac] ss:$16 sps:$4 sm:$0xff]   ;;  %v13030_v40 = vld [vmem:[%s18029_s7 + $0x3e8] ss:$16 sps:$4 sm:$0xff]  }
 0x67c   :  { %v13035_v50 = vld [vmem:[%s18029_s7 + $0x404] ss:$16 sps:$4 sm:$0xff]  }
 0x67d   :  { %v4425_v27 = vadd.f32 %v12196_v15, %v4384_v43  ;;  %v13015_v15 = vld [vmem:[%s18029_s7 + $0x3a0] ss:$16 sps:$4 sm:$0xff]   ;;  %v13038_v43 = vld [vmem:[%s18029_s7 + $0x40c] ss:$16 sps:$4 sm:$0xff]  }
 0x685   :  { %v4462_v46 = vpop.f32.mrb[116].mxu1 }
 0x686   :  { %v4463_v47 = vadd.f32 %v4462_v46, %v4422_v29  ;;  %v12632_v33 = vpop.f32.mrb[117].mxu1  ;;  %v13033_v29 = vld [vmem:[%s18029_s7 + $0x400] ss:$16 sps:$4 sm:$0xff]  }
 0x687   :  { %v4465_v55 = vpop.f32.mrb[118].mxu1  ;;  %v13044_v33 = vld [vmem:[%s18029_s7 + $0x42c] ss:$16 sps:$4 sm:$0xff]  }
 0x688   :  { %v4466_v58 = vadd.f32 %v4465_v55, %v4425_v27  ;;  %v12633_v54 = vpop.f32.mrb[119].mxu1  ;;  %v4469_v24 = vmax.f32 %v4463_v47, 0.0  ;;  %v13036_v27 = vld [vmem:[%s18029_s7 + $0x408] ss:$16 sps:$4 sm:$0xff]   ;;  %v13041_v47 = vld [vmem:[%s18029_s7 + $0x424] ss:$16 sps:$4 sm:$0xff]  }
 0x689   :  { %v13039_v55 = vld [vmem:[%s18029_s7 + $0x420] ss:$16 sps:$4 sm:$0xff]   ;;  %v13047_v54 = vld [vmem:[%s18029_s7 + $0x444] ss:$16 sps:$4 sm:$0xff]  }
 0x68a   :  { %v4470_v0 = vmax.f32 %v4466_v58, 0.0  ;;  %v13042_v58 = vld [vmem:[%s18029_s7 + $0x428] ss:$16 sps:$4 sm:$0xff]  }
 0x68c   :  { %v15765_v36 = vpack.c.bf16 %v4470_v0, %v4469_v24  ;;  %v13050_v24 = vld [vmem:[%s18029_s7 + $0x44c] ss:$16 sps:$4 sm:$0xff]   ;;  %v13045_v0 = vld [vmem:[%s18029_s7 + $0x440] ss:$16 sps:$4 sm:$0xff]  }
 0x68e   :  { %11331 = vmatmul.mubr.msk.bf16.vlgmr.msra.gmra.mrb[176].mxu0 %vm639_vm0, %v15765_v36  ;;  %11332 = vmatmul.mubr.msk.bf16.vlgmr.msra.gmra.mrb[120].mxu1 %vm639_vm0, %v15765_v36  ;;  %v4674_v46 = vrot.slane %v15765_v36, 1 }
 0x68f   :  { %4759 = vmatpush1.bf16.msra.mxu0 %v13009_v32  ;;  %4800 = vmatpush1.bf16.msra.mxu1 %v13012_v8  ;;  %v13048_v32 = vld [vmem:[%s18029_s7 + $0x448] ss:$16 sps:$4 sm:$0xff]   ;;  %v13053_v8 = vld [vmem:[%s18029_s7 + $0x464] ss:$16 sps:$4 sm:$0xff]  }
 0x690   :  { %4760 = vmatprep.subr.bf16.mxu0 %v13017_v35  ;;  %4801 = vmatprep.subr.bf16.mxu1 %v13020_v42  ;;  %v13056_v35 = vld [vmem:[%s18029_s7 + $0x46c] ss:$16 sps:$4 sm:$0xff]   ;;  %v13051_v42 = vld [vmem:[%s18029_s7 + $0x460] ss:$16 sps:$4 sm:$0xff]  }
 0x691   :  { %4790 = vmatprep.mubr.bf16.mxu0 %v13861_v60  ;;  %4831 = vmatprep.mubr.bf16.mxu1 %v13861_v60 }
 0x693   :  { %4761 = vmatpush1.bf16.msra.mxu0 %v13015_v15  ;;  %4802 = vmatpush1.bf16.msra.mxu1 %v13018_v11  ;;  %v13054_v15 = vld [vmem:[%s18029_s7 + $0x468] ss:$16 sps:$4 sm:$0xff]   ;;  %v13059_v11 = vld [vmem:[%s18029_s7 + $0x484] ss:$16 sps:$4 sm:$0xff]  }
 0x694   :  { %4762 = vmatprep.subr.bf16.mxu0 %v13023_v16  ;;  %4803 = vmatprep.subr.bf16.mxu1 %v13026_v28  ;;  %v13062_v16 = vld [vmem:[%s18029_s7 + $0x48c] ss:$16 sps:$4 sm:$0xff]   ;;  %v13057_v28 = vld [vmem:[%s18029_s7 + $0x480] ss:$16 sps:$4 sm:$0xff]  }
 0x697   :  { %4763 = vmatpush1.bf16.msra.mxu0 %v13021_v19  ;;  %4804 = vmatpush1.bf16.msra.mxu1 %v13024_v51  ;;  %v13060_v19 = vld [vmem:[%s18029_s7 + $0x488] ss:$16 sps:$4 sm:$0xff]   ;;  %v4860_v51 = vrot.slane %v15765_v36, 2 }
 0x698   :  { %4764 = vmatprep.subr.bf16.mxu0 %v13029_v53  ;;  %4805 = vmatprep.subr.bf16.mxu1 %v13032_v6  ;;  %v13065_v53 = vld [vmem:[%s18029_s7 + $0x4a4] ss:$16 sps:$4 sm:$0xff]   ;;  %v13068_v6 = vld [vmem:[%s18029_s7 + $0x4ac] ss:$16 sps:$4 sm:$0xff]  }
 0x69b   :  { %4765 = vmatpush1.bf16.msra.mxu0 %v13027_v49  ;;  %4806 = vmatpush1.bf16.msra.mxu1 %v13030_v40  ;;  %v13063_v49 = vld [vmem:[%s18029_s7 + $0x4a0] ss:$16 sps:$4 sm:$0xff]   ;;  %v13066_v40 = vld [vmem:[%s18029_s7 + $0x4a8] ss:$16 sps:$4 sm:$0xff]  }
 0x69c   :  { %4944 = vmatprep.subr.bf16.mxu0 %v13035_v50  ;;  %4985 = vmatprep.subr.bf16.mxu1 %v13038_v43  ;;  %v13071_v50 = vld [vmem:[%s18029_s7 + $0x4c4] ss:$16 sps:$4 sm:$0xff]   ;;  %v13074_v43 = vld [vmem:[%s18029_s7 + $0x4cc] ss:$16 sps:$4 sm:$0xff]  }
 0x69e   :  { %11349 = vmatmul.mubr.msk.bf16.vlgmr.msra.gmra.mrb[180].mxu0 %vm639_vm0, %v4674_v46  ;;  %11350 = vmatmul.mubr.msk.bf16.vlgmr.msra.gmra.mrb[124].mxu1 %vm639_vm0, %v4674_v46  ;;  %v13077_v46 = vld [vmem:[%s18029_s7 + $0x4e4] ss:$16 sps:$4 sm:$0xff]  }
 0x69f   :  { %4945 = vmatpush1.bf16.msra.mxu0 %v13033_v29  ;;  %4986 = vmatpush1.bf16.msra.mxu1 %v13036_v27  ;;  %v13069_v29 = vld [vmem:[%s18029_s7 + $0x4c0] ss:$16 sps:$4 sm:$0xff]   ;;  %v13072_v27 = vld [vmem:[%s18029_s7 + $0x4c8] ss:$16 sps:$4 sm:$0xff]  }
 0x6a0   :  { %4946 = vmatprep.subr.bf16.mxu0 %v13041_v47  ;;  %4987 = vmatprep.subr.bf16.mxu1 %v13044_v33  ;;  %v13080_v47 = vld [vmem:[%s18029_s7 + $0x4ec] ss:$16 sps:$4 sm:$0xff]   ;;  %v13075_v33 = vld [vmem:[%s18029_s7 + $0x4e0] ss:$16 sps:$4 sm:$0xff]  }
 0x6a1   :  { %4976 = vmatprep.mubr.bf16.mxu0 %v13861_v60  ;;  %5017 = vmatprep.mubr.bf16.mxu1 %v13861_v60 }
 0x6a3   :  { %4947 = vmatpush1.bf16.msra.mxu0 %v13039_v55  ;;  %4988 = vmatpush1.bf16.msra.mxu1 %v13042_v58  ;;  %v13078_v55 = vld [vmem:[%s18029_s7 + $0x4e8] ss:$16 sps:$4 sm:$0xff]   ;;  %v13083_v58 = vld [vmem:[%s18029_s7 + $0x504] ss:$16 sps:$4 sm:$0xff]  }
 0x6a4   :  { %4948 = vmatprep.subr.bf16.mxu0 %v13047_v54  ;;  %4989 = vmatprep.subr.bf16.mxu1 %v13050_v24  ;;  %v13086_v54 = vld [vmem:[%s18029_s7 + $0x50c] ss:$16 sps:$4 sm:$0xff]   ;;  %v13081_v24 = vld [vmem:[%s18029_s7 + $0x500] ss:$16 sps:$4 sm:$0xff]  }
 0x6a7   :  { %4949 = vmatpush1.bf16.msra.mxu0 %v13045_v0  ;;  %4990 = vmatpush1.bf16.msra.mxu1 %v13048_v32  ;;  %v13084_v0 = vld [vmem:[%s18029_s7 + $0x508] ss:$16 sps:$4 sm:$0xff]   ;;  %v5046_v32 = vrot.slane %v15765_v36, 3 }
 0x6a8   :  { %4950 = vmatprep.subr.bf16.mxu0 %v13053_v8  ;;  %4991 = vmatprep.subr.bf16.mxu1 %v13056_v35  ;;  %v13089_v8 = vld [vmem:[%s18029_s7 + $0x524] ss:$16 sps:$4 sm:$0xff]   ;;  %v13092_v35 = vld [vmem:[%s18029_s7 + $0x52c] ss:$16 sps:$4 sm:$0xff]  }
 0x6ab   :  { %4951 = vmatpush1.bf16.msra.mxu0 %v13051_v42  ;;  %4992 = vmatpush1.bf16.msra.mxu1 %v13054_v15  ;;  %v13087_v42 = vld [vmem:[%s18029_s7 + $0x520] ss:$16 sps:$4 sm:$0xff]   ;;  %v13090_v15 = vld [vmem:[%s18029_s7 + $0x528] ss:$16 sps:$4 sm:$0xff]  }
 0x6ac   :  { %5130 = vmatprep.subr.bf16.mxu0 %v13059_v11  ;;  %5171 = vmatprep.subr.bf16.mxu1 %v13062_v16  ;;  %v13095_v11 = vld [vmem:[%s18029_s7 + $0x544] ss:$16 sps:$4 sm:$0xff]   ;;  %v13098_v16 = vld [vmem:[%s18029_s7 + $0x54c] ss:$16 sps:$4 sm:$0xff]  }
 0x6ae   :  { %11367 = vmatmul.mubr.msk.bf16.vlgmr.msra.gmra.mrb[184].mxu0 %vm639_vm0, %v4860_v51  ;;  %11368 = vmatmul.mubr.msk.bf16.vlgmr.msra.gmra.mrb[128].mxu1 %vm639_vm0, %v4860_v51  ;;  %v13101_v51 = vld [vmem:[%s18029_s7 + $0x564] ss:$16 sps:$4 sm:$0xff]  }
 0x6af   :  { %5131 = vmatpush1.bf16.msra.mxu0 %v13057_v28  ;;  %5172 = vmatpush1.bf16.msra.mxu1 %v13060_v19  ;;  %v13093_v28 = vld [vmem:[%s18029_s7 + $0x540] ss:$16 sps:$4 sm:$0xff]   ;;  %v13096_v19 = vld [vmem:[%s18029_s7 + $0x548] ss:$16 sps:$4 sm:$0xff]  }
 0x6b0   :  { %5132 = vmatprep.subr.bf16.mxu0 %v13065_v53  ;;  %5173 = vmatprep.subr.bf16.mxu1 %v13068_v6  ;;  %v13104_v53 = vld [vmem:[%s18029_s7 + $0x56c] ss:$16 sps:$4 sm:$0xff]   ;;  %v13099_v6 = vld [vmem:[%s18029_s7 + $0x560] ss:$16 sps:$4 sm:$0xff]  }
 0x6b1   :  { %5162 = vmatprep.mubr.bf16.mxu0 %v13861_v60  ;;  %5203 = vmatprep.mubr.bf16.mxu1 %v13861_v60 }
 0x6b3   :  { %5133 = vmatpush1.bf16.msra.mxu0 %v13063_v49  ;;  %5174 = vmatpush1.bf16.msra.mxu1 %v13066_v40  ;;  %v13102_v49 = vld [vmem:[%s18029_s7 + $0x568] ss:$16 sps:$4 sm:$0xff]   ;;  %v13107_v40 = vld [vmem:[%s18029_s7 + $0x584] ss:$16 sps:$4 sm:$0xff]  }
 0x6b4   :  { %5134 = vmatprep.subr.bf16.mxu0 %v13071_v50  ;;  %5175 = vmatprep.subr.bf16.mxu1 %v13074_v43  ;;  %v13110_v50 = vld [vmem:[%s18029_s7 + $0x58c] ss:$16 sps:$4 sm:$0xff]   ;;  %v13105_v43 = vld [vmem:[%s18029_s7 + $0x580] ss:$16 sps:$4 sm:$0xff]  }
 0x6b7   :  { %5135 = vmatpush1.bf16.msra.mxu0 %v13069_v29  ;;  %5176 = vmatpush1.bf16.msra.mxu1 %v13072_v27  ;;  %v13108_v29 = vld [vmem:[%s18029_s7 + $0x588] ss:$16 sps:$4 sm:$0xff]   ;;  %v5232_v27 = vrot.slane %v15765_v36, 4 }
 0x6b8   :  { %5136 = vmatprep.subr.bf16.mxu0 %v13077_v46  ;;  %5177 = vmatprep.subr.bf16.mxu1 %v13080_v47  ;;  %v13113_v46 = vld [vmem:[%s18029_s7 + $0x5a4] ss:$16 sps:$4 sm:$0xff]   ;;  %v13116_v47 = vld [vmem:[%s18029_s7 + $0x5ac] ss:$16 sps:$4 sm:$0xff]  }
 0x6bb   :  { %5137 = vmatpush1.bf16.msra.mxu0 %v13075_v33  ;;  %5178 = vmatpush1.bf16.msra.mxu1 %v13078_v55  ;;  %v13111_v33 = vld [vmem:[%s18029_s7 + $0x5a0] ss:$16 sps:$4 sm:$0xff]   ;;  %v13114_v55 = vld [vmem:[%s18029_s7 + $0x5a8] ss:$16 sps:$4 sm:$0xff]  }
 0x6bc   :  { %5316 = vmatprep.subr.bf16.mxu0 %v13083_v58  ;;  %5357 = vmatprep.subr.bf16.mxu1 %v13086_v54  ;;  %v13119_v58 = vld [vmem:[%s18029_s7 + $0x5c4] ss:$16 sps:$4 sm:$0xff]   ;;  %v13122_v54 = vld [vmem:[%s18029_s7 + $0x5cc] ss:$16 sps:$4 sm:$0xff]  }
 0x6be   :  { %11385 = vmatmul.mubr.msk.bf16.vlgmr.msra.gmra.mrb[188].mxu0 %vm639_vm0, %v5046_v32  ;;  %11386 = vmatmul.mubr.msk.bf16.vlgmr.msra.gmra.mrb[132].mxu1 %vm639_vm0, %v5046_v32  ;;  %v13125_v32 = vld [vmem:[%s18029_s7 + $0x5e4] ss:$16 sps:$4 sm:$0xff]  }
 0x6bf   :  { %5317 = vmatpush1.bf16.msra.mxu0 %v13081_v24  ;;  %5358 = vmatpush1.bf16.msra.mxu1 %v13084_v0  ;;  %v13117_v24 = vld [vmem:[%s18029_s7 + $0x5c0] ss:$16 sps:$4 sm:$0xff]   ;;  %v13120_v0 = vld [vmem:[%s18029_s7 + $0x5c8] ss:$16 sps:$4 sm:$0xff]  }
 0x6c0   :  { %5318 = vmatprep.subr.bf16.mxu0 %v13089_v8  ;;  %5359 = vmatprep.subr.bf16.mxu1 %v13092_v35  ;;  %v13128_v8 = vld [vmem:[%s18029_s7 + $0x5ec] ss:$16 sps:$4 sm:$0xff]   ;;  %v13123_v35 = vld [vmem:[%s18029_s7 + $0x5e0] ss:$16 sps:$4 sm:$0xff]  }
 0x6c1   :  { %5348 = vmatprep.mubr.bf16.mxu0 %v13861_v60  ;;  %5389 = vmatprep.mubr.bf16.mxu1 %v13861_v60 }
 0x6c3   :  { %5319 = vmatpush1.bf16.msra.mxu0 %v13087_v42  ;;  %5360 = vmatpush1.bf16.msra.mxu1 %v13090_v15  ;;  %v13126_v42 = vld [vmem:[%s18029_s7 + $0x5e8] ss:$16 sps:$4 sm:$0xff]   ;;  %v2705_v15 = vpop.permute.xlu0 %2704 }
 0x6c4   :  { %5320 = vmatprep.subr.bf16.mxu0 %v13095_v11  ;;  %5361 = vmatprep.subr.bf16.mxu1 %v13098_v16  ;;  %v2690_v11 = vpop.permute.xlu1 %2689  ;;  %v5418_v16 = vrot.slane %v15765_v36, 5  ;;  %v16041_v36 = vld [vmem:[%s18027_s5 + $0x80] sm:$0xff]  }
 0x6c7   :  { %5321 = vmatpush1.bf16.msra.mxu0 %v13093_v28  ;;  %5362 = vmatpush1.bf16.msra.mxu1 %v13096_v19  ;;  %v16026_v28 = vld [vmem:[%s18027_s5 + $0xc0] sm:$0xff]   ;;  %v2767_v19 = vsel %vm639_vm0, %v14975_v41, %v2705_v15  ;;  %v16049_v41 = vld [vmem:[%s18027_s5 + $0xc8] sm:$0xff]  }
 0x6c8   :  { %5322 = vmatprep.subr.bf16.mxu0 %v13101_v51  ;;  %5363 = vmatprep.subr.bf16.mxu1 %v13104_v53  ;;  %v2719_v51 = vpop.permute.xlu0 %2718  ;;  %v16145_v53 = vld [vmem:[%s18027_s5 + $0xb8] sm:$0xff]  }
 0x6cb   :  { %5323 = vmatpush1.bf16.msra.mxu0 %v13099_v6  ;;  %5364 = vmatpush1.bf16.msra.mxu1 %v13102_v49  ;;  %v16156_v6 = vld [vmem:[%s18027_s5 + $0x100] sm:$0xff]  }
 0x6cc   :  { %5502 = vmatprep.subr.bf16.mxu0 %v13107_v40  ;;  %5543 = vmatprep.subr.bf16.mxu1 %v13110_v50  ;;  %v13129_v49 = vld [vmem:[%s18029_s7 + $0x600] ss:$16 sps:$4 sm:$0xff]   ;;  %v13131_v40 = vld [vmem:[%s18029_s7 + $0x604] ss:$16 sps:$4 sm:$0xff]   ;;  %v13132_v50 = vld [vmem:[%s18029_s7 + $0x608] ss:$16 sps:$4 sm:$0xff]  }
 0x6ce   :  { %11403 = vmatmul.mubr.msk.bf16.vlgmr.msra.gmra.mrb[192].mxu0 %vm639_vm0, %v5232_v27  ;;  %11404 = vmatmul.mubr.msk.bf16.vlgmr.msra.gmra.mrb[136].mxu1 %vm639_vm0, %v5232_v27  ;;  %v13140_v27 = vld [vmem:[%s18029_s7 + $0x62c] ss:$16 sps:$4 sm:$0xff]  }
 0x6cf   :  { %5503 = vmatpush1.bf16.msra.mxu0 %v13105_v43  ;;  %5544 = vmatpush1.bf16.msra.mxu1 %v13108_v29  ;;  %v13134_v43 = vld [vmem:[%s18029_s7 + $0x60c] ss:$16 sps:$4 sm:$0xff]   ;;  %v13137_v29 = vld [vmem:[%s18029_s7 + $0x624] ss:$16 sps:$4 sm:$0xff]  }
 0x6d0   :  { %5504 = vmatprep.subr.bf16.mxu0 %v13113_v46  ;;  %5545 = vmatprep.subr.bf16.mxu1 %v13116_v47  ;;  %v13135_v46 = vld [vmem:[%s18029_s7 + $0x620] ss:$16 sps:$4 sm:$0xff]   ;;  %v13138_v47 = vld [vmem:[%s18029_s7 + $0x628] ss:$16 sps:$4 sm:$0xff]  }
 0x6d1   :  { %5534 = vmatprep.mubr.bf16.mxu0 %v13861_v60  ;;  %5575 = vmatprep.mubr.bf16.mxu1 %v13861_v60 }
 0x6d3   :  { %5505 = vmatpush1.bf16.msra.mxu0 %v13111_v33  ;;  %5546 = vmatpush1.bf16.msra.mxu1 %v13114_v55  ;;  %v13143_v33 = vld [vmem:[%s18029_s7 + $0x644] ss:$16 sps:$4 sm:$0xff]   ;;  %v13146_v55 = vld [vmem:[%s18029_s7 + $0x64c] ss:$16 sps:$4 sm:$0xff]  }
 0x6d4   :  { %5506 = vmatprep.subr.bf16.mxu0 %v13119_v58  ;;  %5547 = vmatprep.subr.bf16.mxu1 %v13122_v54 }
 0x6d7   :  { %5507 = vmatpush1.bf16.msra.mxu0 %v13117_v24  ;;  %5548 = vmatpush1.bf16.msra.mxu1 %v13120_v0  ;;  %v13141_v24 = vld [vmem:[%s18029_s7 + $0x640] ss:$16 sps:$4 sm:$0xff]   ;;  %v13144_v0 = vld [vmem:[%s18029_s7 + $0x648] ss:$16 sps:$4 sm:$0xff]  }
 0x6d8   :  { %5508 = vmatprep.subr.bf16.mxu0 %v13125_v32  ;;  %5549 = vmatprep.subr.bf16.mxu1 %v13128_v8 }
 0x6db   :  { %5509 = vmatpush1.bf16.msra.mxu0 %v13123_v35  ;;  %5550 = vmatpush1.bf16.msra.mxu1 %v13126_v42 }
 0x6dc   :  { %12202 = vmatprep.subr.bf16.mxu0 %v15566_v57  ;;  %12224 = vmatprep.subr.bf16.mxu1 %v16026_v28  ;;  %v16036_v57 = vsel %vm639_vm0, %v14996_v9, %v2690_v11  ;;  %v13273_v9 = vld [vmem:[%s18029_s7 + $0x900] ss:$16 sps:$4 sm:$0xff]  }
 0x6de   :  { %11421 = vmatmul.mubr.msk.bf16.vlgmr.msra.gmra.mrb[196].mxu0 %vm639_vm0, %v5418_v16  ;;  %11422 = vmatmul.mubr.msk.bf16.vlgmr.msra.gmra.mrb[140].mxu1 %vm639_vm0, %v5418_v16 }
 0x6df   :  { %12203 = vmatpush3.bf16.msra.mxu0 %v15579_v62  ;;  %5622 = vmatprep.mubr.bf16.mxu0 %v2767_v19  ;;  %v16056_v62 = vld [vmem:[%s18027_s5 + $0x88] sm:$0xff]  }
 0x6e0   :  { %12225 = vmatpush3.bf16.msra.mxu1 %v16041_v36  ;;  %5663 = vmatprep.mubr.bf16.mxu1 %v16036_v57 }
 0x6e1   :  { %12204 = vmatprep.subr.bf16.mxu0 %v15585_v13  ;;  %12226 = vmatprep.subr.bf16.mxu1 %v16049_v41  ;;  %v16063_v13 = vld [vmem:[%s18027_s5 + $0xd0] sm:$0xff]  }
 0x6e3   :  { %12205 = vmatpush3.bf16.msra.mxu0 %v15591_v48  ;;  %v16070_v48 = vld [vmem:[%s18027_s5 + $0x90] sm:$0xff]  }
 0x6e4   :  { %12227 = vmatpush3.bf16.msra.mxu1 %v16056_v62  ;;  %12206 = vmatprep.subr.bf16.mxu0 %v15597_v18  ;;  %v16077_v18 = vld [vmem:[%s18027_s5 + $0xd8] sm:$0xff]  }
 0x6e5   :  { %12228 = vmatprep.subr.bf16.mxu1 %v16063_v13 }
 0x6e7   :  { %12207 = vmatpush3.bf16.msra.mxu0 %v15603_v21  ;;  %v16084_v21 = vld [vmem:[%s18027_s5 + $0x98] sm:$0xff]  }
 0x6e8   :  { %12229 = vmatpush3.bf16.msra.mxu1 %v16070_v48  ;;  %12208 = vmatprep.subr.bf16.mxu0 %v15609_v44  ;;  %v16091_v44 = vld [vmem:[%s18027_s5 + $0xe0] sm:$0xff]  }
 0x6e9   :  { %12230 = vmatprep.subr.bf16.mxu1 %v16077_v18 }
 0x6eb   :  { %12209 = vmatpush3.bf16.msra.mxu0 %v15615_v38  ;;  %v16098_v38 = vld [vmem:[%s18027_s5 + $0xa0] sm:$0xff]  }
 0x6ec   :  { %12231 = vmatpush3.bf16.msra.mxu1 %v16084_v21  ;;  %12210 = vmatprep.subr.bf16.mxu0 %v15621_v1  ;;  %v16105_v1 = vld [vmem:[%s18027_s5 + $0xe8] sm:$0xff]  }
 0x6ed   :  { %12232 = vmatprep.subr.bf16.mxu1 %v16091_v44 }
 0x6ef   :  { %12211 = vmatpush3.bf16.msra.mxu0 %v15627_v20  ;;  %v16112_v20 = vld [vmem:[%s18027_s5 + $0xa8] sm:$0xff]  }
 0x6f0   :  { %12233 = vmatpush3.bf16.msra.mxu1 %v16098_v38  ;;  %12212 = vmatprep.subr.bf16.mxu0 %v15633_v3  ;;  %v16119_v3 = vld [vmem:[%s18027_s5 + $0xf0] sm:$0xff]  }
 0x6f1   :  { %12234 = vmatprep.subr.bf16.mxu1 %v16105_v1 }
 0x6f3   :  { %12213 = vmatpush3.bf16.msra.mxu0 %v15639_v34  ;;  %v16126_v34 = vld [vmem:[%s18027_s5 + $0xb0] sm:$0xff]  }
 0x6f4   :  { %12235 = vmatpush3.bf16.msra.mxu1 %v16112_v20  ;;  %12214 = vmatprep.subr.bf16.mxu0 %v15645_v5  ;;  %v16133_v5 = vld [vmem:[%s18027_s5 + $0xf8] sm:$0xff]  }
 0x6f5   :  { %12236 = vmatprep.subr.bf16.mxu1 %v16119_v3 }
 0x6f7   :  { %12215 = vmatpush3.bf16.msra.mxu0 %v15651_v2  ;;  %v16139_v2 = vld [vmem:[%s18027_s5 + $0x38] sm:$0xff]  }
 0x6f8   :  { %12237 = vmatpush3.bf16.msra.mxu1 %v16126_v34  ;;  %12216 = vmatprep.subr.bf16.mxu0 %v15657_v52  ;;  %v2791_v52 = vsel %vm639_vm0, %v2678_v39, %v2719_v51  ;;  %v16173_v39 = vld [vmem:[%s18027_s5 + $0x110] sm:$0xff]  }
 0x6f9   :  { %12238 = vmatprep.subr.bf16.mxu1 %v16133_v5 }
 0x6fb   :  { %12217 = vmatpush3.bf16.msra.mxu0 %v16139_v2 }
 0x6fc   :  { %12239 = vmatpush3.bf16.msra.mxu1 %v16145_v53  ;;  %12634 = vmatprep.subr.bf16.mxu0 %v13859_v63 }
 0x6fd   :  { %5815 = vmatprep.subr.bf16.mxu1 %v13131_v40  ;;  %v13158_v40 = vld [vmem:[%s18029_s7 + $0x68c] ss:$16 sps:$4 sm:$0xff]  }
 0x6fe   :  { %5623 = vmatmul.mubr.bf16.vlgmr.msra.gmra.mrb[200].mxu0 %v15107_v30  ;;  %v16180_v30 = vld [vmem:[%s18027_s5 + $0x118] sm:$0xff]  }
 0x6ff   :  { %5664 = vmatmul.mubr.bf16.vlgmr.msra.gmra.mrb[144].mxu1 %v2791_v52  ;;  %12635 = vmatpush3.bf16.msra.mxu0 %v16156_v6 }
 0x700   :  { %12636 = vmatprep.subr.bf16.mxu0 %v13859_v63  ;;  %12642 = vmatprep.mubr.msk.bf16.mxu0 %vm13860_vm4, %v13859_v63 }
 0x701   :  { %5847 = vmatprep.mubr.bf16.mxu1 %v13861_v60  ;;  %5816 = vmatpush1.bf16.msra.mxu1 %v13129_v49  ;;  %v13155_v49 = vld [vmem:[%s18029_s7 + $0x684] ss:$16 sps:$4 sm:$0xff]  }
 0x702   :  { %5817 = vmatprep.subr.bf16.mxu1 %v13137_v29 }
 0x703   :  { %12637 = vmatpush3.bf16.msra.mxu0 %v16166_v61 }
 0x704   :  { %12638 = vmatprep.subr.bf16.mxu0 %v13859_v63 }
 0x705   :  { %5818 = vmatpush1.bf16.msra.mxu1 %v13135_v46 }
 0x706   :  { %5819 = vmatprep.subr.bf16.mxu1 %v13143_v33 }
 0x707   :  { %12639 = vmatpush3.bf16.msra.mxu0 %v16173_v39 }
 0x708   :  { %12640 = vmatprep.subr.bf16.mxu0 %v13859_v63 }
 0x709   :  { %5820 = vmatpush1.bf16.msra.mxu1 %v13141_v24 }
 0x70b   :  { %12641 = vmatpush3.bf16.msra.mxu0 %v16180_v30 }
 0x70c   :  { %5856 = vmatprep.subr.bf16.mxu0 %v13134_v43 }
 0x70e   :  { %12643 = vmatmul.mubr.msk.bf16.vlgmr.msra.gmra.mrb[204].mxu0 %vm639_vm0, %v15021_v23 }
 0x70f   :  { %5888 = vmatprep.mubr.bf16.mxu0 %v13861_v60  ;;  %5857 = vmatpush1.bf16.msra.mxu0 %v13132_v50 }
 0x710   :  { %5858 = vmatprep.subr.bf16.mxu0 %v13140_v27 }
 0x713   :  { %5859 = vmatpush1.bf16.msra.mxu0 %v13138_v47 }
 0x714   :  { %5860 = vmatprep.subr.bf16.mxu0 %v13146_v55 }
 0x717   :  { %5861 = vmatpush1.bf16.msra.mxu0 %v13144_v0 }
 0x761   :  { %v4605_v58 = vpop.f32.mrb[176].mxu0  ;;  %v4646_v54 = vpop.f32.mrb[120].mxu1 }
 0x762   :  { %v4653_v32 = vadd.f32 %v4605_v58, %v15753_v17  ;;  %v4655_v8 = vadd.f32 %v4646_v54, %v15748_v59  ;;  %v4607_v35 = vpop.f32.mrb[177].mxu0  ;;  %v4648_v42 = vpop.f32.mrb[121].mxu1  ;;  %v13149_v17 = vld [vmem:[%s18029_s7 + $0x664] ss:$16 sps:$4 sm:$0xff]   ;;  %v13152_v59 = vld [vmem:[%s18029_s7 + $0x66c] ss:$16 sps:$4 sm:$0xff]  }
 0x763   :  { %v4654_v15 = vadd.f32 %v4607_v35, %v15755_v4  ;;  %v4656_v11 = vadd.f32 %v4648_v42, %v15751_v22  ;;  %v4609_v16 = vpop.f32.mrb[178].mxu0  ;;  %v4650_v19 = vpop.f32.mrb[122].mxu1  ;;  %v13147_v4 = vld [vmem:[%s18029_s7 + $0x660] ss:$16 sps:$4 sm:$0xff]   ;;  %v13150_v22 = vld [vmem:[%s18029_s7 + $0x668] ss:$16 sps:$4 sm:$0xff]   ;;  %5821 = vmatprep.subr.bf16.mxu1 %v13149_v17  ;;  %5862 = vmatprep.subr.bf16.mxu0 %v13152_v59 }
 0x764   :  { %v4610_v51 = vpop.f32.mrb[179].mxu0  ;;  %v4651_v52 = vpop.f32.mrb[123].mxu1  ;;  %5822 = vmatpush1.bf16.msra.mxu1 %v13147_v4  ;;  %5863 = vmatpush1.bf16.msra.mxu0 %v13150_v22 }
 0x765   :  { %6002 = vmatprep.subr.bf16.mxu1 %v13155_v49  ;;  %6043 = vmatprep.subr.bf16.mxu0 %v13158_v40 }
 0x771   :  { %v4792_v50 = vpop.f32.mrb[180].mxu0  ;;  %v4833_v43 = vpop.f32.mrb[124].mxu1 }
 0x772   :  { %v4840_v29 = vadd.f32 %v4792_v50, %v4653_v32  ;;  %v4842_v27 = vadd.f32 %v4833_v43, %v4655_v8  ;;  %v4794_v46 = vpop.f32.mrb[181].mxu0  ;;  %v4835_v47 = vpop.f32.mrb[125].mxu1 }
 0x773   :  { %v4841_v33 = vadd.f32 %v4794_v46, %v4654_v15  ;;  %v4843_v55 = vadd.f32 %v4835_v47, %v4656_v11  ;;  %v4796_v58 = vpop.f32.mrb[182].mxu0  ;;  %v4837_v54 = vpop.f32.mrb[126].mxu1 }
 0x774   :  { %v4797_v24 = vpop.f32.mrb[183].mxu0  ;;  %v4838_v0 = vpop.f32.mrb[127].mxu1 }
 0x781   :  { %v4978_v35 = vpop.f32.mrb[184].mxu0  ;;  %v5019_v42 = vpop.f32.mrb[128].mxu1 }
 0x782   :  { %v5026_v16 = vadd.f32 %v4978_v35, %v4840_v29  ;;  %v5028_v19 = vadd.f32 %v5019_v42, %v4842_v27  ;;  %v4980_v51 = vpop.f32.mrb[185].mxu0  ;;  %v5021_v52 = vpop.f32.mrb[129].mxu1 }
 0x783   :  { %v5027_v17 = vadd.f32 %v4980_v51, %v4841_v33  ;;  %v5029_v59 = vadd.f32 %v5021_v52, %v4843_v55  ;;  %v4982_v4 = vpop.f32.mrb[186].mxu0  ;;  %v5023_v22 = vpop.f32.mrb[130].mxu1 }
 0x784   :  { %v4983_v32 = vpop.f32.mrb[187].mxu0  ;;  %v5024_v8 = vpop.f32.mrb[131].mxu1 }
 0x791   :  { %v5164_v49 = vpop.f32.mrb[188].mxu0  ;;  %v5205_v40 = vpop.f32.mrb[132].mxu1 }
 0x792   :  { %v5212_v15 = vadd.f32 %v5164_v49, %v5026_v16  ;;  %v5214_v11 = vadd.f32 %v5205_v40, %v5028_v19  ;;  %v5166_v50 = vpop.f32.mrb[189].mxu0  ;;  %v5207_v43 = vpop.f32.mrb[133].mxu1 }
 0x793   :  { %v5213_v46 = vadd.f32 %v5166_v50, %v5027_v17  ;;  %v5215_v47 = vadd.f32 %v5207_v43, %v5029_v59  ;;  %v5168_v58 = vpop.f32.mrb[190].mxu0  ;;  %v5209_v54 = vpop.f32.mrb[134].mxu1 }
 0x794   :  { %v5169_v29 = vpop.f32.mrb[191].mxu0  ;;  %v5210_v27 = vpop.f32.mrb[135].mxu1 }
 0x7a1   :  { %v5350_v24 = vpop.f32.mrb[192].mxu0  ;;  %v5391_v0 = vpop.f32.mrb[136].mxu1 }
 0x7a2   :  { %v5398_v33 = vadd.f32 %v5350_v24, %v5212_v15  ;;  %v5400_v55 = vadd.f32 %v5391_v0, %v5214_v11  ;;  %v5352_v35 = vpop.f32.mrb[193].mxu0  ;;  %v5393_v42 = vpop.f32.mrb[137].mxu1 }
 0x7a3   :  { %v5399_v51 = vadd.f32 %v5352_v35, %v5213_v46  ;;  %v5401_v52 = vadd.f32 %v5393_v42, %v5215_v47  ;;  %v5354_v4 = vpop.f32.mrb[194].mxu0  ;;  %v5395_v22 = vpop.f32.mrb[138].mxu1  ;;  %v16255_v42 = vld [vmem:[%s18028_s6] ss:$0 sm:$0xff] }
 0x7a4   :  { %v5355_v16 = vpop.f32.mrb[195].mxu0  ;;  %v5396_v19 = vpop.f32.mrb[139].mxu1 }
 0x7b1   :  { %v5536_v32 = vpop.f32.mrb[196].mxu0  ;;  %v5577_v8 = vpop.f32.mrb[140].mxu1 }
 0x7b2   :  { %v16244_v17 = vadd.f32 %v5536_v32, %v5398_v33  ;;  %v16246_v59 = vadd.f32 %v5577_v8, %v5400_v55  ;;  %v5538_v49 = vpop.f32.mrb[197].mxu0  ;;  %v5579_v40 = vpop.f32.mrb[141].mxu1 }
 0x7b3   :  { %v16248_v50 = vadd.f32 %v5538_v49, %v5399_v51  ;;  %v16250_v15 = vadd.f32 %v5579_v40, %v5401_v52  ;;  %v5540_v11 = vpop.f32.mrb[198].mxu0  ;;  %v5581_v43 = vpop.f32.mrb[142].mxu1 }
 0x7b4   :  { %v5541_v46 = vpop.f32.mrb[199].mxu0  ;;  %v5582_v47 = vpop.f32.mrb[143].mxu1 }
 0x7d1   :  { %v12218_v58 = vpop.f32.mrb[200].mxu0 }
 0x7d2   :  { %v12240_v54 = vpop.f32.mrb[144].mxu1  ;;  %v12219_v29 = vpop.f32.mrb[201].mxu0 }
 0x7d3   :  { %v12220_v27 = vadd.f32 %v12219_v29, %v12218_v58  ;;  %v12241_v24 = vpop.f32.mrb[145].mxu1  ;;  %v12221_v0 = vpop.f32.mrb[202].mxu0  ;;  %v13156_v29 = vld [vmem:[%s18029_s7 + $0x688] ss:$16 sps:$4 sm:$0xff]  }
 0x7d4   :  { %v12242_v33 = vadd.f32 %v12241_v24, %v12240_v54  ;;  %v12243_v35 = vpop.f32.mrb[146].mxu1  ;;  %v12222_v55 = vpop.f32.mrb[203].mxu0  ;;  %v13153_v54 = vld [vmem:[%s18029_s7 + $0x680] ss:$16 sps:$4 sm:$0xff]   ;;  %v13161_v24 = vld [vmem:[%s18029_s7 + $0x6a4] ss:$16 sps:$4 sm:$0xff]  }
 0x7d5   :  { %v5625_v51 = vadd.f32 %v16255_v42, %v12220_v27  ;;  %v12223_v52 = vadd.f32 %v12222_v55, %v12221_v0  ;;  %v12244_v4 = vpop.f32.mrb[147].mxu1  ;;  %v13164_v0 = vld [vmem:[%s18029_s7 + $0x6ac] ss:$16 sps:$4 sm:$0xff]   ;;  %v13167_v55 = vld [vmem:[%s18029_s7 + $0x6c4] ss:$16 sps:$4 sm:$0xff]  }
 0x7d6   :  { %v12245_v22 = vadd.f32 %v12244_v4, %v12243_v35  ;;  %v13162_v35 = vld [vmem:[%s18029_s7 + $0x6a8] ss:$16 sps:$4 sm:$0xff]  }
 0x7d7   :  { %v5628_v16 = vadd.f32 %v16255_v42, %v12223_v52  ;;  %v5666_v19 = vadd.f32 %v12242_v33, %v5625_v51  ;;  %v13159_v33 = vld [vmem:[%s18029_s7 + $0x6a0] ss:$16 sps:$4 sm:$0xff]   ;;  %v13170_v51 = vld [vmem:[%s18029_s7 + $0x6cc] ss:$16 sps:$4 sm:$0xff]   ;;  %v13168_v4 = vld [vmem:[%s18029_s7 + $0x6c8] ss:$16 sps:$4 sm:$0xff]  }
 0x7d8   :  { %v13165_v52 = vld [vmem:[%s18029_s7 + $0x6c0] ss:$16 sps:$4 sm:$0xff]  }
 0x7d9   :  { %v5669_v32 = vadd.f32 %v12245_v22, %v5628_v16  ;;  %v13173_v22 = vld [vmem:[%s18029_s7 + $0x6e4] ss:$16 sps:$4 sm:$0xff]   ;;  %v13176_v16 = vld [vmem:[%s18029_s7 + $0x6ec] ss:$16 sps:$4 sm:$0xff]  }
 0x7e1   :  { %v5706_v8 = vpop.f32.mrb[204].mxu0 }
 0x7e2   :  { %v5707_v49 = vadd.f32 %v5706_v8, %v5666_v19  ;;  %v12644_v40 = vpop.f32.mrb[205].mxu0  ;;  %v13171_v19 = vld [vmem:[%s18029_s7 + $0x6e0] ss:$16 sps:$4 sm:$0xff]   ;;  %v13179_v8 = vld [vmem:[%s18029_s7 + $0x704] ss:$16 sps:$4 sm:$0xff]  }
 0x7e3   :  { %v5709_v11 = vpop.f32.mrb[206].mxu0  ;;  %v13177_v40 = vld [vmem:[%s18029_s7 + $0x700] ss:$16 sps:$4 sm:$0xff]  }
 0x7e4   :  { %v5710_v43 = vadd.f32 %v5709_v11, %v5669_v32  ;;  %v12645_v46 = vpop.f32.mrb[207].mxu0  ;;  %v5713_v47 = vmax.f32 %v5707_v49, 0.0  ;;  %v13174_v32 = vld [vmem:[%s18029_s7 + $0x6e8] ss:$16 sps:$4 sm:$0xff]   ;;  %v13182_v49 = vld [vmem:[%s18029_s7 + $0x70c] ss:$16 sps:$4 sm:$0xff]  }
 0x7e5   :  { %v13180_v11 = vld [vmem:[%s18029_s7 + $0x708] ss:$16 sps:$4 sm:$0xff]   ;;  %v13185_v46 = vld [vmem:[%s18029_s7 + $0x724] ss:$16 sps:$4 sm:$0xff]  }
 0x7e6   :  { %v5714_v58 = vmax.f32 %v5710_v43, 0.0 }
 0x7e8   :  { %v16265_v27 = vpack.c.bf16 %v5714_v58, %v5713_v47  ;;  %v13188_v47 = vld [vmem:[%s18029_s7 + $0x72c] ss:$16 sps:$4 sm:$0xff]   ;;  %v13183_v58 = vld [vmem:[%s18029_s7 + $0x720] ss:$16 sps:$4 sm:$0xff]  }
 0x7ea   :  { %11440 = vmatmul.mubr.msk.bf16.vlgmr.msra.gmra.mrb[148].mxu1 %vm639_vm0, %v16265_v27  ;;  %11441 = vmatmul.mubr.msk.bf16.vlgmr.msra.gmra.mrb[208].mxu0 %vm639_vm0, %v16265_v27  ;;  %v5918_v43 = vrot.slane %v16265_v27, 1 }
 0x7eb   :  { %6003 = vmatpush1.bf16.msra.mxu1 %v13153_v54  ;;  %6044 = vmatpush1.bf16.msra.mxu0 %v13156_v29  ;;  %v13186_v54 = vld [vmem:[%s18029_s7 + $0x728] ss:$16 sps:$4 sm:$0xff]   ;;  %v13191_v29 = vld [vmem:[%s18029_s7 + $0x744] ss:$16 sps:$4 sm:$0xff]  }
 0x7ec   :  { %6004 = vmatprep.subr.bf16.mxu1 %v13161_v24  ;;  %6045 = vmatprep.subr.bf16.mxu0 %v13164_v0  ;;  %v13194_v24 = vld [vmem:[%s18029_s7 + $0x74c] ss:$16 sps:$4 sm:$0xff]   ;;  %v13189_v0 = vld [vmem:[%s18029_s7 + $0x740] ss:$16 sps:$4 sm:$0xff]  }
 0x7ed   :  { %6034 = vmatprep.mubr.bf16.mxu1 %v13861_v60  ;;  %6075 = vmatprep.mubr.bf16.mxu0 %v13861_v60 }
 0x7ef   :  { %6005 = vmatpush1.bf16.msra.mxu1 %v13159_v33  ;;  %6046 = vmatpush1.bf16.msra.mxu0 %v13162_v35  ;;  %v13192_v33 = vld [vmem:[%s18029_s7 + $0x748] ss:$16 sps:$4 sm:$0xff]   ;;  %v13197_v35 = vld [vmem:[%s18029_s7 + $0x764] ss:$16 sps:$4 sm:$0xff]  }
 0x7f0   :  { %6006 = vmatprep.subr.bf16.mxu1 %v13167_v55  ;;  %6047 = vmatprep.subr.bf16.mxu0 %v13170_v51  ;;  %v13200_v55 = vld [vmem:[%s18029_s7 + $0x76c] ss:$16 sps:$4 sm:$0xff]   ;;  %v13195_v51 = vld [vmem:[%s18029_s7 + $0x760] ss:$16 sps:$4 sm:$0xff]  }
 0x7f3   :  { %6007 = vmatpush1.bf16.msra.mxu1 %v13165_v52  ;;  %6048 = vmatpush1.bf16.msra.mxu0 %v13168_v4  ;;  %v13198_v52 = vld [vmem:[%s18029_s7 + $0x768] ss:$16 sps:$4 sm:$0xff]   ;;  %v13203_v4 = vld [vmem:[%s18029_s7 + $0x784] ss:$16 sps:$4 sm:$0xff]  }
 0x7f4   :  { %6008 = vmatprep.subr.bf16.mxu1 %v13173_v22  ;;  %6049 = vmatprep.subr.bf16.mxu0 %v13176_v16  ;;  %v13206_v22 = vld [vmem:[%s18029_s7 + $0x78c] ss:$16 sps:$4 sm:$0xff]   ;;  %v13201_v16 = vld [vmem:[%s18029_s7 + $0x780] ss:$16 sps:$4 sm:$0xff]  }
 0x7f7   :  { %6009 = vmatpush1.bf16.msra.mxu1 %v13171_v19  ;;  %6050 = vmatpush1.bf16.msra.mxu0 %v13174_v32  ;;  %v13204_v19 = vld [vmem:[%s18029_s7 + $0x788] ss:$16 sps:$4 sm:$0xff]   ;;  %v6104_v32 = vrot.slane %v16265_v27, 2 }
 0x7f8   :  { %6188 = vmatprep.subr.bf16.mxu1 %v13179_v8  ;;  %6229 = vmatprep.subr.bf16.mxu0 %v13182_v49  ;;  %v13209_v8 = vld [vmem:[%s18029_s7 + $0x7a4] ss:$16 sps:$4 sm:$0xff]   ;;  %v13212_v49 = vld [vmem:[%s18029_s7 + $0x7ac] ss:$16 sps:$4 sm:$0xff]  }
 0x7fa   :  { %11458 = vmatmul.mubr.msk.bf16.vlgmr.msra.gmra.mrb[152].mxu1 %vm639_vm0, %v5918_v43  ;;  %11459 = vmatmul.mubr.msk.bf16.vlgmr.msra.gmra.mrb[212].mxu0 %vm639_vm0, %v5918_v43  ;;  %v13215_v43 = vld [vmem:[%s18029_s7 + $0x7c4] ss:$16 sps:$4 sm:$0xff]  }
 0x7fb   :  { %6189 = vmatpush1.bf16.msra.mxu1 %v13177_v40  ;;  %6230 = vmatpush1.bf16.msra.mxu0 %v13180_v11  ;;  %v13207_v40 = vld [vmem:[%s18029_s7 + $0x7a0] ss:$16 sps:$4 sm:$0xff]   ;;  %v13210_v11 = vld [vmem:[%s18029_s7 + $0x7a8] ss:$16 sps:$4 sm:$0xff]  }
 0x7fc   :  { %6190 = vmatprep.subr.bf16.mxu1 %v13185_v46  ;;  %6231 = vmatprep.subr.bf16.mxu0 %v13188_v47  ;;  %v13218_v46 = vld [vmem:[%s18029_s7 + $0x7cc] ss:$16 sps:$4 sm:$0xff]   ;;  %v13213_v47 = vld [vmem:[%s18029_s7 + $0x7c0] ss:$16 sps:$4 sm:$0xff]  }
 0x7fd   :  { %6220 = vmatprep.mubr.bf16.mxu1 %v13861_v60  ;;  %6261 = vmatprep.mubr.bf16.mxu0 %v13861_v60 }
 0x7ff   :  { %6191 = vmatpush1.bf16.msra.mxu1 %v13183_v58  ;;  %6232 = vmatpush1.bf16.msra.mxu0 %v13186_v54  ;;  %v13216_v58 = vld [vmem:[%s18029_s7 + $0x7c8] ss:$16 sps:$4 sm:$0xff]   ;;  %v13221_v54 = vld [vmem:[%s18029_s7 + $0x7e4] ss:$16 sps:$4 sm:$0xff]  }
 0x800   :  { %6192 = vmatprep.subr.bf16.mxu1 %v13191_v29  ;;  %6233 = vmatprep.subr.bf16.mxu0 %v13194_v24  ;;  %v13224_v29 = vld [vmem:[%s18029_s7 + $0x7ec] ss:$16 sps:$4 sm:$0xff]   ;;  %v13219_v24 = vld [vmem:[%s18029_s7 + $0x7e0] ss:$16 sps:$4 sm:$0xff]  }
 0x803   :  { %6193 = vmatpush1.bf16.msra.mxu1 %v13189_v0  ;;  %6234 = vmatpush1.bf16.msra.mxu0 %v13192_v33  ;;  %v13222_v0 = vld [vmem:[%s18029_s7 + $0x7e8] ss:$16 sps:$4 sm:$0xff]   ;;  %v13227_v33 = vld [vmem:[%s18029_s7 + $0x804] ss:$16 sps:$4 sm:$0xff]  }
 0x804   :  { %6194 = vmatprep.subr.bf16.mxu1 %v13197_v35  ;;  %6235 = vmatprep.subr.bf16.mxu0 %v13200_v55  ;;  %v13230_v35 = vld [vmem:[%s18029_s7 + $0x80c] ss:$16 sps:$4 sm:$0xff]   ;;  %v13225_v55 = vld [vmem:[%s18029_s7 + $0x800] ss:$16 sps:$4 sm:$0xff]  }
 0x807   :  { %6195 = vmatpush1.bf16.msra.mxu1 %v13195_v51  ;;  %6236 = vmatpush1.bf16.msra.mxu0 %v13198_v52  ;;  %v13228_v51 = vld [vmem:[%s18029_s7 + $0x808] ss:$16 sps:$4 sm:$0xff]   ;;  %v6290_v52 = vrot.slane %v16265_v27, 3 }
 0x808   :  { %6374 = vmatprep.subr.bf16.mxu1 %v13203_v4  ;;  %6415 = vmatprep.subr.bf16.mxu0 %v13206_v22  ;;  %v13233_v4 = vld [vmem:[%s18029_s7 + $0x824] ss:$16 sps:$4 sm:$0xff]   ;;  %v13236_v22 = vld [vmem:[%s18029_s7 + $0x82c] ss:$16 sps:$4 sm:$0xff]  }
 0x80a   :  { %11476 = vmatmul.mubr.msk.bf16.vlgmr.msra.gmra.mrb[156].mxu1 %vm639_vm0, %v6104_v32  ;;  %11477 = vmatmul.mubr.msk.bf16.vlgmr.msra.gmra.mrb[216].mxu0 %vm639_vm0, %v6104_v32  ;;  %v13239_v32 = vld [vmem:[%s18029_s7 + $0x844] ss:$16 sps:$4 sm:$0xff]  }
 0x80b   :  { %6375 = vmatpush1.bf16.msra.mxu1 %v13201_v16  ;;  %6416 = vmatpush1.bf16.msra.mxu0 %v13204_v19  ;;  %v13231_v16 = vld [vmem:[%s18029_s7 + $0x820] ss:$16 sps:$4 sm:$0xff]   ;;  %v13234_v19 = vld [vmem:[%s18029_s7 + $0x828] ss:$16 sps:$4 sm:$0xff]  }
 0x80c   :  { %6376 = vmatprep.subr.bf16.mxu1 %v13209_v8  ;;  %6417 = vmatprep.subr.bf16.mxu0 %v13212_v49  ;;  %v13242_v8 = vld [vmem:[%s18029_s7 + $0x84c] ss:$16 sps:$4 sm:$0xff]   ;;  %v13237_v49 = vld [vmem:[%s18029_s7 + $0x840] ss:$16 sps:$4 sm:$0xff]  }
 0x80d   :  { %6406 = vmatprep.mubr.bf16.mxu1 %v13861_v60  ;;  %6447 = vmatprep.mubr.bf16.mxu0 %v13861_v60 }
 0x80f   :  { %6377 = vmatpush1.bf16.msra.mxu1 %v13207_v40  ;;  %6418 = vmatpush1.bf16.msra.mxu0 %v13210_v11  ;;  %v13240_v40 = vld [vmem:[%s18029_s7 + $0x848] ss:$16 sps:$4 sm:$0xff]   ;;  %v13245_v11 = vld [vmem:[%s18029_s7 + $0x864] ss:$16 sps:$4 sm:$0xff]  }
 0x810   :  { %6378 = vmatprep.subr.bf16.mxu1 %v13215_v43  ;;  %6419 = vmatprep.subr.bf16.mxu0 %v13218_v46  ;;  %v13248_v43 = vld [vmem:[%s18029_s7 + $0x86c] ss:$16 sps:$4 sm:$0xff]   ;;  %v13243_v46 = vld [vmem:[%s18029_s7 + $0x860] ss:$16 sps:$4 sm:$0xff]  }
 0x813   :  { %6379 = vmatpush1.bf16.msra.mxu1 %v13213_v47  ;;  %6420 = vmatpush1.bf16.msra.mxu0 %v13216_v58  ;;  %v13246_v47 = vld [vmem:[%s18029_s7 + $0x868] ss:$16 sps:$4 sm:$0xff]   ;;  %v13251_v58 = vld [vmem:[%s18029_s7 + $0x884] ss:$16 sps:$4 sm:$0xff]  }
 0x814   :  { %6380 = vmatprep.subr.bf16.mxu1 %v13221_v54  ;;  %6421 = vmatprep.subr.bf16.mxu0 %v13224_v29  ;;  %v13254_v54 = vld [vmem:[%s18029_s7 + $0x88c] ss:$16 sps:$4 sm:$0xff]   ;;  %v13249_v29 = vld [vmem:[%s18029_s7 + $0x880] ss:$16 sps:$4 sm:$0xff]  }
 0x817   :  { %6381 = vmatpush1.bf16.msra.mxu1 %v13219_v24  ;;  %6422 = vmatpush1.bf16.msra.mxu0 %v13222_v0  ;;  %v13252_v24 = vld [vmem:[%s18029_s7 + $0x888] ss:$16 sps:$4 sm:$0xff]   ;;  %v6476_v0 = vrot.slane %v16265_v27, 4 }
 0x818   :  { %6560 = vmatprep.subr.bf16.mxu1 %v13227_v33  ;;  %6601 = vmatprep.subr.bf16.mxu0 %v13230_v35  ;;  %v13257_v33 = vld [vmem:[%s18029_s7 + $0x8a4] ss:$16 sps:$4 sm:$0xff]   ;;  %v13260_v35 = vld [vmem:[%s18029_s7 + $0x8ac] ss:$16 sps:$4 sm:$0xff]  }
 0x81a   :  { %11494 = vmatmul.mubr.msk.bf16.vlgmr.msra.gmra.mrb[160].mxu1 %vm639_vm0, %v6290_v52  ;;  %11495 = vmatmul.mubr.msk.bf16.vlgmr.msra.gmra.mrb[220].mxu0 %vm639_vm0, %v6290_v52  ;;  %v13263_v52 = vld [vmem:[%s18029_s7 + $0x8c4] ss:$16 sps:$4 sm:$0xff]  }
 0x81b   :  { %6561 = vmatpush1.bf16.msra.mxu1 %v13225_v55  ;;  %6602 = vmatpush1.bf16.msra.mxu0 %v13228_v51  ;;  %v13255_v55 = vld [vmem:[%s18029_s7 + $0x8a0] ss:$16 sps:$4 sm:$0xff]   ;;  %v13258_v51 = vld [vmem:[%s18029_s7 + $0x8a8] ss:$16 sps:$4 sm:$0xff]  }
 0x81c   :  { %6562 = vmatprep.subr.bf16.mxu1 %v13233_v4  ;;  %6603 = vmatprep.subr.bf16.mxu0 %v13236_v22  ;;  %v13266_v4 = vld [vmem:[%s18029_s7 + $0x8cc] ss:$16 sps:$4 sm:$0xff]   ;;  %v13261_v22 = vld [vmem:[%s18029_s7 + $0x8c0] ss:$16 sps:$4 sm:$0xff]  }
 0x81d   :  { %6592 = vmatprep.mubr.bf16.mxu1 %v13861_v60  ;;  %6633 = vmatprep.mubr.bf16.mxu0 %v13861_v60 }
 0x81f   :  { %6563 = vmatpush1.bf16.msra.mxu1 %v13231_v16  ;;  %6604 = vmatpush1.bf16.msra.mxu0 %v13234_v19  ;;  %v13264_v16 = vld [vmem:[%s18029_s7 + $0x8c8] ss:$16 sps:$4 sm:$0xff]   ;;  %v13269_v19 = vld [vmem:[%s18029_s7 + $0x8e4] ss:$16 sps:$4 sm:$0xff]  }
 0x820   :  { %6564 = vmatprep.subr.bf16.mxu1 %v13239_v32  ;;  %6605 = vmatprep.subr.bf16.mxu0 %v13242_v8  ;;  %v13272_v32 = vld [vmem:[%s18029_s7 + $0x8ec] ss:$16 sps:$4 sm:$0xff]   ;;  %v13267_v8 = vld [vmem:[%s18029_s7 + $0x8e0] ss:$16 sps:$4 sm:$0xff]  }
 0x823   :  { %6565 = vmatpush1.bf16.msra.mxu1 %v13237_v49  ;;  %6606 = vmatpush1.bf16.msra.mxu0 %v13240_v40  ;;  %v13270_v49 = vld [vmem:[%s18029_s7 + $0x8e8] ss:$16 sps:$4 sm:$0xff]   ;;  %v2707_v40 = vpop.permute.xlu1 %2706 }
 0x824   :  { %6566 = vmatprep.subr.bf16.mxu1 %v13245_v11  ;;  %6607 = vmatprep.subr.bf16.mxu0 %v13248_v43  ;;  %v2692_v11 = vpop.permute.xlu0 %2691  ;;  %v6662_v43 = vrot.slane %v16265_v27, 5  ;;  %v16536_v27 = vld [vmem:[%s18027_s5] sm:$0xff]  }
 0x827   :  { %6567 = vmatpush1.bf16.msra.mxu1 %v13243_v46  ;;  %6608 = vmatpush1.bf16.msra.mxu0 %v13246_v47  ;;  %v16525_v46 = vld [vmem:[%s18027_s5 + $0x40] sm:$0xff]   ;;  %v2771_v47 = vsel %vm639_vm0, %v15003_v14, %v2707_v40  ;;  %v16548_v14 = vld [vmem:[%s18027_s5 + $0x48] sm:$0xff]  }
 0x828   :  { %6746 = vmatprep.subr.bf16.mxu1 %v13251_v58  ;;  %6787 = vmatprep.subr.bf16.mxu0 %v13254_v54  ;;  %v16541_v58 = vsel %vm639_vm0, %v15013_v31, %v2692_v11  ;;  %v2721_v54 = vpop.permute.xlu1 %2720  ;;  %v17128_v31 = vld [vmem:[%s18027_s5 + $0x108] sm:$0xff]  }
 0x82a   :  { %11512 = vmatmul.mubr.msk.bf16.vlgmr.msra.gmra.mrb[164].mxu1 %vm639_vm0, %v6476_v0  ;;  %11513 = vmatmul.mubr.msk.bf16.vlgmr.msra.gmra.mrb[224].mxu0 %vm639_vm0, %v6476_v0  ;;  %v13288_v0 = vld [vmem:[%s18029_s7 + $0x948] ss:$16 sps:$4 sm:$0xff]  }
 0x82b   :  { %6747 = vmatpush1.bf16.msra.mxu1 %v13249_v29  ;;  %6788 = vmatpush1.bf16.msra.mxu0 %v13252_v24  ;;  %v13285_v24 = vld [vmem:[%s18029_s7 + $0x940] ss:$16 sps:$4 sm:$0xff]  }
 0x82c   :  { %6748 = vmatprep.subr.bf16.mxu1 %v13257_v33  ;;  %6789 = vmatprep.subr.bf16.mxu0 %v13260_v35 }
 0x82d   :  { %6778 = vmatprep.mubr.bf16.mxu1 %v13861_v60  ;;  %6819 = vmatprep.mubr.bf16.mxu0 %v13861_v60 }
 0x82f   :  { %6749 = vmatpush1.bf16.msra.mxu1 %v13255_v55  ;;  %6790 = vmatpush1.bf16.msra.mxu0 %v13258_v51 }
 0x830   :  { %6750 = vmatprep.subr.bf16.mxu1 %v13263_v52  ;;  %6791 = vmatprep.subr.bf16.mxu0 %v13266_v4 }
 0x833   :  { %6751 = vmatpush1.bf16.msra.mxu1 %v13261_v22  ;;  %6792 = vmatpush1.bf16.msra.mxu0 %v13264_v16 }
 0x834   :  { %6752 = vmatprep.subr.bf16.mxu1 %v13269_v19  ;;  %6793 = vmatprep.subr.bf16.mxu0 %v13272_v32 }
 0x837   :  { %6753 = vmatpush1.bf16.msra.mxu1 %v13267_v8  ;;  %6794 = vmatpush1.bf16.msra.mxu0 %v13270_v49  ;;  %v13299_v8 = vld [vmem:[%s18029_s7 + $0x984] ss:$16 sps:$4 sm:$0xff]   ;;  %v13302_v49 = vld [vmem:[%s18029_s7 + $0x98c] ss:$16 sps:$4 sm:$0xff]  }
 0x838   :  { %12251 = vmatprep.subr.bf16.mxu1 %v16525_v46  ;;  %12273 = vmatprep.subr.bf16.mxu0 %v16026_v28  ;;  %v16555_v28 = vld [vmem:[%s18027_s5 + $0x8] sm:$0xff]  }
 0x83a   :  { %11530 = vmatmul.mubr.msk.bf16.vlgmr.msra.gmra.mrb[168].mxu1 %vm639_vm0, %v6662_v43  ;;  %11531 = vmatmul.mubr.msk.bf16.vlgmr.msra.gmra.mrb[228].mxu0 %vm639_vm0, %v6662_v43 }
 0x83b   :  { %12252 = vmatpush3.bf16.msra.mxu1 %v16536_v27  ;;  %6866 = vmatprep.mubr.bf16.mxu1 %v2771_v47 }
 0x83c   :  { %12274 = vmatpush3.bf16.msra.mxu0 %v16041_v36  ;;  %6907 = vmatprep.mubr.bf16.mxu0 %v16541_v58  ;;  %v16562_v36 = vld [vmem:[%s18027_s5 + $0x50] sm:$0xff]  }
 0x83d   :  { %12253 = vmatprep.subr.bf16.mxu1 %v16548_v14  ;;  %12275 = vmatprep.subr.bf16.mxu0 %v16049_v41  ;;  %v16569_v41 = vld [vmem:[%s18027_s5 + $0x10] sm:$0xff]  }
 0x83f   :  { %12254 = vmatpush3.bf16.msra.mxu1 %v16555_v28 }
 0x840   :  { %12276 = vmatpush3.bf16.msra.mxu0 %v16056_v62  ;;  %12255 = vmatprep.subr.bf16.mxu1 %v16562_v36  ;;  %v16576_v62 = vld [vmem:[%s18027_s5 + $0x58] sm:$0xff]  }
 0x841   :  { %12277 = vmatprep.subr.bf16.mxu0 %v16063_v13  ;;  %v16583_v13 = vld [vmem:[%s18027_s5 + $0x18] sm:$0xff]  }
 0x843   :  { %12256 = vmatpush3.bf16.msra.mxu1 %v16569_v41 }
 0x844   :  { %12278 = vmatpush3.bf16.msra.mxu0 %v16070_v48  ;;  %12257 = vmatprep.subr.bf16.mxu1 %v16576_v62  ;;  %v16590_v48 = vld [vmem:[%s18027_s5 + $0x60] sm:$0xff]  }
 0x845   :  { %12279 = vmatprep.subr.bf16.mxu0 %v16077_v18  ;;  %v16597_v18 = vld [vmem:[%s18027_s5 + $0x20] sm:$0xff]  }
 0x847   :  { %12258 = vmatpush3.bf16.msra.mxu1 %v16583_v13 }
 0x848   :  { %12280 = vmatpush3.bf16.msra.mxu0 %v16084_v21  ;;  %12259 = vmatprep.subr.bf16.mxu1 %v16590_v48  ;;  %v16604_v21 = vld [vmem:[%s18027_s5 + $0x68] sm:$0xff]  }
 0x849   :  { %12281 = vmatprep.subr.bf16.mxu0 %v16091_v44  ;;  %v16611_v44 = vld [vmem:[%s18027_s5 + $0x28] sm:$0xff]  }
 0x84b   :  { %12260 = vmatpush3.bf16.msra.mxu1 %v16597_v18 }
 0x84c   :  { %12282 = vmatpush3.bf16.msra.mxu0 %v16098_v38  ;;  %12261 = vmatprep.subr.bf16.mxu1 %v16604_v21  ;;  %v16618_v38 = vld [vmem:[%s18027_s5 + $0x70] sm:$0xff]  }
 0x84d   :  { %12283 = vmatprep.subr.bf16.mxu0 %v16105_v1  ;;  %v16625_v1 = vld [vmem:[%s18027_s5 + $0x30] sm:$0xff]  }
 0x84f   :  { %12262 = vmatpush3.bf16.msra.mxu1 %v16611_v44 }
 0x850   :  { %12284 = vmatpush3.bf16.msra.mxu0 %v16112_v20  ;;  %12263 = vmatprep.subr.bf16.mxu1 %v16618_v38  ;;  %v16632_v20 = vld [vmem:[%s18027_s5 + $0x78] sm:$0xff]  }
 0x851   :  { %12285 = vmatprep.subr.bf16.mxu0 %v16119_v3  ;;  %v2795_v3 = vsel %vm639_vm0, %v2679_v10, %v2721_v54  ;;  %v13275_v10 = vld [vmem:[%s18029_s7 + $0x904] ss:$16 sps:$4 sm:$0xff]  }
 0x853   :  { %12264 = vmatpush3.bf16.msra.mxu1 %v16625_v1 }
 0x854   :  { %12286 = vmatpush3.bf16.msra.mxu0 %v16126_v34  ;;  %12265 = vmatprep.subr.bf16.mxu1 %v16632_v20  ;;  %v13278_v34 = vld [vmem:[%s18029_s7 + $0x90c] ss:$16 sps:$4 sm:$0xff]  }
 0x855   :  { %12287 = vmatprep.subr.bf16.mxu0 %v16133_v5  ;;  %v13281_v5 = vld [vmem:[%s18029_s7 + $0x924] ss:$16 sps:$4 sm:$0xff]  }
 0x857   :  { %12266 = vmatpush3.bf16.msra.mxu1 %v16139_v2  ;;  %v13284_v2 = vld [vmem:[%s18029_s7 + $0x92c] ss:$16 sps:$4 sm:$0xff]  }
 0x858   :  { %12288 = vmatpush3.bf16.msra.mxu0 %v16145_v53  ;;  %12646 = vmatprep.subr.bf16.mxu1 %v13859_v63  ;;  %v13279_v53 = vld [vmem:[%s18029_s7 + $0x920] ss:$16 sps:$4 sm:$0xff]  }
 0x859   :  { %7059 = vmatprep.subr.bf16.mxu0 %v13275_v10 }
 0x85a   :  { %6867 = vmatmul.mubr.bf16.vlgmr.msra.gmra.mrb[172].mxu1 %v15388_v56  ;;  %v13276_v56 = vld [vmem:[%s18029_s7 + $0x908] ss:$16 sps:$4 sm:$0xff]  }
 0x85b   :  { %6908 = vmatmul.mubr.bf16.vlgmr.msra.gmra.mrb[232].mxu0 %v2795_v3  ;;  %12647 = vmatpush3.bf16.msra.mxu1 %v16156_v6  ;;  %v13282_v6 = vld [vmem:[%s18029_s7 + $0x928] ss:$16 sps:$4 sm:$0xff]  }
 0x85c   :  { %12648 = vmatprep.subr.bf16.mxu1 %v13859_v63  ;;  %12654 = vmatprep.mubr.msk.bf16.mxu1 %vm13860_vm4, %v13859_v63 }
 0x85d   :  { %7091 = vmatprep.mubr.bf16.mxu0 %v13861_v60  ;;  %7060 = vmatpush1.bf16.msra.mxu0 %v13273_v9 }
 0x85e   :  { %7061 = vmatprep.subr.bf16.mxu0 %v13281_v5 }
 0x85f   :  { %12649 = vmatpush3.bf16.msra.mxu1 %v16166_v61  ;;  %v13287_v61 = vld [vmem:[%s18029_s7 + $0x944] ss:$16 sps:$4 sm:$0xff]  }
 0x860   :  { %12650 = vmatprep.subr.bf16.mxu1 %v13859_v63 }
 0x861   :  { %7062 = vmatpush1.bf16.msra.mxu0 %v13279_v53 }
 0x862   :  { %7063 = vmatprep.subr.bf16.mxu0 %v13287_v61 }
 0x863   :  { %12651 = vmatpush3.bf16.msra.mxu1 %v16173_v39  ;;  %v13290_v39 = vld [vmem:[%s18029_s7 + $0x94c] ss:$16 sps:$4 sm:$0xff]  }
 0x864   :  { %12652 = vmatprep.subr.bf16.mxu1 %v13859_v63 }
 0x865   :  { %7064 = vmatpush1.bf16.msra.mxu0 %v13285_v24 }
 0x867   :  { %12653 = vmatpush3.bf16.msra.mxu1 %v16180_v30 }
 0x868   :  { %7100 = vmatprep.subr.bf16.mxu1 %v13278_v34 }
 0x86a   :  { %12655 = vmatmul.mubr.msk.bf16.vlgmr.msra.gmra.mrb[176].mxu1 %vm639_vm0, %v15046_v26 }
 0x86b   :  { %7132 = vmatprep.mubr.bf16.mxu1 %v13861_v60  ;;  %7101 = vmatpush1.bf16.msra.mxu1 %v13276_v56 }
 0x86c   :  { %7102 = vmatprep.subr.bf16.mxu1 %v13284_v2 }
 0x86f   :  { %7103 = vmatpush1.bf16.msra.mxu1 %v13282_v6 }
 0x870   :  { %7104 = vmatprep.subr.bf16.mxu1 %v13290_v39 }
 0x873   :  { %7105 = vmatpush1.bf16.msra.mxu1 %v13288_v0 }
 0x8bd   :  { %v5849_v30 = vpop.f32.mrb[148].mxu1  ;;  %v5890_v29 = vpop.f32.mrb[208].mxu0 }
 0x8be   :  { %v5897_v33 = vadd.f32 %v5849_v30, %v16244_v17  ;;  %v5899_v35 = vadd.f32 %v5890_v29, %v16246_v59  ;;  %v5851_v55 = vpop.f32.mrb[149].mxu1  ;;  %v5892_v51 = vpop.f32.mrb[209].mxu0  ;;  %v13293_v17 = vld [vmem:[%s18029_s7 + $0x964] ss:$16 sps:$4 sm:$0xff]   ;;  %v13296_v59 = vld [vmem:[%s18029_s7 + $0x96c] ss:$16 sps:$4 sm:$0xff]  }
 0x8bf   :  { %v5898_v52 = vadd.f32 %v5851_v55, %v16248_v50  ;;  %v5900_v4 = vadd.f32 %v5892_v51, %v16250_v15  ;;  %v5853_v22 = vpop.f32.mrb[150].mxu1  ;;  %v5894_v16 = vpop.f32.mrb[210].mxu0  ;;  %v13291_v50 = vld [vmem:[%s18029_s7 + $0x960] ss:$16 sps:$4 sm:$0xff]   ;;  %v13294_v15 = vld [vmem:[%s18029_s7 + $0x968] ss:$16 sps:$4 sm:$0xff]   ;;  %7065 = vmatprep.subr.bf16.mxu0 %v13293_v17  ;;  %7106 = vmatprep.subr.bf16.mxu1 %v13296_v59 }
 0x8c0   :  { %v5854_v19 = vpop.f32.mrb[151].mxu1  ;;  %v5895_v32 = vpop.f32.mrb[211].mxu0  ;;  %7066 = vmatpush1.bf16.msra.mxu0 %v13291_v50  ;;  %7107 = vmatpush1.bf16.msra.mxu1 %v13294_v15 }
 0x8c1   :  { %7246 = vmatprep.subr.bf16.mxu0 %v13299_v8  ;;  %7287 = vmatprep.subr.bf16.mxu1 %v13302_v49 }
 0x8cd   :  { %v6036_v40 = vpop.f32.mrb[152].mxu1  ;;  %v6077_v11 = vpop.f32.mrb[212].mxu0 }
 0x8ce   :  { %v6084_v43 = vadd.f32 %v6036_v40, %v5897_v33  ;;  %v6086_v47 = vadd.f32 %v6077_v11, %v5899_v35  ;;  %v6038_v54 = vpop.f32.mrb[153].mxu1  ;;  %v6079_v3 = vpop.f32.mrb[213].mxu0 }
 0x8cf   :  { %v6085_v9 = vadd.f32 %v6038_v54, %v5898_v52  ;;  %v6087_v10 = vadd.f32 %v6079_v3, %v5900_v4  ;;  %v6040_v56 = vpop.f32.mrb[154].mxu1  ;;  %v6081_v34 = vpop.f32.mrb[214].mxu0 }
 0x8d0   :  { %v6041_v5 = vpop.f32.mrb[155].mxu1  ;;  %v6082_v2 = vpop.f32.mrb[215].mxu0 }
 0x8dd   :  { %v6222_v53 = vpop.f32.mrb[156].mxu1  ;;  %v6263_v6 = vpop.f32.mrb[216].mxu0 }
 0x8de   :  { %v6270_v61 = vadd.f32 %v6222_v53, %v6084_v43  ;;  %v6272_v39 = vadd.f32 %v6263_v6, %v6086_v47  ;;  %v6224_v30 = vpop.f32.mrb[157].mxu1  ;;  %v6265_v29 = vpop.f32.mrb[217].mxu0 }
 0x8df   :  { %v6271_v24 = vadd.f32 %v6224_v30, %v6085_v9  ;;  %v6273_v0 = vadd.f32 %v6265_v29, %v6087_v10  ;;  %v6226_v55 = vpop.f32.mrb[158].mxu1  ;;  %v6267_v51 = vpop.f32.mrb[218].mxu0 }
 0x8e0   :  { %v6227_v33 = vpop.f32.mrb[159].mxu1  ;;  %v6268_v35 = vpop.f32.mrb[219].mxu0 }
 0x8ed   :  { %v6408_v22 = vpop.f32.mrb[160].mxu1  ;;  %v6449_v16 = vpop.f32.mrb[220].mxu0 }
 0x8ee   :  { %v6456_v52 = vadd.f32 %v6408_v22, %v6270_v61  ;;  %v6458_v4 = vadd.f32 %v6449_v16, %v6272_v39  ;;  %v6410_v19 = vpop.f32.mrb[161].mxu1  ;;  %v6451_v32 = vpop.f32.mrb[221].mxu0 }
 0x8ef   :  { %v6457_v17 = vadd.f32 %v6410_v19, %v6271_v24  ;;  %v6459_v59 = vadd.f32 %v6451_v32, %v6273_v0  ;;  %v6412_v50 = vpop.f32.mrb[162].mxu1  ;;  %v6453_v15 = vpop.f32.mrb[222].mxu0 }
 0x8f0   :  { %v6413_v8 = vpop.f32.mrb[163].mxu1  ;;  %v6454_v49 = vpop.f32.mrb[223].mxu0 }
 0x8fd   :  { %v6594_v40 = vpop.f32.mrb[164].mxu1  ;;  %v6635_v11 = vpop.f32.mrb[224].mxu0 }
 0x8fe   :  { %v6642_v43 = vadd.f32 %v6594_v40, %v6456_v52  ;;  %v6644_v47 = vadd.f32 %v6635_v11, %v6458_v4  ;;  %v6596_v54 = vpop.f32.mrb[165].mxu1  ;;  %v6637_v3 = vpop.f32.mrb[225].mxu0 }
 0x8ff   :  { %v6643_v9 = vadd.f32 %v6596_v54, %v6457_v17  ;;  %v6645_v10 = vadd.f32 %v6637_v3, %v6459_v59  ;;  %v6598_v56 = vpop.f32.mrb[166].mxu1  ;;  %v6639_v34 = vpop.f32.mrb[226].mxu0 }
 0x900   :  { %v6599_v5 = vpop.f32.mrb[167].mxu1  ;;  %v6640_v2 = vpop.f32.mrb[227].mxu0 }
 0x90d   :  { %v6780_v53 = vpop.f32.mrb[168].mxu1  ;;  %v6821_v6 = vpop.f32.mrb[228].mxu0 }
 0x90e   :  { %v16714_v61 = vadd.f32 %v6780_v53, %v6642_v43  ;;  %v16716_v39 = vadd.f32 %v6821_v6, %v6644_v47  ;;  %v6782_v30 = vpop.f32.mrb[169].mxu1  ;;  %v6823_v29 = vpop.f32.mrb[229].mxu0  ;;  %v13297_v53 = vld [vmem:[%s18029_s7 + $0x980] ss:$16 sps:$4 sm:$0xff]   ;;  %v13300_v6 = vld [vmem:[%s18029_s7 + $0x988] ss:$16 sps:$4 sm:$0xff]  }
 0x90f   :  { %v16718_v24 = vadd.f32 %v6782_v30, %v6643_v9  ;;  %v16720_v0 = vadd.f32 %v6823_v29, %v6645_v10  ;;  %v6784_v55 = vpop.f32.mrb[170].mxu1  ;;  %v6825_v51 = vpop.f32.mrb[230].mxu0  ;;  %v13308_v29 = vld [vmem:[%s18029_s7 + $0x9ac] ss:$16 sps:$4 sm:$0xff]  }
 0x910   :  { %v6785_v33 = vpop.f32.mrb[171].mxu1  ;;  %v6826_v35 = vpop.f32.mrb[231].mxu0  ;;  %v13303_v55 = vld [vmem:[%s18029_s7 + $0x9a0] ss:$16 sps:$4 sm:$0xff]   ;;  %v13306_v51 = vld [vmem:[%s18029_s7 + $0x9a8] ss:$16 sps:$4 sm:$0xff]  }
 0x911   :  { %v13311_v33 = vld [vmem:[%s18029_s7 + $0x9c4] ss:$16 sps:$4 sm:$0xff]   ;;  %v13314_v35 = vld [vmem:[%s18029_s7 + $0x9cc] ss:$16 sps:$4 sm:$0xff]  }
 0x92d   :  { %v12267_v22 = vpop.f32.mrb[172].mxu1 }
 0x92e   :  { %v12289_v16 = vpop.f32.mrb[232].mxu0  ;;  %v12268_v52 = vpop.f32.mrb[173].mxu1 }
 0x92f   :  { %v12269_v4 = vadd.f32 %v12268_v52, %v12267_v22  ;;  %v12290_v19 = vpop.f32.mrb[233].mxu0  ;;  %v12270_v32 = vpop.f32.mrb[174].mxu1  ;;  %v13309_v22 = vld [vmem:[%s18029_s7 + $0x9c0] ss:$16 sps:$4 sm:$0xff]   ;;  %v13317_v52 = vld [vmem:[%s18029_s7 + $0x9e4] ss:$16 sps:$4 sm:$0xff]  }
 0x930   :  { %v12291_v17 = vadd.f32 %v12290_v19, %v12289_v16  ;;  %v12292_v59 = vpop.f32.mrb[234].mxu0  ;;  %v12271_v50 = vpop.f32.mrb[175].mxu1  ;;  %v13312_v16 = vld [vmem:[%s18029_s7 + $0x9c8] ss:$16 sps:$4 sm:$0xff]   ;;  %v13315_v19 = vld [vmem:[%s18029_s7 + $0x9e0] ss:$16 sps:$4 sm:$0xff]  }
 0x931   :  { %v6869_v15 = vadd.f32 %v16255_v42, %v12269_v4  ;;  %v12272_v8 = vadd.f32 %v12271_v50, %v12270_v32  ;;  %v12293_v49 = vpop.f32.mrb[235].mxu0  ;;  %v13320_v4 = vld [vmem:[%s18029_s7 + $0x9ec] ss:$16 sps:$4 sm:$0xff]   ;;  %v13318_v32 = vld [vmem:[%s18029_s7 + $0x9e8] ss:$16 sps:$4 sm:$0xff]  }
 0x932   :  { %v12294_v40 = vadd.f32 %v12293_v49, %v12292_v59  ;;  %v13326_v59 = vld [vmem:[%s18029_s7 + $0xa0c] ss:$16 sps:$4 sm:$0xff]   ;;  %v13321_v50 = vld [vmem:[%s18029_s7 + $0xa00] ss:$16 sps:$4 sm:$0xff]   ;;  %v13329_v49 = vld [vmem:[%s18029_s7 + $0xa24] ss:$16 sps:$4 sm:$0xff]  }
 0x933   :  { %v6872_v11 = vadd.f32 %v16255_v42, %v12272_v8  ;;  %v6910_v43 = vadd.f32 %v12291_v17, %v6869_v15  ;;  %v13305_v42 = vld [vmem:[%s18029_s7 + $0x9a4] ss:$16 sps:$4 sm:$0xff]   ;;  %v13324_v15 = vld [vmem:[%s18029_s7 + $0xa08] ss:$16 sps:$4 sm:$0xff]  }
 0x934   :  { %v13323_v17 = vld [vmem:[%s18029_s7 + $0xa04] ss:$16 sps:$4 sm:$0xff]  }
 0x935   :  { %v6913_v47 = vadd.f32 %v12294_v40, %v6872_v11  ;;  %v13332_v40 = vld [vmem:[%s18029_s7 + $0xa2c] ss:$16 sps:$4 sm:$0xff]   ;;  %v13327_v11 = vld [vmem:[%s18029_s7 + $0xa20] ss:$16 sps:$4 sm:$0xff]  }
 0x93d   :  { %v6950_v54 = vpop.f32.mrb[176].mxu1 }
 0x93e   :  { %v6951_v3 = vadd.f32 %v6950_v54, %v6910_v43  ;;  %v12656_v9 = vpop.f32.mrb[177].mxu1  ;;  %v13330_v43 = vld [vmem:[%s18029_s7 + $0xa28] ss:$16 sps:$4 sm:$0xff]   ;;  %v13338_v54 = vld [vmem:[%s18029_s7 + $0xa4c] ss:$16 sps:$4 sm:$0xff]  }
 0x93f   :  { %v6953_v10 = vpop.f32.mrb[178].mxu1  ;;  %v13336_v9 = vld [vmem:[%s18029_s7 + $0xa48] ss:$16 sps:$4 sm:$0xff]  }
 0x940   :  { %v6954_v56 = vadd.f32 %v6953_v10, %v6913_v47  ;;  %v12657_v34 = vpop.f32.mrb[179].mxu1  ;;  %v6957_v5 = vmax.f32 %v6951_v3, 0.0  ;;  %v13335_v47 = vld [vmem:[%s18029_s7 + $0xa44] ss:$16 sps:$4 sm:$0xff]   ;;  %v13333_v3 = vld [vmem:[%s18029_s7 + $0xa40] ss:$16 sps:$4 sm:$0xff]  }
 0x941   :  { %v13341_v10 = vld [vmem:[%s18029_s7 + $0xa64] ss:$16 sps:$4 sm:$0xff]   ;;  %v13339_v34 = vld [vmem:[%s18029_s7 + $0xa60] ss:$16 sps:$4 sm:$0xff]  }
 0x942   :  { %v6958_v2 = vmax.f32 %v6954_v56, 0.0  ;;  %v13344_v56 = vld [vmem:[%s18029_s7 + $0xa6c] ss:$16 sps:$4 sm:$0xff]  }
 0x944   :  { %v16730_v30 = vpack.c.bf16 %v6958_v2, %v6957_v5  ;;  %v13342_v5 = vld [vmem:[%s18029_s7 + $0xa68] ss:$16 sps:$4 sm:$0xff]   ;;  %v13347_v2 = vld [vmem:[%s18029_s7 + $0xa84] ss:$16 sps:$4 sm:$0xff]  }
 0x946   :  { %11549 = vmatmul.mubr.msk.bf16.vlgmr.msra.gmra.mrb[236].mxu0 %vm639_vm0, %v16730_v30  ;;  %11550 = vmatmul.mubr.msk.bf16.vlgmr.msra.gmra.mrb[180].mxu1 %vm639_vm0, %v16730_v30  ;;  %v7162_v8 = vrot.slane %v16730_v30, 1 }
 0x947   :  { %7247 = vmatpush1.bf16.msra.mxu0 %v13297_v53  ;;  %7288 = vmatpush1.bf16.msra.mxu1 %v13300_v6  ;;  %v13350_v53 = vld [vmem:[%s18029_s7 + $0xa8c] ss:$16 sps:$4 sm:$0xff]   ;;  %v13345_v6 = vld [vmem:[%s18029_s7 + $0xa80] ss:$16 sps:$4 sm:$0xff]  }
 0x948   :  { %7248 = vmatprep.subr.bf16.mxu0 %v13305_v42  ;;  %7289 = vmatprep.subr.bf16.mxu1 %v13308_v29  ;;  %v13348_v42 = vld [vmem:[%s18029_s7 + $0xa88] ss:$16 sps:$4 sm:$0xff]   ;;  %v7348_v29 = vrot.slane %v16730_v30, 2 }
 0x949   :  { %7278 = vmatprep.mubr.bf16.mxu0 %v13861_v60  ;;  %7319 = vmatprep.mubr.bf16.mxu1 %v13861_v60 }
 0x94b   :  { %7249 = vmatpush1.bf16.msra.mxu0 %v13303_v55  ;;  %7290 = vmatpush1.bf16.msra.mxu1 %v13306_v51  ;;  %v13353_v55 = vld [vmem:[%s18029_s7 + $0xaa4] ss:$16 sps:$4 sm:$0xff]   ;;  %v13356_v51 = vld [vmem:[%s18029_s7 + $0xaac] ss:$16 sps:$4 sm:$0xff]  }
 0x94c   :  { %7250 = vmatprep.subr.bf16.mxu0 %v13311_v33  ;;  %7291 = vmatprep.subr.bf16.mxu1 %v13314_v35  ;;  %v13351_v33 = vld [vmem:[%s18029_s7 + $0xaa0] ss:$16 sps:$4 sm:$0xff]   ;;  %v13354_v35 = vld [vmem:[%s18029_s7 + $0xaa8] ss:$16 sps:$4 sm:$0xff]  }
 0x94f   :  { %7251 = vmatpush1.bf16.msra.mxu0 %v13309_v22  ;;  %7292 = vmatpush1.bf16.msra.mxu1 %v13312_v16  ;;  %v13359_v22 = vld [vmem:[%s18029_s7 + $0xac4] ss:$16 sps:$4 sm:$0xff]   ;;  %v13362_v16 = vld [vmem:[%s18029_s7 + $0xacc] ss:$16 sps:$4 sm:$0xff]  }
 0x950   :  { %7252 = vmatprep.subr.bf16.mxu0 %v13317_v52  ;;  %7293 = vmatprep.subr.bf16.mxu1 %v13320_v4  ;;  %v13357_v52 = vld [vmem:[%s18029_s7 + $0xac0] ss:$16 sps:$4 sm:$0xff]   ;;  %v13360_v4 = vld [vmem:[%s18029_s7 + $0xac8] ss:$16 sps:$4 sm:$0xff]  }
 0x953   :  { %7253 = vmatpush1.bf16.msra.mxu0 %v13315_v19  ;;  %7294 = vmatpush1.bf16.msra.mxu1 %v13318_v32  ;;  %v13365_v19 = vld [vmem:[%s18029_s7 + $0xae4] ss:$16 sps:$4 sm:$0xff]   ;;  %v13368_v32 = vld [vmem:[%s18029_s7 + $0xaec] ss:$16 sps:$4 sm:$0xff]  }
 0x954   :  { %7432 = vmatprep.subr.bf16.mxu0 %v13323_v17  ;;  %7473 = vmatprep.subr.bf16.mxu1 %v13326_v59  ;;  %v13363_v17 = vld [vmem:[%s18029_s7 + $0xae0] ss:$16 sps:$4 sm:$0xff]   ;;  %v13366_v59 = vld [vmem:[%s18029_s7 + $0xae8] ss:$16 sps:$4 sm:$0xff]  }
 0x956   :  { %11567 = vmatmul.mubr.msk.bf16.vlgmr.msra.gmra.mrb[240].mxu0 %vm639_vm0, %v7162_v8  ;;  %11568 = vmatmul.mubr.msk.bf16.vlgmr.msra.gmra.mrb[184].mxu1 %vm639_vm0, %v7162_v8  ;;  %v13369_v8 = vld [vmem:[%s18029_s7 + $0xb00] ss:$16 sps:$4 sm:$0xff]  }
 0x957   :  { %7433 = vmatpush1.bf16.msra.mxu0 %v13321_v50  ;;  %7474 = vmatpush1.bf16.msra.mxu1 %v13324_v15  ;;  %v13371_v50 = vld [vmem:[%s18029_s7 + $0xb04] ss:$16 sps:$4 sm:$0xff]   ;;  %v13374_v15 = vld [vmem:[%s18029_s7 + $0xb0c] ss:$16 sps:$4 sm:$0xff]  }
 0x958   :  { %7434 = vmatprep.subr.bf16.mxu0 %v13329_v49  ;;  %7475 = vmatprep.subr.bf16.mxu1 %v13332_v40  ;;  %v13372_v49 = vld [vmem:[%s18029_s7 + $0xb08] ss:$16 sps:$4 sm:$0xff]   ;;  %v7534_v40 = vrot.slane %v16730_v30, 3 }
 0x959   :  { %7464 = vmatprep.mubr.bf16.mxu0 %v13861_v60  ;;  %7505 = vmatprep.mubr.bf16.mxu1 %v13861_v60 }
 0x95b   :  { %7435 = vmatpush1.bf16.msra.mxu0 %v13327_v11  ;;  %7476 = vmatpush1.bf16.msra.mxu1 %v13330_v43  ;;  %v13377_v11 = vld [vmem:[%s18029_s7 + $0xb24] ss:$16 sps:$4 sm:$0xff]   ;;  %v13380_v43 = vld [vmem:[%s18029_s7 + $0xb2c] ss:$16 sps:$4 sm:$0xff]  }
 0x95c   :  { %7436 = vmatprep.subr.bf16.mxu0 %v13335_v47  ;;  %7477 = vmatprep.subr.bf16.mxu1 %v13338_v54  ;;  %v13375_v47 = vld [vmem:[%s18029_s7 + $0xb20] ss:$16 sps:$4 sm:$0xff]   ;;  %v13378_v54 = vld [vmem:[%s18029_s7 + $0xb28] ss:$16 sps:$4 sm:$0xff]  }
 0x95f   :  { %7437 = vmatpush1.bf16.msra.mxu0 %v13333_v3  ;;  %7478 = vmatpush1.bf16.msra.mxu1 %v13336_v9  ;;  %v13383_v3 = vld [vmem:[%s18029_s7 + $0xb44] ss:$16 sps:$4 sm:$0xff]   ;;  %v13386_v9 = vld [vmem:[%s18029_s7 + $0xb4c] ss:$16 sps:$4 sm:$0xff]  }
 0x960   :  { %7438 = vmatprep.subr.bf16.mxu0 %v13341_v10  ;;  %7479 = vmatprep.subr.bf16.mxu1 %v13344_v56  ;;  %v13381_v10 = vld [vmem:[%s18029_s7 + $0xb40] ss:$16 sps:$4 sm:$0xff]   ;;  %v13384_v56 = vld [vmem:[%s18029_s7 + $0xb48] ss:$16 sps:$4 sm:$0xff]  }
 0x963   :  { %7439 = vmatpush1.bf16.msra.mxu0 %v13339_v34  ;;  %7480 = vmatpush1.bf16.msra.mxu1 %v13342_v5  ;;  %v13389_v34 = vld [vmem:[%s18029_s7 + $0xb64] ss:$16 sps:$4 sm:$0xff]   ;;  %v13392_v5 = vld [vmem:[%s18029_s7 + $0xb6c] ss:$16 sps:$4 sm:$0xff]  }
 0x964   :  { %7618 = vmatprep.subr.bf16.mxu0 %v13347_v2  ;;  %7659 = vmatprep.subr.bf16.mxu1 %v13350_v53  ;;  %v13387_v2 = vld [vmem:[%s18029_s7 + $0xb60] ss:$16 sps:$4 sm:$0xff]   ;;  %v13390_v53 = vld [vmem:[%s18029_s7 + $0xb68] ss:$16 sps:$4 sm:$0xff]  }
 0x966   :  { %11585 = vmatmul.mubr.msk.bf16.vlgmr.msra.gmra.mrb[244].mxu0 %vm639_vm0, %v7348_v29  ;;  %11586 = vmatmul.mubr.msk.bf16.vlgmr.msra.gmra.mrb[188].mxu1 %vm639_vm0, %v7348_v29  ;;  %v13393_v29 = vld [vmem:[%s18029_s7 + $0xb80] ss:$16 sps:$4 sm:$0xff]  }
 0x967   :  { %7619 = vmatpush1.bf16.msra.mxu0 %v13345_v6  ;;  %7660 = vmatpush1.bf16.msra.mxu1 %v13348_v42  ;;  %v13395_v6 = vld [vmem:[%s18029_s7 + $0xb84] ss:$16 sps:$4 sm:$0xff]   ;;  %v13398_v42 = vld [vmem:[%s18029_s7 + $0xb8c] ss:$16 sps:$4 sm:$0xff]  }
 0x968   :  { %7620 = vmatprep.subr.bf16.mxu0 %v13353_v55  ;;  %7661 = vmatprep.subr.bf16.mxu1 %v13356_v51  ;;  %v13396_v55 = vld [vmem:[%s18029_s7 + $0xb88] ss:$16 sps:$4 sm:$0xff]   ;;  %v7720_v51 = vrot.slane %v16730_v30, 4 }
 0x969   :  { %7650 = vmatprep.mubr.bf16.mxu0 %v13861_v60  ;;  %7691 = vmatprep.mubr.bf16.mxu1 %v13861_v60 }
 0x96b   :  { %7621 = vmatpush1.bf16.msra.mxu0 %v13351_v33  ;;  %7662 = vmatpush1.bf16.msra.mxu1 %v13354_v35  ;;  %v13401_v33 = vld [vmem:[%s18029_s7 + $0xba4] ss:$16 sps:$4 sm:$0xff]   ;;  %v13404_v35 = vld [vmem:[%s18029_s7 + $0xbac] ss:$16 sps:$4 sm:$0xff]  }
 0x96c   :  { %7622 = vmatprep.subr.bf16.mxu0 %v13359_v22  ;;  %7663 = vmatprep.subr.bf16.mxu1 %v13362_v16  ;;  %v13399_v22 = vld [vmem:[%s18029_s7 + $0xba0] ss:$16 sps:$4 sm:$0xff]   ;;  %v13402_v16 = vld [vmem:[%s18029_s7 + $0xba8] ss:$16 sps:$4 sm:$0xff]  }
 0x96f   :  { %7623 = vmatpush1.bf16.msra.mxu0 %v13357_v52  ;;  %7664 = vmatpush1.bf16.msra.mxu1 %v13360_v4  ;;  %v13407_v52 = vld [vmem:[%s18029_s7 + $0xbc4] ss:$16 sps:$4 sm:$0xff]   ;;  %v13410_v4 = vld [vmem:[%s18029_s7 + $0xbcc] ss:$16 sps:$4 sm:$0xff]  }
 0x970   :  { %7624 = vmatprep.subr.bf16.mxu0 %v13365_v19  ;;  %7665 = vmatprep.subr.bf16.mxu1 %v13368_v32  ;;  %v13405_v19 = vld [vmem:[%s18029_s7 + $0xbc0] ss:$16 sps:$4 sm:$0xff]   ;;  %v13408_v32 = vld [vmem:[%s18029_s7 + $0xbc8] ss:$16 sps:$4 sm:$0xff]  }
 0x973   :  { %7625 = vmatpush1.bf16.msra.mxu0 %v13363_v17  ;;  %7666 = vmatpush1.bf16.msra.mxu1 %v13366_v59  ;;  %v13413_v17 = vld [vmem:[%s18029_s7 + $0xbe4] ss:$16 sps:$4 sm:$0xff]   ;;  %v13416_v59 = vld [vmem:[%s18029_s7 + $0xbec] ss:$16 sps:$4 sm:$0xff]  }
 0x974   :  { %7804 = vmatprep.subr.bf16.mxu0 %v13371_v50  ;;  %7845 = vmatprep.subr.bf16.mxu1 %v13374_v15  ;;  %v13411_v50 = vld [vmem:[%s18029_s7 + $0xbe0] ss:$16 sps:$4 sm:$0xff]   ;;  %v13414_v15 = vld [vmem:[%s18029_s7 + $0xbe8] ss:$16 sps:$4 sm:$0xff]  }
 0x976   :  { %11603 = vmatmul.mubr.msk.bf16.vlgmr.msra.gmra.mrb[248].mxu0 %vm639_vm0, %v7534_v40  ;;  %11604 = vmatmul.mubr.msk.bf16.vlgmr.msra.gmra.mrb[192].mxu1 %vm639_vm0, %v7534_v40  ;;  %v7906_v40 = vrot.slane %v16730_v30, 5  ;;  %v17004_v30 = vld [vmem:[%s18027_s5 + $0x80] sm:$0xff]  }
 0x977   :  { %7805 = vmatpush1.bf16.msra.mxu0 %v13369_v8  ;;  %7846 = vmatpush1.bf16.msra.mxu1 %v13372_v49  ;;  %v2709_v8 = vpop.permute.xlu0 %2708  ;;  %v2729_v49 = vpop.permute.xlu1 %2728 }
 0x978   :  { %7806 = vmatprep.subr.bf16.mxu0 %v13377_v11  ;;  %7847 = vmatprep.subr.bf16.mxu1 %v13380_v43  ;;  %v16991_v11 = vld [vmem:[%s18027_s5 + $0xc0] sm:$0xff]   ;;  %v2775_v43 = vsel %vm639_vm0, %v15021_v23, %v2709_v8  ;;  %v17011_v23 = vld [vmem:[%s18027_s5 + $0xc8] sm:$0xff]  }
 0x979   :  { %7836 = vmatprep.mubr.bf16.mxu0 %v13861_v60  ;;  %7877 = vmatprep.mubr.bf16.mxu1 %v13861_v60  ;;  %v13446_v8 = vld [vmem:[%s18029_s7 + $0xc8c] ss:$16 sps:$4 sm:$0xff]  }
 0x97b   :  { %7807 = vmatpush1.bf16.msra.mxu0 %v13375_v47  ;;  %7848 = vmatpush1.bf16.msra.mxu1 %v13378_v54  ;;  %v2723_v47 = vpop.permute.xlu0 %2722  ;;  %v17107_v54 = vld [vmem:[%s18027_s5 + $0xb8] sm:$0xff]  }
 0x97c   :  { %7808 = vmatprep.subr.bf16.mxu0 %v13383_v3  ;;  %7849 = vmatprep.subr.bf16.mxu1 %v13386_v9  ;;  %v17118_v3 = vld [vmem:[%s18027_s5 + $0x100] sm:$0xff]  }
 0x97d   :  { %v13417_v9 = vld [vmem:[%s18029_s7 + $0xc00] ss:$16 sps:$4 sm:$0xff]  }
 0x97f   :  { %7809 = vmatpush1.bf16.msra.mxu0 %v13381_v10  ;;  %7850 = vmatpush1.bf16.msra.mxu1 %v13384_v56  ;;  %v13419_v10 = vld [vmem:[%s18029_s7 + $0xc04] ss:$16 sps:$4 sm:$0xff]   ;;  %v13420_v56 = vld [vmem:[%s18029_s7 + $0xc08] ss:$16 sps:$4 sm:$0xff]  }
 0x980   :  { %7810 = vmatprep.subr.bf16.mxu0 %v13389_v34  ;;  %7851 = vmatprep.subr.bf16.mxu1 %v13392_v5  ;;  %v13422_v34 = vld [vmem:[%s18029_s7 + $0xc0c] ss:$16 sps:$4 sm:$0xff]  }
 0x981   :  { %v13428_v5 = vld [vmem:[%s18029_s7 + $0xc2c] ss:$16 sps:$4 sm:$0xff]  }
 0x983   :  { %7811 = vmatpush1.bf16.msra.mxu0 %v13387_v2  ;;  %7852 = vmatpush1.bf16.msra.mxu1 %v13390_v53  ;;  %v13423_v2 = vld [vmem:[%s18029_s7 + $0xc20] ss:$16 sps:$4 sm:$0xff]   ;;  %v13426_v53 = vld [vmem:[%s18029_s7 + $0xc28] ss:$16 sps:$4 sm:$0xff]  }
 0x984   :  { %7990 = vmatprep.subr.bf16.mxu0 %v13395_v6  ;;  %8031 = vmatprep.subr.bf16.mxu1 %v13398_v42  ;;  %v13431_v6 = vld [vmem:[%s18029_s7 + $0xc44] ss:$16 sps:$4 sm:$0xff]   ;;  %v13434_v42 = vld [vmem:[%s18029_s7 + $0xc4c] ss:$16 sps:$4 sm:$0xff]  }
 0x986   :  { %11621 = vmatmul.mubr.msk.bf16.vlgmr.msra.gmra.mrb[252].mxu0 %vm639_vm0, %v7720_v51  ;;  %11622 = vmatmul.mubr.msk.bf16.vlgmr.msra.gmra.mrb[196].mxu1 %vm639_vm0, %v7720_v51  ;;  %v13429_v51 = vld [vmem:[%s18029_s7 + $0xc40] ss:$16 sps:$4 sm:$0xff]  }
 0x987   :  { %7991 = vmatpush1.bf16.msra.mxu0 %v13393_v29  ;;  %8032 = vmatpush1.bf16.msra.mxu1 %v13396_v55 }
 0x988   :  { %7992 = vmatprep.subr.bf16.mxu0 %v13401_v33  ;;  %8033 = vmatprep.subr.bf16.mxu1 %v13404_v35  ;;  %v13432_v33 = vld [vmem:[%s18029_s7 + $0xc48] ss:$16 sps:$4 sm:$0xff]  }
 0x989   :  { %8022 = vmatprep.mubr.bf16.mxu0 %v13861_v60  ;;  %8063 = vmatprep.mubr.bf16.mxu1 %v13861_v60 }
 0x98b   :  { %7993 = vmatpush1.bf16.msra.mxu0 %v13399_v22  ;;  %8034 = vmatpush1.bf16.msra.mxu1 %v13402_v16 }
 0x98c   :  { %7994 = vmatprep.subr.bf16.mxu0 %v13407_v52  ;;  %8035 = vmatprep.subr.bf16.mxu1 %v13410_v4 }
 0x98f   :  { %7995 = vmatpush1.bf16.msra.mxu0 %v13405_v19  ;;  %8036 = vmatpush1.bf16.msra.mxu1 %v13408_v32 }
 0x990   :  { %7996 = vmatprep.subr.bf16.mxu0 %v13413_v17  ;;  %8037 = vmatprep.subr.bf16.mxu1 %v13416_v59 }
 0x993   :  { %7997 = vmatpush1.bf16.msra.mxu0 %v13411_v50  ;;  %8038 = vmatpush1.bf16.msra.mxu1 %v13414_v15  ;;  %v13443_v15 = vld [vmem:[%s18029_s7 + $0xc84] ss:$16 sps:$4 sm:$0xff]  }
 0x994   :  { %12300 = vmatprep.subr.bf16.mxu0 %v16525_v46  ;;  %12322 = vmatprep.subr.bf16.mxu1 %v16991_v11  ;;  %v2807_v46 = vsel %vm639_vm0, %v15036_v7, %v2729_v49  ;;  %v2732_v7 = vrot.slane %v15057_v12, 2 }
 0x996   :  { %11639 = vmatmul.mubr.msk.bf16.vlgmr.msra.gmra.mrb[0].mxu0 %vm639_vm0, %v7906_v40  ;;  %11640 = vmatmul.mubr.msk.bf16.vlgmr.msra.gmra.mrb[200].mxu1 %vm639_vm0, %v7906_v40 }
 0x997   :  { %12301 = vmatpush3.bf16.msra.mxu0 %v16536_v27  ;;  %8111 = vmatprep.mubr.bf16.mxu0 %v2775_v43  ;;  %v17018_v27 = vld [vmem:[%s18027_s5 + $0x88] sm:$0xff]  }
 0x998   :  { %12323 = vmatpush3.bf16.msra.mxu1 %v17004_v30  ;;  %8152 = vmatprep.mubr.bf16.mxu1 %v2807_v46 }
 0x999   :  { %12302 = vmatprep.subr.bf16.mxu0 %v16548_v14  ;;  %12324 = vmatprep.subr.bf16.mxu1 %v17011_v23  ;;  %v17025_v14 = vld [vmem:[%s18027_s5 + $0xd0] sm:$0xff]  }
 0x99b   :  { %12303 = vmatpush3.bf16.msra.mxu0 %v16555_v28  ;;  %v17032_v28 = vld [vmem:[%s18027_s5 + $0x90] sm:$0xff]  }
 0x99c   :  { %12325 = vmatpush3.bf16.msra.mxu1 %v17018_v27  ;;  %12304 = vmatprep.subr.bf16.mxu0 %v16562_v36  ;;  %v17039_v36 = vld [vmem:[%s18027_s5 + $0xd8] sm:$0xff]  }
 0x99d   :  { %12326 = vmatprep.subr.bf16.mxu1 %v17025_v14 }
 0x99f   :  { %12305 = vmatpush3.bf16.msra.mxu0 %v16569_v41  ;;  %v17046_v41 = vld [vmem:[%s18027_s5 + $0x98] sm:$0xff]  }
 0x9a0   :  { %12327 = vmatpush3.bf16.msra.mxu1 %v17032_v28  ;;  %12306 = vmatprep.subr.bf16.mxu0 %v16576_v62  ;;  %v17053_v62 = vld [vmem:[%s18027_s5 + $0xe0] sm:$0xff]  }
 0x9a1   :  { %12328 = vmatprep.subr.bf16.mxu1 %v17039_v36 }
 0x9a3   :  { %12307 = vmatpush3.bf16.msra.mxu0 %v16583_v13  ;;  %v17060_v13 = vld [vmem:[%s18027_s5 + $0xa0] sm:$0xff]  }
 0x9a4   :  { %12329 = vmatpush3.bf16.msra.mxu1 %v17046_v41  ;;  %12308 = vmatprep.subr.bf16.mxu0 %v16590_v48  ;;  %v17067_v48 = vld [vmem:[%s18027_s5 + $0xe8] sm:$0xff]  }
 0x9a5   :  { %12330 = vmatprep.subr.bf16.mxu1 %v17053_v62 }
 0x9a7   :  { %12309 = vmatpush3.bf16.msra.mxu0 %v16597_v18  ;;  %v17074_v18 = vld [vmem:[%s18027_s5 + $0xa8] sm:$0xff]  }
 0x9a8   :  { %12331 = vmatpush3.bf16.msra.mxu1 %v17060_v13  ;;  %12310 = vmatprep.subr.bf16.mxu0 %v16604_v21  ;;  %v17081_v21 = vld [vmem:[%s18027_s5 + $0xf0] sm:$0xff]  }
 0x9a9   :  { %12332 = vmatprep.subr.bf16.mxu1 %v17067_v48 }
 0x9ab   :  { %12311 = vmatpush3.bf16.msra.mxu0 %v16611_v44  ;;  %v17088_v44 = vld [vmem:[%s18027_s5 + $0xb0] sm:$0xff]  }
 0x9ac   :  { %12333 = vmatpush3.bf16.msra.mxu1 %v17074_v18  ;;  %12312 = vmatprep.subr.bf16.mxu0 %v16618_v38  ;;  %v17095_v38 = vld [vmem:[%s18027_s5 + $0xf8] sm:$0xff]  }
 0x9ad   :  { %12334 = vmatprep.subr.bf16.mxu1 %v17081_v21 }
 0x9af   :  { %12313 = vmatpush3.bf16.msra.mxu0 %v16625_v1  ;;  %v17101_v1 = vld [vmem:[%s18027_s5 + $0x38] sm:$0xff]  }
 0x9b0   :  { %12335 = vmatpush3.bf16.msra.mxu1 %v17088_v44  ;;  %12314 = vmatprep.subr.bf16.mxu0 %v16632_v20  ;;  %v2799_v20 = vsel %vm639_vm0, %v2680_v25, %v2723_v47  ;;  %v17135_v25 = vld [vmem:[%s18027_s5 + $0x110] sm:$0xff]  }
 0x9b1   :  { %12336 = vmatprep.subr.bf16.mxu1 %v17095_v38 }
 0x9b3   :  { %12315 = vmatpush3.bf16.msra.mxu0 %v17101_v1 }
 0x9b4   :  { %12337 = vmatpush3.bf16.msra.mxu1 %v17107_v54  ;;  %12658 = vmatprep.subr.bf16.mxu0 %v13859_v63 }
 0x9b5   :  { %8304 = vmatprep.subr.bf16.mxu1 %v13419_v10 }
 0x9b6   :  { %8112 = vmatmul.mubr.bf16.vlgmr.msra.gmra.mrb[4].mxu0 %v16036_v57  ;;  %v17142_v57 = vld [vmem:[%s18027_s5 + $0x118] sm:$0xff]  }
 0x9b7   :  { %8153 = vmatmul.mubr.bf16.vlgmr.msra.gmra.mrb[204].mxu1 %v2799_v20  ;;  %12659 = vmatpush3.bf16.msra.mxu0 %v17118_v3 }
 0x9b8   :  { %12660 = vmatprep.subr.bf16.mxu0 %v13859_v63  ;;  %12666 = vmatprep.mubr.msk.bf16.mxu0 %vm13860_vm4, %v13859_v63 }
 0x9b9   :  { %8336 = vmatprep.mubr.bf16.mxu1 %v13861_v60  ;;  %8305 = vmatpush1.bf16.msra.mxu1 %v13417_v9 }
 0x9bb   :  { %12661 = vmatpush3.bf16.msra.mxu0 %v17128_v31 }
 0x9bc   :  { %12662 = vmatprep.subr.bf16.mxu0 %v13859_v63 }
 0x9bf   :  { %12663 = vmatpush3.bf16.msra.mxu0 %v17135_v25 }
 0x9c0   :  { %12664 = vmatprep.subr.bf16.mxu0 %v13859_v63 }
 0x9c3   :  { %12665 = vmatpush3.bf16.msra.mxu0 %v17142_v57 }
 0x9c4   :  { %8345 = vmatprep.subr.bf16.mxu0 %v13422_v34 }
 0x9c6   :  { %12667 = vmatmul.mubr.msk.bf16.vlgmr.msra.gmra.mrb[8].mxu0 %vm639_vm0, %v2713_v45  ;;  %v13425_v45 = vld [vmem:[%s18029_s7 + $0xc24] ss:$16 sps:$4 sm:$0xff]  }
 0x9c7   :  { %8377 = vmatprep.mubr.bf16.mxu0 %v13861_v60  ;;  %8346 = vmatpush1.bf16.msra.mxu0 %v13420_v56 }
 0x9c8   :  { %8306 = vmatprep.subr.bf16.mxu1 %v13425_v45  ;;  %8347 = vmatprep.subr.bf16.mxu0 %v13428_v5 }
 0x9c9   :  { %8307 = vmatpush1.bf16.msra.mxu1 %v13423_v2 }
 0x9ca   :  { %8308 = vmatprep.subr.bf16.mxu1 %v13431_v6 }
 0x9cb   :  { %8348 = vmatpush1.bf16.msra.mxu0 %v13426_v53 }
 0x9cc   :  { %8349 = vmatprep.subr.bf16.mxu0 %v13434_v42 }
 0x9cd   :  { %8309 = vmatpush1.bf16.msra.mxu1 %v13429_v51 }
 0x9cf   :  { %8350 = vmatpush1.bf16.msra.mxu0 %v13432_v33 }
 0xa19   :  { %v7093_v29 = vpop.f32.mrb[236].mxu0  ;;  %v7134_v55 = vpop.f32.mrb[180].mxu1 }
 0xa1a   :  { %v7141_v35 = vadd.f32 %v7093_v29, %v16714_v61  ;;  %v7143_v22 = vadd.f32 %v7134_v55, %v16716_v39  ;;  %v7095_v16 = vpop.f32.mrb[237].mxu0  ;;  %v7136_v52 = vpop.f32.mrb[181].mxu1  ;;  %v13437_v61 = vld [vmem:[%s18029_s7 + $0xc64] ss:$16 sps:$4 sm:$0xff]   ;;  %v13440_v39 = vld [vmem:[%s18029_s7 + $0xc6c] ss:$16 sps:$4 sm:$0xff]  }
 0xa1b   :  { %v7142_v4 = vadd.f32 %v7095_v16, %v16718_v24  ;;  %v7144_v19 = vadd.f32 %v7136_v52, %v16720_v0  ;;  %v7097_v32 = vpop.f32.mrb[238].mxu0  ;;  %v7138_v17 = vpop.f32.mrb[182].mxu1  ;;  %v13435_v24 = vld [vmem:[%s18029_s7 + $0xc60] ss:$16 sps:$4 sm:$0xff]   ;;  %v13438_v0 = vld [vmem:[%s18029_s7 + $0xc68] ss:$16 sps:$4 sm:$0xff]   ;;  %8310 = vmatprep.subr.bf16.mxu1 %v13437_v61  ;;  %8351 = vmatprep.subr.bf16.mxu0 %v13440_v39 }
 0xa1c   :  { %v7098_v59 = vpop.f32.mrb[239].mxu0  ;;  %v7139_v50 = vpop.f32.mrb[183].mxu1  ;;  %8311 = vmatpush1.bf16.msra.mxu1 %v13435_v24  ;;  %8352 = vmatpush1.bf16.msra.mxu0 %v13438_v0 }
 0xa1d   :  { %8491 = vmatprep.subr.bf16.mxu1 %v13443_v15  ;;  %8532 = vmatprep.subr.bf16.mxu0 %v13446_v8 }
 0xa29   :  { %v7280_v49 = vpop.f32.mrb[240].mxu0  ;;  %v7321_v40 = vpop.f32.mrb[184].mxu1 }
 0xa2a   :  { %v7328_v43 = vadd.f32 %v7280_v49, %v7141_v35  ;;  %v7330_v46 = vadd.f32 %v7321_v40, %v7143_v22  ;;  %v7282_v47 = vpop.f32.mrb[241].mxu0  ;;  %v7323_v20 = vpop.f32.mrb[185].mxu1 }
 0xa2b   :  { %v7329_v9 = vadd.f32 %v7282_v47, %v7142_v4  ;;  %v7331_v10 = vadd.f32 %v7323_v20, %v7144_v19  ;;  %v7284_v56 = vpop.f32.mrb[242].mxu0  ;;  %v7325_v34 = vpop.f32.mrb[186].mxu1 }
 0xa2c   :  { %v7285_v45 = vpop.f32.mrb[243].mxu0  ;;  %v7326_v5 = vpop.f32.mrb[187].mxu1 }
 0xa39   :  { %v7466_v2 = vpop.f32.mrb[244].mxu0  ;;  %v7507_v53 = vpop.f32.mrb[188].mxu1 }
 0xa3a   :  { %v7514_v6 = vadd.f32 %v7466_v2, %v7328_v43  ;;  %v7516_v42 = vadd.f32 %v7507_v53, %v7330_v46  ;;  %v7468_v29 = vpop.f32.mrb[245].mxu0  ;;  %v7509_v55 = vpop.f32.mrb[189].mxu1 }
 0xa3b   :  { %v7515_v51 = vadd.f32 %v7468_v29, %v7329_v9  ;;  %v7517_v33 = vadd.f32 %v7509_v55, %v7331_v10  ;;  %v7470_v16 = vpop.f32.mrb[246].mxu0  ;;  %v7511_v52 = vpop.f32.mrb[190].mxu1 }
 0xa3c   :  { %v7471_v35 = vpop.f32.mrb[247].mxu0  ;;  %v7512_v22 = vpop.f32.mrb[191].mxu1 }
 0xa49   :  { %v7652_v32 = vpop.f32.mrb[248].mxu0  ;;  %v7693_v17 = vpop.f32.mrb[192].mxu1 }
 0xa4a   :  { %v7700_v4 = vadd.f32 %v7652_v32, %v7514_v6  ;;  %v7702_v19 = vadd.f32 %v7693_v17, %v7516_v42  ;;  %v7654_v59 = vpop.f32.mrb[249].mxu0  ;;  %v7695_v50 = vpop.f32.mrb[193].mxu1 }
 0xa4b   :  { %v7701_v61 = vadd.f32 %v7654_v59, %v7515_v51  ;;  %v7703_v39 = vadd.f32 %v7695_v50, %v7517_v33  ;;  %v7656_v24 = vpop.f32.mrb[250].mxu0  ;;  %v7697_v0 = vpop.f32.mrb[194].mxu1 }
 0xa4c   :  { %v7657_v15 = vpop.f32.mrb[251].mxu0  ;;  %v7698_v8 = vpop.f32.mrb[195].mxu1  ;;  %v17218_v0 = vld [vmem:[%s18028_s6] ss:$0 sm:$0xff] }
 0xa59   :  { %v7838_v49 = vpop.f32.mrb[252].mxu0  ;;  %v7879_v40 = vpop.f32.mrb[196].mxu1 }
 0xa5a   :  { %v7886_v43 = vadd.f32 %v7838_v49, %v7700_v4  ;;  %v7888_v46 = vadd.f32 %v7879_v40, %v7702_v19  ;;  %v7840_v47 = vpop.f32.mrb[253].mxu0  ;;  %v7881_v20 = vpop.f32.mrb[197].mxu1 }
 0xa5b   :  { %v7887_v9 = vadd.f32 %v7840_v47, %v7701_v61  ;;  %v7889_v10 = vadd.f32 %v7881_v20, %v7703_v39  ;;  %v7842_v56 = vpop.f32.mrb[254].mxu0  ;;  %v7883_v34 = vpop.f32.mrb[198].mxu1 }
 0xa5c   :  { %v7843_v45 = vpop.f32.mrb[255].mxu0  ;;  %v7884_v5 = vpop.f32.mrb[199].mxu1 }
 0xa69   :  { %v8024_v2 = vpop.f32.mrb[0].mxu0  ;;  %v8065_v53 = vpop.f32.mrb[200].mxu1 }
 0xa6a   :  { %v17207_v6 = vadd.f32 %v8024_v2, %v7886_v43  ;;  %v17209_v42 = vadd.f32 %v8065_v53, %v7888_v46  ;;  %v8026_v29 = vpop.f32.mrb[1].mxu0  ;;  %v8067_v55 = vpop.f32.mrb[201].mxu1  ;;  %v13441_v53 = vld [vmem:[%s18029_s7 + $0xc80] ss:$16 sps:$4 sm:$0xff]  }
 0xa6b   :  { %v17211_v51 = vadd.f32 %v8026_v29, %v7887_v9  ;;  %v17213_v33 = vadd.f32 %v8067_v55, %v7889_v10  ;;  %v8028_v16 = vpop.f32.mrb[2].mxu0  ;;  %v8069_v52 = vpop.f32.mrb[202].mxu1  ;;  %v13444_v29 = vld [vmem:[%s18029_s7 + $0xc88] ss:$16 sps:$4 sm:$0xff]  }
 0xa6c   :  { %v8029_v35 = vpop.f32.mrb[3].mxu0  ;;  %v8070_v22 = vpop.f32.mrb[203].mxu1  ;;  %v13449_v16 = vld [vmem:[%s18029_s7 + $0xca4] ss:$16 sps:$4 sm:$0xff]   ;;  %v13452_v52 = vld [vmem:[%s18029_s7 + $0xcac] ss:$16 sps:$4 sm:$0xff]  }
 0xa6d   :  { %v13447_v35 = vld [vmem:[%s18029_s7 + $0xca0] ss:$16 sps:$4 sm:$0xff]   ;;  %v13450_v22 = vld [vmem:[%s18029_s7 + $0xca8] ss:$16 sps:$4 sm:$0xff]  }
 0xa89   :  { %v12316_v32 = vpop.f32.mrb[4].mxu0 }
 0xa8a   :  { %v12338_v17 = vpop.f32.mrb[204].mxu1  ;;  %v12317_v4 = vpop.f32.mrb[5].mxu0 }
 0xa8b   :  { %v12318_v19 = vadd.f32 %v12317_v4, %v12316_v32  ;;  %v12339_v59 = vpop.f32.mrb[205].mxu1  ;;  %v12319_v50 = vpop.f32.mrb[6].mxu0  ;;  %v13455_v32 = vld [vmem:[%s18029_s7 + $0xcc4] ss:$16 sps:$4 sm:$0xff]   ;;  %v13453_v4 = vld [vmem:[%s18029_s7 + $0xcc0] ss:$16 sps:$4 sm:$0xff]  }
 0xa8c   :  { %v12340_v61 = vadd.f32 %v12339_v59, %v12338_v17  ;;  %v12341_v39 = vpop.f32.mrb[206].mxu1  ;;  %v12320_v24 = vpop.f32.mrb[7].mxu0  ;;  %v13458_v17 = vld [vmem:[%s18029_s7 + $0xccc] ss:$16 sps:$4 sm:$0xff]   ;;  %v13461_v59 = vld [vmem:[%s18029_s7 + $0xce4] ss:$16 sps:$4 sm:$0xff]  }
 0xa8d   :  { %v8114_v15 = vadd.f32 %v17218_v0, %v12318_v19  ;;  %v12321_v8 = vadd.f32 %v12320_v24, %v12319_v50  ;;  %v12342_v49 = vpop.f32.mrb[207].mxu1  ;;  %v13456_v19 = vld [vmem:[%s18029_s7 + $0xcc8] ss:$16 sps:$4 sm:$0xff]   ;;  %v13464_v50 = vld [vmem:[%s18029_s7 + $0xcec] ss:$16 sps:$4 sm:$0xff]  }
 0xa8e   :  { %v12343_v40 = vadd.f32 %v12342_v49, %v12341_v39  ;;  %v13462_v39 = vld [vmem:[%s18029_s7 + $0xce8] ss:$16 sps:$4 sm:$0xff]   ;;  %v13467_v24 = vld [vmem:[%s18029_s7 + $0xd04] ss:$16 sps:$4 sm:$0xff]  }
 0xa8f   :  { %v8117_v43 = vadd.f32 %v17218_v0, %v12321_v8  ;;  %v8155_v46 = vadd.f32 %v12340_v61, %v8114_v15  ;;  %v13459_v61 = vld [vmem:[%s18029_s7 + $0xce0] ss:$16 sps:$4 sm:$0xff]   ;;  %v13470_v15 = vld [vmem:[%s18029_s7 + $0xd0c] ss:$16 sps:$4 sm:$0xff]   ;;  %v13468_v49 = vld [vmem:[%s18029_s7 + $0xd08] ss:$16 sps:$4 sm:$0xff]  }
 0xa90   :  { %v13465_v8 = vld [vmem:[%s18029_s7 + $0xd00] ss:$16 sps:$4 sm:$0xff]  }
 0xa91   :  { %v8158_v47 = vadd.f32 %v12343_v40, %v8117_v43  ;;  %v13473_v43 = vld [vmem:[%s18029_s7 + $0xd24] ss:$16 sps:$4 sm:$0xff]  }
 0xa99   :  { %v8195_v20 = vpop.f32.mrb[8].mxu0 }
 0xa9a   :  { %v8196_v9 = vadd.f32 %v8195_v20, %v8155_v46  ;;  %v12668_v10 = vpop.f32.mrb[9].mxu0  ;;  %v13476_v46 = vld [vmem:[%s18029_s7 + $0xd2c] ss:$16 sps:$4 sm:$0xff]   ;;  %v13474_v20 = vld [vmem:[%s18029_s7 + $0xd28] ss:$16 sps:$4 sm:$0xff]  }
 0xa9b   :  { %v8198_v56 = vpop.f32.mrb[10].mxu0  ;;  %v13482_v10 = vld [vmem:[%s18029_s7 + $0xd4c] ss:$16 sps:$4 sm:$0xff]  }
 0xa9c   :  { %v8199_v34 = vadd.f32 %v8198_v56, %v8158_v47  ;;  %v12669_v45 = vpop.f32.mrb[11].mxu0  ;;  %v8202_v5 = vmax.f32 %v8196_v9, 0.0  ;;  %v13471_v47 = vld [vmem:[%s18029_s7 + $0xd20] ss:$16 sps:$4 sm:$0xff]   ;;  %v13479_v9 = vld [vmem:[%s18029_s7 + $0xd44] ss:$16 sps:$4 sm:$0xff]  }
 0xa9d   :  { %v13477_v56 = vld [vmem:[%s18029_s7 + $0xd40] ss:$16 sps:$4 sm:$0xff]   ;;  %v13485_v45 = vld [vmem:[%s18029_s7 + $0xd64] ss:$16 sps:$4 sm:$0xff]  }
 0xa9e   :  { %v8203_v2 = vmax.f32 %v8199_v34, 0.0  ;;  %v13480_v34 = vld [vmem:[%s18029_s7 + $0xd48] ss:$16 sps:$4 sm:$0xff]  }
 0xaa0   :  { %v17228_v55 = vpack.c.bf16 %v8203_v2, %v8202_v5  ;;  %v13488_v5 = vld [vmem:[%s18029_s7 + $0xd6c] ss:$16 sps:$4 sm:$0xff]   ;;  %v13483_v2 = vld [vmem:[%s18029_s7 + $0xd60] ss:$16 sps:$4 sm:$0xff]  }
 0xaa2   :  { %11658 = vmatmul.mubr.msk.bf16.vlgmr.msra.gmra.mrb[208].mxu1 %vm639_vm0, %v17228_v55  ;;  %11659 = vmatmul.mubr.msk.bf16.vlgmr.msra.gmra.mrb[12].mxu0 %vm639_vm0, %v17228_v55  ;;  %v8407_v40 = vrot.slane %v17228_v55, 1 }
 0xaa3   :  { %8492 = vmatpush1.bf16.msra.mxu1 %v13441_v53  ;;  %8533 = vmatpush1.bf16.msra.mxu0 %v13444_v29  ;;  %v13486_v53 = vld [vmem:[%s18029_s7 + $0xd68] ss:$16 sps:$4 sm:$0xff]   ;;  %v13491_v29 = vld [vmem:[%s18029_s7 + $0xd84] ss:$16 sps:$4 sm:$0xff]  }
 0xaa4   :  { %8493 = vmatprep.subr.bf16.mxu1 %v13449_v16  ;;  %8534 = vmatprep.subr.bf16.mxu0 %v13452_v52  ;;  %v13494_v16 = vld [vmem:[%s18029_s7 + $0xd8c] ss:$16 sps:$4 sm:$0xff]   ;;  %v13489_v52 = vld [vmem:[%s18029_s7 + $0xd80] ss:$16 sps:$4 sm:$0xff]  }
 0xaa5   :  { %8523 = vmatprep.mubr.bf16.mxu1 %v13861_v60  ;;  %8564 = vmatprep.mubr.bf16.mxu0 %v13861_v60 }
 0xaa7   :  { %8494 = vmatpush1.bf16.msra.mxu1 %v13447_v35  ;;  %8535 = vmatpush1.bf16.msra.mxu0 %v13450_v22  ;;  %v13492_v35 = vld [vmem:[%s18029_s7 + $0xd88] ss:$16 sps:$4 sm:$0xff]   ;;  %v8593_v22 = vrot.slane %v17228_v55, 2 }
 0xaa8   :  { %8495 = vmatprep.subr.bf16.mxu1 %v13455_v32  ;;  %8536 = vmatprep.subr.bf16.mxu0 %v13458_v17  ;;  %v13497_v32 = vld [vmem:[%s18029_s7 + $0xda4] ss:$16 sps:$4 sm:$0xff]   ;;  %v13500_v17 = vld [vmem:[%s18029_s7 + $0xdac] ss:$16 sps:$4 sm:$0xff]  }
 0xaab   :  { %8496 = vmatpush1.bf16.msra.mxu1 %v13453_v4  ;;  %8537 = vmatpush1.bf16.msra.mxu0 %v13456_v19  ;;  %v13495_v4 = vld [vmem:[%s18029_s7 + $0xda0] ss:$16 sps:$4 sm:$0xff]   ;;  %v13498_v19 = vld [vmem:[%s18029_s7 + $0xda8] ss:$16 sps:$4 sm:$0xff]  }
 0xaac   :  { %8497 = vmatprep.subr.bf16.mxu1 %v13461_v59  ;;  %8538 = vmatprep.subr.bf16.mxu0 %v13464_v50  ;;  %v13503_v59 = vld [vmem:[%s18029_s7 + $0xdc4] ss:$16 sps:$4 sm:$0xff]   ;;  %v13506_v50 = vld [vmem:[%s18029_s7 + $0xdcc] ss:$16 sps:$4 sm:$0xff]  }
 0xaaf   :  { %8498 = vmatpush1.bf16.msra.mxu1 %v13459_v61  ;;  %8539 = vmatpush1.bf16.msra.mxu0 %v13462_v39  ;;  %v13501_v61 = vld [vmem:[%s18029_s7 + $0xdc0] ss:$16 sps:$4 sm:$0xff]   ;;  %v13504_v39 = vld [vmem:[%s18029_s7 + $0xdc8] ss:$16 sps:$4 sm:$0xff]  }
 0xab0   :  { %8677 = vmatprep.subr.bf16.mxu1 %v13467_v24  ;;  %8718 = vmatprep.subr.bf16.mxu0 %v13470_v15  ;;  %v13509_v24 = vld [vmem:[%s18029_s7 + $0xde4] ss:$16 sps:$4 sm:$0xff]   ;;  %v13512_v15 = vld [vmem:[%s18029_s7 + $0xdec] ss:$16 sps:$4 sm:$0xff]  }
 0xab2   :  { %11676 = vmatmul.mubr.msk.bf16.vlgmr.msra.gmra.mrb[212].mxu1 %vm639_vm0, %v8407_v40  ;;  %11677 = vmatmul.mubr.msk.bf16.vlgmr.msra.gmra.mrb[16].mxu0 %vm639_vm0, %v8407_v40  ;;  %v13515_v40 = vld [vmem:[%s18029_s7 + $0xe04] ss:$16 sps:$4 sm:$0xff]  }
 0xab3   :  { %8678 = vmatpush1.bf16.msra.mxu1 %v13465_v8  ;;  %8719 = vmatpush1.bf16.msra.mxu0 %v13468_v49  ;;  %v13507_v8 = vld [vmem:[%s18029_s7 + $0xde0] ss:$16 sps:$4 sm:$0xff]   ;;  %v13510_v49 = vld [vmem:[%s18029_s7 + $0xde8] ss:$16 sps:$4 sm:$0xff]  }
 0xab4   :  { %8679 = vmatprep.subr.bf16.mxu1 %v13473_v43  ;;  %8720 = vmatprep.subr.bf16.mxu0 %v13476_v46  ;;  %v13518_v43 = vld [vmem:[%s18029_s7 + $0xe0c] ss:$16 sps:$4 sm:$0xff]   ;;  %v13513_v46 = vld [vmem:[%s18029_s7 + $0xe00] ss:$16 sps:$4 sm:$0xff]  }
 0xab5   :  { %8709 = vmatprep.mubr.bf16.mxu1 %v13861_v60  ;;  %8750 = vmatprep.mubr.bf16.mxu0 %v13861_v60 }
 0xab7   :  { %8680 = vmatpush1.bf16.msra.mxu1 %v13471_v47  ;;  %8721 = vmatpush1.bf16.msra.mxu0 %v13474_v20  ;;  %v13516_v47 = vld [vmem:[%s18029_s7 + $0xe08] ss:$16 sps:$4 sm:$0xff]   ;;  %v8779_v20 = vrot.slane %v17228_v55, 3 }
 0xab8   :  { %8681 = vmatprep.subr.bf16.mxu1 %v13479_v9  ;;  %8722 = vmatprep.subr.bf16.mxu0 %v13482_v10  ;;  %v13521_v9 = vld [vmem:[%s18029_s7 + $0xe24] ss:$16 sps:$4 sm:$0xff]   ;;  %v13524_v10 = vld [vmem:[%s18029_s7 + $0xe2c] ss:$16 sps:$4 sm:$0xff]  }
 0xabb   :  { %8682 = vmatpush1.bf16.msra.mxu1 %v13477_v56  ;;  %8723 = vmatpush1.bf16.msra.mxu0 %v13480_v34  ;;  %v13519_v56 = vld [vmem:[%s18029_s7 + $0xe20] ss:$16 sps:$4 sm:$0xff]   ;;  %v13522_v34 = vld [vmem:[%s18029_s7 + $0xe28] ss:$16 sps:$4 sm:$0xff]  }
 0xabc   :  { %8683 = vmatprep.subr.bf16.mxu1 %v13485_v45  ;;  %8724 = vmatprep.subr.bf16.mxu0 %v13488_v5  ;;  %v13527_v45 = vld [vmem:[%s18029_s7 + $0xe44] ss:$16 sps:$4 sm:$0xff]   ;;  %v13530_v5 = vld [vmem:[%s18029_s7 + $0xe4c] ss:$16 sps:$4 sm:$0xff]  }
 0xabf   :  { %8684 = vmatpush1.bf16.msra.mxu1 %v13483_v2  ;;  %8725 = vmatpush1.bf16.msra.mxu0 %v13486_v53  ;;  %v13525_v2 = vld [vmem:[%s18029_s7 + $0xe40] ss:$16 sps:$4 sm:$0xff]   ;;  %v13528_v53 = vld [vmem:[%s18029_s7 + $0xe48] ss:$16 sps:$4 sm:$0xff]  }
 0xac0   :  { %8863 = vmatprep.subr.bf16.mxu1 %v13491_v29  ;;  %8904 = vmatprep.subr.bf16.mxu0 %v13494_v16  ;;  %v13533_v29 = vld [vmem:[%s18029_s7 + $0xe64] ss:$16 sps:$4 sm:$0xff]   ;;  %v13536_v16 = vld [vmem:[%s18029_s7 + $0xe6c] ss:$16 sps:$4 sm:$0xff]  }
 0xac2   :  { %11694 = vmatmul.mubr.msk.bf16.vlgmr.msra.gmra.mrb[216].mxu1 %vm639_vm0, %v8593_v22  ;;  %11695 = vmatmul.mubr.msk.bf16.vlgmr.msra.gmra.mrb[20].mxu0 %vm639_vm0, %v8593_v22  ;;  %v13539_v22 = vld [vmem:[%s18029_s7 + $0xe84] ss:$16 sps:$4 sm:$0xff]  }
 0xac3   :  { %8864 = vmatpush1.bf16.msra.mxu1 %v13489_v52  ;;  %8905 = vmatpush1.bf16.msra.mxu0 %v13492_v35  ;;  %v13531_v52 = vld [vmem:[%s18029_s7 + $0xe60] ss:$16 sps:$4 sm:$0xff]   ;;  %v13534_v35 = vld [vmem:[%s18029_s7 + $0xe68] ss:$16 sps:$4 sm:$0xff]  }
 0xac4   :  { %8865 = vmatprep.subr.bf16.mxu1 %v13497_v32  ;;  %8906 = vmatprep.subr.bf16.mxu0 %v13500_v17  ;;  %v13542_v32 = vld [vmem:[%s18029_s7 + $0xe8c] ss:$16 sps:$4 sm:$0xff]   ;;  %v13537_v17 = vld [vmem:[%s18029_s7 + $0xe80] ss:$16 sps:$4 sm:$0xff]  }
 0xac5   :  { %8895 = vmatprep.mubr.bf16.mxu1 %v13861_v60  ;;  %8936 = vmatprep.mubr.bf16.mxu0 %v13861_v60 }
 0xac7   :  { %8866 = vmatpush1.bf16.msra.mxu1 %v13495_v4  ;;  %8907 = vmatpush1.bf16.msra.mxu0 %v13498_v19  ;;  %v13540_v4 = vld [vmem:[%s18029_s7 + $0xe88] ss:$16 sps:$4 sm:$0xff]   ;;  %v8965_v19 = vrot.slane %v17228_v55, 4 }
 0xac8   :  { %8867 = vmatprep.subr.bf16.mxu1 %v13503_v59  ;;  %8908 = vmatprep.subr.bf16.mxu0 %v13506_v50  ;;  %v13545_v59 = vld [vmem:[%s18029_s7 + $0xea4] ss:$16 sps:$4 sm:$0xff]   ;;  %v13548_v50 = vld [vmem:[%s18029_s7 + $0xeac] ss:$16 sps:$4 sm:$0xff]  }
 0xacb   :  { %8868 = vmatpush1.bf16.msra.mxu1 %v13501_v61  ;;  %8909 = vmatpush1.bf16.msra.mxu0 %v13504_v39  ;;  %v13543_v61 = vld [vmem:[%s18029_s7 + $0xea0] ss:$16 sps:$4 sm:$0xff]   ;;  %v13546_v39 = vld [vmem:[%s18029_s7 + $0xea8] ss:$16 sps:$4 sm:$0xff]  }
 0xacc   :  { %8869 = vmatprep.subr.bf16.mxu1 %v13509_v24  ;;  %8910 = vmatprep.subr.bf16.mxu0 %v13512_v15  ;;  %v13551_v24 = vld [vmem:[%s18029_s7 + $0xec4] ss:$16 sps:$4 sm:$0xff]   ;;  %v13554_v15 = vld [vmem:[%s18029_s7 + $0xecc] ss:$16 sps:$4 sm:$0xff]  }
 0xacf   :  { %8870 = vmatpush1.bf16.msra.mxu1 %v13507_v8  ;;  %8911 = vmatpush1.bf16.msra.mxu0 %v13510_v49  ;;  %v13549_v8 = vld [vmem:[%s18029_s7 + $0xec0] ss:$16 sps:$4 sm:$0xff]   ;;  %v13552_v49 = vld [vmem:[%s18029_s7 + $0xec8] ss:$16 sps:$4 sm:$0xff]  }
 0xad0   :  { %9049 = vmatprep.subr.bf16.mxu1 %v13515_v40  ;;  %9090 = vmatprep.subr.bf16.mxu0 %v13518_v43  ;;  %v13557_v40 = vld [vmem:[%s18029_s7 + $0xee4] ss:$16 sps:$4 sm:$0xff]   ;;  %v13560_v43 = vld [vmem:[%s18029_s7 + $0xeec] ss:$16 sps:$4 sm:$0xff]  }
 0xad2   :  { %11712 = vmatmul.mubr.msk.bf16.vlgmr.msra.gmra.mrb[220].mxu1 %vm639_vm0, %v8779_v20  ;;  %11713 = vmatmul.mubr.msk.bf16.vlgmr.msra.gmra.mrb[24].mxu0 %vm639_vm0, %v8779_v20  ;;  %v2711_v20 = vpop.permute.xlu1 %2710 }
 0xad3   :  { %9050 = vmatpush1.bf16.msra.mxu1 %v13513_v46  ;;  %9091 = vmatpush1.bf16.msra.mxu0 %v13516_v47  ;;  %v13555_v46 = vld [vmem:[%s18029_s7 + $0xee0] ss:$16 sps:$4 sm:$0xff]   ;;  %v13558_v47 = vld [vmem:[%s18029_s7 + $0xee8] ss:$16 sps:$4 sm:$0xff]  }
 0xad4   :  { %9051 = vmatprep.subr.bf16.mxu1 %v13521_v9  ;;  %9092 = vmatprep.subr.bf16.mxu0 %v13524_v10  ;;  %v2731_v9 = vpop.permute.xlu0 %2730  ;;  %v9151_v10 = vrot.slane %v17228_v55, 5 }
 0xad5   :  { %9081 = vmatprep.mubr.bf16.mxu1 %v13861_v60  ;;  %9122 = vmatprep.mubr.bf16.mxu0 %v13861_v60  ;;  %v2811_v55 = vsel %vm639_vm0, %v15057_v12, %v2731_v9  ;;  %v13566_v12 = vld [vmem:[%s18029_s7 + $0xf0c] ss:$16 sps:$4 sm:$0xff]  }
 0xad7   :  { %9052 = vmatpush1.bf16.msra.mxu1 %v13519_v56  ;;  %9093 = vmatpush1.bf16.msra.mxu0 %v13522_v34  ;;  %v13817_v56 = vld [vmem:[%s18027_s5 + $0x40] sm:$0xff]   ;;  %v2779_v34 = vsel %vm639_vm0, %v15046_v26, %v2711_v20  ;;  %v13820_v26 = vld [vmem:[%s18027_s5 + $0x8] sm:$0xff]  }
 0xad8   :  { %9053 = vmatprep.subr.bf16.mxu1 %v13527_v45  ;;  %9094 = vmatprep.subr.bf16.mxu0 %v13530_v5  ;;  %v13818_v45 = vld [vmem:[%s18027_s5] sm:$0xff]   ;;  %v13821_v5 = vld [vmem:[%s18027_s5 + $0x50] sm:$0xff]  }
 0xadb   :  { %9054 = vmatpush1.bf16.msra.mxu1 %v13525_v2  ;;  %9095 = vmatpush1.bf16.msra.mxu0 %v13528_v53  ;;  %v13573_v2 = vld [vmem:[%s18029_s7 + $0xf40] ss:$16 sps:$4 sm:$0xff]   ;;  %v13576_v53 = vld [vmem:[%s18029_s7 + $0xf48] ss:$16 sps:$4 sm:$0xff]  }
 0xadc   :  { %9055 = vmatprep.subr.bf16.mxu1 %v13533_v29  ;;  %9096 = vmatprep.subr.bf16.mxu0 %v13536_v16 }
 0xadf   :  { %9056 = vmatpush1.bf16.msra.mxu1 %v13531_v52  ;;  %9097 = vmatpush1.bf16.msra.mxu0 %v13534_v35 }
 0xae0   :  { %9235 = vmatprep.subr.bf16.mxu1 %v13539_v22  ;;  %9276 = vmatprep.subr.bf16.mxu0 %v13542_v32 }
 0xae2   :  { %11730 = vmatmul.mubr.msk.bf16.vlgmr.msra.gmra.mrb[224].mxu1 %vm639_vm0, %v8965_v19  ;;  %11731 = vmatmul.mubr.msk.bf16.vlgmr.msra.gmra.mrb[28].mxu0 %vm639_vm0, %v8965_v19 }
 0xae3   :  { %9236 = vmatpush1.bf16.msra.mxu1 %v13537_v17  ;;  %9277 = vmatpush1.bf16.msra.mxu0 %v13540_v4 }
 0xae4   :  { %9237 = vmatprep.subr.bf16.mxu1 %v13545_v59  ;;  %9278 = vmatprep.subr.bf16.mxu0 %v13548_v50  ;;  %v13587_v50 = vld [vmem:[%s18029_s7 + $0xf84] ss:$16 sps:$4 sm:$0xff]  }
 0xae5   :  { %9267 = vmatprep.mubr.bf16.mxu1 %v13861_v60  ;;  %9308 = vmatprep.mubr.bf16.mxu0 %v13861_v60 }
 0xae7   :  { %9238 = vmatpush1.bf16.msra.mxu1 %v13543_v61  ;;  %9279 = vmatpush1.bf16.msra.mxu0 %v13546_v39  ;;  %v13590_v61 = vld [vmem:[%s18029_s7 + $0xf8c] ss:$16 sps:$4 sm:$0xff]  }
 0xae8   :  { %9239 = vmatprep.subr.bf16.mxu1 %v13551_v24  ;;  %9280 = vmatprep.subr.bf16.mxu0 %v13554_v15 }
 0xaeb   :  { %9240 = vmatpush1.bf16.msra.mxu1 %v13549_v8  ;;  %9281 = vmatpush1.bf16.msra.mxu0 %v13552_v49 }
 0xaec   :  { %9241 = vmatprep.subr.bf16.mxu1 %v13557_v40  ;;  %9282 = vmatprep.subr.bf16.mxu0 %v13560_v43 }
 0xaef   :  { %9242 = vmatpush1.bf16.msra.mxu1 %v13555_v46  ;;  %9283 = vmatpush1.bf16.msra.mxu0 %v13558_v47 }
 0xaf0   :  { %12349 = vmatprep.subr.bf16.mxu1 %v13817_v56  ;;  %12371 = vmatprep.subr.bf16.mxu0 %v16991_v11  ;;  %v13819_v11 = vld [vmem:[%s18027_s5 + $0x48] sm:$0xff]  }
 0xaf2   :  { %11748 = vmatmul.mubr.msk.bf16.vlgmr.msra.gmra.mrb[228].mxu1 %vm639_vm0, %v9151_v10  ;;  %11749 = vmatmul.mubr.msk.bf16.vlgmr.msra.gmra.mrb[32].mxu0 %vm639_vm0, %v9151_v10 }
 0xaf3   :  { %12350 = vmatpush3.bf16.msra.mxu1 %v13818_v45  ;;  %9356 = vmatprep.mubr.bf16.mxu1 %v2779_v34 }
 0xaf4   :  { %12372 = vmatpush3.bf16.msra.mxu0 %v17004_v30  ;;  %9397 = vmatprep.mubr.bf16.mxu0 %v2811_v55  ;;  %v13822_v30 = vld [vmem:[%s18027_s5 + $0x10] sm:$0xff]  }
 0xaf5   :  { %12351 = vmatprep.subr.bf16.mxu1 %v13819_v11  ;;  %12373 = vmatprep.subr.bf16.mxu0 %v17011_v23  ;;  %v13823_v23 = vld [vmem:[%s18027_s5 + $0x58] sm:$0xff]  }
 0xaf7   :  { %12352 = vmatpush3.bf16.msra.mxu1 %v13820_v26 }
 0xaf8   :  { %12374 = vmatpush3.bf16.msra.mxu0 %v17018_v27  ;;  %12353 = vmatprep.subr.bf16.mxu1 %v13821_v5  ;;  %v13824_v27 = vld [vmem:[%s18027_s5 + $0x18] sm:$0xff]  }
 0xaf9   :  { %12375 = vmatprep.subr.bf16.mxu0 %v17025_v14  ;;  %v13825_v14 = vld [vmem:[%s18027_s5 + $0x60] sm:$0xff]  }
 0xafb   :  { %12354 = vmatpush3.bf16.msra.mxu1 %v13822_v30 }
 0xafc   :  { %12376 = vmatpush3.bf16.msra.mxu0 %v17032_v28  ;;  %12355 = vmatprep.subr.bf16.mxu1 %v13823_v23  ;;  %v13826_v28 = vld [vmem:[%s18027_s5 + $0x20] sm:$0xff]  }
 0xafd   :  { %12377 = vmatprep.subr.bf16.mxu0 %v17039_v36  ;;  %v13827_v36 = vld [vmem:[%s18027_s5 + $0x68] sm:$0xff]  }
 0xaff   :  { %12356 = vmatpush3.bf16.msra.mxu1 %v13824_v27 }
 0xb00   :  { %12378 = vmatpush3.bf16.msra.mxu0 %v17046_v41  ;;  %12357 = vmatprep.subr.bf16.mxu1 %v13825_v14  ;;  %v13828_v41 = vld [vmem:[%s18027_s5 + $0x28] sm:$0xff]  }
 0xb01   :  { %12379 = vmatprep.subr.bf16.mxu0 %v17053_v62  ;;  %v13829_v62 = vld [vmem:[%s18027_s5 + $0x70] sm:$0xff]  }
 0xb03   :  { %12358 = vmatpush3.bf16.msra.mxu1 %v13826_v28 }
 0xb04   :  { %12380 = vmatpush3.bf16.msra.mxu0 %v17060_v13  ;;  %12359 = vmatprep.subr.bf16.mxu1 %v13827_v36  ;;  %v13830_v13 = vld [vmem:[%s18027_s5 + $0x30] sm:$0xff]  }
 0xb05   :  { %12381 = vmatprep.subr.bf16.mxu0 %v17067_v48  ;;  %v13831_v48 = vld [vmem:[%s18027_s5 + $0x78] sm:$0xff]  }
 0xb07   :  { %12360 = vmatpush3.bf16.msra.mxu1 %v13828_v41 }
 0xb08   :  { %12382 = vmatpush3.bf16.msra.mxu0 %v17074_v18  ;;  %12361 = vmatprep.subr.bf16.mxu1 %v13829_v62  ;;  %v2725_v18 = vpop.permute.xlu1 %2724 }
 0xb09   :  { %12383 = vmatprep.subr.bf16.mxu0 %v17081_v21  ;;  %v2803_v21 = vsel %vm639_vm0, %v2712_v37, %v2725_v18  ;;  %v13561_v37 = vld [vmem:[%s18029_s7 + $0xf00] ss:$16 sps:$4 sm:$0xff]  }
 0xb0b   :  { %12362 = vmatpush3.bf16.msra.mxu1 %v13830_v13 }
 0xb0c   :  { %12384 = vmatpush3.bf16.msra.mxu0 %v17088_v44  ;;  %12363 = vmatprep.subr.bf16.mxu1 %v13831_v48  ;;  %v13569_v44 = vld [vmem:[%s18029_s7 + $0xf24] ss:$16 sps:$4 sm:$0xff]  }
 0xb0d   :  { %12385 = vmatprep.subr.bf16.mxu0 %v17095_v38  ;;  %v13572_v38 = vld [vmem:[%s18029_s7 + $0xf2c] ss:$16 sps:$4 sm:$0xff]  }
 0xb0f   :  { %12364 = vmatpush3.bf16.msra.mxu1 %v17101_v1  ;;  %v13567_v1 = vld [vmem:[%s18029_s7 + $0xf20] ss:$16 sps:$4 sm:$0xff]  }
 0xb10   :  { %12386 = vmatpush3.bf16.msra.mxu0 %v17107_v54  ;;  %12670 = vmatprep.subr.bf16.mxu1 %v13859_v63  ;;  %v13570_v54 = vld [vmem:[%s18029_s7 + $0xf28] ss:$16 sps:$4 sm:$0xff]  }
 0xb12   :  { %9357 = vmatmul.mubr.bf16.vlgmr.msra.gmra.mrb[232].mxu1 %v16541_v58  ;;  %v13563_v58 = vld [vmem:[%s18029_s7 + $0xf04] ss:$16 sps:$4 sm:$0xff]  }
 0xb13   :  { %9398 = vmatmul.mubr.bf16.vlgmr.msra.gmra.mrb[36].mxu0 %v2803_v21  ;;  %12671 = vmatpush3.bf16.msra.mxu1 %v17118_v3  ;;  %v13575_v3 = vld [vmem:[%s18029_s7 + $0xf44] ss:$16 sps:$4 sm:$0xff]  }
 0xb14   :  { %12672 = vmatprep.subr.bf16.mxu1 %v13859_v63  ;;  %12678 = vmatprep.mubr.msk.bf16.mxu1 %vm13860_vm4, %v13859_v63 }
 0xb15   :  { %9581 = vmatprep.mubr.bf16.mxu0 %v13861_v60  ;;  %9549 = vmatprep.subr.bf16.mxu0 %v13563_v58 }
 0xb16   :  { %9550 = vmatpush1.bf16.msra.mxu0 %v13561_v37 }
 0xb17   :  { %12673 = vmatpush3.bf16.msra.mxu1 %v17128_v31  ;;  %9551 = vmatprep.subr.bf16.mxu0 %v13569_v44  ;;  %v13578_v31 = vld [vmem:[%s18029_s7 + $0xf4c] ss:$16 sps:$4 sm:$0xff]  }
 0xb18   :  { %12674 = vmatprep.subr.bf16.mxu1 %v13859_v63 }
 0xb1a   :  { %9552 = vmatpush1.bf16.msra.mxu0 %v13567_v1 }
 0xb1b   :  { %12675 = vmatpush3.bf16.msra.mxu1 %v17135_v25  ;;  %9553 = vmatprep.subr.bf16.mxu0 %v13575_v3 }
 0xb1c   :  { %12676 = vmatprep.subr.bf16.mxu1 %v13859_v63  ;;  %v13564_v63 = vld [vmem:[%s18029_s7 + $0xf08] ss:$16 sps:$4 sm:$0xff]  }
 0xb1e   :  { %9554 = vmatpush1.bf16.msra.mxu0 %v13573_v2 }
 0xb1f   :  { %12677 = vmatpush3.bf16.msra.mxu1 %v17142_v57 }
 0xb20   :  { %9590 = vmatprep.subr.bf16.mxu1 %v13566_v12 }
 0xb22   :  { %12679 = vmatmul.mubr.msk.bf16.vlgmr.msra.gmra.mrb[236].mxu1 %vm639_vm0, %v2732_v7 }
 0xb23   :  { %9622 = vmatprep.mubr.bf16.mxu1 %v13861_v60  ;;  %9591 = vmatpush1.bf16.msra.mxu1 %v13564_v63 }
 0xb24   :  { %9592 = vmatprep.subr.bf16.mxu1 %v13572_v38 }
 0xb27   :  { %9593 = vmatpush1.bf16.msra.mxu1 %v13570_v54 }
 0xb28   :  { %9594 = vmatprep.subr.bf16.mxu1 %v13578_v31 }
 0xb2b   :  { %9595 = vmatpush1.bf16.msra.mxu1 %v13576_v53 }
 0xb75   :  { %v8338_v25 = vpop.f32.mrb[208].mxu1  ;;  %v8379_v57 = vpop.f32.mrb[12].mxu0 }
 0xb76   :  { %v8386_v29 = vadd.f32 %v8338_v25, %v17207_v6  ;;  %v8388_v16 = vadd.f32 %v8379_v57, %v17209_v42  ;;  %v8340_v52 = vpop.f32.mrb[209].mxu1  ;;  %v8381_v35 = vpop.f32.mrb[13].mxu0  ;;  %v13581_v6 = vld [vmem:[%s18029_s7 + $0xf64] ss:$16 sps:$4 sm:$0xff]   ;;  %v13584_v42 = vld [vmem:[%s18029_s7 + $0xf6c] ss:$16 sps:$4 sm:$0xff]  }
 0xb77   :  { %v8387_v22 = vadd.f32 %v8340_v52, %v17211_v51  ;;  %v8389_v32 = vadd.f32 %v8381_v35, %v17213_v33  ;;  %v8342_v17 = vpop.f32.mrb[210].mxu1  ;;  %v8383_v4 = vpop.f32.mrb[14].mxu0  ;;  %v13579_v51 = vld [vmem:[%s18029_s7 + $0xf60] ss:$16 sps:$4 sm:$0xff]   ;;  %v13582_v33 = vld [vmem:[%s18029_s7 + $0xf68] ss:$16 sps:$4 sm:$0xff]   ;;  %9555 = vmatprep.subr.bf16.mxu0 %v13581_v6  ;;  %9596 = vmatprep.subr.bf16.mxu1 %v13584_v42 }
 0xb78   :  { %v8343_v19 = vpop.f32.mrb[211].mxu1  ;;  %v8384_v59 = vpop.f32.mrb[15].mxu0  ;;  %9556 = vmatpush1.bf16.msra.mxu0 %v13579_v51  ;;  %9597 = vmatpush1.bf16.msra.mxu1 %v13582_v33 }
 0xb79   :  { %9736 = vmatprep.subr.bf16.mxu0 %v13587_v50  ;;  %9777 = vmatprep.subr.bf16.mxu1 %v13590_v61 }
 0xb85   :  { %v8525_v39 = vpop.f32.mrb[212].mxu1  ;;  %v8566_v24 = vpop.f32.mrb[16].mxu0 }
 0xb86   :  { %v8573_v15 = vadd.f32 %v8525_v39, %v8386_v29  ;;  %v8575_v8 = vadd.f32 %v8566_v24, %v8388_v16  ;;  %v8527_v49 = vpop.f32.mrb[213].mxu1  ;;  %v8568_v40 = vpop.f32.mrb[17].mxu0 }
 0xb87   :  { %v8574_v43 = vadd.f32 %v8527_v49, %v8387_v22  ;;  %v8576_v46 = vadd.f32 %v8568_v40, %v8389_v32  ;;  %v8529_v47 = vpop.f32.mrb[214].mxu1  ;;  %v8570_v20 = vpop.f32.mrb[18].mxu0 }
 0xb88   :  { %v8530_v9 = vpop.f32.mrb[215].mxu1  ;;  %v8571_v10 = vpop.f32.mrb[19].mxu0 }
 0xb95   :  { %v8711_v56 = vpop.f32.mrb[216].mxu1  ;;  %v8752_v34 = vpop.f32.mrb[20].mxu0 }
 0xb96   :  { %v8759_v45 = vadd.f32 %v8711_v56, %v8573_v15  ;;  %v8761_v55 = vadd.f32 %v8752_v34, %v8575_v8  ;;  %v8713_v11 = vpop.f32.mrb[217].mxu1  ;;  %v8754_v26 = vpop.f32.mrb[21].mxu0 }
 0xb97   :  { %v8760_v5 = vadd.f32 %v8713_v11, %v8574_v43  ;;  %v8762_v30 = vadd.f32 %v8754_v26, %v8576_v46  ;;  %v8715_v23 = vpop.f32.mrb[218].mxu1  ;;  %v8756_v27 = vpop.f32.mrb[22].mxu0 }
 0xb98   :  { %v8716_v14 = vpop.f32.mrb[219].mxu1  ;;  %v8757_v28 = vpop.f32.mrb[23].mxu0 }
 0xb99   :  { %v13585_v14 = vld [vmem:[%s18029_s7 + $0xf80] ss:$16 sps:$4 sm:$0xff]   ;;  %v13588_v28 = vld [vmem:[%s18029_s7 + $0xf88] ss:$16 sps:$4 sm:$0xff]  }
 0xba5   :  { %v8897_v36 = vpop.f32.mrb[220].mxu1  ;;  %v8938_v41 = vpop.f32.mrb[24].mxu0 }
 0xba6   :  { %v8945_v62 = vadd.f32 %v8897_v36, %v8759_v45  ;;  %v8947_v13 = vadd.f32 %v8938_v41, %v8761_v55  ;;  %v8899_v48 = vpop.f32.mrb[221].mxu1  ;;  %v8940_v18 = vpop.f32.mrb[25].mxu0  ;;  %v13596_v41 = vld [vmem:[%s18029_s7 + $0xfac] ss:$16 sps:$4 sm:$0xff]  }
 0xba7   :  { %v8946_v21 = vadd.f32 %v8899_v48, %v8760_v5  ;;  %v8948_v7 = vadd.f32 %v8940_v18, %v8762_v30  ;;  %v8901_v37 = vpop.f32.mrb[222].mxu1  ;;  %v8942_v58 = vpop.f32.mrb[26].mxu0  ;;  %v13599_v48 = vld [vmem:[%s18029_s7 + $0xfc4] ss:$16 sps:$4 sm:$0xff]   ;;  %v13602_v18 = vld [vmem:[%s18029_s7 + $0xfcc] ss:$16 sps:$4 sm:$0xff]  }
 0xba8   :  { %v8902_v63 = vpop.f32.mrb[223].mxu1  ;;  %v8943_v12 = vpop.f32.mrb[27].mxu0  ;;  %v13605_v37 = vld [vmem:[%s18029_s7 + $0xfe4] ss:$16 sps:$4 sm:$0xff]   ;;  %v13608_v58 = vld [vmem:[%s18029_s7 + $0xfec] ss:$16 sps:$4 sm:$0xff]  }
 0xba9   :  { %v13603_v63 = vld [vmem:[%s18029_s7 + $0xfe0] ss:$16 sps:$4 sm:$0xff]   ;;  %v13606_v12 = vld [vmem:[%s18029_s7 + $0xfe8] ss:$16 sps:$4 sm:$0xff]  }
 0xbb5   :  { %v9083_v44 = vpop.f32.mrb[224].mxu1  ;;  %v9124_v38 = vpop.f32.mrb[28].mxu0 }
 0xbb6   :  { %v9131_v1 = vadd.f32 %v9083_v44, %v8945_v62  ;;  %v9133_v54 = vadd.f32 %v9124_v38, %v8947_v13  ;;  %v9085_v3 = vpop.f32.mrb[225].mxu1  ;;  %v9126_v31 = vpop.f32.mrb[29].mxu0  ;;  %v13591_v62 = vld [vmem:[%s18029_s7 + $0xfa0] ss:$16 sps:$4 sm:$0xff]   ;;  %v13594_v13 = vld [vmem:[%s18029_s7 + $0xfa8] ss:$16 sps:$4 sm:$0xff]  }
 0xbb7   :  { %v9132_v25 = vadd.f32 %v9085_v3, %v8946_v21  ;;  %v9134_v57 = vadd.f32 %v9126_v31, %v8948_v7  ;;  %v9087_v2 = vpop.f32.mrb[226].mxu1  ;;  %v9128_v53 = vpop.f32.mrb[30].mxu0  ;;  %v13597_v21 = vld [vmem:[%s18029_s7 + $0xfc0] ss:$16 sps:$4 sm:$0xff]   ;;  %v13600_v7 = vld [vmem:[%s18029_s7 + $0xfc8] ss:$16 sps:$4 sm:$0xff]  }
 0xbb8   :  { %v9088_v29 = vpop.f32.mrb[227].mxu1  ;;  %v9129_v16 = vpop.f32.mrb[31].mxu0  ;;  %v13611_v44 = vld [vmem:[%s18029_s7 + $0x1004] ss:$16 sps:$4 sm:$0xff]   ;;  %v13614_v38 = vld [vmem:[%s18029_s7 + $0x100c] ss:$16 sps:$4 sm:$0xff]  }
 0xbb9   :  { %v13617_v31 = vld [vmem:[%s18029_s7 + $0x1024] ss:$16 sps:$4 sm:$0xff]   ;;  %v13618_v2 = vld [vmem:[%s18029_s7 + $0x1028] ss:$16 sps:$4 sm:$0xff]   ;;  %v13626_v29 = vld [vmem:[%s18029_s7 + $0x104c] ss:$16 sps:$4 sm:$0xff]  }
 0xbba   :  { %v13623_v53 = vld [vmem:[%s18029_s7 + $0x1044] ss:$16 sps:$4 sm:$0xff]   ;;  %v13621_v16 = vld [vmem:[%s18029_s7 + $0x1040] ss:$16 sps:$4 sm:$0xff]  }
 0xbc5   :  { %v9269_v52 = vpop.f32.mrb[228].mxu1  ;;  %v9310_v35 = vpop.f32.mrb[32].mxu0 }
 0xbc6   :  { %v17629_v22 = vadd.f32 %v9269_v52, %v9131_v1  ;;  %v17631_v32 = vadd.f32 %v9310_v35, %v9133_v54  ;;  %v9271_v17 = vpop.f32.mrb[229].mxu1  ;;  %v9312_v4 = vpop.f32.mrb[33].mxu0  ;;  %v13609_v1 = vld [vmem:[%s18029_s7 + $0x1000] ss:$16 sps:$4 sm:$0xff]   ;;  %v13612_v54 = vld [vmem:[%s18029_s7 + $0x1008] ss:$16 sps:$4 sm:$0xff]  }
 0xbc7   :  { %v17633_v19 = vadd.f32 %v9271_v17, %v9132_v25  ;;  %v17635_v59 = vadd.f32 %v9312_v4, %v9134_v57  ;;  %v9273_v6 = vpop.f32.mrb[230].mxu1  ;;  %v9314_v42 = vpop.f32.mrb[34].mxu0  ;;  %v13620_v25 = vld [vmem:[%s18029_s7 + $0x102c] ss:$16 sps:$4 sm:$0xff]   ;;  %v13615_v57 = vld [vmem:[%s18029_s7 + $0x1020] ss:$16 sps:$4 sm:$0xff]  }
 0xbc8   :  { %v9274_v51 = vpop.f32.mrb[231].mxu1  ;;  %v9315_v33 = vpop.f32.mrb[35].mxu0  ;;  %v13624_v52 = vld [vmem:[%s18029_s7 + $0x1048] ss:$16 sps:$4 sm:$0xff]   ;;  %v13629_v35 = vld [vmem:[%s18029_s7 + $0x1064] ss:$16 sps:$4 sm:$0xff]  }
 0xbc9   :  { %v13632_v17 = vld [vmem:[%s18029_s7 + $0x106c] ss:$16 sps:$4 sm:$0xff]   ;;  %v13627_v4 = vld [vmem:[%s18029_s7 + $0x1060] ss:$16 sps:$4 sm:$0xff]   ;;  %v13630_v6 = vld [vmem:[%s18029_s7 + $0x1068] ss:$16 sps:$4 sm:$0xff]  }
 0xbca   :  { %v13635_v42 = vld [vmem:[%s18029_s7 + $0x1084] ss:$16 sps:$4 sm:$0xff]   ;;  %v13638_v51 = vld [vmem:[%s18029_s7 + $0x108c] ss:$16 sps:$4 sm:$0xff]   ;;  %v13633_v33 = vld [vmem:[%s18029_s7 + $0x1080] ss:$16 sps:$4 sm:$0xff]  }
 0xbe5   :  { %v12365_v50 = vpop.f32.mrb[232].mxu1 }
 0xbe6   :  { %v12387_v61 = vpop.f32.mrb[36].mxu0  ;;  %v12366_v39 = vpop.f32.mrb[233].mxu1 }
 0xbe7   :  { %v12367_v24 = vadd.f32 %v12366_v39, %v12365_v50  ;;  %v12388_v15 = vpop.f32.mrb[37].mxu0  ;;  %v12368_v8 = vpop.f32.mrb[234].mxu1  ;;  %v13636_v50 = vld [vmem:[%s18029_s7 + $0x1088] ss:$16 sps:$4 sm:$0xff]   ;;  %v13641_v39 = vld [vmem:[%s18029_s7 + $0x10a4] ss:$16 sps:$4 sm:$0xff]  }
 0xbe8   :  { %v12389_v49 = vadd.f32 %v12388_v15, %v12387_v61  ;;  %v12390_v40 = vpop.f32.mrb[38].mxu0  ;;  %v12369_v43 = vpop.f32.mrb[235].mxu1  ;;  %v13639_v15 = vld [vmem:[%s18029_s7 + $0x10a0] ss:$16 sps:$4 sm:$0xff]  }
 0xbe9   :  { %v9359_v46 = vadd.f32 %v17218_v0, %v12367_v24  ;;  %v12370_v47 = vadd.f32 %v12369_v43, %v12368_v8  ;;  %v12391_v20 = vpop.f32.mrb[39].mxu0  ;;  %v13644_v24 = vld [vmem:[%s18029_s7 + $0x10ac] ss:$16 sps:$4 sm:$0xff]   ;;  %v13642_v8 = vld [vmem:[%s18029_s7 + $0x10a8] ss:$16 sps:$4 sm:$0xff]  }
 0xbea   :  { %v12392_v9 = vadd.f32 %v12391_v20, %v12390_v40  ;;  %v13650_v40 = vld [vmem:[%s18029_s7 + $0x10cc] ss:$16 sps:$4 sm:$0xff]   ;;  %v13645_v43 = vld [vmem:[%s18029_s7 + $0x10c0] ss:$16 sps:$4 sm:$0xff]  }
 0xbeb   :  { %v9362_v10 = vadd.f32 %v17218_v0, %v12370_v47  ;;  %v9400_v56 = vadd.f32 %v12389_v49, %v9359_v46  ;;  %v13593_v0 = vld [vmem:[%s18029_s7 + $0xfa4] ss:$16 sps:$4 sm:$0xff]   ;;  %v13648_v46 = vld [vmem:[%s18029_s7 + $0x10c8] ss:$16 sps:$4 sm:$0xff]   ;;  %v13656_v20 = vld [vmem:[%s18029_s7 + $0x10ec] ss:$16 sps:$4 sm:$0xff]  }
 0xbec   :  { %v13647_v49 = vld [vmem:[%s18029_s7 + $0x10c4] ss:$16 sps:$4 sm:$0xff]  }
 0xbed   :  { %v9403_v34 = vadd.f32 %v12392_v9, %v9362_v10  ;;  %v13653_v47 = vld [vmem:[%s18029_s7 + $0x10e4] ss:$16 sps:$4 sm:$0xff]   ;;  %v13651_v9 = vld [vmem:[%s18029_s7 + $0x10e0] ss:$16 sps:$4 sm:$0xff]   ;;  %v13654_v10 = vld [vmem:[%s18029_s7 + $0x10e8] ss:$16 sps:$4 sm:$0xff]  }
 0xbf5   :  { %v9440_v45 = vpop.f32.mrb[236].mxu1 }
 0xbf6   :  { %v9441_v55 = vadd.f32 %v9440_v45, %v9400_v56  ;;  %v12680_v11 = vpop.f32.mrb[237].mxu1  ;;  %v13659_v56 = vld [vmem:[%s18029_s7 + $0x1104] ss:$16 sps:$4 sm:$0xff]   ;;  %v13657_v45 = vld [vmem:[%s18029_s7 + $0x1100] ss:$16 sps:$4 sm:$0xff]  }
 0xbf7   :  { %v9443_v26 = vpop.f32.mrb[238].mxu1 }
 0xbf8   :  { %v9444_v5 = vadd.f32 %v9443_v26, %v9403_v34  ;;  %v12681_v30 = vpop.f32.mrb[239].mxu1  ;;  %v9447_v23 = vmax.f32 %v9441_v55, 0.0  ;;  %v13662_v34 = vld [vmem:[%s18029_s7 + $0x110c] ss:$16 sps:$4 sm:$0xff]   ;;  %v13660_v55 = vld [vmem:[%s18029_s7 + $0x1108] ss:$16 sps:$4 sm:$0xff]  }
 0xbf9   :  { %v13665_v26 = vld [vmem:[%s18029_s7 + $0x1124] ss:$16 sps:$4 sm:$0xff]   ;;  %v13663_v30 = vld [vmem:[%s18029_s7 + $0x1120] ss:$16 sps:$4 sm:$0xff]  }
 0xbfa   :  { %v9448_v27 = vmax.f32 %v9444_v5, 0.0  ;;  %v13668_v5 = vld [vmem:[%s18029_s7 + $0x112c] ss:$16 sps:$4 sm:$0xff]  }
 0xbfc   :  { %v17645_v36 = vpack.c.bf16 %v9448_v27, %v9447_v23  ;;  %v13666_v23 = vld [vmem:[%s18029_s7 + $0x1128] ss:$16 sps:$4 sm:$0xff]   ;;  %v13671_v27 = vld [vmem:[%s18029_s7 + $0x1144] ss:$16 sps:$4 sm:$0xff]  }
 0xbfe   :  { %11767 = vmatmul.mubr.msk.bf16.vlgmr.msra.gmra.mrb[40].mxu0 %vm639_vm0, %v17645_v36  ;;  %11768 = vmatmul.mubr.msk.bf16.vlgmr.msra.gmra.mrb[240].mxu1 %vm639_vm0, %v17645_v36  ;;  %v9652_v3 = vrot.slane %v17645_v36, 1  ;;  %v9838_v61 = vrot.slane %v17645_v36, 2  ;;  %v10024_v11 = vrot.slane %v17645_v36, 3 }
 0xbff   :  { %9737 = vmatpush1.bf16.msra.mxu0 %v13585_v14  ;;  %9778 = vmatpush1.bf16.msra.mxu1 %v13588_v28  ;;  %v13674_v14 = vld [vmem:[%s18029_s7 + $0x114c] ss:$16 sps:$4 sm:$0xff]   ;;  %v13669_v28 = vld [vmem:[%s18029_s7 + $0x1140] ss:$16 sps:$4 sm:$0xff]  }
 0xc00   :  { %9738 = vmatprep.subr.bf16.mxu0 %v13593_v0  ;;  %9779 = vmatprep.subr.bf16.mxu1 %v13596_v41  ;;  %v13672_v0 = vld [vmem:[%s18029_s7 + $0x1148] ss:$16 sps:$4 sm:$0xff]   ;;  %v13677_v41 = vld [vmem:[%s18029_s7 + $0x1164] ss:$16 sps:$4 sm:$0xff]  }
 0xc01   :  { %9768 = vmatprep.mubr.bf16.mxu0 %v13861_v60  ;;  %9809 = vmatprep.mubr.bf16.mxu1 %v13861_v60 }
 0xc03   :  { %9739 = vmatpush1.bf16.msra.mxu0 %v13591_v62  ;;  %9780 = vmatpush1.bf16.msra.mxu1 %v13594_v13  ;;  %v13680_v62 = vld [vmem:[%s18029_s7 + $0x116c] ss:$16 sps:$4 sm:$0xff]   ;;  %v13675_v13 = vld [vmem:[%s18029_s7 + $0x1160] ss:$16 sps:$4 sm:$0xff]  }
 0xc04   :  { %9740 = vmatprep.subr.bf16.mxu0 %v13599_v48  ;;  %9781 = vmatprep.subr.bf16.mxu1 %v13602_v18  ;;  %v13678_v48 = vld [vmem:[%s18029_s7 + $0x1168] ss:$16 sps:$4 sm:$0xff]   ;;  %v13683_v18 = vld [vmem:[%s18029_s7 + $0x1184] ss:$16 sps:$4 sm:$0xff]  }
 0xc07   :  { %9741 = vmatpush1.bf16.msra.mxu0 %v13597_v21  ;;  %9782 = vmatpush1.bf16.msra.mxu1 %v13600_v7  ;;  %v13686_v21 = vld [vmem:[%s18029_s7 + $0x118c] ss:$16 sps:$4 sm:$0xff]   ;;  %v13681_v7 = vld [vmem:[%s18029_s7 + $0x1180] ss:$16 sps:$4 sm:$0xff]  }
 0xc08   :  { %9742 = vmatprep.subr.bf16.mxu0 %v13605_v37  ;;  %9783 = vmatprep.subr.bf16.mxu1 %v13608_v58  ;;  %v13684_v37 = vld [vmem:[%s18029_s7 + $0x1188] ss:$16 sps:$4 sm:$0xff]   ;;  %v10210_v58 = vrot.slane %v17645_v36, 4 }
 0xc0b   :  { %9743 = vmatpush1.bf16.msra.mxu0 %v13603_v63  ;;  %9784 = vmatpush1.bf16.msra.mxu1 %v13606_v12  ;;  %v13689_v63 = vld [vmem:[%s18029_s7 + $0x11a4] ss:$16 sps:$4 sm:$0xff]   ;;  %v13692_v12 = vld [vmem:[%s18029_s7 + $0x11ac] ss:$16 sps:$4 sm:$0xff]  }
 0xc0c   :  { %9922 = vmatprep.subr.bf16.mxu0 %v13611_v44  ;;  %9963 = vmatprep.subr.bf16.mxu1 %v13614_v38  ;;  %v13687_v44 = vld [vmem:[%s18029_s7 + $0x11a0] ss:$16 sps:$4 sm:$0xff]   ;;  %v13690_v38 = vld [vmem:[%s18029_s7 + $0x11a8] ss:$16 sps:$4 sm:$0xff]  }
 0xc0e   :  { %11785 = vmatmul.mubr.msk.bf16.vlgmr.msra.gmra.mrb[44].mxu0 %vm639_vm0, %v9652_v3  ;;  %11786 = vmatmul.mubr.msk.bf16.vlgmr.msra.gmra.mrb[244].mxu1 %vm639_vm0, %v9652_v3  ;;  %v13693_v3 = vld [vmem:[%s18029_s7 + $0x11c0] ss:$16 sps:$4 sm:$0xff]  }
 0xc0f   :  { %9923 = vmatpush1.bf16.msra.mxu0 %v13609_v1  ;;  %9964 = vmatpush1.bf16.msra.mxu1 %v13612_v54  ;;  %v13695_v1 = vld [vmem:[%s18029_s7 + $0x11c4] ss:$16 sps:$4 sm:$0xff]   ;;  %v13698_v54 = vld [vmem:[%s18029_s7 + $0x11cc] ss:$16 sps:$4 sm:$0xff]  }
 0xc10   :  { %9924 = vmatprep.subr.bf16.mxu0 %v13617_v31  ;;  %9965 = vmatprep.subr.bf16.mxu1 %v13620_v25  ;;  %v13696_v31 = vld [vmem:[%s18029_s7 + $0x11c8] ss:$16 sps:$4 sm:$0xff]   ;;  %v13701_v25 = vld [vmem:[%s18029_s7 + $0x11e4] ss:$16 sps:$4 sm:$0xff]  }
 0xc11   :  { %9954 = vmatprep.mubr.bf16.mxu0 %v13861_v60  ;;  %9995 = vmatprep.mubr.bf16.mxu1 %v13861_v60 }
 0xc13   :  { %9925 = vmatpush1.bf16.msra.mxu0 %v13615_v57  ;;  %9966 = vmatpush1.bf16.msra.mxu1 %v13618_v2  ;;  %v13699_v57 = vld [vmem:[%s18029_s7 + $0x11e0] ss:$16 sps:$4 sm:$0xff]   ;;  %v13702_v2 = vld [vmem:[%s18029_s7 + $0x11e8] ss:$16 sps:$4 sm:$0xff]  }
 0xc14   :  { %9926 = vmatprep.subr.bf16.mxu0 %v13623_v53  ;;  %9967 = vmatprep.subr.bf16.mxu1 %v13626_v29  ;;  %v10396_v53 = vrot.slane %v17645_v36, 5  ;;  %v13705_v29 = vld [vmem:[%s18031_s9 + $0x40] sm:$0xff]  }
 0xc15   :  { %v13708_v36 = vld [vmem:[%s18031_s9 + $0x80] sm:$0xff]  }
 0xc17   :  { %9927 = vmatpush1.bf16.msra.mxu0 %v13621_v16  ;;  %9968 = vmatpush1.bf16.msra.mxu1 %v13624_v52  ;;  %v13706_v16 = vld [vmem:[%s18031_s9 + $0xc0] sm:$0xff]  }
 0xc18   :  { %9928 = vmatprep.subr.bf16.mxu0 %v13629_v35  ;;  %9969 = vmatprep.subr.bf16.mxu1 %v13632_v17  ;;  %v13707_v52 = vld [vmem:[%s18031_s9] sm:$0xff]   ;;  %v13709_v35 = vld [vmem:[%s18031_s9 + $0x48] sm:$0xff]  }
 0xc19   :  { %v13710_v17 = vld [vmem:[%s18031_s9 + $0xc8] sm:$0xff]  }
 0xc1b   :  { %9929 = vmatpush1.bf16.msra.mxu0 %v13627_v4  ;;  %9970 = vmatpush1.bf16.msra.mxu1 %v13630_v6  ;;  %v13711_v4 = vld [vmem:[%s18031_s9 + $0x8] sm:$0xff]  }
 0xc1c   :  { %10108 = vmatprep.subr.bf16.mxu0 %v13635_v42  ;;  %10149 = vmatprep.subr.bf16.mxu1 %v13638_v51  ;;  %v13712_v6 = vld [vmem:[%s18031_s9 + $0x88] sm:$0xff]   ;;  %v13713_v42 = vld [vmem:[%s18031_s9 + $0x50] sm:$0xff]  }
 0xc1d   :  { %v13714_v51 = vld [vmem:[%s18031_s9 + $0xd0] sm:$0xff]  }
 0xc1e   :  { %11803 = vmatmul.mubr.msk.bf16.vlgmr.msra.gmra.mrb[48].mxu0 %vm639_vm0, %v9838_v61  ;;  %11804 = vmatmul.mubr.msk.bf16.vlgmr.msra.gmra.mrb[248].mxu1 %vm639_vm0, %v9838_v61  ;;  %v13717_v61 = vld [vmem:[%s18031_s9 + $0x58] sm:$0xff]  }
 0xc1f   :  { %10109 = vmatpush1.bf16.msra.mxu0 %v13633_v33  ;;  %10150 = vmatpush1.bf16.msra.mxu1 %v13636_v50  ;;  %v13715_v33 = vld [vmem:[%s18031_s9 + $0x10] sm:$0xff]  }
 0xc20   :  { %10110 = vmatprep.subr.bf16.mxu0 %v13641_v39  ;;  %10151 = vmatprep.subr.bf16.mxu1 %v13644_v24  ;;  %v13716_v50 = vld [vmem:[%s18031_s9 + $0x90] sm:$0xff]   ;;  %v13718_v39 = vld [vmem:[%s18031_s9 + $0xd8] sm:$0xff]  }
 0xc21   :  { %10140 = vmatprep.mubr.bf16.mxu0 %v13861_v60  ;;  %10181 = vmatprep.mubr.bf16.mxu1 %v13861_v60  ;;  %v13719_v24 = vld [vmem:[%s18031_s9 + $0x18] sm:$0xff]  }
 0xc23   :  { %10111 = vmatpush1.bf16.msra.mxu0 %v13639_v15  ;;  %10152 = vmatpush1.bf16.msra.mxu1 %v13642_v8  ;;  %v13720_v15 = vld [vmem:[%s18031_s9 + $0x98] sm:$0xff]   ;;  %v13721_v8 = vld [vmem:[%s18031_s9 + $0x60] sm:$0xff]  }
 0xc24   :  { %10112 = vmatprep.subr.bf16.mxu0 %v13647_v49  ;;  %10153 = vmatprep.subr.bf16.mxu1 %v13650_v40  ;;  %v13722_v49 = vld [vmem:[%s18031_s9 + $0xe0] sm:$0xff]  }
 0xc25   :  { %v13723_v40 = vld [vmem:[%s18031_s9 + $0x20] sm:$0xff]  }
 0xc27   :  { %10113 = vmatpush1.bf16.msra.mxu0 %v13645_v43  ;;  %10154 = vmatpush1.bf16.msra.mxu1 %v13648_v46  ;;  %v13724_v43 = vld [vmem:[%s18031_s9 + $0xa0] sm:$0xff]   ;;  %v13725_v46 = vld [vmem:[%s18031_s9 + $0x68] sm:$0xff]  }
 0xc28   :  { %10114 = vmatprep.subr.bf16.mxu0 %v13653_v47  ;;  %10155 = vmatprep.subr.bf16.mxu1 %v13656_v20  ;;  %v13726_v47 = vld [vmem:[%s18031_s9 + $0xe8] sm:$0xff]  }
 0xc29   :  { %v13727_v20 = vld [vmem:[%s18031_s9 + $0x28] sm:$0xff]  }
 0xc2b   :  { %10115 = vmatpush1.bf16.msra.mxu0 %v13651_v9  ;;  %10156 = vmatpush1.bf16.msra.mxu1 %v13654_v10  ;;  %v13728_v9 = vld [vmem:[%s18031_s9 + $0xa8] sm:$0xff]   ;;  %v13729_v10 = vld [vmem:[%s18031_s9 + $0x70] sm:$0xff]  }
 0xc2c   :  { %10294 = vmatprep.subr.bf16.mxu0 %v13659_v56  ;;  %10335 = vmatprep.subr.bf16.mxu1 %v13662_v34  ;;  %v13730_v56 = vld [vmem:[%s18031_s9 + $0xf0] sm:$0xff]  }
 0xc2d   :  { %v13731_v34 = vld [vmem:[%s18031_s9 + $0x30] sm:$0xff]  }
 0xc2e   :  { %11821 = vmatmul.mubr.msk.bf16.vlgmr.msra.gmra.mrb[52].mxu0 %vm639_vm0, %v10024_v11  ;;  %11822 = vmatmul.mubr.msk.bf16.vlgmr.msra.gmra.mrb[252].mxu1 %vm639_vm0, %v10024_v11  ;;  %v13734_v11 = vld [vmem:[%s18031_s9 + $0xf8] sm:$0xff]  }
 0xc2f   :  { %10295 = vmatpush1.bf16.msra.mxu0 %v13657_v45  ;;  %10336 = vmatpush1.bf16.msra.mxu1 %v13660_v55  ;;  %v13732_v45 = vld [vmem:[%s18031_s9 + $0xb0] sm:$0xff]   ;;  %v13733_v55 = vld [vmem:[%s18031_s9 + $0x78] sm:$0xff]  }
 0xc30   :  { %10296 = vmatprep.subr.bf16.mxu0 %v13665_v26  ;;  %10337 = vmatprep.subr.bf16.mxu1 %v13668_v5  ;;  %v13735_v26 = vld [vmem:[%s18031_s9 + $0x38] sm:$0xff]  }
 0xc31   :  { %10326 = vmatprep.mubr.bf16.mxu0 %v13861_v60  ;;  %10367 = vmatprep.mubr.bf16.mxu1 %v13861_v60  ;;  %v13736_v5 = vld [vmem:[%s18031_s9 + $0xb8] sm:$0xff]  }
 0xc33   :  { %10297 = vmatpush1.bf16.msra.mxu0 %v13663_v30  ;;  %10338 = vmatpush1.bf16.msra.mxu1 %v13666_v23 }
 0xc34   :  { %10298 = vmatprep.subr.bf16.mxu0 %v13671_v27  ;;  %10339 = vmatprep.subr.bf16.mxu1 %v13674_v14 }
 0xc37   :  { %10299 = vmatpush1.bf16.msra.mxu0 %v13669_v28  ;;  %10340 = vmatpush1.bf16.msra.mxu1 %v13672_v0 }
 0xc38   :  { %10300 = vmatprep.subr.bf16.mxu0 %v13677_v41  ;;  %10341 = vmatprep.subr.bf16.mxu1 %v13680_v62 }
 0xc3b   :  { %10301 = vmatpush1.bf16.msra.mxu0 %v13675_v13  ;;  %10342 = vmatpush1.bf16.msra.mxu1 %v13678_v48 }
 0xc3c   :  { %10480 = vmatprep.subr.bf16.mxu0 %v13683_v18  ;;  %10521 = vmatprep.subr.bf16.mxu1 %v13686_v21 }
 0xc3e   :  { %11839 = vmatmul.mubr.msk.bf16.vlgmr.msra.gmra.mrb[56].mxu0 %vm639_vm0, %v10210_v58  ;;  %11840 = vmatmul.mubr.msk.bf16.vlgmr.msra.gmra.mrb[0].mxu1 %vm639_vm0, %v10210_v58 }
 0xc3f   :  { %10481 = vmatpush1.bf16.msra.mxu0 %v13681_v7  ;;  %10522 = vmatpush1.bf16.msra.mxu1 %v13684_v37 }
 0xc40   :  { %10482 = vmatprep.subr.bf16.mxu0 %v13689_v63  ;;  %10523 = vmatprep.subr.bf16.mxu1 %v13692_v12 }
 0xc41   :  { %10512 = vmatprep.mubr.bf16.mxu0 %v13861_v60  ;;  %10553 = vmatprep.mubr.bf16.mxu1 %v13861_v60  ;;  %v13704_v60 = vld [vmem:[%s18029_s7 + $0x11ec] ss:$16 sps:$4 sm:$0xff]  }
 0xc43   :  { %10483 = vmatpush1.bf16.msra.mxu0 %v13687_v44  ;;  %10524 = vmatpush1.bf16.msra.mxu1 %v13690_v38 }
 0xc44   :  { %10484 = vmatprep.subr.bf16.mxu0 %v13695_v1  ;;  %10525 = vmatprep.subr.bf16.mxu1 %v13698_v54 }
 0xc47   :  { %10485 = vmatpush1.bf16.msra.mxu0 %v13693_v3  ;;  %10526 = vmatpush1.bf16.msra.mxu1 %v13696_v31 }
 0xc48   :  { %10486 = vmatprep.subr.bf16.mxu0 %v13701_v25  ;;  %10527 = vmatprep.subr.bf16.mxu1 %v13704_v60 }
 0xc4b   :  { %10487 = vmatpush1.bf16.msra.mxu0 %v13699_v57  ;;  %10528 = vmatpush1.bf16.msra.mxu1 %v13702_v2 }
 0xc4c   :  { %12398 = vmatprep.subr.bf16.mxu0 %v13705_v29  ;;  %12420 = vmatprep.subr.bf16.mxu1 %v13706_v16 }
 0xc4e   :  { %11857 = vmatmul.mubr.msk.bf16.vlgmr.msra.gmra.mrb[60].mxu0 %vm639_vm0, %v10396_v53  ;;  %11858 = vmatmul.mubr.msk.bf16.vlgmr.msra.gmra.mrb[4].mxu1 %vm639_vm0, %v10396_v53 }
 0xc4f   :  { %12399 = vmatpush3.bf16.msra.mxu0 %v13707_v52  ;;  %12421 = vmatpush3.bf16.msra.mxu1 %v13708_v36 }
 0xc50   :  { %12400 = vmatprep.subr.bf16.mxu0 %v13709_v35  ;;  %12422 = vmatprep.subr.bf16.mxu1 %v13710_v17 }
 0xc53   :  { %12401 = vmatpush3.bf16.msra.mxu0 %v13711_v4  ;;  %12423 = vmatpush3.bf16.msra.mxu1 %v13712_v6 }
 0xc54   :  { %12402 = vmatprep.subr.bf16.mxu0 %v13713_v42  ;;  %12424 = vmatprep.subr.bf16.mxu1 %v13714_v51 }
 0xc57   :  { %12403 = vmatpush3.bf16.msra.mxu0 %v13715_v33  ;;  %12425 = vmatpush3.bf16.msra.mxu1 %v13716_v50 }
 0xc58   :  { %12404 = vmatprep.subr.bf16.mxu0 %v13717_v61  ;;  %12426 = vmatprep.subr.bf16.mxu1 %v13718_v39 }
 0xc5b   :  { %12405 = vmatpush3.bf16.msra.mxu0 %v13719_v24  ;;  %12427 = vmatpush3.bf16.msra.mxu1 %v13720_v15 }
 0xc5c   :  { %12406 = vmatprep.subr.bf16.mxu0 %v13721_v8  ;;  %12428 = vmatprep.subr.bf16.mxu1 %v13722_v49 }
 0xc5f   :  { %12407 = vmatpush3.bf16.msra.mxu0 %v13723_v40  ;;  %12429 = vmatpush3.bf16.msra.mxu1 %v13724_v43 }
 0xc60   :  { %12408 = vmatprep.subr.bf16.mxu0 %v13725_v46  ;;  %12430 = vmatprep.subr.bf16.mxu1 %v13726_v47 }
 0xc63   :  { %12409 = vmatpush3.bf16.msra.mxu0 %v13727_v20  ;;  %12431 = vmatpush3.bf16.msra.mxu1 %v13728_v9 }
 0xc64   :  { %12410 = vmatprep.subr.bf16.mxu0 %v13729_v10  ;;  %12432 = vmatprep.subr.bf16.mxu1 %v13730_v56 }
 0xc67   :  { %12411 = vmatpush3.bf16.msra.mxu0 %v13731_v34  ;;  %12433 = vmatpush3.bf16.msra.mxu1 %v13732_v45 }
 0xc68   :  { %12412 = vmatprep.subr.bf16.mxu0 %v13733_v55  ;;  %12434 = vmatprep.subr.bf16.mxu1 %v13734_v11  ;;  %v10568_v55 = vlaneseq }
 0xc6a   :  { %v10569_v11 = vshrl.u32 %v10568_v55, 7 }
 0xc6b   :  { %12413 = vmatpush3.bf16.msra.mxu0 %v13735_v26  ;;  %12435 = vmatpush3.bf16.msra.mxu1 %v13736_v5 }
 0xc6c   :  { %v10570_v26 = vsub.s32 0, %v10569_v11  ;;  %v10578_v5 = vsub.s32 2, %v10569_v11 }
 0xcd1   :  { %v9583_v30 = vpop.f32.mrb[40].mxu0  ;;  %v9624_v23 = vpop.f32.mrb[240].mxu1 }
 0xcd2   :  { %v9631_v27 = vadd.f32 %v9583_v30, %v17629_v22  ;;  %v9633_v14 = vadd.f32 %v9624_v23, %v17631_v32  ;;  %v9585_v28 = vpop.f32.mrb[41].mxu0  ;;  %v9626_v0 = vpop.f32.mrb[241].mxu1  ;;  %v10566_v30 = vld [vmem:[%s18030_s8] sm:$0xf]  ;;  %v10574_v23 = vsub.s32 1, %v10569_v11 }
 0xcd3   :  { %v9632_v41 = vadd.f32 %v9585_v28, %v17633_v19  ;;  %v9634_v62 = vadd.f32 %v9626_v0, %v17635_v59  ;;  %v9587_v13 = vpop.f32.mrb[42].mxu0  ;;  %v9628_v48 = vpop.f32.mrb[242].mxu1  ;;  %v10579_v28 = vrot.slane %v10566_v30, %v10578_v5 }
 0xcd4   :  { %v9588_v18 = vpop.f32.mrb[43].mxu0  ;;  %v9629_v21 = vpop.f32.mrb[243].mxu1 }
 0xce1   :  { %v9770_v7 = vpop.f32.mrb[44].mxu0  ;;  %v9811_v37 = vpop.f32.mrb[244].mxu1 }
 0xce2   :  { %v9818_v58 = vadd.f32 %v9770_v7, %v9631_v27  ;;  %v9820_v63 = vadd.f32 %v9811_v37, %v9633_v14  ;;  %v9772_v12 = vpop.f32.mrb[45].mxu0  ;;  %v9813_v44 = vpop.f32.mrb[245].mxu1  ;;  %v10582_v27 = vsub.s32 3, %v10569_v11  ;;  %v10571_v14 = vrot.slane %v10566_v30, %v10570_v26 }
 0xce3   :  { %v9819_v38 = vadd.f32 %v9772_v12, %v9632_v41  ;;  %v9821_v22 = vadd.f32 %v9813_v44, %v9634_v62  ;;  %v9774_v1 = vpop.f32.mrb[46].mxu0  ;;  %v9815_v32 = vpop.f32.mrb[246].mxu1  ;;  %v10575_v62 = vrot.slane %v10566_v30, %v10574_v23 }
 0xce4   :  { %v9775_v54 = vpop.f32.mrb[47].mxu0  ;;  %v9816_v3 = vpop.f32.mrb[247].mxu1  ;;  %v10583_v13 = vrot.slane %v10566_v30, %v10582_v27 }
 0xcf1   :  { %v9956_v31 = vpop.f32.mrb[48].mxu0  ;;  %v9997_v19 = vpop.f32.mrb[248].mxu1 }
 0xcf2   :  { %v10004_v25 = vadd.f32 %v9956_v31, %v9818_v58  ;;  %v10006_v59 = vadd.f32 %v9997_v19, %v9820_v63  ;;  %v9958_v60 = vpop.f32.mrb[49].mxu0  ;;  %v9999_v57 = vpop.f32.mrb[249].mxu1 }
 0xcf3   :  { %v10005_v2 = vadd.f32 %v9958_v60, %v9819_v38  ;;  %v10007_v53 = vadd.f32 %v9999_v57, %v9821_v22  ;;  %v9960_v29 = vpop.f32.mrb[50].mxu0  ;;  %v10001_v16 = vpop.f32.mrb[250].mxu1 }
 0xcf4   :  { %v9961_v52 = vpop.f32.mrb[51].mxu0  ;;  %v10002_v36 = vpop.f32.mrb[251].mxu1  ;;  %v11859_v16 = vld [vmem:[%s18032_s10] ss:$0 sm:$0xff]  ;;  %s13862_s10 = smov [#allocation2]  }
 0xcf5   :  { %s10962_s2 = sshll.u32 %s13862_s10, 4  ;;  %s10963_s2 = int_to_ptr.vmem [resolvable:$true] %s10962_s2 }
 0xcf6   :  { %s13832_s26 = scalar_lea.vmem %s10963_s2, 32  ;;  %p13837_p1 = scmp.lt.s32.totalorder %s10963_s2, %s10963_s2 }
 0xcf7   :  { %p13833_p0 = scmp.ne.s32.totalorder %s10963_s2, %s13832_s26  ;;  %p13838_p2 = scmp.lt.s32.totalorder %s13832_s26, %s13832_s26 }
 0xcf9   :  { %p13839_p3 = por %p13838_p2, %p13837_p1 }
 0xcfb   :  { %p13840_p4 = pnand %p13839_p3, %p13833_p0 }
 0xd01   :  { %v10142_v35 = vpop.f32.mrb[52].mxu0  ;;  %v10183_v17 = vpop.f32.mrb[252].mxu1 }
 0xd02   :  { %v10190_v4 = vadd.f32 %v10142_v35, %v10004_v25  ;;  %v10192_v6 = vadd.f32 %v10183_v17, %v10006_v59  ;;  %v10144_v42 = vpop.f32.mrb[53].mxu0  ;;  %v10185_v51 = vpop.f32.mrb[253].mxu1 }
 0xd03   :  { %v10191_v33 = vadd.f32 %v10144_v42, %v10005_v2  ;;  %v10193_v50 = vadd.f32 %v10185_v51, %v10007_v53  ;;  %v10146_v61 = vpop.f32.mrb[54].mxu0  ;;  %v10187_v39 = vpop.f32.mrb[254].mxu1 }
 0xd04   :  { %v10147_v24 = vpop.f32.mrb[55].mxu0  ;;  %v10188_v15 = vpop.f32.mrb[255].mxu1 }
 0xd11   :  { %v10328_v8 = vpop.f32.mrb[56].mxu0  ;;  %v10369_v49 = vpop.f32.mrb[0].mxu1 }
 0xd12   :  { %v10376_v40 = vadd.f32 %v10328_v8, %v10190_v4  ;;  %v10378_v43 = vadd.f32 %v10369_v49, %v10192_v6  ;;  %v10330_v46 = vpop.f32.mrb[57].mxu0  ;;  %v10371_v47 = vpop.f32.mrb[1].mxu1 }
 0xd13   :  { %v10377_v20 = vadd.f32 %v10330_v46, %v10191_v33  ;;  %v10379_v9 = vadd.f32 %v10371_v47, %v10193_v50  ;;  %v10332_v10 = vpop.f32.mrb[58].mxu0  ;;  %v10373_v56 = vpop.f32.mrb[2].mxu1 }
 0xd14   :  { %v10333_v34 = vpop.f32.mrb[59].mxu0  ;;  %v10374_v45 = vpop.f32.mrb[3].mxu1 }
 0xd21   :  { %v10514_v0 = vpop.f32.mrb[60].mxu0  ;;  %v10555_v41 = vpop.f32.mrb[4].mxu1 }
 0xd22   :  { %v10562_v48 = vadd.f32 %v10514_v0, %v10376_v40  ;;  %v10564_v18 = vadd.f32 %v10555_v41, %v10378_v43  ;;  %v10516_v21 = vpop.f32.mrb[61].mxu0  ;;  %v10557_v7 = vpop.f32.mrb[5].mxu1 }
 0xd23   :  { %v10563_v37 = vadd.f32 %v10516_v21, %v10377_v20  ;;  %v10565_v58 = vadd.f32 %v10557_v7, %v10379_v9  ;;  %v10518_v63 = vpop.f32.mrb[62].mxu0  ;;  %v10559_v12 = vpop.f32.mrb[6].mxu1 }
 0xd24   :  { %v10588_v44 = vadd.f32 %v10571_v14, %v10562_v48  ;;  %v10590_v38 = vadd.f32 %v10579_v28, %v10564_v18  ;;  %v10519_v22 = vpop.f32.mrb[63].mxu0  ;;  %v10560_v1 = vpop.f32.mrb[7].mxu1 }
 0xd25   :  { %v10589_v32 = vadd.f32 %v10575_v62, %v10563_v37  ;;  %v10591_v54 = vadd.f32 %v10583_v13, %v10565_v58 }
 0xd26   :  { %v10592_v3 = vmax.f32 %v10588_v44, 0.0  ;;  %v10594_v31 = vmax.f32 %v10590_v38, 0.0 }
 0xd27   :  { %v10593_v19 = vmax.f32 %v10589_v32, 0.0  ;;  %v10595_v25 = vmax.f32 %v10591_v54, 0.0 }
 0xd28   :  { %v10596_v57 = vpack.c.bf16 %v10592_v3, %v10592_v3  ;;  %v10598_v2 = vpack.c.bf16 %v10594_v31, %v10594_v31 }
 0xd29   :  { %v10597_v59 = vpack.c.bf16 %v10593_v19, %v10593_v19  ;;  %v10599_v60 = vpack.c.bf16 %v10595_v25, %v10595_v25 }
 0xd2b   :  { %10895 = vmatprep.mubr.bf16.mxu0 %v10597_v59  ;;  %10935 = vmatprep.mubr.bf16.mxu1 %v10599_v60 }
 0xd2c   :  { %10896 = vmatmul.mubr.bf16.vlgmr.msra.gmra.mrb[64].mxu0 %v10596_v57  ;;  %10936 = vmatmul.mubr.bf16.vlgmr.msra.gmra.mrb[8].mxu1 %v10598_v2 }
 0xdff   :  { %v12414_v53 = vpop.f32.mrb[64].mxu0  ;;  %v12436_v29 = vpop.f32.mrb[8].mxu1 }
 0xe00   :  { %v12415_v52 = vpop.f32.mrb[65].mxu0  ;;  %v12437_v36 = vpop.f32.mrb[9].mxu1 }
 0xe01   :  { %v12416_v35 = vadd.f32 %v12415_v52, %v12414_v53  ;;  %v12438_v17 = vadd.f32 %v12437_v36, %v12436_v29  ;;  %v12417_v4 = vpop.f32.mrb[66].mxu0  ;;  %v12439_v6 = vpop.f32.mrb[10].mxu1 }
 0xe02   :  { %v12418_v42 = vpop.f32.mrb[67].mxu0  ;;  %v12440_v51 = vpop.f32.mrb[11].mxu1 }
 0xe03   :  { %v10898_v33 = vadd.f32 %v12416_v35, %v11859_v16 }
 0xe05   :  { %v10938_v50 = vadd.f32 %v12438_v17, %v10898_v33 }
 0xe07   :  { %v10944_v61 = vsel %vm10943_vm5, %v10938_v50, -inf }
 0xe08   :  { %10945 = vmax.xlane.f32.xlu0 %v10944_v61 }
 0xe95   :  { %v10946_v39 = vpop.xlane.xlu0 %10945 }
 0xe96   :  { %v10947_v24 = vsub.f32 %v10938_v50, %v10946_v39 }
 0xe98   :  { %v10948_v15 = vmul.f32 1.442695, %v10947_v24 }
 0xe9a   :  { %13737 = vpow2.f32 %v10948_v15 }
 0xea4   :  { %v13738_v8 = vpop.eup %13737 }
 0xea5   :  { %v10950_v49 = vsel %vm10943_vm5, %v13738_v8, 0.0 }
 0xea6   :  { %10951 = vadd.xlane.f32.xlu1 %v10950_v49 }
 0xf33   :  { %v10952_v40 = vpop.xlane.xlu1 %10951 }
 0xf34   :  { %13739 = vrcp.f32 %v10952_v40 }
 0xf3e   :  { %v13740_v43 = vpop.eup %13739 }
 0xf3f   :  { %v10954_v46 = vmul.f32 %v13740_v43, %v13738_v8 }
 0xf41   :  { %10955 = vst [vmem:[#allocation2] sm:$0x3] %v10954_v46 }
 0xf42   :  { %13843 = shalt.err (!%p13840_p4)
}
 0xf43   :  { %s13844_s13 = scalar_lea.hbm %s18033_s11, 32 }
 0xf44   :  { %p13845_p5 = scmp.ne.s32.totalorder %s18033_s11, %s13844_s13  ;;  %p13848_p6 = scmp.lt.u32.totalorder %s13844_s13, %s18033_s11 }
 0xf46   :  { %p13850_p7 = pnand %p13848_p6, %p13845_p5 }
 0xf48   :  { %13853 = shalt.err (!%p13850_p7)
}
 0xf49   :  { %10965 = dma.vmem_to_hbm [thread:$0]  %s10963_s2, 32, %s18033_s11, [#allocation3]  }
 0xf4a   :  { %13854 = dma.done.wait [#allocation3], 32  }
 0xf4b   :  { %13855 = vsyncadd [#allocation3], 4294967264 }
 0xf4c   :  { %10969 = vsyncpa [#allocation3], 1 }

</bundles_post_ra>
